<compile_context>
chip_gen: v7x
topology: tpu7x:2x2x1
jax: 0.10.0
libtpu: 0.0.40
codegen_flags: <defaults>
</compile_context>

<pallas_src>
import functools

import jax
import jax.numpy as jnp
from jax.experimental import pallas as pl
from jax.experimental.pallas import tpu as pltpu

_ACT_DTYPE = jnp.bfloat16            # activation / MXU operand dtype


@functools.lru_cache(maxsize=None)
def _vmem_limit_bytes():
    """~80% of per-core VMEM (v7x ~51 MiB, v5e/v6e ~102 MiB), leaving compiler headroom."""
    try:
        cap = int(pltpu.get_tpu_info().vmem_capacity_bytes)
    except Exception:
        cap = 128 * 1024 * 1024
    return max(32 * 1024 * 1024, int(cap * 0.80))


# ---------------------------------------------------------------------------
# Row-tiled 1x1 conv == matmul + bias (conv_in); B is folded into M by the caller.
# ---------------------------------------------------------------------------
def _conv1x1_kernel(x_ref, w_ref, b_ref, o_ref):
    acc = jnp.dot(x_ref[...], w_ref[...], preferred_element_type=jnp.float32)
    o_ref[...] = (acc + b_ref[...]).astype(o_ref.dtype)


def conv1x1(x2d, w, b, *, out_dtype=None, block_rows=2048):
    """x2d: (M, Cin), w: (Cin, Cout), b: (Cout,) -> (M, Cout).

    NOTE: a partial last row tile feeds garbage rows into the matmul; their outputs are
    masked on write-back and there is no cross-step accumulation, so this is safe.
    """
    M, Cin = x2d.shape
    Cout = w.shape[1]
    out_dtype = out_dtype or x2d.dtype
    tm = M if M <= block_rows else (block_rows // 8) * 8     # row tile; multiple of 8 sublanes
    return pl.pallas_call(
        _conv1x1_kernel,
        grid=(pl.cdiv(M, tm),),
        in_specs=[
            pl.BlockSpec((tm, Cin), lambda i: (i, 0)),
            pl.BlockSpec((Cin, Cout), lambda i: (0, 0)),
            pl.BlockSpec((1, Cout), lambda i: (0, 0)),
        ],
        out_specs=pl.BlockSpec((tm, Cout), lambda i: (i, 0)),
        out_shape=jax.ShapeDtypeStruct((M, Cout), out_dtype),
        compiler_params=pltpu.CompilerParams(
            dimension_semantics=("parallel",),
            vmem_limit_bytes=_vmem_limit_bytes()),
    )(x2d.astype(_ACT_DTYPE), w.astype(_ACT_DTYPE), b.reshape(1, Cout).astype(jnp.float32))


# ---------------------------------------------------------------------------
# Fused GroupNorm + SiLU + 3x3 conv (padding=1) [+ residual / fused 1x1 shortcut]
# on the flat zero-padded layout (B, (H+2)*Wp, C), Wp % 8 == 0.
# ---------------------------------------------------------------------------
def _gn_silu_conv3x3_kernel(x_ref, gamma_ref, beta_ref, w_ref, bias_ref, *rest,
                            H, W, Wp, eps, cg, mode):
    """mode: 0 = no residual, 1 = plain residual, 2 = residual through a fused 1x1 shortcut."""
    if mode == 0:
        (o_ref,) = rest
    elif mode == 1:
        res_ref, o_ref = rest
    else:
        res_ref, scw_ref, scb_ref, o_ref = rest

    Np, Cin = x_ref.shape[1], x_ref.shape[2]
    Cout = o_ref.shape[-1]
    C0 = Wp + 1                     # flat index of the first interior pixel (h=1, w=1)
    Li = H * Wp - 2                 # contiguous window covering every interior output row

    x = x_ref[0].astype(jnp.float32)                        # (Np, Cin), zero pad ring

    # Interior-row mask built in-kernel (int iota -> f32 div/floor; exact for realistic H, W
    # since 1/Wp is far larger than half an f32 ULP near H+2).
    r = jax.lax.broadcasted_iota(jnp.int32, (Np, 1), 0).astype(jnp.float32)
    hp = jnp.floor(r / float(Wp))
    wp = r - hp * float(Wp)
    msk = ((hp >= 1.0) & (hp <= float(H)) &
           (wp >= 1.0) & (wp <= float(W))).astype(jnp.float32)            # (Np, 1)

    # Same-group channel indicator (Cin, Cin) built from iotas (no host-side table).
    ci = jax.lax.broadcasted_iota(jnp.int32, (Cin, Cin), 0).astype(jnp.float32)
    cj = jax.lax.broadcasted_iota(jnp.int32, (Cin, Cin), 1).astype(jnp.float32)
    gmask = (jnp.floor(ci / float(cg)) == jnp.floor(cj / float(cg))).astype(jnp.float32)

    # ---- GroupNorm (f32 stats; zero pad ring drops out of the sums) + SiLU prologue ----
    inv_n = 1.0 / float(H * W * cg)
    s = jnp.sum(x, axis=0, keepdims=True)                                  # (1, Cin)
    mean = jnp.dot(s, gmask, preferred_element_type=jnp.float32) * inv_n
    xc = x - mean
    sq = jnp.sum(msk * xc * xc, axis=0, keepdims=True)                     # pad ring masked out
    var = jnp.dot(sq, gmask, preferred_element_type=jnp.float32) * inv_n
    y = xc * jax.lax.rsqrt(var + eps) * gamma_ref[...] + beta_ref[...]
    y = y * jax.nn.sigmoid(y)                                              # SiLU
    y = y * msk                                                            # restore zero ring

    # ---- 3x3 conv: im2col along K, a single (Li, 9*Cin) x (9*Cin, Cout) MXU pass ----
    # out_flat[C0 + r] = sum_{ky,kx} y_flat[r + ky*Wp + kx] @ W[ky, kx]
    # Wp % 8 == 0 keeps the three kx==0 taps sublane-aligned; the +-1 column shifts are the
    # only relayouts.  Accumulation happens inside the one dot (value result, no VMEM RMW).
    taps = [y[ky * Wp + kx: ky * Wp + kx + Li, :]
            for ky in range(3) for kx in range(3)]
    slab = jnp.concatenate(taps, axis=-1).astype(jnp.bfloat16)             # (Li, 9*Cin)
    out = jnp.dot(slab, w_ref[...], preferred_element_type=jnp.float32) + bias_ref[...]

    if mode == 1:
        out = out + res_ref[0, C0:C0 + Li, :].astype(jnp.float32)
    elif mode == 2:
        r_in = res_ref[0, C0:C0 + Li, :]                                   # raw block input
        out = out + (jnp.dot(r_in, scw_ref[...], preferred_element_type=jnp.float32)
                     + scb_ref[...])
    out = out * msk[C0:C0 + Li, :]                                         # zero ring columns

    # Write the full flat-padded output (zero ring kept) so the next fused call uses it as-is.
    o_ref[0, :C0, :] = jnp.zeros((C0, Cout), o_ref.dtype)
    o_ref[0, C0 + Li:, :] = jnp.zeros((C0, Cout), o_ref.dtype)
    o_ref[0, C0:C0 + Li, :] = out.astype(o_ref.dtype)


def gn_silu_conv3x3(xf, H, W, Wp, gamma, beta, w9, bias, *, residual=None,
                    sc_w=None, sc_b=None, groups=32, eps=1e-6):
    """Fused GroupNorm + SiLU + 3x3 conv (padding=1) [+ residual / fused 1x1 shortcut].

    xf:  (B, (H+2)*Wp, Cin) flat zero-padded activation (Wp % 8 == 0), bf16.
    w9:  (9, Cin, Cout) conv taps in row-major (ky, kx) order.
    out: (B, (H+2)*Wp, Cout) flat zero-padded, bf16.
    """
    B, Np, Cin = xf.shape
    Cout = w9.shape[-1]
    assert Np == (H + 2) * Wp and Wp % 8 == 0 and Wp >= W + 2
    assert Cin % groups == 0
    mode = 0 if residual is None else (2 if sc_w is not None else 1)

    kernel = functools.partial(_gn_silu_conv3x3_kernel, H=H, W=W, Wp=Wp, eps=eps,
                               cg=Cin // groups, mode=mode)

    # Invariant operands (gamma/beta/w/bias) are < 100 KB, so default double-buffering of
    # them is a negligible VMEM cost here (see TODO on pl.Buffered(1) in the header).
    in_specs = [
        pl.BlockSpec((1, Np, Cin), lambda b: (b, 0, 0)),          # activation (flat padded)
        pl.BlockSpec((1, Cin), lambda b: (0, 0)),                 # gamma
        pl.BlockSpec((1, Cin), lambda b: (0, 0)),                 # beta
        pl.BlockSpec((9 * Cin, Cout), lambda b: (0, 0)),          # K-folded conv taps
        pl.BlockSpec((1, Cout), lambda b: (0, 0)),                # bias
    ]
    args = [xf,
            gamma.reshape(1, Cin).astype(jnp.float32),
            beta.reshape(1, Cin).astype(jnp.float32),
            w9.reshape(9 * Cin, Cout).astype(_ACT_DTYPE),
            bias.reshape(1, Cout).astype(jnp.float32)]
    if mode >= 1:
        Cres = residual.shape[-1]
        in_specs.append(pl.BlockSpec((1, Np, Cres), lambda b: (b, 0, 0)))
        args.append(residual.astype(_ACT_DTYPE))
    if mode == 2:
        Cres = sc_w.shape[0]
        in_specs += [pl.BlockSpec((Cres, Cout), lambda b: (0, 0)),
                     pl.BlockSpec((1, Cout), lambda b: (0, 0))]
        args += [sc_w.astype(_ACT_DTYPE), sc_b.reshape(1, Cout).astype(jnp.float32)]

    return pl.pallas_call(
        kernel,
        grid=(B,),
        in_specs=in_specs,
        out_specs=pl.BlockSpec((1, Np, Cout), lambda b: (b, 0, 0)),
        out_shape=jax.ShapeDtypeStruct((B, Np, Cout), _ACT_DTYPE),
        compiler_params=pltpu.CompilerParams(
            dimension_semantics=("parallel",),
            vmem_limit_bytes=_vmem_limit_bytes()),
    )(*args)


# ---------------------------------------------------------------------------
# Layout glue kept in plain JAX (PixelUnshuffle / pad / pool are memory-bound reshuffles
# that XLA fuses; no Pallas kernel needed)
# ---------------------------------------------------------------------------
def pixel_unshuffle_nhwc(x, r):
    """PyTorch PixelUnshuffle(r): out channel index = c*r*r + i*r + j, NHWC layout."""
    B, H, W, C = x.shape
    x = x.reshape(B, H // r, r, W // r, r, C)
    x = x.transpose(0, 1, 3, 5, 2, 4)                       # B, H/r, W/r, C, i, j
    return x.reshape(B, H // r, W // r, C * r * r)


def pad_flatten(x):
    """(B,H,W,C) -> (B,(H+2)*Wp,C) flat with a zero ring; Wp rounded up to a multiple of 8 so
    the fused conv kernel's row shifts stay sublane-aligned (free row-major reshape)."""
    B, H, W, C = x.shape
    Wp = ((W + 2 + 7) // 8) * 8
    xp = jnp.pad(x, ((0, 0), (1, 1), (1, Wp - W - 1), (0, 0)))
    return xp.reshape(B, (H + 2) * Wp, C), Wp


# ---------------------------------------------------------------------------
# Module-level composition
# ---------------------------------------------------------------------------
def resnet_block(xf, H, W, Wp, p, *, groups=32):
    """diffusers ResnetBlock2D(temb=None): GN1->SiLU->conv1 -> GN2->SiLU->conv2 (+ shortcut).

    The 1x1 conv_shortcut (when Cin != Cout) and the residual add are fused into the second
    pallas_call, so a whole block is exactly two kernel launches.
    """
    h = gn_silu_conv3x3(xf, H, W, Wp, p["gn1_g"], p["gn1_b"], p["conv1_w"], p["conv1_b"],
                        groups=groups)
    return gn_silu_conv3x3(h, H, W, Wp, p["gn2_g"], p["gn2_b"], p["conv2_w"], p["conv2_b"],
                           residual=xf, sc_w=p.get("sc_w"), sc_b=p.get("sc_b"), groups=groups)


def pose_encoder_forward(x_nchw, params, *, downscale_factor, groups=32):
    r = downscale_factor
    x = jnp.transpose(x_nchw, (0, 2, 3, 1))                  # NCHW -> NHWC (C on lanes)
    x = pixel_unshuffle_nhwc(x, r).astype(_ACT_DTYPE)
    B, H, W, Cu = x.shape
    Cin = params["conv_in_w"].shape[1]
    x = conv1x1(x.reshape(B * H * W, Cu), params["conv_in_w"], params["conv_in_b"])
    xf, Wp = pad_flatten(x.reshape(B, H, W, Cin))            # flat zero-padded working layout

    features = []
    n = len(params["resnets"])
    for i, rp in enumerate(params["resnets"]):
        yf = resnet_block(xf, H, W, Wp, rp, groups=groups)
        C = yf.shape[-1]
        y = yf.reshape(B, H + 2, Wp, C)                      # free reshape; ring already zero
        features.append(
            jnp.transpose(y[:, 1:H + 1, 1:W + 1, :], (0, 3, 1, 2)).astype(jnp.float32))
        if i != n - 1:
            # Downsample2D(use_conv=False) == AvgPool2d(2): strided-slice adds (XLA fuses)
            pooled = 0.25 * (y[:, 1:H + 1:2, 1:W + 1:2, :] + y[:, 2:H + 2:2, 1:W + 1:2, :] +
                             y[:, 1:H + 1:2, 2:W + 2:2, :] + y[:, 2:H + 2:2, 2:W + 2:2, :])
            H, W = H // 2, W // 2
            xf, Wp = pad_flatten(pooled)
    return features


# ---------------------------------------------------------------------------
# Deterministic synthetic parameters (shapes follow PoseEncoder.__init__)
#   NOTE: any real weight import must permute torch (Cout,Cin,3,3) -> (9,Cin,Cout) taps.
# ---------------------------------------------------------------------------
def init_params(key, *, downscale_factor, pose_channels, in_channels, channels):
    def nrm(k, shape, scale=0.05, dtype=jnp.float32):
        return (scale * jax.random.normal(k, shape, jnp.float32)).astype(dtype)

    keys = iter(jax.random.split(key, 64))
    params = {
        "conv_in_w": nrm(next(keys), (pose_channels * downscale_factor ** 2, in_channels),
                         dtype=_ACT_DTYPE),
        "conv_in_b": nrm(next(keys), (in_channels,)),
        "resnets": [],
    }
    for i, cout in enumerate(channels):
        cin_i = in_channels if i == 0 else channels[i - 1]
        rp = {
            "gn1_g": jnp.ones((cin_i,), jnp.float32),
            "gn1_b": jnp.zeros((cin_i,), jnp.float32),
            "conv1_w": nrm(next(keys), (9, cin_i, cout), dtype=_ACT_DTYPE),
            "conv1_b": nrm(next(keys), (cout,)),
            "gn2_g": jnp.ones((cout,), jnp.float32),
            "gn2_b": jnp.zeros((cout,), jnp.float32),
            "conv2_w": nrm(next(keys), (9, cout, cout), dtype=_ACT_DTYPE),
            "conv2_b": nrm(next(keys), (cout,)),
        }
        if cin_i != cout:
            rp["sc_w"] = nrm(next(keys), (cin_i, cout), dtype=_ACT_DTYPE)
            rp["sc_b"] = nrm(next(keys), (cout,))
        params["resnets"].append(rp)
    return params


# ---------------------------------------------------------------------------
# Pure-JAX f32 reference (same math, lax.conv) for the correctness check
# ---------------------------------------------------------------------------
def reference_forward(x_nchw, params, *, downscale_factor, groups=32, eps=1e-6):
    hi = jax.lax.Precision.HIGHEST

    def gn(x, g, b):
        B, H, W, C = x.shape
        cg = C // groups
        xg = x.reshape(B, H, W, groups, cg)
        mu = xg.mean(axis=(1, 2, 4), keepdims=True)
        var = ((xg - mu) ** 2).mean(axis=(1, 2, 4), keepdims=True)
        xn = ((xg - mu) * jax.lax.rsqrt(var + eps)).reshape(B, H, W, C)
        return xn * g.reshape(1, 1, 1, C) + b.reshape(1, 1, 1, C)

    def silu(v):
        return v * jax.nn.sigmoid(v)

    def conv3(x, w9, b):
        Cin, Cout = w9.shape[1], w9.shape[2]
        w = w9.astype(jnp.float32).reshape(3, 3, Cin, Cout)
        y = jax.lax.conv_general_dilated(
            x, w, (1, 1), ((1, 1), (1, 1)),
            dimension_numbers=("NHWC", "HWIO", "NHWC"), precision=hi)
        return y + b.reshape(1, 1, 1, Cout)

    x = jnp.transpose(x_nchw, (0, 2, 3, 1)).astype(jnp.float32)
    x = pixel_unshuffle_nhwc(x, downscale_factor)
    x = jnp.matmul(x, params["conv_in_w"].astype(jnp.float32), precision=hi) + params["conv_in_b"]
    feats = []
    n = len(params["resnets"])
    for i, p in enumerate(params["resnets"]):
        h = conv3(silu(gn(x, p["gn1_g"], p["gn1_b"])), p["conv1_w"], p["conv1_b"])
        h = conv3(silu(gn(h, p["gn2_g"], p["gn2_b"])), p["conv2_w"], p["conv2_b"])
        if "sc_w" in p:
            res = jnp.matmul(x, p["sc_w"].astype(jnp.float32), precision=hi) + p["sc_b"]
        else:
            res = x
        x = h + res
        feats.append(jnp.transpose(x, (0, 3, 1, 2)))
        if i != n - 1:
            B, H, W, C = x.shape
            x = x.reshape(B, H // 2, 2, W // 2, 2, C).mean(axis=(2, 4))
    return feats


if __name__ == "__main__":
    # Small config (GroupNorm default = 32 groups -> channel counts are multiples of 32).
    downscale_factor = 2
    pose_channels = 4
    in_channels = 32
    channels = (32, 64)

    key = jax.random.PRNGKey(0)
    x = jax.random.normal(key, (2, pose_channels, 16, 16), jnp.float32)     # NCHW like PyTorch

    params = init_params(
        jax.random.PRNGKey(1),
        downscale_factor=downscale_factor,
        pose_channels=pose_channels,
        in_channels=in_channels,
        channels=channels,
    )

    fwd = jax.jit(functools.partial(pose_encoder_forward, downscale_factor=downscale_factor))
    feats = fwd(x, params)
    feats = [jax.block_until_ready(f) for f in feats]

    # shape / sanity checks
    assert feats[0].shape == (2, 32, 8, 8), feats[0].shape
    assert feats[1].shape == (2, 64, 4, 4), feats[1].shape
    assert all(bool(jnp.isfinite(f).all()) for f in feats)

    # numerical check vs. a pure-JAX f32 reference (kernels run bf16 operands on the MXU,
    # f32 GroupNorm statistics and f32 accumulation)
    ref = reference_forward(x, params, downscale_factor=downscale_factor)
    for f, rf in zip(feats, ref):
        err = float(jnp.max(jnp.abs(f.astype(jnp.float32) - rf)))
        assert err < 0.1, f"max abs error vs reference too large: {err}"

    print("KERNEL_OK")
</pallas_src>

<mosaic_0001>
module attributes {stable_mosaic.version = 11 : i64} {
  func.func @_conv1x1_kernel(%arg0: i32, %arg1: memref<128x16xbf16, #tpu.memory_space<vmem>>, %arg2: memref<16x32xbf16, #tpu.memory_space<vmem>>, %arg3: memref<1x32xf32, #tpu.memory_space<vmem>>, %arg4: memref<128x32xbf16, #tpu.memory_space<vmem>>) attributes {dimension_semantics = [#tpu.dimension_semantics<parallel>], iteration_bounds = array<i64: 1>, scalar_prefetch = 0 : i64, scratch_operands = 0 : i64, tpu.core_type = #tpu.core_type<tc>, window_params = [{transform_indices = @transform_0, window_bounds = array<i64: 128, 16>}, {pipeline_mode = #tpu.pipeline_mode<synchronous>, transform_indices = @transform_1, window_bounds = array<i64: 16, 32>}, {pipeline_mode = #tpu.pipeline_mode<synchronous>, transform_indices = @transform_2, window_bounds = array<i64: 1, 32>}, {transform_indices = @transform_3, window_bounds = array<i64: 128, 32>}]} {
    %c0 = arith.constant 0 : index
    %c0_0 = arith.constant 0 : index
    %0 = vector.load %arg1[%c0, %c0_0] : memref<128x16xbf16, #tpu.memory_space<vmem>>, vector<128x16xbf16>
    %c0_1 = arith.constant 0 : index
    %c0_2 = arith.constant 0 : index
    %1 = vector.load %arg2[%c0_1, %c0_2] : memref<16x32xbf16, #tpu.memory_space<vmem>>, vector<16x32xbf16>
    %cst = arith.constant dense<0.000000e+00> : vector<128x32xf32>
    %2 = tpu.matmul %0, %1, %cst {dimension_numbers = #tpu.dot_dimension_numbers<[1], [0], [0], [1], [0, 0, 1, 1], [], []>} : vector<128x16xbf16>, vector<16x32xbf16>, vector<128x32xf32> -> vector<128x32xf32>
    %c0_3 = arith.constant 0 : index
    %c0_4 = arith.constant 0 : index
    %3 = vector.load %arg3[%c0_3, %c0_4] : memref<1x32xf32, #tpu.memory_space<vmem>>, vector<1x32xf32>
    %4 = vector.broadcast %3 : vector<1x32xf32> to vector<128x32xf32>
    %5 = arith.addf %2, %4 : vector<128x32xf32>
    %6 = arith.truncf %5 : vector<128x32xf32> to vector<128x32xbf16>
    %c0_5 = arith.constant 0 : index
    %c0_6 = arith.constant 0 : index
    %7 = vector.load %arg4[%c0_5, %c0_6] : memref<128x32xbf16, #tpu.memory_space<vmem>>, vector<128x32xbf16>
    tpu.vector_store %arg4[%c0_5, %c0_6], %6 {strides = array<i32>} : memref<128x32xbf16, #tpu.memory_space<vmem>>, vector<128x32xbf16>,
    return
  }
  func.func @transform_0(%arg0: i32) -> (i32, i32) {
    %c0_i32 = arith.constant 0 : i32
    %c0_i32_0 = arith.constant 0 : i32
    return %arg0, %c0_i32 : i32, i32
  }
  func.func @transform_1(%arg0: i32) -> (i32, i32) {
    %c0_i32 = arith.constant 0 : i32
    %c0_i32_0 = arith.constant 0 : i32
    %c0_i32_1 = arith.constant 0 : i32
    return %c0_i32, %c0_i32_0 : i32, i32
  }
  func.func @transform_2(%arg0: i32) -> (i32, i32) {
    %c0_i32 = arith.constant 0 : i32
    %c0_i32_0 = arith.constant 0 : i32
    %c0_i32_1 = arith.constant 0 : i32
    return %c0_i32, %c0_i32_0 : i32, i32
  }
  func.func @transform_3(%arg0: i32) -> (i32, i32) {
    %c0_i32 = arith.constant 0 : i32
    %c0_i32_0 = arith.constant 0 : i32
    return %arg0, %c0_i32 : i32, i32
  }
}

module attributes {stable_mosaic.version = 11 : i64} {
  func.func @_gn_silu_conv3x3_kernel(%arg0: i32, %arg1: memref<1x160x32xbf16, #tpu.memory_space<vmem>>, %arg2: memref<1x32xf32, #tpu.memory_space<vmem>>, %arg3: memref<1x32xf32, #tpu.memory_space<vmem>>, %arg4: memref<288x32xbf16, #tpu.memory_space<vmem>>, %arg5: memref<1x32xf32, #tpu.memory_space<vmem>>, %arg6: memref<1x160x32xbf16, #tpu.memory_space<vmem>>) attributes {dimension_semantics = [#tpu.dimension_semantics<parallel>], iteration_bounds = array<i64: 2>, scalar_prefetch = 0 : i64, scratch_operands = 0 : i64, tpu.core_type = #tpu.core_type<tc>, window_params = [{transform_indices = @transform_0, window_bounds = array<i64: 1, 160, 32>}, {pipeline_mode = #tpu.pipeline_mode<synchronous>, transform_indices = @transform_1, window_bounds = array<i64: 1, 32>}, {pipeline_mode = #tpu.pipeline_mode<synchronous>, transform_indices = @transform_2, window_bounds = array<i64: 1, 32>}, {pipeline_mode = #tpu.pipeline_mode<synchronous>, transform_indices = @transform_3, window_bounds = array<i64: 288, 32>}, {pipeline_mode = #tpu.pipeline_mode<synchronous>, transform_indices = @transform_4, window_bounds = array<i64: 1, 32>}, {transform_indices = @transform_5, window_bounds = array<i64: 1, 160, 32>}]} {
    %c0 = arith.constant 0 : index
    %c0_0 = arith.constant 0 : index
    %c0_1 = arith.constant 0 : index
    %0 = vector.load %arg1[%c0, %c0_0, %c0_1] : memref<1x160x32xbf16, #tpu.memory_space<vmem>>, vector<1x160x32xbf16>
    %1 = vector.shape_cast %0 : vector<1x160x32xbf16> to vector<160x32xbf16>
    %2 = arith.extf %1 : vector<160x32xbf16> to vector<160x32xf32>
    %3 = tpu.iota {dimensions = array<i32: 0>} : vector<160x1xi32>
    %4 = arith.sitofp %3 : vector<160x1xi32> to vector<160x1xf32>
    %cst = arith.constant 1.600000e+01 : f32
    %5 = vector.broadcast %cst : f32 to vector<160x1xf32>
    %6 = arith.divf %4, %5 : vector<160x1xf32>
    %7 = math.floor %6 : vector<160x1xf32>
    %cst_2 = arith.constant 1.600000e+01 : f32
    %8 = vector.broadcast %cst_2 : f32 to vector<160x1xf32>
    %9 = arith.mulf %7, %8 : vector<160x1xf32>
    %10 = arith.subf %4, %9 : vector<160x1xf32>
    %cst_3 = arith.constant 1.000000e+00 : f32
    %11 = vector.broadcast %cst_3 : f32 to vector<160x1xf32>
    %12 = arith.cmpf oge, %7, %11 : vector<160x1xf32>
    %cst_4 = arith.constant 8.000000e+00 : f32
    %13 = vector.broadcast %cst_4 : f32 to vector<160x1xf32>
    %14 = arith.cmpf ole, %7, %13 : vector<160x1xf32>
    %15 = arith.andi %12, %14 : vector<160x1xi1>
    %cst_5 = arith.constant 1.000000e+00 : f32
    %16 = vector.broadcast %cst_5 : f32 to vector<160x1xf32>
    %17 = arith.cmpf oge, %10, %16 : vector<160x1xf32>
    %18 = arith.andi %15, %17 : vector<160x1xi1>
    %cst_6 = arith.constant 8.000000e+00 : f32
    %19 = vector.broadcast %cst_6 : f32 to vector<160x1xf32>
    %20 = arith.cmpf ole, %10, %19 : vector<160x1xf32>
    %21 = arith.andi %18, %20 : vector<160x1xi1>
    %22 = arith.extui %21 : vector<160x1xi1> to vector<160x1xi32>
    %23 = arith.sitofp %22 : vector<160x1xi32> to vector<160x1xf32>
    %24 = tpu.iota {dimensions = array<i32: 0>} : vector<32x32xi32>
    %25 = arith.sitofp %24 : vector<32x32xi32> to vector<32x32xf32>
    %26 = tpu.iota {dimensions = array<i32: 1>} : vector<32x32xi32>
    %27 = arith.sitofp %26 : vector<32x32xi32> to vector<32x32xf32>
    %cst_7 = arith.constant 1.000000e+00 : f32
    %28 = vector.broadcast %cst_7 : f32 to vector<32x32xf32>
    %29 = arith.divf %25, %28 : vector<32x32xf32>
    %30 = math.floor %29 : vector<32x32xf32>
    %cst_8 = arith.constant 1.000000e+00 : f32
    %31 = vector.broadcast %cst_8 : f32 to vector<32x32xf32>
    %32 = arith.divf %27, %31 : vector<32x32xf32>
    %33 = math.floor %32 : vector<32x32xf32>
    %34 = arith.cmpf oeq, %30, %33 : vector<32x32xf32>
    %35 = arith.extui %34 : vector<32x32xi1> to vector<32x32xi32>
    %36 = arith.sitofp %35 : vector<32x32xi32> to vector<32x32xf32>
    %cst_9 = arith.constant dense<0.000000e+00> : vector<32xf32>
    %37 = vector.multi_reduction <add>, %2, %cst_9 [0] : vector<160x32xf32> to vector<32xf32>
    %38 = vector.shape_cast %37 : vector<32xf32> to vector<1x32xf32>
    %cst_10 = arith.constant dense<0.000000e+00> : vector<1x32xf32>
    %39 = tpu.matmul %38, %36, %cst_10 {dimension_numbers = #tpu.dot_dimension_numbers<[1], [0], [0], [1], [0, 0, 1, 1], [], []>} : vector<1x32xf32>, vector<32x32xf32>, vector<1x32xf32> -> vector<1x32xf32>
    %cst_11 = arith.constant 1.562500e-02 : f32
    %40 = vector.broadcast %cst_11 : f32 to vector<1x32xf32>
    %41 = arith.mulf %39, %40 : vector<1x32xf32>
    %42 = vector.broadcast %41 : vector<1x32xf32> to vector<160x32xf32>
    %43 = arith.subf %2, %42 : vector<160x32xf32>
    %44 = vector.broadcast %23 : vector<160x1xf32> to vector<160x32xf32>
    %45 = arith.mulf %44, %43 : vector<160x32xf32>
    %46 = arith.mulf %45, %43 : vector<160x32xf32>
    %cst_12 = arith.constant dense<0.000000e+00> : vector<32xf32>
    %47 = vector.multi_reduction <add>, %46, %cst_12 [0] : vector<160x32xf32> to vector<32xf32>
    %48 = vector.shape_cast %47 : vector<32xf32> to vector<1x32xf32>
    %cst_13 = arith.constant dense<0.000000e+00> : vector<1x32xf32>
    %49 = tpu.matmul %48, %36, %cst_13 {dimension_numbers = #tpu.dot_dimension_numbers<[1], [0], [0], [1], [0, 0, 1, 1], [], []>} : vector<1x32xf32>, vector<32x32xf32>, vector<1x32xf32> -> vector<1x32xf32>
    %cst_14 = arith.constant 1.562500e-02 : f32
    %50 = vector.broadcast %cst_14 : f32 to vector<1x32xf32>
    %51 = arith.mulf %49, %50 : vector<1x32xf32>
    %cst_15 = arith.constant 9.99999997E-7 : f32
    %52 = vector.broadcast %cst_15 : f32 to vector<1x32xf32>
    %53 = arith.addf %51, %52 : vector<1x32xf32>
    %54 = math.rsqrt %53 : vector<1x32xf32>
    %55 = vector.broadcast %54 : vector<1x32xf32> to vector<160x32xf32>
    %56 = arith.mulf %43, %55 : vector<160x32xf32>
    %c0_16 = arith.constant 0 : index
    %c0_17 = arith.constant 0 : index
    %57 = vector.load %arg2[%c0_16, %c0_17] : memref<1x32xf32, #tpu.memory_space<vmem>>, vector<1x32xf32>
    %58 = vector.broadcast %57 : vector<1x32xf32> to vector<160x32xf32>
    %59 = arith.mulf %56, %58 : vector<160x32xf32>
    %c0_18 = arith.constant 0 : index
    %c0_19 = arith.constant 0 : index
    %60 = vector.load %arg3[%c0_18, %c0_19] : memref<1x32xf32, #tpu.memory_space<vmem>>, vector<1x32xf32>
    %61 = vector.broadcast %60 : vector<1x32xf32> to vector<160x32xf32>
    %62 = arith.addf %59, %61 : vector<160x32xf32>
    %63 = arith.negf %62 : vector<160x32xf32>
    %64 = math.exp %63 : vector<160x32xf32>
    %cst_20 = arith.constant 1.000000e+00 : f32
    %65 = vector.broadcast %cst_20 : f32 to vector<160x32xf32>
    %66 = arith.addf %65, %64 : vector<160x32xf32>
    %67 = arith.divf %65, %66 : vector<160x32xf32>
    %68 = arith.mulf %62, %67 : vector<160x32xf32>
    %69 = vector.broadcast %23 : vector<160x1xf32> to vector<160x32xf32>
    %70 = arith.mulf %68, %69 : vector<160x32xf32>
    %71 = vector.extract_strided_slice %70 {offsets = [0, 0], sizes = [126, 32], strides = [1, 1]} : vector<160x32xf32> to vector<126x32xf32>
    %72 = vector.extract_strided_slice %70 {offsets = [1, 0], sizes = [126, 32], strides = [1, 1]} : vector<160x32xf32> to vector<126x32xf32>
    %73 = vector.extract_strided_slice %70 {offsets = [2, 0], sizes = [126, 32], strides = [1, 1]} : vector<160x32xf32> to vector<126x32xf32>
    %74 = vector.extract_strided_slice %70 {offsets = [16, 0], sizes = [126, 32], strides = [1, 1]} : vector<160x32xf32> to vector<126x32xf32>
    %75 = vector.extract_strided_slice %70 {offsets = [17, 0], sizes = [126, 32], strides = [1, 1]} : vector<160x32xf32> to vector<126x32xf32>
    %76 = vector.extract_strided_slice %70 {offsets = [18, 0], sizes = [126, 32], strides = [1, 1]} : vector<160x32xf32> to vector<126x32xf32>
    %77 = vector.extract_strided_slice %70 {offsets = [32, 0], sizes = [126, 32], strides = [1, 1]} : vector<160x32xf32> to vector<126x32xf32>
    %78 = vector.extract_strided_slice %70 {offsets = [33, 0], sizes = [126, 32], strides = [1, 1]} : vector<160x32xf32> to vector<126x32xf32>
    %79 = vector.extract_strided_slice %70 {offsets = [34, 0], sizes = [126, 32], strides = [1, 1]} : vector<160x32xf32> to vector<126x32xf32>
    %80 = tpu.concatenate %71, %72, %73, %74, %75, %76, %77, %78, %79 in 1 : vector<126x32xf32>, vector<126x32xf32>, vector<126x32xf32>, vector<126x32xf32>, vector<126x32xf32>, vector<126x32xf32>, vector<126x32xf32>, vector<126x32xf32>, vector<126x32xf32> -> vector<126x288xf32>
    %81 = arith.truncf %80 : vector<126x288xf32> to vector<126x288xbf16>
    %c0_21 = arith.constant 0 : index
    %c0_22 = arith.constant 0 : index
    %82 = vector.load %arg4[%c0_21, %c0_22] : memref<288x32xbf16, #tpu.memory_space<vmem>>, vector<288x32xbf16>
    %cst_23 = arith.constant dense<0.000000e+00> : vector<126x32xf32>
    %83 = tpu.matmul %81, %82, %cst_23 {dimension_numbers = #tpu.dot_dimension_numbers<[1], [0], [0], [1], [0, 0, 1, 1], [], []>} : vector<126x288xbf16>, vector<288x32xbf16>, vector<126x32xf32> -> vector<126x32xf32>
    %c0_24 = arith.constant 0 : index
    %c0_25 = arith.constant 0 : index
    %84 = vector.load %arg5[%c0_24, %c0_25] : memref<1x32xf32, #tpu.memory_space<vmem>>, vector<1x32xf32>
    %85 = vector.broadcast %84 : vector<1x32xf32> to vector<126x32xf32>
    %86 = arith.addf %83, %85 : vector<126x32xf32>
    %87 = vector.extract_strided_slice %23 {offsets = [17, 0], sizes = [126, 1], strides = [1, 1]} : vector<160x1xf32> to vector<126x1xf32>
    %88 = vector.broadcast %87 : vector<126x1xf32> to vector<126x32xf32>
    %89 = arith.mulf %86, %88 : vector<126x32xf32>
    %cst_26 = arith.constant 0.000000e+00 : bf16
    %90 = vector.broadcast %cst_26 : bf16 to vector<17x32xbf16>
    %c0_27 = arith.constant 0 : index
    %c0_28 = arith.constant 0 : index
    %c0_29 = arith.constant 0 : index
    %91 = vector.load %arg6[%c0_27, %c0_28, %c0_29] : memref<1x160x32xbf16, #tpu.memory_space<vmem>>, vector<1x17x32xbf16>
    %92 = vector.shape_cast %91 : vector<1x17x32xbf16> to vector<17x32xbf16>
    %93 = vector.shape_cast %90 : vector<17x32xbf16> to vector<1x17x32xbf16>
    tpu.vector_store %arg6[%c0_27, %c0_28, %c0_29], %93 {strides = array<i32>} : memref<1x160x32xbf16, #tpu.memory_space<vmem>>, vector<1x17x32xbf16>,
    %cst_30 = arith.constant 0.000000e+00 : bf16
    %94 = vector.broadcast %cst_30 : bf16 to vector<17x32xbf16>
    %c0_31 = arith.constant 0 : index
    %c143 = arith.constant 143 : index
    %c0_32 = arith.constant 0 : index
    %95 = vector.load %arg6[%c0_31, %c143, %c0_32] : memref<1x160x32xbf16, #tpu.memory_space<vmem>>, vector<1x17x32xbf16>
    %96 = vector.shape_cast %95 : vector<1x17x32xbf16> to vector<17x32xbf16>
    %97 = vector.shape_cast %94 : vector<17x32xbf16> to vector<1x17x32xbf16>
    tpu.vector_store %arg6[%c0_31, %c143, %c0_32], %97 {strides = array<i32>} : memref<1x160x32xbf16, #tpu.memory_space<vmem>>, vector<1x17x32xbf16>,
    %98 = arith.truncf %89 : vector<126x32xf32> to vector<126x32xbf16>
    %c0_33 = arith.constant 0 : index
    %c17 = arith.constant 17 : index
    %c0_34 = arith.constant 0 : index
    %99 = vector.load %arg6[%c0_33, %c17, %c0_34] : memref<1x160x32xbf16, #tpu.memory_space<vmem>>, vector<1x126x32xbf16>
    %100 = vector.shape_cast %99 : vector<1x126x32xbf16> to vector<126x32xbf16>
    %101 = vector.shape_cast %98 : vector<126x32xbf16> to vector<1x126x32xbf16>
    tpu.vector_store %arg6[%c0_33, %c17, %c0_34], %101 {strides = array<i32>} : memref<1x160x32xbf16, #tpu.memory_space<vmem>>, vector<1x126x32xbf16>,
    return
  }
  func.func @transform_0(%arg0: i32) -> (i32, i32, i32) {
    %c0_i32 = arith.constant 0 : i32
    %c0_i32_0 = arith.constant 0 : i32
    %c0_i32_1 = arith.constant 0 : i32
    return %arg0, %c0_i32, %c0_i32_0 : i32, i32, i32
  }
  func.func @transform_1(%arg0: i32) -> (i32, i32) {
    %c0_i32 = arith.constant 0 : i32
    %c0_i32_0 = arith.constant 0 : i32
    %c0_i32_1 = arith.constant 0 : i32
    return %c0_i32, %c0_i32_0 : i32, i32
  }
  func.func @transform_2(%arg0: i32) -> (i32, i32) {
    %c0_i32 = arith.constant 0 : i32
    %c0_i32_0 = arith.constant 0 : i32
    %c0_i32_1 = arith.constant 0 : i32
    return %c0_i32, %c0_i32_0 : i32, i32
  }
  func.func @transform_3(%arg0: i32) -> (i32, i32) {
    %c0_i32 = arith.constant 0 : i32
    %c0_i32_0 = arith.constant 0 : i32
    %c0_i32_1 = arith.constant 0 : i32
    return %c0_i32, %c0_i32_0 : i32, i32
  }
  func.func @transform_4(%arg0: i32) -> (i32, i32) {
    %c0_i32 = arith.constant 0 : i32
    %c0_i32_0 = arith.constant 0 : i32
    %c0_i32_1 = arith.constant 0 : i32
    return %c0_i32, %c0_i32_0 : i32, i32
  }
  func.func @transform_5(%arg0: i32) -> (i32, i32, i32) {
    %c0_i32 = arith.constant 0 : i32
    %c0_i32_0 = arith.constant 0 : i32
    %c0_i32_1 = arith.constant 0 : i32
    return %arg0, %c0_i32, %c0_i32_0 : i32, i32, i32
  }
}

module attributes {stable_mosaic.version = 11 : i64} {
  func.func @_gn_silu_conv3x3_kernel(%arg0: i32, %arg1: memref<1x160x32xbf16, #tpu.memory_space<vmem>>, %arg2: memref<1x32xf32, #tpu.memory_space<vmem>>, %arg3: memref<1x32xf32, #tpu.memory_space<vmem>>, %arg4: memref<288x32xbf16, #tpu.memory_space<vmem>>, %arg5: memref<1x32xf32, #tpu.memory_space<vmem>>, %arg6: memref<1x160x32xbf16, #tpu.memory_space<vmem>>, %arg7: memref<1x160x32xbf16, #tpu.memory_space<vmem>>) attributes {dimension_semantics = [#tpu.dimension_semantics<parallel>], iteration_bounds = array<i64: 2>, scalar_prefetch = 0 : i64, scratch_operands = 0 : i64, tpu.core_type = #tpu.core_type<tc>, window_params = [{transform_indices = @transform_0, window_bounds = array<i64: 1, 160, 32>}, {pipeline_mode = #tpu.pipeline_mode<synchronous>, transform_indices = @transform_1, window_bounds = array<i64: 1, 32>}, {pipeline_mode = #tpu.pipeline_mode<synchronous>, transform_indices = @transform_2, window_bounds = array<i64: 1, 32>}, {pipeline_mode = #tpu.pipeline_mode<synchronous>, transform_indices = @transform_3, window_bounds = array<i64: 288, 32>}, {pipeline_mode = #tpu.pipeline_mode<synchronous>, transform_indices = @transform_4, window_bounds = array<i64: 1, 32>}, {transform_indices = @transform_5, window_bounds = array<i64: 1, 160, 32>}, {transform_indices = @transform_6, window_bounds = array<i64: 1, 160, 32>}]} {
    %c0 = arith.constant 0 : index
    %c0_0 = arith.constant 0 : index
    %c0_1 = arith.constant 0 : index
    %0 = vector.load %arg1[%c0, %c0_0, %c0_1] : memref<1x160x32xbf16, #tpu.memory_space<vmem>>, vector<1x160x32xbf16>
    %1 = vector.shape_cast %0 : vector<1x160x32xbf16> to vector<160x32xbf16>
    %2 = arith.extf %1 : vector<160x32xbf16> to vector<160x32xf32>
    %3 = tpu.iota {dimensions = array<i32: 0>} : vector<160x1xi32>
    %4 = arith.sitofp %3 : vector<160x1xi32> to vector<160x1xf32>
    %cst = arith.constant 1.600000e+01 : f32
    %5 = vector.broadcast %cst : f32 to vector<160x1xf32>
    %6 = arith.divf %4, %5 : vector<160x1xf32>
    %7 = math.floor %6 : vector<160x1xf32>
    %cst_2 = arith.constant 1.600000e+01 : f32
    %8 = vector.broadcast %cst_2 : f32 to vector<160x1xf32>
    %9 = arith.mulf %7, %8 : vector<160x1xf32>
    %10 = arith.subf %4, %9 : vector<160x1xf32>
    %cst_3 = arith.constant 1.000000e+00 : f32
    %11 = vector.broadcast %cst_3 : f32 to vector<160x1xf32>
    %12 = arith.cmpf oge, %7, %11 : vector<160x1xf32>
    %cst_4 = arith.constant 8.000000e+00 : f32
    %13 = vector.broadcast %cst_4 : f32 to vector<160x1xf32>
    %14 = arith.cmpf ole, %7, %13 : vector<160x1xf32>
    %15 = arith.andi %12, %14 : vector<160x1xi1>
    %cst_5 = arith.constant 1.000000e+00 : f32
    %16 = vector.broadcast %cst_5 : f32 to vector<160x1xf32>
    %17 = arith.cmpf oge, %10, %16 : vector<160x1xf32>
    %18 = arith.andi %15, %17 : vector<160x1xi1>
    %cst_6 = arith.constant 8.000000e+00 : f32
    %19 = vector.broadcast %cst_6 : f32 to vector<160x1xf32>
    %20 = arith.cmpf ole, %10, %19 : vector<160x1xf32>
    %21 = arith.andi %18, %20 : vector<160x1xi1>
    %22 = arith.extui %21 : vector<160x1xi1> to vector<160x1xi32>
    %23 = arith.sitofp %22 : vector<160x1xi32> to vector<160x1xf32>
    %24 = tpu.iota {dimensions = array<i32: 0>} : vector<32x32xi32>
    %25 = arith.sitofp %24 : vector<32x32xi32> to vector<32x32xf32>
    %26 = tpu.iota {dimensions = array<i32: 1>} : vector<32x32xi32>
    %27 = arith.sitofp %26 : vector<32x32xi32> to vector<32x32xf32>
    %cst_7 = arith.constant 1.000000e+00 : f32
    %28 = vector.broadcast %cst_7 : f32 to vector<32x32xf32>
    %29 = arith.divf %25, %28 : vector<32x32xf32>
    %30 = math.floor %29 : vector<32x32xf32>
    %cst_8 = arith.constant 1.000000e+00 : f32
    %31 = vector.broadcast %cst_8 : f32 to vector<32x32xf32>
    %32 = arith.divf %27, %31 : vector<32x32xf32>
    %33 = math.floor %32 : vector<32x32xf32>
    %34 = arith.cmpf oeq, %30, %33 : vector<32x32xf32>
    %35 = arith.extui %34 : vector<32x32xi1> to vector<32x32xi32>
    %36 = arith.sitofp %35 : vector<32x32xi32> to vector<32x32xf32>
    %cst_9 = arith.constant dense<0.000000e+00> : vector<32xf32>
    %37 = vector.multi_reduction <add>, %2, %cst_9 [0] : vector<160x32xf32> to vector<32xf32>
    %38 = vector.shape_cast %37 : vector<32xf32> to vector<1x32xf32>
    %cst_10 = arith.constant dense<0.000000e+00> : vector<1x32xf32>
    %39 = tpu.matmul %38, %36, %cst_10 {dimension_numbers = #tpu.dot_dimension_numbers<[1], [0], [0], [1], [0, 0, 1, 1], [], []>} : vector<1x32xf32>, vector<32x32xf32>, vector<1x32xf32> -> vector<1x32xf32>
    %cst_11 = arith.constant 1.562500e-02 : f32
    %40 = vector.broadcast %cst_11 : f32 to vector<1x32xf32>
    %41 = arith.mulf %39, %40 : vector<1x32xf32>
    %42 = vector.broadcast %41 : vector<1x32xf32> to vector<160x32xf32>
    %43 = arith.subf %2, %42 : vector<160x32xf32>
    %44 = vector.broadcast %23 : vector<160x1xf32> to vector<160x32xf32>
    %45 = arith.mulf %44, %43 : vector<160x32xf32>
    %46 = arith.mulf %45, %43 : vector<160x32xf32>
    %cst_12 = arith.constant dense<0.000000e+00> : vector<32xf32>
    %47 = vector.multi_reduction <add>, %46, %cst_12 [0] : vector<160x32xf32> to vector<32xf32>
    %48 = vector.shape_cast %47 : vector<32xf32> to vector<1x32xf32>
    %cst_13 = arith.constant dense<0.000000e+00> : vector<1x32xf32>
    %49 = tpu.matmul %48, %36, %cst_13 {dimension_numbers = #tpu.dot_dimension_numbers<[1], [0], [0], [1], [0, 0, 1, 1], [], []>} : vector<1x32xf32>, vector<32x32xf32>, vector<1x32xf32> -> vector<1x32xf32>
    %cst_14 = arith.constant 1.562500e-02 : f32
    %50 = vector.broadcast %cst_14 : f32 to vector<1x32xf32>
    %51 = arith.mulf %49, %50 : vector<1x32xf32>
    %cst_15 = arith.constant 9.99999997E-7 : f32
    %52 = vector.broadcast %cst_15 : f32 to vector<1x32xf32>
    %53 = arith.addf %51, %52 : vector<1x32xf32>
    %54 = math.rsqrt %53 : vector<1x32xf32>
    %55 = vector.broadcast %54 : vector<1x32xf32> to vector<160x32xf32>
    %56 = arith.mulf %43, %55 : vector<160x32xf32>
    %c0_16 = arith.constant 0 : index
    %c0_17 = arith.constant 0 : index
    %57 = vector.load %arg2[%c0_16, %c0_17] : memref<1x32xf32, #tpu.memory_space<vmem>>, vector<1x32xf32>
    %58 = vector.broadcast %57 : vector<1x32xf32> to vector<160x32xf32>
    %59 = arith.mulf %56, %58 : vector<160x32xf32>
    %c0_18 = arith.constant 0 : index
    %c0_19 = arith.constant 0 : index
    %60 = vector.load %arg3[%c0_18, %c0_19] : memref<1x32xf32, #tpu.memory_space<vmem>>, vector<1x32xf32>
    %61 = vector.broadcast %60 : vector<1x32xf32> to vector<160x32xf32>
    %62 = arith.addf %59, %61 : vector<160x32xf32>
    %63 = arith.negf %62 : vector<160x32xf32>
    %64 = math.exp %63 : vector<160x32xf32>
    %cst_20 = arith.constant 1.000000e+00 : f32
    %65 = vector.broadcast %cst_20 : f32 to vector<160x32xf32>
    %66 = arith.addf %65, %64 : vector<160x32xf32>
    %67 = arith.divf %65, %66 : vector<160x32xf32>
    %68 = arith.mulf %62, %67 : vector<160x32xf32>
    %69 = vector.broadcast %23 : vector<160x1xf32> to vector<160x32xf32>
    %70 = arith.mulf %68, %69 : vector<160x32xf32>
    %71 = vector.extract_strided_slice %70 {offsets = [0, 0], sizes = [126, 32], strides = [1, 1]} : vector<160x32xf32> to vector<126x32xf32>
    %72 = vector.extract_strided_slice %70 {offsets = [1, 0], sizes = [126, 32], strides = [1, 1]} : vector<160x32xf32> to vector<126x32xf32>
    %73 = vector.extract_strided_slice %70 {offsets = [2, 0], sizes = [126, 32], strides = [1, 1]} : vector<160x32xf32> to vector<126x32xf32>
    %74 = vector.extract_strided_slice %70 {offsets = [16, 0], sizes = [126, 32], strides = [1, 1]} : vector<160x32xf32> to vector<126x32xf32>
    %75 = vector.extract_strided_slice %70 {offsets = [17, 0], sizes = [126, 32], strides = [1, 1]} : vector<160x32xf32> to vector<126x32xf32>
    %76 = vector.extract_strided_slice %70 {offsets = [18, 0], sizes = [126, 32], strides = [1, 1]} : vector<160x32xf32> to vector<126x32xf32>
    %77 = vector.extract_strided_slice %70 {offsets = [32, 0], sizes = [126, 32], strides = [1, 1]} : vector<160x32xf32> to vector<126x32xf32>
    %78 = vector.extract_strided_slice %70 {offsets = [33, 0], sizes = [126, 32], strides = [1, 1]} : vector<160x32xf32> to vector<126x32xf32>
    %79 = vector.extract_strided_slice %70 {offsets = [34, 0], sizes = [126, 32], strides = [1, 1]} : vector<160x32xf32> to vector<126x32xf32>
    %80 = tpu.concatenate %71, %72, %73, %74, %75, %76, %77, %78, %79 in 1 : vector<126x32xf32>, vector<126x32xf32>, vector<126x32xf32>, vector<126x32xf32>, vector<126x32xf32>, vector<126x32xf32>, vector<126x32xf32>, vector<126x32xf32>, vector<126x32xf32> -> vector<126x288xf32>
    %81 = arith.truncf %80 : vector<126x288xf32> to vector<126x288xbf16>
    %c0_21 = arith.constant 0 : index
    %c0_22 = arith.constant 0 : index
    %82 = vector.load %arg4[%c0_21, %c0_22] : memref<288x32xbf16, #tpu.memory_space<vmem>>, vector<288x32xbf16>
    %cst_23 = arith.constant dense<0.000000e+00> : vector<126x32xf32>
    %83 = tpu.matmul %81, %82, %cst_23 {dimension_numbers = #tpu.dot_dimension_numbers<[1], [0], [0], [1], [0, 0, 1, 1], [], []>} : vector<126x288xbf16>, vector<288x32xbf16>, vector<126x32xf32> -> vector<126x32xf32>
    %c0_24 = arith.constant 0 : index
    %c0_25 = arith.constant 0 : index
    %84 = vector.load %arg5[%c0_24, %c0_25] : memref<1x32xf32, #tpu.memory_space<vmem>>, vector<1x32xf32>
    %85 = vector.broadcast %84 : vector<1x32xf32> to vector<126x32xf32>
    %86 = arith.addf %83, %85 : vector<126x32xf32>
    %c0_26 = arith.constant 0 : index
    %c17 = arith.constant 17 : index
    %c0_27 = arith.constant 0 : index
    %87 = vector.load %arg6[%c0_26, %c17, %c0_27] : memref<1x160x32xbf16, #tpu.memory_space<vmem>>, vector<1x126x32xbf16>
    %88 = vector.shape_cast %87 : vector<1x126x32xbf16> to vector<126x32xbf16>
    %89 = arith.extf %88 : vector<126x32xbf16> to vector<126x32xf32>
    %90 = arith.addf %86, %89 : vector<126x32xf32>
    %91 = vector.extract_strided_slice %23 {offsets = [17, 0], sizes = [126, 1], strides = [1, 1]} : vector<160x1xf32> to vector<126x1xf32>
    %92 = vector.broadcast %91 : vector<126x1xf32> to vector<126x32xf32>
    %93 = arith.mulf %90, %92 : vector<126x32xf32>
    %cst_28 = arith.constant 0.000000e+00 : bf16
    %94 = vector.broadcast %cst_28 : bf16 to vector<17x32xbf16>
    %c0_29 = arith.constant 0 : index
    %c0_30 = arith.constant 0 : index
    %c0_31 = arith.constant 0 : index
    %95 = vector.load %arg7[%c0_29, %c0_30, %c0_31] : memref<1x160x32xbf16, #tpu.memory_space<vmem>>, vector<1x17x32xbf16>
    %96 = vector.shape_cast %95 : vector<1x17x32xbf16> to vector<17x32xbf16>
    %97 = vector.shape_cast %94 : vector<17x32xbf16> to vector<1x17x32xbf16>
    tpu.vector_store %arg7[%c0_29, %c0_30, %c0_31], %97 {strides = array<i32>} : memref<1x160x32xbf16, #tpu.memory_space<vmem>>, vector<1x17x32xbf16>,
    %cst_32 = arith.constant 0.000000e+00 : bf16
    %98 = vector.broadcast %cst_32 : bf16 to vector<17x32xbf16>
    %c0_33 = arith.constant 0 : index
    %c143 = arith.constant 143 : index
    %c0_34 = arith.constant 0 : index
    %99 = vector.load %arg7[%c0_33, %c143, %c0_34] : memref<1x160x32xbf16, #tpu.memory_space<vmem>>, vector<1x17x32xbf16>
    %100 = vector.shape_cast %99 : vector<1x17x32xbf16> to vector<17x32xbf16>
    %101 = vector.shape_cast %98 : vector<17x32xbf16> to vector<1x17x32xbf16>
    tpu.vector_store %arg7[%c0_33, %c143, %c0_34], %101 {strides = array<i32>} : memref<1x160x32xbf16, #tpu.memory_space<vmem>>, vector<1x17x32xbf16>,
    %102 = arith.truncf %93 : vector<126x32xf32> to vector<126x32xbf16>
    %c0_35 = arith.constant 0 : index
    %c17_36 = arith.constant 17 : index
    %c0_37 = arith.constant 0 : index
    %103 = vector.load %arg7[%c0_35, %c17_36, %c0_37] : memref<1x160x32xbf16, #tpu.memory_space<vmem>>, vector<1x126x32xbf16>
    %104 = vector.shape_cast %103 : vector<1x126x32xbf16> to vector<126x32xbf16>
    %105 = vector.shape_cast %102 : vector<126x32xbf16> to vector<1x126x32xbf16>
    tpu.vector_store %arg7[%c0_35, %c17_36, %c0_37], %105 {strides = array<i32>} : memref<1x160x32xbf16, #tpu.memory_space<vmem>>, vector<1x126x32xbf16>,
    return
  }
  func.func @transform_0(%arg0: i32) -> (i32, i32, i32) {
    %c0_i32 = arith.constant 0 : i32
    %c0_i32_0 = arith.constant 0 : i32
    %c0_i32_1 = arith.constant 0 : i32
    return %arg0, %c0_i32, %c0_i32_0 : i32, i32, i32
  }
  func.func @transform_1(%arg0: i32) -> (i32, i32) {
    %c0_i32 = arith.constant 0 : i32
    %c0_i32_0 = arith.constant 0 : i32
    %c0_i32_1 = arith.constant 0 : i32
    return %c0_i32, %c0_i32_0 : i32, i32
  }
  func.func @transform_2(%arg0: i32) -> (i32, i32) {
    %c0_i32 = arith.constant 0 : i32
    %c0_i32_0 = arith.constant 0 : i32
    %c0_i32_1 = arith.constant 0 : i32
    return %c0_i32, %c0_i32_0 : i32, i32
  }
  func.func @transform_3(%arg0: i32) -> (i32, i32) {
    %c0_i32 = arith.constant 0 : i32
    %c0_i32_0 = arith.constant 0 : i32
    %c0_i32_1 = arith.constant 0 : i32
    return %c0_i32, %c0_i32_0 : i32, i32
  }
  func.func @transform_4(%arg0: i32) -> (i32, i32) {
    %c0_i32 = arith.constant 0 : i32
    %c0_i32_0 = arith.constant 0 : i32
    %c0_i32_1 = arith.constant 0 : i32
    return %c0_i32, %c0_i32_0 : i32, i32
  }
  func.func @transform_5(%arg0: i32) -> (i32, i32, i32) {
    %c0_i32 = arith.constant 0 : i32
    %c0_i32_0 = arith.constant 0 : i32
    %c0_i32_1 = arith.constant 0 : i32
    return %arg0, %c0_i32, %c0_i32_0 : i32, i32, i32
  }
  func.func @transform_6(%arg0: i32) -> (i32, i32, i32) {
    %c0_i32 = arith.constant 0 : i32
    %c0_i32_0 = arith.constant 0 : i32
    %c0_i32_1 = arith.constant 0 : i32
    return %arg0, %c0_i32, %c0_i32_0 : i32, i32, i32
  }
}

module attributes {stable_mosaic.version = 11 : i64} {
  func.func @_gn_silu_conv3x3_kernel(%arg0: i32, %arg1: memref<1x48x64xbf16, #tpu.memory_space<vmem>>, %arg2: memref<1x64xf32, #tpu.memory_space<vmem>>, %arg3: memref<1x64xf32, #tpu.memory_space<vmem>>, %arg4: memref<576x64xbf16, #tpu.memory_space<vmem>>, %arg5: memref<1x64xf32, #tpu.memory_space<vmem>>, %arg6: memref<1x48x32xbf16, #tpu.memory_space<vmem>>, %arg7: memref<32x64xbf16, #tpu.memory_space<vmem>>, %arg8: memref<1x64xf32, #tpu.memory_space<vmem>>, %arg9: memref<1x48x64xbf16, #tpu.memory_space<vmem>>) attributes {dimension_semantics = [#tpu.dimension_semantics<parallel>], iteration_bounds = array<i64: 2>, scalar_prefetch = 0 : i64, scratch_operands = 0 : i64, tpu.core_type = #tpu.core_type<tc>, window_params = [{transform_indices = @transform_0, window_bounds = array<i64: 1, 48, 64>}, {pipeline_mode = #tpu.pipeline_mode<synchronous>, transform_indices = @transform_1, window_bounds = array<i64: 1, 64>}, {pipeline_mode = #tpu.pipeline_mode<synchronous>, transform_indices = @transform_2, window_bounds = array<i64: 1, 64>}, {pipeline_mode = #tpu.pipeline_mode<synchronous>, transform_indices = @transform_3, window_bounds = array<i64: 576, 64>}, {pipeline_mode = #tpu.pipeline_mode<synchronous>, transform_indices = @transform_4, window_bounds = array<i64: 1, 64>}, {transform_indices = @transform_5, window_bounds = array<i64: 1, 48, 32>}, {pipeline_mode = #tpu.pipeline_mode<synchronous>, transform_indices = @transform_6, window_bounds = array<i64: 32, 64>}, {pipeline_mode = #tpu.pipeline_mode<synchronous>, transform_indices = @transform_7, window_bounds = array<i64: 1, 64>}, {transform_indices = @transform_8, window_bounds = array<i64: 1, 48, 64>}]} {
    %c0 = arith.constant 0 : index
    %c0_0 = arith.constant 0 : index
    %c0_1 = arith.constant 0 : index
    %0 = vector.load %arg1[%c0, %c0_0, %c0_1] : memref<1x48x64xbf16, #tpu.memory_space<vmem>>, vector<1x48x64xbf16>
    %1 = vector.shape_cast %0 : vector<1x48x64xbf16> to vector<48x64xbf16>
    %2 = arith.extf %1 : vector<48x64xbf16> to vector<48x64xf32>
    %3 = tpu.iota {dimensions = array<i32: 0>} : vector<48x1xi32>
    %4 = arith.sitofp %3 : vector<48x1xi32> to vector<48x1xf32>
    %cst = arith.constant 8.000000e+00 : f32
    %5 = vector.broadcast %cst : f32 to vector<48x1xf32>
    %6 = arith.divf %4, %5 : vector<48x1xf32>
    %7 = math.floor %6 : vector<48x1xf32>
    %cst_2 = arith.constant 8.000000e+00 : f32
    %8 = vector.broadcast %cst_2 : f32 to vector<48x1xf32>
    %9 = arith.mulf %7, %8 : vector<48x1xf32>
    %10 = arith.subf %4, %9 : vector<48x1xf32>
    %cst_3 = arith.constant 1.000000e+00 : f32
    %11 = vector.broadcast %cst_3 : f32 to vector<48x1xf32>
    %12 = arith.cmpf oge, %7, %11 : vector<48x1xf32>
    %cst_4 = arith.constant 4.000000e+00 : f32
    %13 = vector.broadcast %cst_4 : f32 to vector<48x1xf32>
    %14 = arith.cmpf ole, %7, %13 : vector<48x1xf32>
    %15 = arith.andi %12, %14 : vector<48x1xi1>
    %cst_5 = arith.constant 1.000000e+00 : f32
    %16 = vector.broadcast %cst_5 : f32 to vector<48x1xf32>
    %17 = arith.cmpf oge, %10, %16 : vector<48x1xf32>
    %18 = arith.andi %15, %17 : vector<48x1xi1>
    %cst_6 = arith.constant 4.000000e+00 : f32
    %19 = vector.broadcast %cst_6 : f32 to vector<48x1xf32>
    %20 = arith.cmpf ole, %10, %19 : vector<48x1xf32>
    %21 = arith.andi %18, %20 : vector<48x1xi1>
    %22 = arith.extui %21 : vector<48x1xi1> to vector<48x1xi32>
    %23 = arith.sitofp %22 : vector<48x1xi32> to vector<48x1xf32>
    %24 = tpu.iota {dimensions = array<i32: 0>} : vector<64x64xi32>
    %25 = arith.sitofp %24 : vector<64x64xi32> to vector<64x64xf32>
    %26 = tpu.iota {dimensions = array<i32: 1>} : vector<64x64xi32>
    %27 = arith.sitofp %26 : vector<64x64xi32> to vector<64x64xf32>
    %cst_7 = arith.constant 2.000000e+00 : f32
    %28 = vector.broadcast %cst_7 : f32 to vector<64x64xf32>
    %29 = arith.divf %25, %28 : vector<64x64xf32>
    %30 = math.floor %29 : vector<64x64xf32>
    %cst_8 = arith.constant 2.000000e+00 : f32
    %31 = vector.broadcast %cst_8 : f32 to vector<64x64xf32>
    %32 = arith.divf %27, %31 : vector<64x64xf32>
    %33 = math.floor %32 : vector<64x64xf32>
    %34 = arith.cmpf oeq, %30, %33 : vector<64x64xf32>
    %35 = arith.extui %34 : vector<64x64xi1> to vector<64x64xi32>
    %36 = arith.sitofp %35 : vector<64x64xi32> to vector<64x64xf32>
    %cst_9 = arith.constant dense<0.000000e+00> : vector<64xf32>
    %37 = vector.multi_reduction <add>, %2, %cst_9 [0] : vector<48x64xf32> to vector<64xf32>
    %38 = vector.shape_cast %37 : vector<64xf32> to vector<1x64xf32>
    %cst_10 = arith.constant dense<0.000000e+00> : vector<1x64xf32>
    %39 = tpu.matmul %38, %36, %cst_10 {dimension_numbers = #tpu.dot_dimension_numbers<[1], [0], [0], [1], [0, 0, 1, 1], [], []>} : vector<1x64xf32>, vector<64x64xf32>, vector<1x64xf32> -> vector<1x64xf32>
    %cst_11 = arith.constant 3.125000e-02 : f32
    %40 = vector.broadcast %cst_11 : f32 to vector<1x64xf32>
    %41 = arith.mulf %39, %40 : vector<1x64xf32>
    %42 = vector.broadcast %41 : vector<1x64xf32> to vector<48x64xf32>
    %43 = arith.subf %2, %42 : vector<48x64xf32>
    %44 = vector.broadcast %23 : vector<48x1xf32> to vector<48x64xf32>
    %45 = arith.mulf %44, %43 : vector<48x64xf32>
    %46 = arith.mulf %45, %43 : vector<48x64xf32>
    %cst_12 = arith.constant dense<0.000000e+00> : vector<64xf32>
    %47 = vector.multi_reduction <add>, %46, %cst_12 [0] : vector<48x64xf32> to vector<64xf32>
    %48 = vector.shape_cast %47 : vector<64xf32> to vector<1x64xf32>
    %cst_13 = arith.constant dense<0.000000e+00> : vector<1x64xf32>
    %49 = tpu.matmul %48, %36, %cst_13 {dimension_numbers = #tpu.dot_dimension_numbers<[1], [0], [0], [1], [0, 0, 1, 1], [], []>} : vector<1x64xf32>, vector<64x64xf32>, vector<1x64xf32> -> vector<1x64xf32>
    %cst_14 = arith.constant 3.125000e-02 : f32
    %50 = vector.broadcast %cst_14 : f32 to vector<1x64xf32>
    %51 = arith.mulf %49, %50 : vector<1x64xf32>
    %cst_15 = arith.constant 9.99999997E-7 : f32
    %52 = vector.broadcast %cst_15 : f32 to vector<1x64xf32>
    %53 = arith.addf %51, %52 : vector<1x64xf32>
    %54 = math.rsqrt %53 : vector<1x64xf32>
    %55 = vector.broadcast %54 : vector<1x64xf32> to vector<48x64xf32>
    %56 = arith.mulf %43, %55 : vector<48x64xf32>
    %c0_16 = arith.constant 0 : index
    %c0_17 = arith.constant 0 : index
    %57 = vector.load %arg2[%c0_16, %c0_17] : memref<1x64xf32, #tpu.memory_space<vmem>>, vector<1x64xf32>
    %58 = vector.broadcast %57 : vector<1x64xf32> to vector<48x64xf32>
    %59 = arith.mulf %56, %58 : vector<48x64xf32>
    %c0_18 = arith.constant 0 : index
    %c0_19 = arith.constant 0 : index
    %60 = vector.load %arg3[%c0_18, %c0_19] : memref<1x64xf32, #tpu.memory_space<vmem>>, vector<1x64xf32>
    %61 = vector.broadcast %60 : vector<1x64xf32> to vector<48x64xf32>
    %62 = arith.addf %59, %61 : vector<48x64xf32>
    %63 = arith.negf %62 : vector<48x64xf32>
    %64 = math.exp %63 : vector<48x64xf32>
    %cst_20 = arith.constant 1.000000e+00 : f32
    %65 = vector.broadcast %cst_20 : f32 to vector<48x64xf32>
    %66 = arith.addf %65, %64 : vector<48x64xf32>
    %67 = arith.divf %65, %66 : vector<48x64xf32>
    %68 = arith.mulf %62, %67 : vector<48x64xf32>
    %69 = vector.broadcast %23 : vector<48x1xf32> to vector<48x64xf32>
    %70 = arith.mulf %68, %69 : vector<48x64xf32>
    %71 = vector.extract_strided_slice %70 {offsets = [0, 0], sizes = [30, 64], strides = [1, 1]} : vector<48x64xf32> to vector<30x64xf32>
    %72 = vector.extract_strided_slice %70 {offsets = [1, 0], sizes = [30, 64], strides = [1, 1]} : vector<48x64xf32> to vector<30x64xf32>
    %73 = vector.extract_strided_slice %70 {offsets = [2, 0], sizes = [30, 64], strides = [1, 1]} : vector<48x64xf32> to vector<30x64xf32>
    %74 = vector.extract_strided_slice %70 {offsets = [8, 0], sizes = [30, 64], strides = [1, 1]} : vector<48x64xf32> to vector<30x64xf32>
    %75 = vector.extract_strided_slice %70 {offsets = [9, 0], sizes = [30, 64], strides = [1, 1]} : vector<48x64xf32> to vector<30x64xf32>
    %76 = vector.extract_strided_slice %70 {offsets = [10, 0], sizes = [30, 64], strides = [1, 1]} : vector<48x64xf32> to vector<30x64xf32>
    %77 = vector.extract_strided_slice %70 {offsets = [16, 0], sizes = [30, 64], strides = [1, 1]} : vector<48x64xf32> to vector<30x64xf32>
    %78 = vector.extract_strided_slice %70 {offsets = [17, 0], sizes = [30, 64], strides = [1, 1]} : vector<48x64xf32> to vector<30x64xf32>
    %79 = vector.extract_strided_slice %70 {offsets = [18, 0], sizes = [30, 64], strides = [1, 1]} : vector<48x64xf32> to vector<30x64xf32>
    %80 = tpu.concatenate %71, %72, %73, %74, %75, %76, %77, %78, %79 in 1 : vector<30x64xf32>, vector<30x64xf32>, vector<30x64xf32>, vector<30x64xf32>, vector<30x64xf32>, vector<30x64xf32>, vector<30x64xf32>, vector<30x64xf32>, vector<30x64xf32> -> vector<30x576xf32>
    %81 = arith.truncf %80 : vector<30x576xf32> to vector<30x576xbf16>
    %c0_21 = arith.constant 0 : index
    %c0_22 = arith.constant 0 : index
    %82 = vector.load %arg4[%c0_21, %c0_22] : memref<576x64xbf16, #tpu.memory_space<vmem>>, vector<576x64xbf16>
    %cst_23 = arith.constant dense<0.000000e+00> : vector<30x64xf32>
    %83 = tpu.matmul %81, %82, %cst_23 {dimension_numbers = #tpu.dot_dimension_numbers<[1], [0], [0], [1], [0, 0, 1, 1], [], []>} : vector<30x576xbf16>, vector<576x64xbf16>, vector<30x64xf32> -> vector<30x64xf32>
    %c0_24 = arith.constant 0 : index
    %c0_25 = arith.constant 0 : index
    %84 = vector.load %arg5[%c0_24, %c0_25] : memref<1x64xf32, #tpu.memory_space<vmem>>, vector<1x64xf32>
    %85 = vector.broadcast %84 : vector<1x64xf32> to vector<30x64xf32>
    %86 = arith.addf %83, %85 : vector<30x64xf32>
    %c0_26 = arith.constant 0 : index
    %c9 = arith.constant 9 : index
    %c0_27 = arith.constant 0 : index
    %87 = vector.load %arg6[%c0_26, %c9, %c0_27] : memref<1x48x32xbf16, #tpu.memory_space<vmem>>, vector<1x30x32xbf16>
    %88 = vector.shape_cast %87 : vector<1x30x32xbf16> to vector<30x32xbf16>
    %c0_28 = arith.constant 0 : index
    %c0_29 = arith.constant 0 : index
    %89 = vector.load %arg7[%c0_28, %c0_29] : memref<32x64xbf16, #tpu.memory_space<vmem>>, vector<32x64xbf16>
    %cst_30 = arith.constant dense<0.000000e+00> : vector<30x64xf32>
    %90 = tpu.matmul %88, %89, %cst_30 {dimension_numbers = #tpu.dot_dimension_numbers<[1], [0], [0], [1], [0, 0, 1, 1], [], []>} : vector<30x32xbf16>, vector<32x64xbf16>, vector<30x64xf32> -> vector<30x64xf32>
    %c0_31 = arith.constant 0 : index
    %c0_32 = arith.constant 0 : index
    %91 = vector.load %arg8[%c0_31, %c0_32] : memref<1x64xf32, #tpu.memory_space<vmem>>, vector<1x64xf32>
    %92 = vector.broadcast %91 : vector<1x64xf32> to vector<30x64xf32>
    %93 = arith.addf %90, %92 : vector<30x64xf32>
    %94 = arith.addf %86, %93 : vector<30x64xf32>
    %95 = vector.extract_strided_slice %23 {offsets = [9, 0], sizes = [30, 1], strides = [1, 1]} : vector<48x1xf32> to vector<30x1xf32>
    %96 = vector.broadcast %95 : vector<30x1xf32> to vector<30x64xf32>
    %97 = arith.mulf %94, %96 : vector<30x64xf32>
    %cst_33 = arith.constant 0.000000e+00 : bf16
    %98 = vector.broadcast %cst_33 : bf16 to vector<9x64xbf16>
    %c0_34 = arith.constant 0 : index
    %c0_35 = arith.constant 0 : index
    %c0_36 = arith.constant 0 : index
    %99 = vector.load %arg9[%c0_34, %c0_35, %c0_36] : memref<1x48x64xbf16, #tpu.memory_space<vmem>>, vector<1x9x64xbf16>
    %100 = vector.shape_cast %99 : vector<1x9x64xbf16> to vector<9x64xbf16>
    %101 = vector.shape_cast %98 : vector<9x64xbf16> to vector<1x9x64xbf16>
    tpu.vector_store %arg9[%c0_34, %c0_35, %c0_36], %101 {strides = array<i32>} : memref<1x48x64xbf16, #tpu.memory_space<vmem>>, vector<1x9x64xbf16>,
    %cst_37 = arith.constant 0.000000e+00 : bf16
    %102 = vector.broadcast %cst_37 : bf16 to vector<9x64xbf16>
    %c0_38 = arith.constant 0 : index
    %c39 = arith.constant 39 : index
    %c0_39 = arith.constant 0 : index
    %103 = vector.load %arg9[%c0_38, %c39, %c0_39] : memref<1x48x64xbf16, #tpu.memory_space<vmem>>, vector<1x9x64xbf16>
    %104 = vector.shape_cast %103 : vector<1x9x64xbf16> to vector<9x64xbf16>
    %105 = vector.shape_cast %102 : vector<9x64xbf16> to vector<1x9x64xbf16>
    tpu.vector_store %arg9[%c0_38, %c39, %c0_39], %105 {strides = array<i32>} : memref<1x48x64xbf16, #tpu.memory_space<vmem>>, vector<1x9x64xbf16>,
    %106 = arith.truncf %97 : vector<30x64xf32> to vector<30x64xbf16>
    %c0_40 = arith.constant 0 : index
    %c9_41 = arith.constant 9 : index
    %c0_42 = arith.constant 0 : index
    %107 = vector.load %arg9[%c0_40, %c9_41, %c0_42] : memref<1x48x64xbf16, #tpu.memory_space<vmem>>, vector<1x30x64xbf16>
    %108 = vector.shape_cast %107 : vector<1x30x64xbf16> to vector<30x64xbf16>
    %109 = vector.shape_cast %106 : vector<30x64xbf16> to vector<1x30x64xbf16>
    tpu.vector_store %arg9[%c0_40, %c9_41, %c0_42], %109 {strides = array<i32>} : memref<1x48x64xbf16, #tpu.memory_space<vmem>>, vector<1x30x64xbf16>,
    return
  }
  func.func @transform_0(%arg0: i32) -> (i32, i32, i32) {
    %c0_i32 = arith.constant 0 : i32
    %c0_i32_0 = arith.constant 0 : i32
    %c0_i32_1 = arith.constant 0 : i32
    return %arg0, %c0_i32, %c0_i32_0 : i32, i32, i32
  }
  func.func @transform_1(%arg0: i32) -> (i32, i32) {
    %c0_i32 = arith.constant 0 : i32
    %c0_i32_0 = arith.constant 0 : i32
    %c0_i32_1 = arith.constant 0 : i32
    return %c0_i32, %c0_i32_0 : i32, i32
  }
  func.func @transform_2(%arg0: i32) -> (i32, i32) {
    %c0_i32 = arith.constant 0 : i32
    %c0_i32_0 = arith.constant 0 : i32
    %c0_i32_1 = arith.constant 0 : i32
    return %c0_i32, %c0_i32_0 : i32, i32
  }
  func.func @transform_3(%arg0: i32) -> (i32, i32) {
    %c0_i32 = arith.constant 0 : i32
    %c0_i32_0 = arith.constant 0 : i32
    %c0_i32_1 = arith.constant 0 : i32
    return %c0_i32, %c0_i32_0 : i32, i32
  }
  func.func @transform_4(%arg0: i32) -> (i32, i32) {
    %c0_i32 = arith.constant 0 : i32
    %c0_i32_0 = arith.constant 0 : i32
    %c0_i32_1 = arith.constant 0 : i32
    return %c0_i32, %c0_i32_0 : i32, i32
  }
  func.func @transform_5(%arg0: i32) -> (i32, i32, i32) {
    %c0_i32 = arith.constant 0 : i32
    %c0_i32_0 = arith.constant 0 : i32
    %c0_i32_1 = arith.constant 0 : i32
    return %arg0, %c0_i32, %c0_i32_0 : i32, i32, i32
  }
  func.func @transform_6(%arg0: i32) -> (i32, i32) {
    %c0_i32 = arith.constant 0 : i32
    %c0_i32_0 = arith.constant 0 : i32
    %c0_i32_1 = arith.constant 0 : i32
    return %c0_i32, %c0_i32_0 : i32, i32
  }
  func.func @transform_7(%arg0: i32) -> (i32, i32) {
    %c0_i32 = arith.constant 0 : i32
    %c0_i32_0 = arith.constant 0 : i32
    %c0_i32_1 = arith.constant 0 : i32
    return %c0_i32, %c0_i32_0 : i32, i32
  }
  func.func @transform_8(%arg0: i32) -> (i32, i32, i32) {
    %c0_i32 = arith.constant 0 : i32
    %c0_i32_0 = arith.constant 0 : i32
    %c0_i32_1 = arith.constant 0 : i32
    return %arg0, %c0_i32, %c0_i32_0 : i32, i32, i32
  }
}

module attributes {stable_mosaic.version = 11 : i64} {
  func.func @_gn_silu_conv3x3_kernel(%arg0: i32, %arg1: memref<1x48x32xbf16, #tpu.memory_space<vmem>>, %arg2: memref<1x32xf32, #tpu.memory_space<vmem>>, %arg3: memref<1x32xf32, #tpu.memory_space<vmem>>, %arg4: memref<288x64xbf16, #tpu.memory_space<vmem>>, %arg5: memref<1x64xf32, #tpu.memory_space<vmem>>, %arg6: memref<1x48x64xbf16, #tpu.memory_space<vmem>>) attributes {dimension_semantics = [#tpu.dimension_semantics<parallel>], iteration_bounds = array<i64: 2>, scalar_prefetch = 0 : i64, scratch_operands = 0 : i64, tpu.core_type = #tpu.core_type<tc>, window_params = [{transform_indices = @transform_0, window_bounds = array<i64: 1, 48, 32>}, {pipeline_mode = #tpu.pipeline_mode<synchronous>, transform_indices = @transform_1, window_bounds = array<i64: 1, 32>}, {pipeline_mode = #tpu.pipeline_mode<synchronous>, transform_indices = @transform_2, window_bounds = array<i64: 1, 32>}, {pipeline_mode = #tpu.pipeline_mode<synchronous>, transform_indices = @transform_3, window_bounds = array<i64: 288, 64>}, {pipeline_mode = #tpu.pipeline_mode<synchronous>, transform_indices = @transform_4, window_bounds = array<i64: 1, 64>}, {transform_indices = @transform_5, window_bounds = array<i64: 1, 48, 64>}]} {
    %c0 = arith.constant 0 : index
    %c0_0 = arith.constant 0 : index
    %c0_1 = arith.constant 0 : index
    %0 = vector.load %arg1[%c0, %c0_0, %c0_1] : memref<1x48x32xbf16, #tpu.memory_space<vmem>>, vector<1x48x32xbf16>
    %1 = vector.shape_cast %0 : vector<1x48x32xbf16> to vector<48x32xbf16>
    %2 = arith.extf %1 : vector<48x32xbf16> to vector<48x32xf32>
    %3 = tpu.iota {dimensions = array<i32: 0>} : vector<48x1xi32>
    %4 = arith.sitofp %3 : vector<48x1xi32> to vector<48x1xf32>
    %cst = arith.constant 8.000000e+00 : f32
    %5 = vector.broadcast %cst : f32 to vector<48x1xf32>
    %6 = arith.divf %4, %5 : vector<48x1xf32>
    %7 = math.floor %6 : vector<48x1xf32>
    %cst_2 = arith.constant 8.000000e+00 : f32
    %8 = vector.broadcast %cst_2 : f32 to vector<48x1xf32>
    %9 = arith.mulf %7, %8 : vector<48x1xf32>
    %10 = arith.subf %4, %9 : vector<48x1xf32>
    %cst_3 = arith.constant 1.000000e+00 : f32
    %11 = vector.broadcast %cst_3 : f32 to vector<48x1xf32>
    %12 = arith.cmpf oge, %7, %11 : vector<48x1xf32>
    %cst_4 = arith.constant 4.000000e+00 : f32
    %13 = vector.broadcast %cst_4 : f32 to vector<48x1xf32>
    %14 = arith.cmpf ole, %7, %13 : vector<48x1xf32>
    %15 = arith.andi %12, %14 : vector<48x1xi1>
    %cst_5 = arith.constant 1.000000e+00 : f32
    %16 = vector.broadcast %cst_5 : f32 to vector<48x1xf32>
    %17 = arith.cmpf oge, %10, %16 : vector<48x1xf32>
    %18 = arith.andi %15, %17 : vector<48x1xi1>
    %cst_6 = arith.constant 4.000000e+00 : f32
    %19 = vector.broadcast %cst_6 : f32 to vector<48x1xf32>
    %20 = arith.cmpf ole, %10, %19 : vector<48x1xf32>
    %21 = arith.andi %18, %20 : vector<48x1xi1>
    %22 = arith.extui %21 : vector<48x1xi1> to vector<48x1xi32>
    %23 = arith.sitofp %22 : vector<48x1xi32> to vector<48x1xf32>
    %24 = tpu.iota {dimensions = array<i32: 0>} : vector<32x32xi32>
    %25 = arith.sitofp %24 : vector<32x32xi32> to vector<32x32xf32>
    %26 = tpu.iota {dimensions = array<i32: 1>} : vector<32x32xi32>
    %27 = arith.sitofp %26 : vector<32x32xi32> to vector<32x32xf32>
    %cst_7 = arith.constant 1.000000e+00 : f32
    %28 = vector.broadcast %cst_7 : f32 to vector<32x32xf32>
    %29 = arith.divf %25, %28 : vector<32x32xf32>
    %30 = math.floor %29 : vector<32x32xf32>
    %cst_8 = arith.constant 1.000000e+00 : f32
    %31 = vector.broadcast %cst_8 : f32 to vector<32x32xf32>
    %32 = arith.divf %27, %31 : vector<32x32xf32>
    %33 = math.floor %32 : vector<32x32xf32>
    %34 = arith.cmpf oeq, %30, %33 : vector<32x32xf32>
    %35 = arith.extui %34 : vector<32x32xi1> to vector<32x32xi32>
    %36 = arith.sitofp %35 : vector<32x32xi32> to vector<32x32xf32>
    %cst_9 = arith.constant dense<0.000000e+00> : vector<32xf32>
    %37 = vector.multi_reduction <add>, %2, %cst_9 [0] : vector<48x32xf32> to vector<32xf32>
    %38 = vector.shape_cast %37 : vector<32xf32> to vector<1x32xf32>
    %cst_10 = arith.constant dense<0.000000e+00> : vector<1x32xf32>
    %39 = tpu.matmul %38, %36, %cst_10 {dimension_numbers = #tpu.dot_dimension_numbers<[1], [0], [0], [1], [0, 0, 1, 1], [], []>} : vector<1x32xf32>, vector<32x32xf32>, vector<1x32xf32> -> vector<1x32xf32>
    %cst_11 = arith.constant 6.250000e-02 : f32
    %40 = vector.broadcast %cst_11 : f32 to vector<1x32xf32>
    %41 = arith.mulf %39, %40 : vector<1x32xf32>
    %42 = vector.broadcast %41 : vector<1x32xf32> to vector<48x32xf32>
    %43 = arith.subf %2, %42 : vector<48x32xf32>
    %44 = vector.broadcast %23 : vector<48x1xf32> to vector<48x32xf32>
    %45 = arith.mulf %44, %43 : vector<48x32xf32>
    %46 = arith.mulf %45, %43 : vector<48x32xf32>
    %cst_12 = arith.constant dense<0.000000e+00> : vector<32xf32>
    %47 = vector.multi_reduction <add>, %46, %cst_12 [0] : vector<48x32xf32> to vector<32xf32>
    %48 = vector.shape_cast %47 : vector<32xf32> to vector<1x32xf32>
    %cst_13 = arith.constant dense<0.000000e+00> : vector<1x32xf32>
    %49 = tpu.matmul %48, %36, %cst_13 {dimension_numbers = #tpu.dot_dimension_numbers<[1], [0], [0], [1], [0, 0, 1, 1], [], []>} : vector<1x32xf32>, vector<32x32xf32>, vector<1x32xf32> -> vector<1x32xf32>
    %cst_14 = arith.constant 6.250000e-02 : f32
    %50 = vector.broadcast %cst_14 : f32 to vector<1x32xf32>
    %51 = arith.mulf %49, %50 : vector<1x32xf32>
    %cst_15 = arith.constant 9.99999997E-7 : f32
    %52 = vector.broadcast %cst_15 : f32 to vector<1x32xf32>
    %53 = arith.addf %51, %52 : vector<1x32xf32>
    %54 = math.rsqrt %53 : vector<1x32xf32>
    %55 = vector.broadcast %54 : vector<1x32xf32> to vector<48x32xf32>
    %56 = arith.mulf %43, %55 : vector<48x32xf32>
    %c0_16 = arith.constant 0 : index
    %c0_17 = arith.constant 0 : index
    %57 = vector.load %arg2[%c0_16, %c0_17] : memref<1x32xf32, #tpu.memory_space<vmem>>, vector<1x32xf32>
    %58 = vector.broadcast %57 : vector<1x32xf32> to vector<48x32xf32>
    %59 = arith.mulf %56, %58 : vector<48x32xf32>
    %c0_18 = arith.constant 0 : index
    %c0_19 = arith.constant 0 : index
    %60 = vector.load %arg3[%c0_18, %c0_19] : memref<1x32xf32, #tpu.memory_space<vmem>>, vector<1x32xf32>
    %61 = vector.broadcast %60 : vector<1x32xf32> to vector<48x32xf32>
    %62 = arith.addf %59, %61 : vector<48x32xf32>
    %63 = arith.negf %62 : vector<48x32xf32>
    %64 = math.exp %63 : vector<48x32xf32>
    %cst_20 = arith.constant 1.000000e+00 : f32
    %65 = vector.broadcast %cst_20 : f32 to vector<48x32xf32>
    %66 = arith.addf %65, %64 : vector<48x32xf32>
    %67 = arith.divf %65, %66 : vector<48x32xf32>
    %68 = arith.mulf %62, %67 : vector<48x32xf32>
    %69 = vector.broadcast %23 : vector<48x1xf32> to vector<48x32xf32>
    %70 = arith.mulf %68, %69 : vector<48x32xf32>
    %71 = vector.extract_strided_slice %70 {offsets = [0, 0], sizes = [30, 32], strides = [1, 1]} : vector<48x32xf32> to vector<30x32xf32>
    %72 = vector.extract_strided_slice %70 {offsets = [1, 0], sizes = [30, 32], strides = [1, 1]} : vector<48x32xf32> to vector<30x32xf32>
    %73 = vector.extract_strided_slice %70 {offsets = [2, 0], sizes = [30, 32], strides = [1, 1]} : vector<48x32xf32> to vector<30x32xf32>
    %74 = vector.extract_strided_slice %70 {offsets = [8, 0], sizes = [30, 32], strides = [1, 1]} : vector<48x32xf32> to vector<30x32xf32>
    %75 = vector.extract_strided_slice %70 {offsets = [9, 0], sizes = [30, 32], strides = [1, 1]} : vector<48x32xf32> to vector<30x32xf32>
    %76 = vector.extract_strided_slice %70 {offsets = [10, 0], sizes = [30, 32], strides = [1, 1]} : vector<48x32xf32> to vector<30x32xf32>
    %77 = vector.extract_strided_slice %70 {offsets = [16, 0], sizes = [30, 32], strides = [1, 1]} : vector<48x32xf32> to vector<30x32xf32>
    %78 = vector.extract_strided_slice %70 {offsets = [17, 0], sizes = [30, 32], strides = [1, 1]} : vector<48x32xf32> to vector<30x32xf32>
    %79 = vector.extract_strided_slice %70 {offsets = [18, 0], sizes = [30, 32], strides = [1, 1]} : vector<48x32xf32> to vector<30x32xf32>
    %80 = tpu.concatenate %71, %72, %73, %74, %75, %76, %77, %78, %79 in 1 : vector<30x32xf32>, vector<30x32xf32>, vector<30x32xf32>, vector<30x32xf32>, vector<30x32xf32>, vector<30x32xf32>, vector<30x32xf32>, vector<30x32xf32>, vector<30x32xf32> -> vector<30x288xf32>
    %81 = arith.truncf %80 : vector<30x288xf32> to vector<30x288xbf16>
    %c0_21 = arith.constant 0 : index
    %c0_22 = arith.constant 0 : index
    %82 = vector.load %arg4[%c0_21, %c0_22] : memref<288x64xbf16, #tpu.memory_space<vmem>>, vector<288x64xbf16>
    %cst_23 = arith.constant dense<0.000000e+00> : vector<30x64xf32>
    %83 = tpu.matmul %81, %82, %cst_23 {dimension_numbers = #tpu.dot_dimension_numbers<[1], [0], [0], [1], [0, 0, 1, 1], [], []>} : vector<30x288xbf16>, vector<288x64xbf16>, vector<30x64xf32> -> vector<30x64xf32>
    %c0_24 = arith.constant 0 : index
    %c0_25 = arith.constant 0 : index
    %84 = vector.load %arg5[%c0_24, %c0_25] : memref<1x64xf32, #tpu.memory_space<vmem>>, vector<1x64xf32>
    %85 = vector.broadcast %84 : vector<1x64xf32> to vector<30x64xf32>
    %86 = arith.addf %83, %85 : vector<30x64xf32>
    %87 = vector.extract_strided_slice %23 {offsets = [9, 0], sizes = [30, 1], strides = [1, 1]} : vector<48x1xf32> to vector<30x1xf32>
    %88 = vector.broadcast %87 : vector<30x1xf32> to vector<30x64xf32>
    %89 = arith.mulf %86, %88 : vector<30x64xf32>
    %cst_26 = arith.constant 0.000000e+00 : bf16
    %90 = vector.broadcast %cst_26 : bf16 to vector<9x64xbf16>
    %c0_27 = arith.constant 0 : index
    %c0_28 = arith.constant 0 : index
    %c0_29 = arith.constant 0 : index
    %91 = vector.load %arg6[%c0_27, %c0_28, %c0_29] : memref<1x48x64xbf16, #tpu.memory_space<vmem>>, vector<1x9x64xbf16>
    %92 = vector.shape_cast %91 : vector<1x9x64xbf16> to vector<9x64xbf16>
    %93 = vector.shape_cast %90 : vector<9x64xbf16> to vector<1x9x64xbf16>
    tpu.vector_store %arg6[%c0_27, %c0_28, %c0_29], %93 {strides = array<i32>} : memref<1x48x64xbf16, #tpu.memory_space<vmem>>, vector<1x9x64xbf16>,
    %cst_30 = arith.constant 0.000000e+00 : bf16
    %94 = vector.broadcast %cst_30 : bf16 to vector<9x64xbf16>
    %c0_31 = arith.constant 0 : index
    %c39 = arith.constant 39 : index
    %c0_32 = arith.constant 0 : index
    %95 = vector.load %arg6[%c0_31, %c39, %c0_32] : memref<1x48x64xbf16, #tpu.memory_space<vmem>>, vector<1x9x64xbf16>
    %96 = vector.shape_cast %95 : vector<1x9x64xbf16> to vector<9x64xbf16>
    %97 = vector.shape_cast %94 : vector<9x64xbf16> to vector<1x9x64xbf16>
    tpu.vector_store %arg6[%c0_31, %c39, %c0_32], %97 {strides = array<i32>} : memref<1x48x64xbf16, #tpu.memory_space<vmem>>, vector<1x9x64xbf16>,
    %98 = arith.truncf %89 : vector<30x64xf32> to vector<30x64xbf16>
    %c0_33 = arith.constant 0 : index
    %c9 = arith.constant 9 : index
    %c0_34 = arith.constant 0 : index
    %99 = vector.load %arg6[%c0_33, %c9, %c0_34] : memref<1x48x64xbf16, #tpu.memory_space<vmem>>, vector<1x30x64xbf16>
    %100 = vector.shape_cast %99 : vector<1x30x64xbf16> to vector<30x64xbf16>
    %101 = vector.shape_cast %98 : vector<30x64xbf16> to vector<1x30x64xbf16>
    tpu.vector_store %arg6[%c0_33, %c9, %c0_34], %101 {strides = array<i32>} : memref<1x48x64xbf16, #tpu.memory_space<vmem>>, vector<1x30x64xbf16>,
    return
  }
  func.func @transform_0(%arg0: i32) -> (i32, i32, i32) {
    %c0_i32 = arith.constant 0 : i32
    %c0_i32_0 = arith.constant 0 : i32
    %c0_i32_1 = arith.constant 0 : i32
    return %arg0, %c0_i32, %c0_i32_0 : i32, i32, i32
  }
  func.func @transform_1(%arg0: i32) -> (i32, i32) {
    %c0_i32 = arith.constant 0 : i32
    %c0_i32_0 = arith.constant 0 : i32
    %c0_i32_1 = arith.constant 0 : i32
    return %c0_i32, %c0_i32_0 : i32, i32
  }
  func.func @transform_2(%arg0: i32) -> (i32, i32) {
    %c0_i32 = arith.constant 0 : i32
    %c0_i32_0 = arith.constant 0 : i32
    %c0_i32_1 = arith.constant 0 : i32
    return %c0_i32, %c0_i32_0 : i32, i32
  }
  func.func @transform_3(%arg0: i32) -> (i32, i32) {
    %c0_i32 = arith.constant 0 : i32
    %c0_i32_0 = arith.constant 0 : i32
    %c0_i32_1 = arith.constant 0 : i32
    return %c0_i32, %c0_i32_0 : i32, i32
  }
  func.func @transform_4(%arg0: i32) -> (i32, i32) {
    %c0_i32 = arith.constant 0 : i32
    %c0_i32_0 = arith.constant 0 : i32
    %c0_i32_1 = arith.constant 0 : i32
    return %c0_i32, %c0_i32_0 : i32, i32
  }
  func.func @transform_5(%arg0: i32) -> (i32, i32, i32) {
    %c0_i32 = arith.constant 0 : i32
    %c0_i32_0 = arith.constant 0 : i32
    %c0_i32_1 = arith.constant 0 : i32
    return %arg0, %c0_i32, %c0_i32_0 : i32, i32, i32
  }
}

</mosaic_0001>

<bundles_post_ra>
// kernel: pose_encoder_forward.5
= control target key start
LH: loop header
LB: loop body
LE: loop exit
PB: predicated region body
PF: predicated region fallthrough
CT: control target
= control target key end

     0   :  { %8 = vsyncpa [#allocation3], 0  ;;  %s649_s0 = inlined_call_operand.hbm [shape: bf16[128,16], index: 0, kind: input, shape index: {}]   ;;  %s650_s1 = inlined_call_operand.hbm [shape: bf16[16,32], index: 1, kind: input, shape index: {}]   ;;  %s651_s2 = inlined_call_operand.hbm [shape: f32[1,32], index: 2, kind: input, shape index: {}]   ;;  %s652_s3 = inlined_call_operand.hbm [shape: bf16[128,32], index: 3, kind: output, shape index: {}]  }
   0x1   :  { %9 = vsyncpa [#allocation6], 0 }
   0x2   :  { %10 = vsyncpa [#allocation4], 0  ;;  %s535_s12 = smov [#allocation5]   ;;  %s536_s14 = smov [#allocation2]  }
   0x3   :  { %s28_s13 = sshll.u32 %s535_s12, 4  ;;  %s16_s15 = sshll.u32 %s536_s14, 4  ;;  %s29_s13 = int_to_ptr.vmem [resolvable:$true] %s28_s13  ;;  %s561_s15 = int_to_ptr.vmem [resolvable:$true] %s16_s15 }
   0x4   :  { %s441_s18 = scalar_lea.hbm %s650_s1, 128 }
   0x5   :  { %p442_p0 = scmp.ne.s32.totalorder %s650_s1, %s441_s18  ;;  %p445_p1 = scmp.lt.u32.totalorder %s441_s18, %s650_s1 }
   0x7   :  { %p447_p2 = pnand %p445_p1, %p442_p0 }
   0x9   :  { %450 = shalt.err (!%p447_p2)
}
   0xa   :  { %s451_s23 = scalar_lea.vmem %s29_s13, 128  ;;  %p456_p4 = scmp.lt.s32.totalorder %s29_s13, %s29_s13 }
   0xb   :  { %p452_p3 = scmp.ne.s32.totalorder %s29_s13, %s451_s23  ;;  %p457_p5 = scmp.lt.s32.totalorder %s451_s23, %s451_s23 }
   0xd   :  { %p458_p6 = por %p457_p5, %p456_p4 }
   0xf   :  { %p459_p7 = pnand %p458_p6, %p452_p3 }
  0x11   :  { %462 = shalt.err (!%p459_p7)
}
  0x12   :  { %s537_s24 = smov 64   ;;  %s538_s25 = smov 4  }
  0x13   :  { %34 = dma.hbm_to_vmem [thread:$0]  %s650_s1, 128, %s29_s13, [#allocation6], %s537_s24, %s537_s24, %s538_s25  }
  0x14   :  { %s463_s30 = scalar_lea.hbm %s649_s0, 1024 }
  0x15   :  { %p464_p8 = scmp.ne.s32.totalorder %s649_s0, %s463_s30  ;;  %p467_p9 = scmp.lt.u32.totalorder %s463_s30, %s649_s0 }
  0x17   :  { %p469_p10 = pnand %p467_p9, %p464_p8 }
  0x19   :  { %472 = shalt.err (!%p469_p10)
}
  0x1a   :  { %s473_s8 = scalar_lea.vmem %s561_s15, 1024  ;;  %p478_p12 = scmp.lt.s32.totalorder %s561_s15, %s561_s15 }
  0x1b   :  { %p474_p11 = scmp.ne.s32.totalorder %s561_s15, %s473_s8  ;;  %p479_p13 = scmp.lt.s32.totalorder %s473_s8, %s473_s8 }
  0x1d   :  { %p480_p0 = por %p479_p13, %p478_p12 }
  0x1f   :  { %p481_p1 = pnand %p480_p0, %p474_p11 }
  0x21   :  { %484 = shalt.err (!%p481_p1)
}
  0x22   :  { %22 = dma.hbm_to_vmem [thread:$0]  %s649_s0, 1024, %s561_s15, [#allocation3], %s537_s24, %s537_s24, %s538_s25  }
  0x23   :  { %s539_s10 = smov [#allocation7]   ;;  %s485_s14 = scalar_lea.hbm %s651_s2, 16 }
  0x24   :  { %s41_s11 = sshll.u32 %s539_s10, 4  ;;  %p486_p2 = scmp.ne.s32.totalorder %s651_s2, %s485_s14  ;;  %s42_s11 = int_to_ptr.vmem [resolvable:$true] %s41_s11 }
  0x25   :  { %p489_p3 = scmp.lt.u32.totalorder %s485_s14, %s651_s2 }
  0x27   :  { %p491_p4 = pnand %p489_p3, %p486_p2 }
  0x29   :  { %494 = shalt.err (!%p491_p4)
}
  0x2a   :  { %s495_s20 = scalar_lea.vmem %s42_s11, 16  ;;  %s499_s0 = scalar_lea.vmem %s42_s11, 32 }
  0x2b   :  { %p496_p5 = scmp.ne.s32.totalorder %s42_s11, %s495_s20  ;;  %p500_p6 = scmp.lt.s32.totalorder %s42_s11, %s42_s11 }
  0x2c   :  { %p501_p7 = scmp.lt.s32.totalorder %s499_s0, %s495_s20 }
  0x2e   :  { %p502_p8 = por %p501_p7, %p500_p6 }
  0x30   :  { %p503_p9 = pnand %p502_p8, %p496_p5 }
  0x32   :  { %506 = shalt.err (!%p503_p9)
}
  0x33   :  { %44 = dma.hbm_to_vmem [thread:$0]  %s651_s2, 16, %s42_s11, [#allocation6]  }
  0x34   :  { %529 = dma.done.wait [#allocation3], 1024  }
  0x35   :  { %530 = vsyncadd [#allocation3], 4294966272 }
  0x36   :  { %531 = dma.done.wait [#allocation6], 144  }
  0x37   :  { %532 = vsyncadd [#allocation6], 4294967152  ;;  %v432_v0 = vld [vmem:[#allocation5] sm:$0xff]   ;;  %vm126_vm0 = vcmask 130048   ;;  %v435_v3 = vld [vmem:[#allocation2 + $0x8] sm:$0xff]   ;;  %vm312_vm1 = vcmask 257024  }
  0x38   :  { %v433_v1 = vld [vmem:[#allocation2] sm:$0xff]   ;;  %406 = vmatprep.subr.bf16.mxu0 %v432_v0  ;;  %424 = vmatprep.subr.bf16.mxu1 %v432_v0  ;;  %v436_v4 = vld [vmem:[#allocation2 + $0x28] sm:$0xff]   ;;  %v437_v5 = vld [vmem:[#allocation2 + $0x10] sm:$0xff]   ;;  %s540_s2 = smov [#allocation8]  }
  0x39   :  { %v434_v2 = vld [vmem:[#allocation2 + $0x20] sm:$0xff]   ;;  %407 = vmatpush3.bf16.msra.mxu0 %v432_v0  ;;  %425 = vmatpush3.bf16.msra.mxu1 %v432_v0  ;;  %v438_v6 = vld [vmem:[#allocation2 + $0x30] sm:$0xff]   ;;  %v439_v7 = vld [vmem:[#allocation2 + $0x18] sm:$0xff]   ;;  %s334_s22 = sshll.u32 %s540_s2, 4  ;;  %s335_s22 = int_to_ptr.vmem [resolvable:$true] %s334_s22 }
  0x3a   :  { %408 = vmatprep.mubr.msk.bf16.mxu0 %vm126_vm0, %v433_v1  ;;  %416 = vmatprep.mubr.msk.bf16.mxu1 %vm126_vm0, %v434_v2  ;;  %v440_v8 = vld [vmem:[#allocation2 + $0x38] sm:$0xff]   ;;  %v347_v9 = vld [vmem:[#allocation7] ss:$0 sm:$0xff]  ;;  %s507_s23 = scalar_lea.vmem %s335_s22, 1024  ;;  %p512_p11 = scmp.lt.s32.totalorder %s335_s22, %s335_s22 }
  0x3b   :  { %p508_p10 = scmp.ne.s32.totalorder %s335_s22, %s507_s23  ;;  %p513_p12 = scmp.lt.s32.totalorder %s507_s23, %s507_s23 }
  0x3c   :  { %409 = vmatmul.mubr.msk.bf16.vlgmr.msra.gmra.mrb[0].mxu0 %vm126_vm0, %v435_v3  ;;  %417 = vmatmul.mubr.msk.bf16.vlgmr.msra.gmra.mrb[0].mxu1 %vm126_vm0, %v436_v4 }
  0x3d   :  { %412 = vmatprep.mubr.msk.bf16.mxu0 %vm126_vm0, %v437_v5  ;;  %420 = vmatprep.mubr.msk.bf16.mxu1 %vm126_vm0, %v438_v6  ;;  %p514_p13 = por %p513_p12, %p512_p11 }
  0x3f   :  { %p515_p0 = pnand %p514_p13, %p508_p10 }
  0x44   :  { %413 = vmatmul.mubr.msk.bf16.gmra.mrb[4].mxu0 %vm126_vm0, %v439_v7  ;;  %421 = vmatmul.mubr.msk.bf16.gmra.mrb[4].mxu1 %vm126_vm0, %v440_v8 }
 0x10f   :  { %v410_v10 = vpop.f32.mrb[0].mxu0  ;;  %v418_v11 = vpop.f32.mrb[0].mxu1 }
 0x110   :  { %v194_v12 = vadd.f32 %v410_v10, %v347_v9  ;;  %v226_v13 = vadd.f32 %v418_v11, %v347_v9  ;;  %v185_v14 = vpop.f32.mrb[1].mxu0  ;;  %v217_v15 = vpop.f32.mrb[1].mxu1 }
 0x111   :  { %v186_v16 = vadd.f32 %v347_v9, %v185_v14  ;;  %v218_v17 = vadd.f32 %v347_v9, %v217_v15  ;;  %v411_v18 = vpop.f32.mrb[2].mxu0  ;;  %v419_v19 = vpop.f32.mrb[2].mxu1 }
 0x112   :  { %v383_v20 = vpack.c.bf16 %v194_v12, %v194_v12  ;;  %v391_v21 = vpack.c.bf16 %v226_v13, %v226_v13  ;;  %v197_v22 = vadd.f32 %v411_v18, %v347_v9  ;;  %v229_v23 = vadd.f32 %v419_v19, %v347_v9  ;;  %v188_v24 = vpop.f32.mrb[3].mxu0  ;;  %v220_v25 = vpop.f32.mrb[3].mxu1 }
 0x113   :  { %v381_v26 = vpack.c.bf16 %v186_v16, %v186_v16  ;;  %v389_v27 = vpack.c.bf16 %v218_v17, %v218_v17  ;;  %v189_v28 = vadd.f32 %v347_v9, %v188_v24  ;;  %v221_v29 = vadd.f32 %v347_v9, %v220_v25 }
 0x114   :  { %315 = vst.msk [vmem:[#allocation8 + $0x8] sm:$0xf] %vm312_vm1, %v383_v20  ;;  %323 = vst.msk [vmem:[#allocation8 + $0x28] sm:$0xf] %vm312_vm1, %v391_v21  ;;  %v384_v30 = vpack.c.bf16 %v197_v22, %v197_v22  ;;  %v392_v31 = vpack.c.bf16 %v229_v23, %v229_v23 }
 0x115   :  { %313 = vst.msk [vmem:[#allocation8] sm:$0xf] %vm312_vm1, %v381_v26  ;;  %321 = vst.msk [vmem:[#allocation8 + $0x20] sm:$0xf] %vm312_vm1, %v389_v27  ;;  %v382_v32 = vpack.c.bf16 %v189_v28, %v189_v28  ;;  %v390_v33 = vpack.c.bf16 %v221_v29, %v221_v29 }
 0x116   :  { %316 = vst.msk [vmem:[#allocation8 + $0xc] sm:$0xf] %vm312_vm1, %v384_v30  ;;  %324 = vst.msk [vmem:[#allocation8 + $0x2c] sm:$0xf] %vm312_vm1, %v392_v31 }
 0x117   :  { %314 = vst.msk [vmem:[#allocation8 + $0x4] sm:$0xf] %vm312_vm1, %v382_v32  ;;  %322 = vst.msk [vmem:[#allocation8 + $0x24] sm:$0xf] %vm312_vm1, %v390_v33  ;;  %v414_v34 = vpop.f32.mrb[4].mxu0  ;;  %v422_v35 = vpop.f32.mrb[4].mxu1 }
 0x118   :  { %v210_v36 = vadd.f32 %v414_v34, %v347_v9  ;;  %v242_v37 = vadd.f32 %v422_v35, %v347_v9  ;;  %v201_v38 = vpop.f32.mrb[5].mxu0  ;;  %v233_v39 = vpop.f32.mrb[5].mxu1 }
 0x119   :  { %v202_v40 = vadd.f32 %v347_v9, %v201_v38  ;;  %v234_v41 = vadd.f32 %v347_v9, %v233_v39  ;;  %v415_v42 = vpop.f32.mrb[6].mxu0  ;;  %v423_v43 = vpop.f32.mrb[6].mxu1 }
 0x11a   :  { %v387_v44 = vpack.c.bf16 %v210_v36, %v210_v36  ;;  %v395_v45 = vpack.c.bf16 %v242_v37, %v242_v37  ;;  %v213_v46 = vadd.f32 %v415_v42, %v347_v9  ;;  %v245_v47 = vadd.f32 %v423_v43, %v347_v9  ;;  %v204_v48 = vpop.f32.mrb[7].mxu0  ;;  %v236_v49 = vpop.f32.mrb[7].mxu1 }
 0x11b   :  { %v385_v50 = vpack.c.bf16 %v202_v40, %v202_v40  ;;  %v393_v51 = vpack.c.bf16 %v234_v41, %v234_v41  ;;  %v205_v52 = vadd.f32 %v347_v9, %v204_v48  ;;  %v237_v53 = vadd.f32 %v347_v9, %v236_v49 }
 0x11c   :  { %319 = vst.msk [vmem:[#allocation8 + $0x18] sm:$0xf] %vm312_vm1, %v387_v44  ;;  %327 = vst.msk [vmem:[#allocation8 + $0x38] sm:$0xf] %vm312_vm1, %v395_v45  ;;  %v388_v54 = vpack.c.bf16 %v213_v46, %v213_v46  ;;  %v396_v55 = vpack.c.bf16 %v245_v47, %v245_v47 }
 0x11d   :  { %317 = vst.msk [vmem:[#allocation8 + $0x10] sm:$0xf] %vm312_vm1, %v385_v50  ;;  %325 = vst.msk [vmem:[#allocation8 + $0x30] sm:$0xf] %vm312_vm1, %v393_v51  ;;  %v386_v56 = vpack.c.bf16 %v205_v52, %v205_v52  ;;  %v394_v57 = vpack.c.bf16 %v237_v53, %v237_v53 }
 0x11e   :  { %320 = vst.msk [vmem:[#allocation8 + $0x1c] sm:$0xf] %vm312_vm1, %v388_v54  ;;  %328 = vst.msk [vmem:[#allocation8 + $0x3c] sm:$0xf] %vm312_vm1, %v396_v55 }
 0x11f   :  { %318 = vst.msk [vmem:[#allocation8 + $0x14] sm:$0xf] %vm312_vm1, %v386_v56  ;;  %326 = vst.msk [vmem:[#allocation8 + $0x34] sm:$0xf] %vm312_vm1, %v394_v57 }
 0x120   :  { %518 = shalt.err (!%p515_p0)
}
 0x121   :  { %s519_s28 = scalar_lea.hbm %s652_s3, 1024 }
 0x122   :  { %p520_p1 = scmp.ne.s32.totalorder %s652_s3, %s519_s28  ;;  %p523_p2 = scmp.lt.u32.totalorder %s519_s28, %s652_s3 }
 0x124   :  { %p525_p3 = pnand %p523_p2, %p520_p1 }
 0x126   :  { %528 = shalt.err (!%p525_p3)
}
 0x127   :  { %340 = dma.vmem_to_hbm [thread:$0]  %s335_s22, 1024, %s652_s3, [#allocation4], %s537_s24, %s537_s24, %s538_s25  }
 0x128   :  { %533 = dma.done.wait [#allocation4], 1024  }
 0x129   :  { %534 = vsyncadd [#allocation4], 4294966272 }
 0x12a   :  { %344 = vsyncpa [#allocation3], 1 }
 0x12b   :  { %345 = vsyncpa [#allocation6], 1 }
 0x12c   :  { %346 = vsyncpa [#allocation4], 1 }

// kernel: pose_encoder_forward.6
= control target key start
LH: loop header
LB: loop body
LE: loop exit
PB: predicated region body
PF: predicated region fallthrough
CT: control target
= control target key end

     0   :  { %10 = vsyncpa [#allocation3], 0  ;;  %s5808_s0 = inlined_call_operand.hbm [shape: bf16[2,160,32], index: 0, kind: input, shape index: {}]   ;;  %s5809_s1 = inlined_call_operand.hbm [shape: f32[1,32], index: 1, kind: input, shape index: {}]   ;;  %s5810_s2 = inlined_call_operand.hbm [shape: f32[1,32], index: 2, kind: input, shape index: {}]   ;;  %s5811_s3 = inlined_call_operand.hbm [shape: bf16[288,32], index: 3, kind: input, shape index: {}]   ;;  %s5812_s4 = inlined_call_operand.hbm [shape: f32[1,32], index: 4, kind: input, shape index: {}]   ;;  %s5813_s5 = inlined_call_operand.hbm [shape: bf16[2,160,32], index: 5, kind: output, shape index: {}]  }
   0x1   :  { %12 = vsyncpa [#allocation3 + $0x1], 0 }
   0x2   :  { %13 = vsyncpa [#allocation6], 0 }
   0x3   :  { %14 = vsyncpa [#allocation9], 0 }
   0x4   :  { %15 = vsyncpa [#allocation4], 0 }
   0x5   :  { %17 = vsyncpa [#allocation4 + $0x1], 0  ;;  %s3607_s18 = smov 0   ;;  %s3609_s19 = smov 0  }
   0x6   :  { %s3611_s20 = smov 0   ;;  %s3613_s21 = smov 0  }
   0x7 LB: > { %s3628_s22 = sadd.s32 4294967295, %s3558_s21   ;;  %s2566_s23 = sadd.s32 4294967294, %s3558_s21   ;;  %s3558_s21 = sphi %s3613_s21, %s6262_s21   ;;  %s3554_s20 = sphi %s3611_s20, %s6261_s20   ;;  %s3550_s19 = sphi %s3609_s19, %s6260_s19   ;;  %s3546_s18 = sphi %s3607_s18, %s6259_s18  }
   0x8   : > { %p43_p0 = scmp.ne.s32.totalorder %s3550_s19, %s3546_s18  ;;  %p5814_p1 = scmp.eq.s32.totalorder %s3628_s22, 0 }
   0x9   : > { %p157_p3 = scmp.eq.s32.totalorder %s2566_s23, 1  ;;  %p2567_p5 = scmp.ge.s32.totalorder %s3558_s21, 1 }
   0xa   : > { %p3637_p4 = por %p5814_p1, %p43_p0  ;;  %p164_p7 = scmp.lt.s32.totalorder %s3558_s21, 3 }
   0xb   : > { %p3642_p6 = por %p157_p3, %p43_p0  ;;  %s3560_s27 = smov [#allocation5]  }
   0xc   : > { %s5922_s24 = scalar_select %p3637_p4, 1, 0 }
   0xd   : > { %s5923_s25 = scalar_select %p3642_p6, 1, 0 }
   0xe   : > { %p3647_p8 = pnand %p2567_p5, %p164_p7  ;;  %s177_s28 = sshll.u32 %s3560_s27, 4  ;;  %s178_s28 = int_to_ptr.vmem [resolvable:$true] %s177_s28 }
   0xf   : > { %s3561_s29 = smov [#allocation8]   ;;  %s3562_s7 = smov [#allocation7]  }
  0x10   : > { %s5924_s26 = scalar_select %p3647_p8, 1, 0 }
  0x11   : > { %p2924_p10 = pneg %p3647_p8  ;;  %s198_s30 = sshll.u32 %s3561_s29, 4  ;;  %s3660_s30 = int_to_ptr.vmem [resolvable:$true] %s198_s30 }
  0x12   : > { %s3662_s8 = sshll.u32 %s3562_s7, 4  ;;  %s3342_s11 = scalar_lea.hbm %s5809_s1, 16  ;;  %s189_s8 = int_to_ptr.vmem [resolvable:$true] %s3662_s8 }
  0x13   : > { %p3656_p11 = pnand %p2924_p10, %p5814_p1  ;;  %p3343_p12 = scmp.ne.s32.totalorder %s5809_s1, %s3342_s11 }
  0x14   : > { %p3349_p5 = scmp.lt.u32.totalorder %s3342_s11, %s5809_s1 }
  0x15   : > { %p3672_p13 = pneg %p3656_p11 }
  0x17   : > { %p3345_p0 = pnand %p3672_p13, %p3343_p12 }
  0x19   : > { %p3346_p3 = pneg %p3345_p0 }
  0x1b   : > { %p3351_p7 = pnand %p3349_p5, %p3346_p3 }
  0x1d   : > { %3354 = shalt.err (!%p3351_p7)
}
  0x1e   : > { %s3355_s17 = scalar_lea.vmem %s178_s28, 16  ;;  %s3362_s23 = scalar_lea.vmem %s178_s28, 32 }
  0x1f   : > { %p3356_p10 = scmp.ne.s32.totalorder %s178_s28, %s3355_s17  ;;  %p3363_p2 = scmp.lt.s32.totalorder %s178_s28, %s178_s28 }
  0x20   : > { %p3364_p6 = scmp.lt.s32.totalorder %s3362_s23, %s3355_s17 }
  0x21   : > { %p3358_p9 = pnand %p3356_p10, %p3672_p13 }
  0x22   : > { %p3365_p4 = por %p3364_p6, %p3363_p2 }
  0x23   : > { %p3359_p1 = pneg %p3358_p9 }
  0x25   : > { %p3366_p8 = pnand %p3365_p4, %p3359_p1 }
  0x27   : > { %3369 = shalt.err (!%p3366_p8)
}
  0x28   : > { %2927 = dma.hbm_to_vmem [thread:$0]  (!%p3656_p11), %s5809_s1, 16, %s178_s28, [#allocation6]  }
  0x29   : > { %s3370_s10 = scalar_lea.hbm %s5811_s3, 2304 }
  0x2a   : > { %p3371_p9 = scmp.ne.s32.totalorder %s5811_s3, %s3370_s10  ;;  %p3377_p1 = scmp.lt.u32.totalorder %s3370_s10, %s5811_s3 }
  0x2c   : > { %p3373_p12 = pnand %p3371_p9, %p3672_p13 }
  0x2e   : > { %p3374_p2 = pneg %p3373_p12 }
  0x30   : > { %p3379_p4 = pnand %p3377_p1, %p3374_p2 }
  0x32   : > { %3382 = shalt.err (!%p3379_p4)
}
  0x33   : > { %s3383_s28 = scalar_lea.vmem %s3660_s30, 2304  ;;  %p3391_p3 = scmp.lt.s32.totalorder %s3660_s30, %s3660_s30 }
  0x34   : > { %p3384_p6 = scmp.ne.s32.totalorder %s3660_s30, %s3383_s28  ;;  %p3392_p5 = scmp.lt.s32.totalorder %s3383_s28, %s3383_s28 }
  0x36   : > { %p3386_p8 = pnand %p3384_p6, %p3672_p13  ;;  %p3393_p7 = por %p3392_p5, %p3391_p3 }
  0x38   : > { %p3387_p0 = pneg %p3386_p8 }
  0x3a   : > { %p3394_p10 = pnand %p3393_p7, %p3387_p0 }
  0x3c   : > { %3397 = shalt.err (!%p3394_p10)
}
  0x3d   : > { %s5817_s16 = smov 64   ;;  %s3564_s17 = smov 4  }
  0x3e   : > { %2933 = dma.hbm_to_vmem [thread:$0]  (!%p3656_p11), %s5811_s3, 2304, %s3660_s30, [#allocation9], %s5817_s16, %s5817_s16, %s3564_s17  }
  0x3f   : > { %s3398_s9 = scalar_lea.hbm %s5810_s2, 16 }
  0x40   : > { %p3399_p9 = scmp.ne.s32.totalorder %s5810_s2, %s3398_s9  ;;  %p3405_p1 = scmp.lt.u32.totalorder %s3398_s9, %s5810_s2 }
  0x42   : > { %p3401_p12 = pnand %p3399_p9, %p3672_p13 }
  0x44   : > { %p3402_p2 = pneg %p3401_p12 }
  0x46   : > { %p3407_p4 = pnand %p3405_p1, %p3402_p2 }
  0x48   : > { %3410 = shalt.err (!%p3407_p4)
}
  0x49   : > { %s3411_s15 = scalar_lea.vmem %s189_s8, 16  ;;  %s3418_s30 = scalar_lea.vmem %s189_s8, 32 }
  0x4a   : > { %p3412_p6 = scmp.ne.s32.totalorder %s189_s8, %s3411_s15  ;;  %p3419_p3 = scmp.lt.s32.totalorder %s189_s8, %s189_s8 }
  0x4b   : > { %p3420_p5 = scmp.lt.s32.totalorder %s3418_s30, %s3411_s15 }
  0x4c   : > { %p3414_p8 = pnand %p3412_p6, %p3672_p13 }
  0x4d   : > { %p3421_p7 = por %p3420_p5, %p3419_p3 }
  0x4e   : > { %p3415_p0 = pneg %p3414_p8 }
  0x50   : > { %p3422_p10 = pnand %p3421_p7, %p3415_p0 }
  0x52   : > { %3425 = shalt.err (!%p3422_p10)
}
  0x53   : > { %2930 = dma.hbm_to_vmem [thread:$0]  (!%p3656_p11), %s5810_s2, 16, %s189_s8, [#allocation6]  }
  0x54   : > { %s3565_s27 = smov [#allocation10]   ;;  %s3426_s10 = scalar_lea.hbm %s5812_s4, 16 }
  0x55   : > { %s212_s29 = sshll.u32 %s3565_s27, 4  ;;  %p3427_p9 = scmp.ne.s32.totalorder %s5812_s4, %s3426_s10  ;;  %s213_s29 = int_to_ptr.vmem [resolvable:$true] %s212_s29 }
  0x56   : > { %p3433_p1 = scmp.lt.u32.totalorder %s3426_s10, %s5812_s4 }
  0x57   : > { %p3429_p12 = pnand %p3427_p9, %p3672_p13 }
  0x59   : > { %p3430_p2 = pneg %p3429_p12 }
  0x5b   : > { %p3435_p4 = pnand %p3433_p1, %p3430_p2 }
  0x5d   : > { %3438 = shalt.err (!%p3435_p4)
}
  0x5e   : > { %s3439_s8 = scalar_lea.vmem %s213_s29, 16  ;;  %s3446_s30 = scalar_lea.vmem %s213_s29, 32 }
  0x5f   : > { %p3440_p6 = scmp.ne.s32.totalorder %s213_s29, %s3439_s8  ;;  %p3447_p3 = scmp.lt.s32.totalorder %s213_s29, %s213_s29 }
  0x60   : > { %p3448_p5 = scmp.lt.s32.totalorder %s3446_s30, %s3439_s8 }
  0x61   : > { %p3442_p8 = pnand %p3440_p6, %p3672_p13 }
  0x62   : > { %p3449_p7 = por %p3448_p5, %p3447_p3 }
  0x63   : > { %p3443_p0 = pneg %p3442_p8 }
  0x65   : > { %p3450_p10 = pnand %p3449_p7, %p3443_p0 }
  0x67   : > { %3453 = shalt.err (!%p3450_p10)
}
  0x68   : > { %2936 = dma.hbm_to_vmem [thread:$0]  (!%p3656_p11), %s5812_s4, 16, %s213_s29, [#allocation9]  }
  0x69   : > { %s3752_s14 = sadd.s32 1, %s3558_s21   ;;  %s30_s27 = sadd.s32 1, %s3554_s20 }
  0x6a   : > { %s27_s6 = ssub.s32 %s3558_s21, %s3752_s14  ;;  %p37_p13 = scmp.ne.s32.totalorder %s3554_s20, %s3550_s19 }
  0x6b   : > { %p28_p9 = scmp.eq.s32.totalorder %s27_s6, 0  ;;  %p38_p12 = scmp.eq.s32.totalorder %s3558_s21, 0 }
  0x6c   : > { %p5927_p2 = scmp.eq.s32.totalorder %s3628_s22, 1  ;;  %p2949_p4 = scmp.lt.s32.totalorder %s3558_s21, 2 }
  0x6d   : > { %s3768_s9 = scalar_select %p28_p9, %s3554_s20, %s30_s27  }
  0x6e   : > { %p3762_p1 = por %p5927_p2, %p37_p13  ;;  %p39_p6 = por %p38_p12, %p37_p13 }
  0x6f   : > { %s223_s10 = sand.u32 1, %s3554_s20   ;;  %s2901_s29 = smul.u32 1280, %s3558_s21 }
  0x70   : > { %s2900_s11 = smul.u32 80, %s223_s10  ;;  %p3772_p11 = pnand %p2949_p4, %p39_p6 }
  0x71   : > { %s3779_s8 = scalar_lea.hbm %s5808_s0, %s2901_s29  ;;  %s3783_s23 = scalar_lea.sflag [#allocation3], %s223_s10 }
  0x72   : > { %s227_s30 = scalar_lea.vmem [#allocation2], %s2900_s11  ;;  %s3454_s27 = scalar_lea.hbm %s3779_s8, 1280 }
  0x73   : > { %s234_s28 = sshll.u32 %s227_s30, 4  ;;  %p3455_p8 = scmp.ne.s32.totalorder %s3779_s8, %s3454_s27  ;;  %s3781_s28 = int_to_ptr.vmem [resolvable:$true] %s234_s28 }
  0x74   : > { %p3456_p0 = pneg %p3772_p11  ;;  %s3459_s13 = scalar_lea.hbm %s5808_s0, 2560 }
  0x75   : > { %p3460_p7 = scmp.lt.u32.totalorder %s3779_s8, %s5808_s0  ;;  %p3461_p10 = scmp.lt.u32.totalorder %s3459_s13, %s3454_s27 }
  0x76   : > { %p3457_p3 = pnand %p3456_p0, %p3455_p8  ;;  %p3463_p9 = scmp.lt.u32.totalorder %s3454_s27, %s3779_s8 }
  0x77   : > { %p3462_p13 = por %p3461_p10, %p3460_p7 }
  0x78   : > { %p3458_p5 = pneg %p3457_p3 }
  0x79   : > { %p3464_p12 = por %p3463_p9, %p3462_p13 }
  0x7b   : > { %p3465_p2 = pnand %p3464_p12, %p3458_p5 }
  0x7d   : > { %3468 = shalt.err (!%p3465_p2)
}
  0x7e   : > { %s3469_s10 = scalar_lea.vmem %s3781_s28, 1280  ;;  %s3566_s11 = smov [#allocation2]  }
  0x7f   : > { %p3470_p4 = scmp.ne.s32.totalorder %s3781_s28, %s3469_s10  ;;  %s3474_s30 = sshll.u32 %s3566_s11, 4  ;;  %s3475_s30 = int_to_ptr.vmem [resolvable:$false] %s3474_s30 }
  0x80   : > { %s3476_s16 = scalar_lea.vmem %s3475_s30, 2560  ;;  %p3477_p3 = scmp.lt.s32.totalorder %s3781_s28, %s3475_s30 }
  0x81   : > { %p3472_p6 = pnand %p3470_p4, %p3456_p0  ;;  %p3478_p7 = scmp.lt.s32.totalorder %s3476_s16, %s3469_s10 }
  0x83   : > { %p3473_p8 = pneg %p3472_p6  ;;  %p3479_p10 = por %p3478_p7, %p3477_p3 }
  0x85   : > { %p3480_p13 = pnand %p3479_p10, %p3473_p8 }
  0x87   : > { %3483 = shalt.err (!%p3480_p13)
}
  0x88   : > { %s5930_s27 = smov 64   ;;  %p5931_p0 = scmp.ne.s32.totalorder %s5924_s26, 0 }
  0x89   : > { %2940 = dma.hbm_to_vmem [thread:$0]  (!%p3772_p11), %s3779_s8, 1280, %s3781_s28, %s3783_s23, %s5930_s27, %s5930_s27, %s3564_s17  }
  0x8a   : > { %246 = sbr.rel (%p5931_p0) target bundleno = 1244 (0x4dc), region = 40 }
  0x91   : > { %s3817_s6 = sand.u32 1, %s3550_s19   ;;  %p5932_p5 = scmp.ne.s32.totalorder %s5922_s24, 0 }
  0x92   : > { %s2902_s29 = smul.u32 80, %s3817_s6  ;;  %s249_s13 = scalar_lea.sflag [#allocation3], %s3817_s6 }
  0x94   : > { %s3823_s12 = scalar_lea.vmem [#allocation2], %s2902_s29 }
  0x95   : > { %3529 = dma.done.wait (%p5932_p5), %s249_s13, 1280  }
  0x96   : > { %3531 = vsyncadd (%p5932_p5), %s249_s13, 4294966016  ;;  %p5933_p11 = scmp.eq.s32.totalorder %s3628_s22, 0 }
  0x98   : > { %3533 = dma.done.wait (%p5933_p11), [#allocation6], 32   ;;  %p5934_p9 = pmov %p5933_p11 }
  0x9a   : > { %3535 = vsyncadd (%p5934_p9), [#allocation6], 4294967264  ;;  %p5935_p12 = pmov %p5934_p9 }
  0x9b   : > { %p5936_p2 = pmov %p5934_p9 }
  0x9c   : > { %3537 = dma.done.wait (%p5935_p12), [#allocation9], 2320  }
  0x9d   : > { %3539 = vsyncadd (%p5936_p2), [#allocation9], 4294964976  ;;  %v336_v0 = vlaneseq  ;;  %v3567_v1 = vmov 0.0|0.0   ;;  %vm3568_vm0 = vmmov 0   ;;  %v5834_v4 = vmov 0.0   ;;  %v3856_v17 = vld [vmem:[%s3823_s12] sm:$0xff]  }
  0x9e   : > { %2872 = vmatprep.subr.bf16.mxu0 %v3567_v1  ;;  %2878 = vmatprep.subr.bf16.mxu1 %v3567_v1  ;;  %v3570_v14 = vmov 1.0|1.0   ;;  %v3859_v18 = vld [vmem:[%s3823_s12 + $0x8] sm:$0xff]   ;;  %v5840_v21 = vunpack.c.l.bf16 %v3856_v17  ;;  %v5839_v22 = vunpack.c.h.bf16 %v3856_v17  ;;  %v3867_v24 = vld [vmem:[%s3823_s12 + $0x10] sm:$0xff]   ;;  %vm5818_vm4 = vcmask 261120   ;;  %v3871_v26 = vld [vmem:[%s3823_s12 + $0x18] sm:$0xff]  }
  0x9f   : > { %v3837_v2 = vshrl.u32 %v336_v0, 7  ;;  %v639_v3 = vand.u32 127, %v336_v0  ;;  %2838 = vmatprep.mubr.msk.f32.mxu0 %vm3568_vm0, %v5834_v4  ;;  %2849 = vmatprep.mubr.msk.f32.mxu1 %vm3568_vm0, %v5834_v4  ;;  %v5838_v23 = vunpack.c.l.bf16 %v3859_v18  ;;  %v5837_v25 = vunpack.c.h.bf16 %v3859_v18  ;;  %5937 = vst [vmem:[#allocation16_spill] sm:$0xff] %v3871_v26  ;;  %v3892_v37 = vld [vmem:[%s3823_s12 + $0x20] sm:$0xff]   ;;  %v3903_v44 = vld [vmem:[%s3823_s12 + $0x28] sm:$0xff]   ;;  %v3914_v51 = vld [vmem:[%s3823_s12 + $0x30] sm:$0xff]  }
  0xa0   : > { %v5836_v27 = vunpack.c.l.bf16 %v3867_v24  ;;  %v659_v28 = vsel %vm5818_vm4, %v5840_v21, 0.0  ;;  %v660_v29 = vsel %vm5818_vm4, %v5839_v22, 0.0  ;;  %v5833_v32 = vunpack.c.h.bf16 %v3867_v24  ;;  %5938 = vst [vmem:[#allocation17_spill] sm:$0xff] %v3892_v37  ;;  %5939 = vst [vmem:[#allocation18_spill] sm:$0xff] %v3903_v44  ;;  %v3925_v58 = vld [vmem:[%s3823_s12 + $0x38] sm:$0xff]   ;;  %s3571_s24 = smov 64  }
  0xa1   : > { %v338_v5 = vadd.s32 8, %v3837_v2  ;;  %v3843_v6 = vcvt.s32.f32 %v3837_v2  ;;  %v640_v7 = vcvt.s32.f32 %v639_v3  ;;  %v339_v12 = vadd.s32 16, %v3837_v2  ;;  %5940 = vst [vmem:[#allocation19_spill] sm:$0xff] %v3914_v51  ;;  %5941 = vst [vmem:[#allocation20_spill] sm:$0xff] %v3925_v58  ;;  %s3572_s26 = smov 96   ;;  %s3573_s17 = smov 32  }
  0xa2   : > { %v340_v13 = vadd.s32 24, %v3837_v2  ;;  %v662_v30 = vsel %vm5818_vm4, %v5838_v23, 0.0  ;;  %v661_v31 = vadd.f32 %v660_v29, %v659_v28  ;;  %v5832_v33 = vunpack.c.l.bf16 %v3871_v26  ;;  %s5541_s8 = scalar_lea.vmem [#allocation11], %s2902_s29  ;;  %s2903_s28 = smul.u32 1280, %s3628_s22 }
  0xa3   : > { %v3845_v8 = vcvt.s32.f32 %v338_v5  ;;  %v641_v9 = vfloor.f32 %v3843_v6  ;;  %v645_v10 = vfloor.f32 %v640_v7  ;;  %v3851_v15 = vcvt.s32.f32 %v339_v12  ;;  %v3947_v12 = vld [vmem:[%s3823_s12 + $0x48] sm:$0xff]   ;;  %s2455_s23 = sshll.u32 %s5541_s8, 4  ;;  %s2442_s11 = scalar_lea.sflag [#allocation4], %s3817_s6  ;;  %s5754_s23 = int_to_ptr.vmem [resolvable:$true] %s2455_s23 }
  0xa4   : > { %v3853_v16 = vcvt.s32.f32 %v340_v13  ;;  %v664_v34 = vsel %vm5818_vm4, %v5837_v25, 0.0  ;;  %v663_v35 = vadd.f32 %v662_v30, %v661_v31  ;;  %v666_v36 = vsel %vm5818_vm4, %v5836_v27, 0.0  ;;  %5943 = vst [vmem:[#allocation22_spill] sm:$0xff] %v3947_v12  ;;  %s5752_s10 = scalar_lea.hbm %s5813_s5, %s2903_s28  ;;  %s3484_s30 = scalar_lea.vmem %s5754_s23, 1280 }
  0xa5   : > { %v642_v11 = vfloor.f32 %v3845_v8  ;;  %vm646_vm1 = vcmp.eq.f32.partialorder %v641_v9, %v645_v10  ;;  %v643_v19 = vfloor.f32 %v3851_v15  ;;  %v5831_v39 = vunpack.c.h.bf16 %v3871_v26  ;;  %p3485_p4 = scmp.ne.s32.totalorder %s5754_s23, %s3484_s30  ;;  %s3575_s16 = smov [#allocation11]  }
  0xa6   : > { %v644_v20 = vfloor.f32 %v3853_v16  ;;  %v665_v38 = vadd.f32 %v664_v34, %v663_v35  ;;  %v668_v40 = vsel %vm5818_vm4, %v5833_v32, 0.0  ;;  %v670_v41 = vsel %vm5818_vm4, %v5832_v33, 0.0  ;;  %s3488_s27 = sshll.u32 %s3575_s16, 4  ;;  %s3489_s27 = int_to_ptr.vmem [resolvable:$false] %s3488_s27 }
  0xa7   : > { %vm647_vm2 = vcmp.eq.f32.partialorder %v642_v11, %v645_v10  ;;  %vm648_vm5 = vcmp.eq.f32.partialorder %v643_v19, %v645_v10  ;;  %v5830_v43 = vunpack.c.l.bf16 %v3892_v37  ;;  %v5829_v46 = vunpack.c.h.bf16 %v3892_v37  ;;  %p3486_p6 = pnand %p3485_p4, %p3762_p1  ;;  %s3490_s29 = scalar_lea.vmem %s3489_s27, 2560 }
  0xa8   : > { %vm2873_vm3 = vmpackc.low %vm647_vm2, %vm646_vm1  ;;  %vm649_vm6 = vcmp.eq.f32.partialorder %v644_v20, %v645_v10  ;;  %v667_v42 = vadd.f32 %v666_v36, %v665_v38  ;;  %v672_v47 = vsel %vm5818_vm4, %v5831_v39, 0.0  ;;  %v5828_v49 = vunpack.c.l.bf16 %v3903_v44  ;;  %p3491_p3 = scmp.lt.s32.totalorder %s5754_s23, %s3489_s27  ;;  %p3492_p7 = scmp.lt.s32.totalorder %s3490_s29, %s3484_s30 }
  0xa9   : > { %2874 = vmatpush3.bf16.msk.msra.mxu0 %vm2873_vm3, %v3570_v14  ;;  %2880 = vmatpush3.bf16.msk.msra.mxu1 %vm2873_vm3, %v3570_v14  ;;  %vm2876_vm7 = vmpackc.low %vm649_vm6, %vm648_vm5  ;;  %v674_v50 = vsel %vm5818_vm4, %v5830_v43, 0.0  ;;  %v5827_v53 = vunpack.c.h.bf16 %v3903_v44  ;;  %v676_v54 = vsel %vm5818_vm4, %v5829_v46, 0.0  ;;  %v5826_v56 = vunpack.c.l.bf16 %v3914_v51  ;;  %p3487_p8 = pneg %p3486_p6 }
  0xaa   : > { %2875 = vmatprep.subr.bf16.mxu0 %v3567_v1  ;;  %2881 = vmatprep.subr.bf16.mxu1 %v3567_v1  ;;  %v669_v45 = vadd.f32 %v668_v40, %v667_v42  ;;  %v678_v57 = vsel %vm5818_vm4, %v5828_v49, 0.0  ;;  %v5825_v60 = vunpack.c.h.bf16 %v3914_v51  ;;  %v5824_v63 = vunpack.c.l.bf16 %v3925_v58  ;;  %v3936_v1 = vld [vmem:[%s3823_s12 + $0x40] sm:$0xff]   ;;  %p3493_p10 = por %p3492_p7, %p3491_p3 }
  0xab   : > { %v680_v61 = vsel %vm5818_vm4, %v5827_v53, 0.0  ;;  %v682_v0 = vsel %vm5818_vm4, %v5826_v56, 0.0  ;;  %5942 = vst [vmem:[#allocation21_spill] sm:$0xff] %v3936_v1  ;;  %v5823_v5 = vunpack.c.h.bf16 %v3925_v58  ;;  %v5822_v10 = vunpack.c.l.bf16 %v3936_v1 }
  0xac   : > { %v671_v48 = vadd.f32 %v670_v41, %v669_v45  ;;  %v684_v7 = vsel %vm5818_vm4, %v5825_v60, 0.0  ;;  %v686_v11 = vsel %vm5818_vm4, %v5824_v63, 0.0  ;;  %v5820_v28 = vunpack.c.l.bf16 %v3947_v12  ;;  %p3494_p13 = pnand %p3493_p10, %p3487_p8 }
  0xad   : > { %2877 = vmatpush3.bf16.msk.msra.mxu0 %vm2876_vm7, %v3570_v14  ;;  %2883 = vmatpush3.bf16.msk.msra.mxu1 %vm2876_vm7, %v3570_v14  ;;  %v5821_v14 = vunpack.c.h.bf16 %v3936_v1  ;;  %v688_v19 = vsel %vm5818_vm4, %v5823_v5, 0.0  ;;  %v690_v29 = vsel %vm5818_vm4, %v5822_v10, 0.0  ;;  %v5819_v31 = vunpack.c.h.bf16 %v3947_v12 }
  0xae   : > { %v673_v52 = vadd.f32 %v672_v47, %v671_v48  ;;  %v694_v36 = vsel %vm5818_vm4, %v5820_v28, 0.0 }
  0xaf   : > { %v692_v34 = vsel %vm5818_vm4, %v5821_v14, 0.0  ;;  %v696_v40 = vsel %vm5818_vm4, %v5819_v31, 0.0 }
  0xb0   : > { %v675_v55 = vadd.f32 %v674_v50, %v673_v52 }
  0xb2   : > { %v677_v59 = vadd.f32 %v676_v54, %v675_v55  ;;  %v378_v55 = vmul.f32 0.0625, %v3843_v6 }
  0xb4   : > { %v679_v62 = vadd.f32 %v678_v57, %v677_v59  ;;  %v398_v57 = vfloor.f32 %v378_v55  ;;  %v379_v59 = vmul.f32 0.0625, %v3845_v8  ;;  %v4025_v55 = vadd.s32 128, %v3837_v2 }
  0xb6   : > { %v681_v3 = vadd.f32 %v680_v61, %v679_v62  ;;  %v380_v61 = vmul.f32 0.0625, %v3851_v15  ;;  %v418_v62 = vmul.f32 16.0, %v398_v57  ;;  %vm458_vm8 = vcmp.ge.f32.partialorder %v398_v57, 1.0 }
  0xb7   : > { %vm478_vm9 = vcmp.le.f32.partialorder %v398_v57, 8.0  ;;  %v4028_v57 = vadd.s32 136, %v3837_v2  ;;  %v5847_v31 = vcvt.s32.f32 %v4025_v55 }
  0xb8   : > { %v683_v9 = vadd.f32 %v682_v0, %v681_v3  ;;  %v381_v0 = vmul.f32 0.0625, %v3853_v16  ;;  %v399_v3 = vfloor.f32 %v379_v59  ;;  %vm498_vm10 = vmand %vm458_vm8, %vm478_vm9  ;;  %v4031_v59 = vadd.s32 144, %v3837_v2 }
  0xb9   : > { %v5849_v28 = vcvt.s32.f32 %v4028_v57  ;;  %v394_v25 = vmul.f32 0.0625, %v5847_v31 }
  0xba   : > { %v685_v13 = vadd.f32 %v684_v7, %v683_v9  ;;  %v400_v7 = vfloor.f32 %v380_v61  ;;  %v438_v9 = vsub.f32 %v3843_v6, %v418_v62  ;;  %vm459_vm12 = vcmp.ge.f32.partialorder %v399_v3, 1.0 }
  0xbb   : > { %vm479_vm13 = vcmp.le.f32.partialorder %v399_v3, 8.0  ;;  %v4034_v61 = vadd.s32 152, %v3837_v2  ;;  %v5850_v14 = vcvt.s32.f32 %v4031_v59  ;;  %v395_v23 = vmul.f32 0.0625, %v5849_v28 }
  0xbc   : > { %v687_v20 = vadd.f32 %v686_v11, %v685_v13  ;;  %v401_v11 = vfloor.f32 %v381_v0  ;;  %v419_v13 = vmul.f32 16.0, %v399_v3  ;;  %vm518_vm11 = vcmp.ge.f32.partialorder %v438_v9, 1.0  ;;  %vm499_vm2 = vmand %vm459_vm12, %vm479_vm13 }
  0xbd   : > { %vm538_vm14 = vmand %vm498_vm10, %vm518_vm11  ;;  %vm558_vm15 = vcmp.le.f32.partialorder %v438_v9, 8.0  ;;  %vm460_vm0 = vcmp.ge.f32.partialorder %v400_v7, 1.0  ;;  %vm480_vm1 = vcmp.le.f32.partialorder %v400_v7, 8.0  ;;  %v5852_v10 = vcvt.s32.f32 %v4034_v61 }
  0xbe   : > { %v689_v30 = vadd.f32 %v688_v19, %v687_v20  ;;  %v420_v19 = vmul.f32 16.0, %v400_v7  ;;  %v421_v20 = vmul.f32 16.0, %v401_v11  ;;  %vm461_vm3 = vcmp.ge.f32.partialorder %v401_v11, 1.0  ;;  %vm578_vm7 = vmand %vm538_vm14, %vm558_vm15 }
  0xbf   : > { %vm481_vm5 = vcmp.le.f32.partialorder %v401_v11, 8.0  ;;  %vm500_vm8 = vmand %vm460_vm0, %vm480_vm1  ;;  %v3977_v6 = vsel %vm578_vm7, 1.0, %v5834_v4  ;;  %v396_v22 = vmul.f32 0.0625, %v5850_v14  ;;  %v397_v21 = vmul.f32 0.0625, %v5852_v10 }
  0xc0   : > { %v691_v35 = vadd.f32 %v690_v29, %v689_v30  ;;  %v439_v29 = vsub.f32 %v3845_v8, %v419_v13  ;;  %v440_v30 = vsub.f32 %v3851_v15, %v420_v19 }
  0xc2   : > { %v693_v38 = vadd.f32 %v692_v34, %v691_v35  ;;  %v441_v34 = vsub.f32 %v3853_v16, %v421_v20  ;;  %vm519_vm6 = vcmp.ge.f32.partialorder %v439_v29, 1.0  ;;  %vm520_vm9 = vcmp.ge.f32.partialorder %v440_v30, 1.0 }
  0xc3   : > { %vm539_vm11 = vmand %vm499_vm2, %vm519_vm6  ;;  %vm559_vm12 = vcmp.le.f32.partialorder %v439_v29, 8.0  ;;  %vm560_vm14 = vcmp.le.f32.partialorder %v440_v30, 8.0  ;;  %v3989_v35 = vadd.s32 32, %v3837_v2 }
  0xc4   : > { %v695_v41 = vadd.f32 %v694_v36, %v693_v38  ;;  %vm521_vm10 = vcmp.ge.f32.partialorder %v441_v34, 1.0  ;;  %vm540_vm13 = vmand %vm500_vm8, %vm520_vm9  ;;  %vm561_vm0 = vcmp.le.f32.partialorder %v441_v34, 8.0  ;;  %v3992_v36 = vadd.s32 40, %v3837_v2 }
  0xc5   : > { %vm579_vm1 = vmand %vm539_vm11, %vm559_vm12  ;;  %v3995_v38 = vadd.s32 48, %v3837_v2  ;;  %v5856_v62 = vcvt.s32.f32 %v3989_v35  ;;  %v5948_v12 = vcvt.s32.f32 %v3989_v35 }
  0xc6   : > { %v697_v42 = vadd.f32 %v696_v40, %v695_v41  ;;  %v3980_v8 = vsel %vm579_vm1, 1.0, %v5834_v4  ;;  %v3998_v40 = vadd.s32 56, %v3837_v2  ;;  %v4001_v41 = vadd.s32 64, %v3837_v2 }
  0xc7   : > { %v5855_v0 = vcvt.s32.f32 %v3992_v36  ;;  %v5854_v3 = vcvt.s32.f32 %v3995_v38  ;;  %v382_v5 = vmul.f32 0.0625, %v5856_v62  ;;  %v5949_v58 = vcvt.s32.f32 %v3992_v36 }
  0xc8   : > { %v698_v45 = vrot.slane %v697_v42, 4  ;;  %v5853_v7 = vcvt.s32.f32 %v3998_v40  ;;  %v5851_v9 = vcvt.s32.f32 %v4001_v41  ;;  %v5950_v26 = vcvt.s32.f32 %v3995_v38 }
  0xc9   : > { %v383_v63 = vmul.f32 0.0625, %v5855_v0  ;;  %v384_v60 = vmul.f32 0.0625, %v5854_v3 }
  0xca   : > { %v699_v47 = vadd.f32 %v698_v45, %v697_v42  ;;  %v4004_v42 = vadd.s32 72, %v3837_v2  ;;  %v4007_v45 = vadd.s32 80, %v3837_v2  ;;  %v385_v56 = vmul.f32 0.0625, %v5853_v7 }
  0xcb   : > { %v386_v53 = vmul.f32 0.0625, %v5851_v9 }
  0xcc   : > { %v700_v48 = vrot.slane %v699_v47, 2  ;;  %v5848_v11 = vcvt.s32.f32 %v4004_v42  ;;  %v5845_v13 = vcvt.s32.f32 %v4007_v45  ;;  %v405_v49 = vfloor.f32 %v385_v56 }
  0xce   : > { %v701_v50 = vadd.f32 %v700_v48, %v699_v47  ;;  %v4010_v47 = vadd.s32 88, %v3837_v2  ;;  %v4013_v48 = vadd.s32 96, %v3837_v2  ;;  %v387_v46 = vmul.f32 0.0625, %v5848_v11 }
  0xcf   : > { %v388_v43 = vmul.f32 0.0625, %v5845_v13  ;;  %vm485_vm11 = vcmp.le.f32.partialorder %v405_v49, 8.0 }
  0xd0   : > { %v702_v52 = vrot.slane %v701_v50, 1  ;;  %v5843_v19 = vcvt.s32.f32 %v4010_v47  ;;  %v5841_v20 = vcvt.s32.f32 %v4013_v48  ;;  %v4087_v13 = vfloor.f32 %v387_v46 }
  0xd1   : > { %v4107_v46 = vfloor.f32 %v397_v21 }
  0xd2   : > { %v703_v54 = vadd.f32 %v702_v52, %v701_v50  ;;  %v4016_v50 = vadd.s32 104, %v3837_v2  ;;  %v4019_v52 = vadd.s32 112, %v3837_v2  ;;  %v389_v39 = vmul.f32 0.0625, %v5843_v19 }
  0xd3   : > { %v390_v33 = vmul.f32 0.0625, %v5841_v20  ;;  %v402_v20 = vfloor.f32 %v382_v5  ;;  %v404_v19 = vfloor.f32 %v384_v60  ;;  %v4101_v5 = vfloor.f32 %v394_v25  ;;  %5947 = vst [vmem:[#allocation26_spill] sm:$0xff] %v4107_v46 }
  0xd4   : > { %2839 = vmatmul.mubr.msk.f32.vlgmr.msra.gmra.mrb[0].mxu0 %vm5818_vm4, %v703_v54  ;;  %vm501_vm4 = vmand %vm461_vm3, %vm481_vm5  ;;  %v4022_v54 = vadd.s32 120, %v3837_v2  ;;  %v5842_v29 = vcvt.s32.f32 %v4016_v50  ;;  %v5844_v30 = vcvt.s32.f32 %v4019_v52  ;;  %v4091_v31 = vfloor.f32 %v389_v39 }
  0xd5   : > { %vm541_vm15 = vmand %vm501_vm4, %vm521_vm10  ;;  %v4093_v11 = vfloor.f32 %v390_v33  ;;  %v4103_v60 = vfloor.f32 %v395_v23  ;;  %v424_v39 = vmul.f32 16.0, %v404_v19  ;;  %v434_v10 = vmul.f32 16.0, %v4101_v5 }
  0xd6   : > { %vm580_vm3 = vmand %vm540_vm13, %vm560_vm14  ;;  %v5846_v34 = vcvt.s32.f32 %v4022_v54  ;;  %v391_v32 = vmul.f32 0.0625, %v5842_v29  ;;  %v403_v29 = vfloor.f32 %v383_v63  ;;  %v425_v63 = vmul.f32 16.0, %v405_v49 }
  0xd7   : > { %vm581_vm5 = vmand %vm541_vm15, %vm561_vm0  ;;  %v3983_v15 = vsel %vm580_vm3, 1.0, %v5834_v4  ;;  %v430_v25 = vmul.f32 16.0, %v4093_v11  ;;  %v435_v7 = vmul.f32 16.0, %v4103_v60  ;;  %v437_v0 = vmul.f32 16.0, %v4107_v46 }
  0xd8   : > { %5944 = vst [vmem:[#allocation23_spill] sm:$0xff] %v3983_v15  ;;  %v3986_v16 = vsel %vm581_vm5, 1.0, %v5834_v4  ;;  %v392_v4 = vmul.f32 0.0625, %v5844_v30  ;;  %v393_v27 = vmul.f32 0.0625, %v5846_v34  ;;  %v4085_v30 = vfloor.f32 %v386_v53 }
  0xd9   : > { %5945 = vst [vmem:[#allocation24_spill] sm:$0xff] %v3986_v16  ;;  %v4089_v34 = vfloor.f32 %v388_v43  ;;  %v4095_v28 = vfloor.f32 %v391_v32  ;;  %v4105_v53 = vfloor.f32 %v396_v22  ;;  %v422_v43 = vmul.f32 16.0, %v402_v20 }
  0xda   : > { %v4097_v14 = vfloor.f32 %v392_v4  ;;  %v4099_v9 = vfloor.f32 %v393_v27  ;;  %v423_v56 = vmul.f32 16.0, %v403_v29  ;;  %v426_v33 = vmul.f32 16.0, %v4085_v30 }
  0xdb   : > { %5946 = vst [vmem:[#allocation25_spill] sm:$0xff] %v4105_v53  ;;  %v427_v32 = vmul.f32 16.0, %v4087_v13  ;;  %v428_v4 = vmul.f32 16.0, %v4089_v34  ;;  %v429_v27 = vmul.f32 16.0, %v4091_v31  ;;  %v431_v23 = vmul.f32 16.0, %v4095_v28 }
  0xdc   : > { %v432_v22 = vmul.f32 16.0, %v4097_v14  ;;  %v433_v21 = vmul.f32 16.0, %v4099_v9  ;;  %v436_v3 = vmul.f32 16.0, %v4105_v53  ;;  %v442_v1 = vsub.f32 %v5948_v12, %v422_v43 }
  0xdd   : > { %v4125_v51 = vsub.f32 %v5949_v58, %v423_v56  ;;  %vm462_vm4 = vcmp.ge.f32.partialorder %v402_v20, 1.0  ;;  %vm482_vm2 = vcmp.le.f32.partialorder %v402_v20, 8.0  ;;  %v4129_v16 = vsub.f32 %v5950_v26, %v424_v39 }
  0xde   : > { %vm463_vm6 = vcmp.ge.f32.partialorder %v403_v29, 1.0  ;;  %vm483_vm7 = vcmp.le.f32.partialorder %v403_v29, 8.0  ;;  %v5951_v46 = vcvt.s32.f32 %v3998_v40  ;;  %v5952_v12 = vcvt.s32.f32 %v4001_v41  ;;  %vm4148_vm12 = vmand %vm462_vm4, %vm482_vm2 }
  0xdf   : > { %vm464_vm8 = vcmp.ge.f32.partialorder %v404_v19, 1.0  ;;  %vm484_vm9 = vcmp.le.f32.partialorder %v404_v19, 8.0  ;;  %v5953_v58 = vcvt.s32.f32 %v4004_v42  ;;  %vm465_vm10 = vcmp.ge.f32.partialorder %v405_v49, 1.0  ;;  %vm4163_vm15 = vmand %vm463_vm6, %vm483_vm7 }
  0xe0   : > { %v4133_v53 = vsub.f32 %v5951_v46, %v425_v63  ;;  %v4137_v35 = vsub.f32 %v5952_v12, %v426_v33  ;;  %v5957_v40 = vsub.s32 0, %v3837_v2  ;;  %vm466_vm13 = vcmp.ge.f32.partialorder %v4085_v30, 1.0  ;;  %vm4179_vm3 = vmand %vm464_vm8, %vm484_vm9 }
  0xe1   : > { %v4141_v36 = vsub.f32 %v5953_v58, %v427_v32  ;;  %vm486_vm14 = vcmp.le.f32.partialorder %v4085_v30, 8.0  ;;  %v5961_v20 = vcvt.s32.f32 %v4013_v48  ;;  %vm467_vm0 = vcmp.ge.f32.partialorder %v4087_v13, 1.0  ;;  %vm4197_vm5 = vmand %vm465_vm10, %vm485_vm11 }
  0xe2   : > { %vm487_vm1 = vcmp.le.f32.partialorder %v4087_v13, 8.0  ;;  %v5965_v29 = vcvt.s32.f32 %v4019_v52  ;;  %v5966_v48 = vcvt.s32.f32 %v4022_v54  ;;  %vm522_vm4 = vcmp.ge.f32.partialorder %v442_v1, 1.0  ;;  %vm4215_vm7 = vmand %vm466_vm13, %vm486_vm14  ;;  %v6001_v12 = vld [vmem:[#allocation25_spill] sm:$0xff]  ;;  %v6025_v13 = vld [vmem:[#allocation16_spill] sm:$0xff] }
  0xe3   : > { %v4169_v46 = vsub.f32 %v5961_v20, %v430_v25  ;;  %v5970_v19 = vcvt.s32.f32 %v4028_v57  ;;  %v5971_v33 = vcvt.s32.f32 %v4031_v59  ;;  %vm468_vm2 = vcmp.ge.f32.partialorder %v4089_v34, 1.0  ;;  %vm4223_vm8 = vmand %vm467_vm0, %vm487_vm1  ;;  %v6014_v20 = vld [vmem:[#allocation24_spill] sm:$0xff] }
  0xe4   : > { %v4185_v56 = vsub.f32 %v5965_v29, %v432_v22  ;;  %v4189_v39 = vsub.f32 %v5966_v48, %v433_v21  ;;  %vm488_vm6 = vcmp.le.f32.partialorder %v4089_v34, 8.0  ;;  %v5975_v57 = vmov 0  ;;  %vm542_vm14 = vmand %vm4148_vm12, %vm522_vm4  ;;  %v6015_v29 = vld [vmem:[#allocation26_spill] sm:$0xff] }
  0xe5   : > { %v4203_v52 = vsub.f32 %v5970_v19, %v435_v7  ;;  %v4207_v54 = vsub.f32 %v5971_v33, %v436_v3  ;;  %v5976_v57 = vsel %vm4223_vm8, 4294967295, %v5975_v57  ;;  %v5977_v59 = vunpack.c.l.bf16 %v3856_v17  ;;  %vm4247_vm8 = vmand %vm468_vm2, %vm488_vm6 }
  0xe6   : > { %v5978_v7 = vunpack.c.h.bf16 %v3856_v17  ;;  %vm489_vm13 = vcmp.le.f32.partialorder %v4091_v31, 8.0  ;;  %vm562_vm0 = vcmp.le.f32.partialorder %v442_v1, 8.0  ;;  %vm490_vm1 = vcmp.le.f32.partialorder %v4093_v11, 8.0 }
  0xe7   : > { %vm5982_vm9 = vcmp.ge.f32.partialorder %v4125_v51, 1.0  ;;  %vm5985_vm11 = vcmp.ge.f32.partialorder %v4091_v31, 1.0  ;;  %vm4276_vm12 = vmand %vm542_vm14, %vm562_vm0  ;;  %vm5991_vm14 = vcmp.ge.f32.partialorder %v4129_v16, 1.0  ;;  %vm564_vm4 = vcmp.le.f32.partialorder %v4129_v16, 8.0 }
  0xe8   : > { %vm4264_vm2 = vmand %vm4163_vm15, %vm5982_vm9  ;;  %vm5994_vm15 = vcmp.ge.f32.partialorder %v4093_v11, 1.0  ;;  %v6000_v16 = vunpack.c.l.bf16 %v3867_v24  ;;  %vm6002_vm6 = vcmp.ge.f32.partialorder %v4133_v53, 1.0  ;;  %v6005_v58 = vmov 0.0  }
  0xe9   : > { %vm4271_vm10 = vmand %vm5985_vm11, %vm489_vm13  ;;  %vm526_vm13 = vcmp.ge.f32.partialorder %v4137_v35, 1.0  ;;  %vm5997_vm11 = vcmp.le.f32.partialorder %v4125_v51, 8.0  ;;  %v6026_v19 = vunpack.c.l.bf16 %v6025_v13 }
  0xea   : > { %vm4297_vm0 = vmand %vm4179_vm3, %vm5991_vm14 }
  0xeb   : > { %vm4307_vm9 = vmand %vm5994_vm15, %vm490_vm1  ;;  %vm6007_vm1 = vcmp.le.f32.partialorder %v4095_v28, 8.0  ;;  %vm6008_vm15 = vcmp.ge.f32.partialorder %v4095_v28, 1.0 }
  0xec   : > { %vm4316_vm3 = vmand %vm4264_vm2, %vm5997_vm11  ;;  %vm565_vm11 = vcmp.le.f32.partialorder %v4133_v53, 8.0 }
  0xed   : > { %vm4334_vm2 = vmand %vm4197_vm5, %vm6002_vm6  ;;  %v4382_v48 = vsel %vm4316_vm3, 1.0, %v6005_v58  ;;  %vm6033_vm6 = vcmp.le.f32.partialorder %v4099_v9, 8.0  ;;  %vm6034_vm3 = vcmp.ge.f32.partialorder %v4099_v9, 1.0 }
  0xee   : > { %vm4348_vm14 = vmand %vm6008_vm15, %vm6007_vm1  ;;  %vm566_vm1 = vcmp.le.f32.partialorder %v4137_v35, 8.0  ;;  %6018 = vst [vmem:[#allocation26_spill] sm:$0xff] %v4382_v48  ;;  %vm6019_vm15 = vcmp.le.f32.partialorder %v4097_v14, 8.0 }
  0xef   : > { %vm4354_vm5 = vmand %vm4297_vm0, %vm564_vm4 }
  0xf0   : > { %vm4374_vm0 = vmand %vm4215_vm7, %vm526_vm13 }
  0xf1   : > { %vm4397_vm13 = vmand %vm4334_vm2, %vm565_vm11 }
 0x1a7   : > { %v773_v62 = vpop.f32.mrb[0].mxu0 }
 0x1a8   : > { %v777_v44 = vmul.f32 0.015625, %v773_v62  ;;  %v2840_v37 = vpop.f32.mrb[1].mxu0  ;;  %v5958_v62 = vcvt.s32.f32 %v4010_v47 }
 0x1a9   : > { %v5954_v37 = vcvt.s32.f32 %v4007_v45 }
 0x1aa   : > { %v4154_v41 = vrot.slane %v777_v44, %v5957_v40  ;;  %v4158_v42 = vsub.f32 %v5958_v62, %v429_v27  ;;  %v5962_v44 = vcvt.s32.f32 %v4016_v50  ;;  %v5967_v50 = vcvt.s32.f32 %v4025_v55 }
 0x1ab   : > { %v4145_v26 = vsub.f32 %v5954_v37, %v428_v4  ;;  %v5990_v4 = vunpack.c.h.bf16 %v3859_v18  ;;  %v4342_v37 = vsel %vm4276_vm12, 1.0, %v6005_v58  ;;  %v6013_v62 = vunpack.c.h.bf16 %v3867_v24 }
 0x1ac   : > { %v4173_v43 = vsub.f32 %v5962_v44, %v431_v23  ;;  %v4193_v63 = vsub.f32 %v5967_v50, %v434_v10  ;;  %v5974_v10 = vcvt.s32.f32 %v4034_v61  ;;  %v4231_v3 = vsub.f32 %v5977_v59, %v4154_v41  ;;  %6006 = vst [vmem:[#allocation25_spill] sm:$0xff] %v4342_v37 }
 0x1ad   : > { %v4236_v30 = vsub.f32 %v5978_v7, %v4154_v41  ;;  %v5981_v61 = vunpack.c.l.bf16 %v3859_v18  ;;  %v4283_v27 = vsub.f32 %v5990_v4, %v4154_v41  ;;  %v4323_v21 = vsub.f32 %v6000_v16, %v4154_v41  ;;  %v6051_v16 = vld [vmem:[#allocation17_spill] sm:$0xff] }
 0x1ae   : > { %v4221_v55 = vsub.f32 %v5974_v10, %v437_v0  ;;  %v802_v25 = vmul.f32 %v3977_v6, %v4231_v3  ;;  %v4361_v45 = vsub.f32 %v6013_v62, %v4154_v41  ;;  %vm6020_vm12 = vcmp.ge.f32.partialorder %v4097_v14, 1.0 }
 0x1af   : > { %v4255_v0 = vsub.f32 %v5981_v61, %v4154_v41  ;;  %v803_v31 = vmul.f32 %v3980_v8, %v4236_v30  ;;  %v805_v44 = vmul.f32 %v6014_v20, %v4283_v27  ;;  %vm4388_vm4 = vmand %vm6020_vm12, %vm6019_vm15  ;;  %vm528_vm7 = vcmp.ge.f32.partialorder %v4145_v26, 1.0 }
 0x1b0   : > { %v822_v28 = vmul.f32 %v802_v25, %v4231_v3  ;;  %v4404_v33 = vsub.f32 %v6026_v19, %v4154_v41  ;;  %v806_v14 = vmul.f32 %v4342_v37, %v4323_v21  ;;  %vm6027_vm12 = vcmp.ge.f32.partialorder %v4141_v36, 1.0 }
 0x1b1   : > { %v804_v11 = vmul.f32 %v3983_v15, %v4255_v0  ;;  %v823_v47 = vmul.f32 %v803_v31, %v4236_v30  ;;  %vm6028_vm15 = vnez %v5976_v57  ;;  %v4422_v10 = vsel %vm4354_vm5, 1.0, %v6005_v58 }
 0x1b2   : > { %vm4414_vm2 = vmand %vm6028_vm15, %vm6027_vm12  ;;  %6031 = vst [vmem:[#allocation16_spill] sm:$0xff] %v4422_v10  ;;  %v6032_v59 = vunpack.c.h.bf16 %v6025_v13  ;;  %v807_v1 = vmul.f32 %v4382_v48, %v4361_v45  ;;  %v825_v32 = vmul.f32 %v805_v44, %v4283_v27  ;;  %vm6039_vm5 = vcmask 261120  }
 0x1b3   : > { %v824_v49 = vmul.f32 %v804_v11, %v4255_v0  ;;  %vm4433_vm12 = vmand %vm6034_vm3, %vm6033_vm6  ;;  %v842_v4 = vsel %vm6039_vm5, %v822_v28, 0.0  ;;  %v4461_v31 = vsel %vm4397_vm13, 1.0, %v6005_v58  ;;  %v6052_v11 = vunpack.c.l.bf16 %v6051_v16 }
 0x1b4   : > { %v4427_v7 = vsub.f32 %v6032_v59, %v4154_v41  ;;  %vm4439_vm15 = vmand %vm4374_vm0, %vm566_vm1  ;;  %vm568_vm0 = vcmp.le.f32.partialorder %v4145_v26, 8.0  ;;  %6043 = vst [vmem:[#allocation27_spill] sm:$0xff] %v4461_v31  ;;  %vm6044_vm1 = vcmp.le.f32.partialorder %v4101_v5, 8.0  ;;  %v826_v40 = vmul.f32 %v806_v14, %v4323_v21  ;;  %v6076_v59 = vld [vmem:[#allocation18_spill] sm:$0xff] }
 0x1b5   : > { %vm6040_vm11 = vmmov %vm6039_vm5  ;;  %v4482_v51 = vsub.f32 %v6052_v11, %v4154_v41  ;;  %vm6053_vm13 = vcmask 261120   ;;  %v4501_v44 = vsel %vm4439_vm15, 1.0, %v6005_v58  ;;  %v6064_v24 = vunpack.c.h.bf16 %v6051_v16 }
 0x1b6   : > { %v843_v25 = vsel %vm6040_vm11, %v823_v47, 0.0  ;;  %vm4453_vm3 = vmand %vm4247_vm8, %vm528_vm7  ;;  %vm6045_vm11 = vcmp.ge.f32.partialorder %v4101_v5, 1.0  ;;  %vm6048_vm8 = vcmp.le.f32.partialorder %v4141_v36, 8.0  ;;  %v808_v5 = vmul.f32 %v4422_v10, %v4404_v33  ;;  %6057 = vst [vmem:[#allocation17_spill] sm:$0xff] %v4501_v44 }
 0x1b7   : > { %v844_v18 = vadd.f32 %v843_v25, %v842_v4  ;;  %vm4467_vm5 = vmand %vm6045_vm11, %vm6044_vm1  ;;  %v845_v62 = vsel %vm6053_vm13, %v824_v49, 0.0  ;;  %vm6054_vm11 = vcmp.ge.f32.partialorder %v4158_v42, 1.0  ;;  %vm6058_vm13 = vcmp.le.f32.partialorder %v4103_v60, 8.0 }
 0x1b8   : > { %vm4475_vm7 = vmand %vm4414_vm2, %vm6048_vm8  ;;  %vm569_vm8 = vcmp.le.f32.partialorder %v4158_v42, 8.0  ;;  %vm6059_vm1 = vcmp.ge.f32.partialorder %v4103_v60, 1.0  ;;  %v4522_v35 = vsub.f32 %v6064_v24, %v4154_v41  ;;  %v809_v60 = vmul.f32 %v4461_v31, %v4427_v7 }
 0x1b9   : > { %vm4493_vm2 = vmand %vm4271_vm10, %vm6054_vm11  ;;  %v846_v28 = vadd.f32 %v845_v62, %v844_v18  ;;  %v827_v13 = vmul.f32 %v807_v1, %v4361_v45  ;;  %vm6065_vm15 = vcmask 261120   ;;  %vm6066_vm11 = vcmp.ge.f32.partialorder %v4169_v46, 1.0  ;;  %v6095_v62 = vld [vmem:[#allocation19_spill] sm:$0xff] }
 0x1ba   : > { %vm4507_vm6 = vmand %vm6059_vm1, %vm6058_vm13  ;;  %v847_v19 = vsel %vm6065_vm15, %v825_v32, 0.0  ;;  %v4541_v14 = vsel %vm4475_vm7, 1.0, %v6005_v58  ;;  %vm6070_vm13 = vcmp.le.f32.partialorder %v6001_v12, 8.0  ;;  %vm6071_vm15 = vcmp.ge.f32.partialorder %v6001_v12, 1.0 }
 0x1bb   : > { %vm4515_vm10 = vmand %vm4453_vm3, %vm568_vm0  ;;  %vm570_vm0 = vcmp.le.f32.partialorder %v4169_v46, 8.0  ;;  %6069 = vst [vmem:[#allocation28_spill] sm:$0xff] %v4541_v14  ;;  %v848_v49 = vadd.f32 %v847_v19, %v846_v28  ;;  %v6077_v61 = vunpack.c.l.bf16 %v6076_v59  ;;  %v810_v12 = vmul.f32 %v4501_v44, %v4482_v51 }
 0x1bc   : > { %vm4533_vm3 = vmand %vm4307_vm9, %vm6066_vm11  ;;  %v828_v32 = vmul.f32 %v808_v5, %v4404_v33  ;;  %vm6078_vm7 = vcmask 261120   ;;  %v4581_v25 = vsel %vm4515_vm10, 1.0, %v6005_v58  ;;  %v6089_v38 = vunpack.c.h.bf16 %v6076_v59 }
 0x1bd   : > { %vm4547_vm1 = vmand %vm6071_vm15, %vm6070_vm13  ;;  %v4562_v1 = vsub.f32 %v6077_v61, %v4154_v41  ;;  %v849_v4 = vsel %vm6078_vm7, %v826_v40, 0.0  ;;  %vm6079_vm13 = vcmp.ge.f32.partialorder %v4173_v43, 1.0  ;;  %6082 = vst [vmem:[#allocation18_spill] sm:$0xff] %v4581_v25  ;;  %vm6083_vm15 = vcmp.le.f32.partialorder %v6015_v29, 8.0 }
 0x1be   : > { %vm4555_vm9 = vmand %vm4493_vm2, %vm569_vm8  ;;  %vm571_vm8 = vcmp.le.f32.partialorder %v4173_v43, 8.0  ;;  %v850_v9 = vadd.f32 %v849_v4, %v848_v49  ;;  %vm6084_vm7 = vcmp.ge.f32.partialorder %v6015_v29, 1.0  ;;  %v4602_v17 = vsub.f32 %v6089_v38, %v4154_v41 }
 0x1bf   : > { %vm4573_vm2 = vmand %vm4348_vm14, %vm6079_vm13  ;;  %v811_v29 = vmul.f32 %v4541_v14, %v4522_v35  ;;  %v829_v16 = vmul.f32 %v809_v60, %v4427_v7  ;;  %vm6090_vm10 = vcmask 261120   ;;  %vm534_vm13 = vcmp.ge.f32.partialorder %v4193_v63, 1.0 }
 0x1c0   : > { %vm4587_vm11 = vmand %vm6084_vm7, %vm6083_vm15  ;;  %v851_v11 = vsel %vm6090_vm10, %v827_v13, 0.0  ;;  %vm6091_vm15 = vcmp.ge.f32.partialorder %v4185_v56, 1.0  ;;  %v4617_v46 = vsel %vm4555_vm9, 1.0, %v6005_v58  ;;  %v6096_v36 = vunpack.c.l.bf16 %v6095_v62 }
 0x1c1   : > { %vm4595_vm14 = vmand %vm4533_vm3, %vm570_vm0  ;;  %vm572_vm0 = vcmp.le.f32.partialorder %v4185_v56, 8.0  ;;  %6092 = vst [vmem:[#allocation29_spill] sm:$0xff] %v4617_v46  ;;  %v852_v5 = vadd.f32 %v851_v11, %v850_v9  ;;  %v812_v56 = vmul.f32 %v4581_v25, %v4562_v1  ;;  %v830_v50 = vmul.f32 %v810_v12, %v4482_v51  ;;  %v6107_v12 = vld [vmem:[#allocation20_spill] sm:$0xff] }
 0x1c2   : > { %vm552_vm3 = vmand %vm4388_vm4, %vm6091_vm15  ;;  %v4628_v28 = vsub.f32 %v6096_v36, %v4154_v41  ;;  %vm535_vm9 = vcmp.ge.f32.partialorder %v4203_v52, 1.0  ;;  %v4643_v24 = vsel %vm4595_vm14, 1.0, %v6005_v58  ;;  %v6102_v19 = vunpack.c.h.bf16 %v6095_v62  ;;  %v6116_v62 = vld [vmem:[#allocation21_spill] sm:$0xff] }
 0x1c3   : > { %vm4621_vm7 = vmand %vm4573_vm2, %vm571_vm8  ;;  %vm573_vm8 = vcmp.le.f32.partialorder %v4189_v39, 8.0  ;;  %6099 = vst [vmem:[#allocation19_spill] sm:$0xff] %v4643_v24  ;;  %v813_v57 = vmul.f32 %v4617_v46, %v4602_v17  ;;  %vm536_vm14 = vcmp.ge.f32.partialorder %v4207_v54, 1.0  ;;  %v6117_v36 = vunpack.c.l.bf16 %v6116_v62 }
 0x1c4   : > { %vm6097_vm4 = vmmov %vm6090_vm10  ;;  %vm6098_vm10 = vcmp.ge.f32.partialorder %v4189_v39, 1.0  ;;  %v4652_v26 = vsub.f32 %v6102_v19, %v4154_v41  ;;  %v831_v39 = vmul.f32 %v811_v29, %v4522_v35  ;;  %v4667_v23 = vsel %vm4621_vm7, 1.0, %v6005_v58 }
 0x1c5   : > { %v853_v34 = vsel %vm6097_vm4, %v828_v32, 0.0  ;;  %vm553_vm2 = vmand %vm4433_vm12, %vm6098_vm10  ;;  %6104 = vst [vmem:[#allocation30_spill] sm:$0xff] %v4667_v23  ;;  %v6108_v32 = vunpack.c.l.bf16 %v6107_v12  ;;  %v814_v22 = vmul.f32 %v4643_v24, %v4628_v28  ;;  %vm575_vm10 = vcmp.le.f32.partialorder %v4203_v52, 8.0 }
 0x1c6   : > { %v854_v60 = vadd.f32 %v853_v34, %v852_v5  ;;  %vm4645_vm15 = vmand %vm552_vm3, %vm572_vm0  ;;  %vm574_vm0 = vcmp.le.f32.partialorder %v4193_v63, 8.0  ;;  %v832_v63 = vmul.f32 %v812_v56, %v4562_v1  ;;  %v6113_v29 = vunpack.c.h.bf16 %v6107_v12 }
 0x1c7   : > { %vm6103_vm12 = vmmov %vm6097_vm4  ;;  %v4676_v4 = vsub.f32 %v6108_v32, %v4154_v41  ;;  %v4691_v9 = vsel %vm4645_vm15, 1.0, %v6005_v58  ;;  %v815_v47 = vmul.f32 %v4667_v23, %v4652_v26  ;;  %v833_v52 = vmul.f32 %v813_v57, %v4602_v17 }
 0x1c8   : > { %v855_v49 = vsel %vm6103_vm12, %v829_v16, 0.0  ;;  %vm554_vm3 = vmand %vm4467_vm5, %vm534_vm13  ;;  %vm537_vm13 = vcmp.ge.f32.partialorder %v4221_v55, 1.0  ;;  %6110 = vst [vmem:[#allocation20_spill] sm:$0xff] %v4691_v9  ;;  %v4700_v16 = vsub.f32 %v6113_v29, %v4154_v41  ;;  %v798_v56 = vsub.f32 %v6117_v36, %v4154_v41 }
 0x1c9   : > { %v856_v59 = vadd.f32 %v855_v49, %v854_v60  ;;  %vm4669_vm4 = vmand %vm553_vm2, %vm573_vm8  ;;  %vm576_vm8 = vcmp.le.f32.partialorder %v4207_v54, 8.0  ;;  %v834_v34 = vmul.f32 %v814_v22, %v4628_v28  ;;  %v6120_v13 = vunpack.c.h.bf16 %v6116_v62 }
 0x1ca   : > { %vm6109_vm5 = vmmov %vm6103_vm12  ;;  %v4714_v5 = vsel %vm4669_vm4, 1.0, %v6005_v58 }
 0x1cb   : > { %v857_v42 = vsel %vm6109_vm5, %v830_v50, 0.0  ;;  %vm555_vm7 = vmand %vm4507_vm6, %vm535_vm9  ;;  %6115 = vst [vmem:[#allocation31_spill] sm:$0xff] %v4714_v5  ;;  %v816_v50 = vmul.f32 %v4691_v9, %v4676_v4  ;;  %v799_v19 = vsub.f32 %v6120_v13, %v4154_v41  ;;  %v817_v57 = vmul.f32 %v4714_v5, %v4700_v16 }
 0x1cc   : > { %v858_v43 = vadd.f32 %v857_v42, %v856_v59  ;;  %vm4693_vm2 = vmand %vm554_vm3, %vm574_vm0  ;;  %v6123_v59 = vld [vmem:[#allocation22_spill] sm:$0xff] }
 0x1cd   : > { %vm6114_vm6 = vmmov %vm6109_vm5  ;;  %v4731_v54 = vsel %vm4693_vm2, 1.0, %v6005_v58  ;;  %v6124_v61 = vunpack.c.l.bf16 %v6123_v59  ;;  %v836_v22 = vmul.f32 %v816_v50, %v4676_v4  ;;  %v6126_v38 = vunpack.c.h.bf16 %v6123_v59 }
 0x1ce   : > { %v859_v11 = vsel %vm6114_vm6, %v831_v39, 0.0  ;;  %vm556_vm9 = vmand %vm4547_vm1, %vm536_vm14  ;;  %vm577_vm14 = vcmp.le.f32.partialorder %v4221_v55, 8.0  ;;  %6119 = vst [vmem:[#allocation21_spill] sm:$0xff] %v4731_v54  ;;  %v835_v39 = vmul.f32 %v815_v47, %v4652_v26  ;;  %v818_v32 = vmul.f32 %v4731_v54, %v798_v56 }
 0x1cf   : > { %v860_v40 = vadd.f32 %v859_v11, %v858_v43  ;;  %vm595_vm15 = vmand %vm555_vm7, %vm575_vm10  ;;  %v4746_v12 = vsub.f32 %v6124_v61, %v4154_v41  ;;  %v4757_v29 = vsub.f32 %v6126_v38, %v4154_v41 }
 0x1d0   : > { %vm6118_vm12 = vmmov %vm6109_vm5  ;;  %v4741_v55 = vsel %vm595_vm15, 1.0, %v6005_v58  ;;  %v838_v50 = vmul.f32 %v818_v32, %v798_v56  ;;  %vm1297_vm15 = vcmask 1045504  }
 0x1d1   : > { %v861_v53 = vsel %vm6118_vm12, %v832_v63, 0.0  ;;  %vm557_vm1 = vmand %vm4587_vm11, %vm537_vm13  ;;  %6122 = vst [vmem:[#allocation32_spill] sm:$0xff] %v4741_v55  ;;  %v819_v47 = vmul.f32 %v4741_v55, %v799_v19  ;;  %vm1217_vm12 = vcmask 1046528  }
 0x1d2   : > { %v862_v60 = vadd.f32 %v861_v53, %v860_v40  ;;  %vm596_vm3 = vmand %vm556_vm9, %vm576_vm8 }
 0x1d3   : > { %vm6121_vm0 = vmmov %vm6109_vm5  ;;  %v4752_v42 = vsel %vm596_vm3, 1.0, %v6005_v58 }
 0x1d4   : > { %v863_v18 = vsel %vm6121_vm0, %v833_v52, 0.0  ;;  %vm597_vm11 = vmand %vm557_vm1, %vm577_vm14  ;;  %v837_v52 = vmul.f32 %v817_v57, %v4700_v16  ;;  %v820_v36 = vmul.f32 %v4752_v42, %v4746_v12  ;;  %vm1637_vm1 = vcmask 523264  }
 0x1d5   : > { %v864_v49 = vadd.f32 %v863_v18, %v862_v60  ;;  %vm6125_vm4 = vmmov %vm6121_vm0  ;;  %v4763_v40 = vsel %vm597_vm11, 1.0, %v6005_v58  ;;  %v839_v60 = vmul.f32 %v819_v47, %v799_v19  ;;  %vm1654_vm14 = vcmask 785408  }
 0x1d6   : > { %v865_v63 = vsel %vm6125_vm4, %v834_v34, 0.0  ;;  %vm6127_vm5 = vmmov %vm6121_vm0  ;;  %v821_v41 = vmul.f32 %v4763_v40, %v4757_v29 }
 0x1d7   : > { %v866_v43 = vadd.f32 %v865_v63, %v864_v49  ;;  %v867_v11 = vsel %vm6127_vm5, %v835_v39, 0.0  ;;  %vm6128_vm13 = vmmov %vm6121_vm0  ;;  %v840_v39 = vmul.f32 %v820_v36, %v4746_v12 }
 0x1d8   : > { %v869_v34 = vsel %vm6128_vm13, %v836_v22, 0.0  ;;  %vm6129_vm7 = vmmov %vm6121_vm0  ;;  %v841_v49 = vmul.f32 %v821_v41, %v4757_v29 }
 0x1d9   : > { %v868_v62 = vadd.f32 %v867_v11, %v866_v43  ;;  %v871_v13 = vsel %vm6129_vm7, %v837_v52, 0.0  ;;  %vm6130_vm10 = vmmov %vm6121_vm0 }
 0x1da   : > { %v873_v58 = vsel %vm6130_vm10, %v838_v50, 0.0  ;;  %vm6131_vm2 = vmmov %vm6121_vm0 }
 0x1db   : > { %v870_v53 = vadd.f32 %v869_v34, %v868_v62  ;;  %v875_v59 = vsel %vm6131_vm2, %v839_v60, 0.0  ;;  %vm6132_vm6 = vmmov %vm6121_vm0 }
 0x1dc   : > { %v877_v32 = vsel %vm6132_vm6, %v840_v39, 0.0  ;;  %vm6133_vm9 = vmmov %vm6121_vm0  ;;  %v4782_v39 = vld [vmem:[#allocation5] ss:$0 sm:$0xff] }
 0x1dd   : > { %v872_v57 = vadd.f32 %v871_v13, %v870_v53  ;;  %v879_v63 = vsel %vm6133_vm9, %v841_v49, 0.0  ;;  %vm6134_vm8 = vmmov %vm6121_vm0  ;;  %v6135_v13 = vsub.s32 0, %v3837_v2 }
 0x1de   : > { %vm6170_vm3 = vmmov %vm6121_vm0 }
 0x1df   : > { %v874_v18 = vadd.f32 %v873_v58, %v872_v57  ;;  %vm6171_vm11 = vmmov %vm6121_vm0 }
 0x1e0   : > { %vm6172_vm4 = vmmov %vm6121_vm0 }
 0x1e1   : > { %v876_v61 = vadd.f32 %v875_v59, %v874_v18  ;;  %vm6173_vm5 = vmmov %vm6121_vm0 }
 0x1e2   : > { %vm6174_vm13 = vmmov %vm6121_vm0 }
 0x1e3   : > { %v878_v22 = vadd.f32 %v877_v32, %v876_v61  ;;  %v4790_v61 = vld [vmem:[#allocation7] ss:$0 sm:$0xff]  ;;  %vm6175_vm7 = vmmov %vm6121_vm0 }
 0x1e4   : > { %vm6176_vm10 = vmmov %vm6121_vm0 }
 0x1e5   : > { %v880_v43 = vadd.f32 %v879_v63, %v878_v22  ;;  %vm6177_vm2 = vmmov %vm6121_vm0 }
 0x1e6   : > { %vm6178_vm6 = vmmov %vm6121_vm0 }
 0x1e7   : > { %v881_v38 = vrot.slane %v880_v43, 4  ;;  %vm6179_vm9 = vmmov %vm6121_vm0 }
 0x1e9   : > { %v882_v47 = vadd.f32 %v881_v38, %v880_v43 }
 0x1eb   : > { %v883_v52 = vrot.slane %v882_v47, 2 }
 0x1ed   : > { %v884_v11 = vadd.f32 %v883_v52, %v882_v47 }
 0x1ef   : > { %v885_v62 = vrot.slane %v884_v11, 1 }
 0x1f1   : > { %v886_v36 = vadd.f32 %v885_v62, %v884_v11 }
 0x1f3   : > { %2850 = vmatmul.mubr.msk.f32.vlgmr.msra.gmra.mrb[0].mxu1 %vm6134_vm8, %v886_v36  ;;  %vm6180_vm8 = vmmov %vm6121_vm0 }
 0x2c6   : > { %v956_v50 = vpop.f32.mrb[0].mxu1 }
 0x2c7   : > { %v960_v34 = vmul.f32 0.015625, %v956_v50  ;;  %v2851_v53 = vpop.f32.mrb[1].mxu1 }
 0x2c9   : > { %v961_v41 = vadd.f32 1e-06, %v960_v34 }
 0x2cb   : > { %3260 = vrsqrt.f32 %v961_v41 }
 0x2d5   : > { %v3261_v60 = vpop.eup %3260 }
 0x2d6   : > { %v4780_v57 = vrot.slane %v3261_v60, %v6135_v13 }
 0x2d8   : > { %v983_v58 = vmul.f32 %v4780_v57, %v798_v56  ;;  %v984_v18 = vmul.f32 %v4780_v57, %v799_v19  ;;  %v971_v49 = vmul.f32 %v4780_v57, %v4323_v21  ;;  %v972_v59 = vmul.f32 %v4780_v57, %v4361_v45 }
 0x2d9   : > { %v973_v32 = vmul.f32 %v4780_v57, %v4404_v33  ;;  %v974_v2 = vmul.f32 %v4780_v57, %v4427_v7  ;;  %v969_v22 = vmul.f32 %v4780_v57, %v4255_v0  ;;  %v970_v56 = vmul.f32 %v4780_v57, %v4283_v27 }
 0x2da   : > { %v1010_v19 = vmul.f32 %v4782_v39, %v983_v58  ;;  %v1011_v21 = vmul.f32 %v4782_v39, %v984_v18  ;;  %v998_v45 = vmul.f32 %v4782_v39, %v971_v49  ;;  %v999_v63 = vmul.f32 %v4782_v39, %v972_v59 }
 0x2db   : > { %v1000_v43 = vmul.f32 %v4782_v39, %v973_v32  ;;  %v1001_v33 = vmul.f32 %v4782_v39, %v974_v2  ;;  %v996_v7 = vmul.f32 %v4782_v39, %v969_v22  ;;  %v997_v38 = vmul.f32 %v4782_v39, %v970_v56 }
 0x2dc   : > { %v4809_v0 = vadd.f32 %v4790_v61, %v1010_v19  ;;  %v4812_v27 = vadd.f32 %v4790_v61, %v1011_v21  ;;  %v4815_v47 = vadd.f32 %v4790_v61, %v998_v45  ;;  %v4818_v52 = vadd.f32 %v4790_v61, %v999_v63 }
 0x2dd   : > { %v4821_v11 = vadd.f32 %v4790_v61, %v1000_v43  ;;  %v4824_v62 = vadd.f32 %v4790_v61, %v1001_v33  ;;  %v4827_v36 = vadd.f32 %v4790_v61, %v996_v7  ;;  %v4830_v50 = vadd.f32 %v4790_v61, %v997_v38 }
 0x2de   : > { %v2631_v34 = vmul.f32 -1.442695, %v4809_v0  ;;  %v2632_v53 = vmul.f32 -1.442695, %v4812_v27  ;;  %v2619_v41 = vmul.f32 -1.442695, %v4815_v47  ;;  %v985_v60 = vmul.f32 %v4780_v57, %v4746_v12 }
 0x2df   : > { %v2620_v13 = vmul.f32 -1.442695, %v4818_v52  ;;  %v2621_v58 = vmul.f32 -1.442695, %v4821_v11  ;;  %v986_v18 = vmul.f32 %v4780_v57, %v4757_v29  ;;  %v2622_v49 = vmul.f32 -1.442695, %v4824_v62 }
 0x2e0   : > { %3262 = vpow2.f32 %v2631_v34  ;;  %v2617_v59 = vmul.f32 -1.442695, %v4827_v36  ;;  %v1012_v32 = vmul.f32 %v4782_v39, %v985_v60  ;;  %v981_v12 = vmul.f32 %v4780_v57, %v4676_v4 }
 0x2e1   : > { %3264 = vpow2.f32 %v2632_v53  ;;  %v1013_v2 = vmul.f32 %v4782_v39, %v986_v18  ;;  %v982_v22 = vmul.f32 %v4780_v57, %v4700_v16  ;;  %v2618_v56 = vmul.f32 -1.442695, %v4830_v50 }
 0x2e2   : > { %3266 = vpow2.f32 %v2619_v41  ;;  %v4851_v29 = vadd.f32 %v4790_v61, %v1012_v32  ;;  %v975_v19 = vmul.f32 %v4780_v57, %v4482_v51  ;;  %v1008_v45 = vmul.f32 %v4782_v39, %v981_v12 }
 0x2e3   : > { %3268 = vpow2.f32 %v2620_v13  ;;  %v4856_v21 = vadd.f32 %v4790_v61, %v1013_v2  ;;  %v1009_v4 = vmul.f32 %v4782_v39, %v982_v22  ;;  %v976_v41 = vmul.f32 %v4780_v57, %v4522_v35 }
 0x2e4   : > { %3270 = vpow2.f32 %v2621_v58  ;;  %v2633_v16 = vmul.f32 -1.442695, %v4851_v29  ;;  %v1002_v63 = vmul.f32 %v4782_v39, %v975_v19  ;;  %v4864_v33 = vadd.f32 %v4790_v61, %v1008_v45 }
 0x2e5   : > { %3272 = vpow2.f32 %v2622_v49  ;;  %v2634_v43 = vmul.f32 -1.442695, %v4856_v21  ;;  %v4867_v51 = vadd.f32 %v4790_v61, %v1009_v4  ;;  %v977_v18 = vmul.f32 %v4780_v57, %v4562_v1 }
 0x2e6   : > { %3274 = vpow2.f32 %v2617_v59  ;;  %v4870_v7 = vadd.f32 %v4790_v61, %v1002_v63  ;;  %v2629_v38 = vmul.f32 -1.442695, %v4864_v33  ;;  %v978_v32 = vmul.f32 %v4780_v57, %v4602_v17 }
 0x2e7   : > { %3276 = vpow2.f32 %v2618_v56  ;;  %v2630_v34 = vmul.f32 -1.442695, %v4867_v51  ;;  %v1003_v22 = vmul.f32 %v4782_v39, %v976_v41  ;;  %v979_v35 = vmul.f32 %v4780_v57, %v4628_v28 }
 0x2e8   : > { %3278 = vpow2.f32 %v2633_v16  ;;  %v2623_v53 = vmul.f32 -1.442695, %v4870_v7  ;;  %v980_v1 = vmul.f32 %v4780_v57, %v4652_v26  ;;  %v1004_v16 = vmul.f32 %v4782_v39, %v977_v18 }
 0x2e9   : > { %3280 = vpow2.f32 %v2634_v43  ;;  %v1005_v43 = vmul.f32 %v4782_v39, %v978_v32  ;;  %v4889_v28 = vadd.f32 %v4790_v61, %v1003_v22 }
 0x2ea   : > { %v3263_v60 = vpop.eup %3262  ;;  %3282 = vpow2.f32 %v2629_v38 }
 0x2eb   : > { %v3265_v13 = vpop.eup %3264  ;;  %v1117_v58 = vadd.f32 1.0, %v3263_v60  ;;  %3284 = vpow2.f32 %v2630_v34  ;;  %v1007_v60 = vmul.f32 %v4782_v39, %v980_v1 }
 0x2ec   : > { %v3267_v49 = vpop.eup %3266  ;;  %v1118_v59 = vadd.f32 1.0, %v3265_v13  ;;  %3286 = vpow2.f32 %v2623_v53  ;;  %v1006_v53 = vmul.f32 %v4782_v39, %v979_v35  ;;  %v967_v13 = vmul.f32 %v4780_v57, %v4231_v3 }
 0x2ed   : > { %v3269_v2 = vpop.eup %3268  ;;  %3288 = vrcp.f32 %v1117_v58  ;;  %v1105_v12 = vadd.f32 1.0, %v3267_v49  ;;  %v4896_v49 = vadd.f32 %v4790_v61, %v1004_v16  ;;  %v2624_v3 = vmul.f32 -1.442695, %v4889_v28 }
 0x2ee   : > { %v3271_v56 = vpop.eup %3270  ;;  %3290 = vrcp.f32 %v1118_v59  ;;  %v1106_v19 = vadd.f32 1.0, %v3269_v2  ;;  %v4899_v2 = vadd.f32 %v4790_v61, %v1005_v43 }
 0x2ef   : > { %v3273_v45 = vpop.eup %3272  ;;  %3292 = vrcp.f32 %v1105_v12  ;;  %v1107_v4 = vadd.f32 1.0, %v3271_v56  ;;  %v968_v12 = vmul.f32 %v4780_v57, %v4236_v30  ;;  %v4905_v56 = vadd.f32 %v4790_v61, %v1006_v53 }
 0x2f0   : > { %v3275_v17 = vpop.eup %3274  ;;  %3294 = vrcp.f32 %v1106_v19  ;;  %v1108_v63 = vadd.f32 1.0, %v3273_v45  ;;  %v4908_v45 = vadd.f32 %v4790_v61, %v1007_v60  ;;  %v2625_v30 = vmul.f32 -1.442695, %v4896_v49 }
 0x2f1   : > { %v3277_v38 = vpop.eup %3276  ;;  %3296 = vrcp.f32 %v1107_v4  ;;  %v1103_v34 = vadd.f32 1.0, %v3275_v17  ;;  %v994_v4 = vmul.f32 %v4782_v39, %v967_v13  ;;  %v995_v43 = vmul.f32 %v4782_v39, %v968_v12 }
 0x2f2   : > { %v3279_v41 = vpop.eup %3278  ;;  %3298 = vrcp.f32 %v1108_v63  ;;  %v1104_v26 = vadd.f32 1.0, %v3277_v38  ;;  %v2626_v63 = vmul.f32 -1.442695, %v4899_v2  ;;  %v2627_v53 = vmul.f32 -1.442695, %v4905_v56 }
 0x2f3   : > { %v3281_v58 = vpop.eup %3280  ;;  %3300 = vrcp.f32 %v1103_v34  ;;  %v1119_v18 = vadd.f32 1.0, %v3279_v41  ;;  %v2628_v13 = vmul.f32 -1.442695, %v4908_v45 }
 0x2f4   : > { %v3283_v59 = vpop.eup %3282  ;;  %3302 = vrcp.f32 %v1104_v26  ;;  %v1120_v32 = vadd.f32 1.0, %v3281_v58 }
 0x2f5   : > { %v3285_v22 = vpop.eup %3284  ;;  %3304 = vrcp.f32 %v1119_v18  ;;  %v1115_v35 = vadd.f32 1.0, %v3283_v59 }
 0x2f6   : > { %v3287_v19 = vpop.eup %3286  ;;  %3306 = vrcp.f32 %v1120_v32  ;;  %v1116_v1 = vadd.f32 1.0, %v3285_v22  ;;  %v3242_v22 = vld [vmem:[#allocation8 + $0x40] sm:$0xff]  }
 0x2f7   : > { %v3289_v16 = vpop.eup %3288  ;;  %3308 = vrcp.f32 %v1115_v35  ;;  %v1109_v18 = vadd.f32 1.0, %v3287_v19  ;;  %v3243_v35 = vld [vmem:[#allocation8] sm:$0xff]   ;;  %2756 = vmatprep.subr.bf16.mxu0 %v3242_v22  ;;  %2884 = vmatprep.subr.bf16.mxu1 %v3242_v22 }
 0x2f8   : > { %v3291_v57 = vpop.eup %3290  ;;  %v1177_v17 = vmul.f32 %v3289_v16, %v4809_v0  ;;  %3310 = vrcp.f32 %v1116_v1  ;;  %v4923_v0 = vadd.f32 %v4790_v61, %v994_v4  ;;  %2757 = vmatpush3.bf16.msra.mxu0 %v3243_v35  ;;  %2892 = vmatpush3.bf16.msra.mxu1 %v3243_v35 }
 0x2f9   : > { %v3293_v38 = vpop.eup %3292  ;;  %v1178_v34 = vmul.f32 %v3291_v57, %v4812_v27  ;;  %3312 = vpow2.f32 %v2624_v3 }
 0x2fa   : > { %v3295_v41 = vpop.eup %3294  ;;  %v4918_v26 = vmul.f32 %v4731_v54, %v1177_v17  ;;  %v1165_v60 = vmul.f32 %v3293_v38, %v4815_v47  ;;  %3314 = vpow2.f32 %v2625_v30  ;;  %v4934_v47 = vadd.f32 %v4790_v61, %v995_v43 }
 0x2fb   : > { %v3297_v58 = vpop.eup %3296  ;;  %v4926_v39 = vmul.f32 %v4741_v55, %v1178_v34  ;;  %v1166_v27 = vmul.f32 %v3295_v41, %v4818_v52  ;;  %3316 = vpow2.f32 %v2626_v63  ;;  %v2615_v61 = vmul.f32 -1.442695, %v4923_v0 }
 0x2fc   : > { %v3299_v59 = vpop.eup %3298  ;;  %v4930_v32 = vmul.f32 %v4342_v37, %v1165_v60  ;;  %v1167_v12 = vmul.f32 %v3297_v58, %v4821_v11  ;;  %3318 = vpow2.f32 %v2627_v53  ;;  %v2616_v38 = vmul.f32 -1.442695, %v4934_v47 }
 0x2fd   : > { %v3301_v3 = vpop.eup %3300  ;;  %v4938_v1 = vpack.i.bf16 %v4926_v39, %v4918_v26  ;;  %v4941_v52 = vmul.f32 %v4382_v48, %v1166_v27  ;;  %v1168_v19 = vmul.f32 %v3299_v59, %v4824_v62  ;;  %3320 = vrcp.f32 %v1109_v18 }
 0x2fe   : > { %v3303_v4 = vpop.eup %3302  ;;  %v4945_v16 = vmul.f32 %v4422_v10, %v1167_v12  ;;  %v1163_v11 = vmul.f32 %v3301_v3, %v4827_v36  ;;  %3322 = vpow2.f32 %v2628_v13  ;;  %v1225_v55 = vrot.slane %v4930_v32, 1 }
 0x2ff   : > { %v3305_v30 = vpop.eup %3304  ;;  %3013 = vrot.lane.b32.xlu0 %v4938_v1, %s3571_s24  ;;  %v3002_v57 = vpack.i.bf16 %v4941_v52, %v4930_v32  ;;  %v4954_v62 = vmul.f32 %v4461_v31, %v1168_v19  ;;  %v1164_v17 = vmul.f32 %v3303_v4, %v4830_v50  ;;  %3324 = vpow2.f32 %v2615_v61 }
 0x300   : > { %v3307_v36 = vpop.eup %3306  ;;  %v4958_v63 = vmul.f32 %v3983_v15, %v1163_v11  ;;  %v1179_v43 = vmul.f32 %v3305_v30, %v4851_v29  ;;  %3326 = vpow2.f32 %v2616_v38  ;;  %v1447_v4 = vrot.slane %v4918_v26, 2  ;;  %v3245_v38 = vld [vmem:[#allocation8 + $0x8] sm:$0xff]  }
 0x301   : > { %v3309_v34 = vpop.eup %3308  ;;  %3003 = vrot.lane.b32.xlu1 %v3002_v57, %s3571_s24  ;;  %v4965_v53 = vpack.i.bf16 %v4954_v62, %v4945_v16  ;;  %v4968_v50 = vmul.f32 %v6014_v20, %v1164_v17  ;;  %v1180_v41 = vmul.f32 %v3307_v36, %v4856_v21 }
 0x302   : > { %v3311_v60 = vpop.eup %3310  ;;  %v4972_v29 = vmul.f32 %v4752_v42, %v1179_v43  ;;  %v1175_v13 = vmul.f32 %v3309_v34, %v4864_v33  ;;  %v3244_v43 = vld [vmem:[#allocation8 + $0x48] sm:$0xff]  }
 0x303   : > { %v3313_v58 = vpop.eup %3312  ;;  %3023 = vrot.lane.b32.xlu0 %v4965_v53, %s3571_s24  ;;  %v3007_v27 = vpack.i.bf16 %v4968_v50, %v4958_v63  ;;  %v4980_v18 = vmul.f32 %v4763_v40, %v1180_v41  ;;  %v1176_v59 = vmul.f32 %v3311_v60, %v4867_v51  ;;  %2758 = vmatprep.subr.bf16.mxu0 %v3244_v43 }
 0x304   : > { %v4984_v21 = vmul.f32 %v4691_v9, %v1175_v13  ;;  %v1110_v42 = vadd.f32 1.0, %v3313_v58  ;;  %v3315_v12 = vpop.eup %3314  ;;  %2885 = vmatprep.subr.bf16.mxu1 %v3244_v43  ;;  %2759 = vmatpush3.bf16.msra.mxu0 %v3245_v38  ;;  %v3256_v9 = vld [vmem:[#allocation8 + $0x78] sm:$0xff]  }
 0x305   : > { %3008 = vrot.lane.b32.xlu1 %v3007_v27, %s3572_s26  ;;  %v3032_v33 = vpack.i.bf16 %v4980_v18, %v4972_v29  ;;  %v4990_v22 = vmul.f32 %v4714_v5, %v1176_v59  ;;  %v3317_v35 = vpop.eup %3316  ;;  %v1111_v40 = vadd.f32 1.0, %v3315_v12  ;;  %v3246_v12 = vld [vmem:[#allocation8 + $0x50] sm:$0xff]   ;;  %2893 = vmatpush3.bf16.msra.mxu1 %v3245_v38  ;;  %v5030_v38 = vrot.slane %v4926_v39, 2 }
 0x306   : > { %3328 = vrcp.f32 %v1110_v42  ;;  %v1112_v3 = vadd.f32 1.0, %v3317_v35  ;;  %v3319_v19 = vpop.eup %3318  ;;  %v5877_v30 = vrot.slane %v4984_v21, 2  ;;  %2760 = vmatprep.subr.bf16.mxu0 %v3246_v12  ;;  %2886 = vmatprep.subr.bf16.mxu1 %v3246_v12  ;;  %v3251_v12 = vld [vmem:[#allocation8 + $0x20] sm:$0xff]  }
 0x307   : > { %3033 = vrot.lane.b32.xlu0 %v3032_v33, %s3571_s24  ;;  %v4995_v51 = vpack.i.bf16 %v4990_v22, %v4984_v21  ;;  %3330 = vrcp.f32 %v1111_v40  ;;  %v3321_v11 = vpop.eup %3320  ;;  %v1113_v61 = vadd.f32 1.0, %v3319_v19  ;;  %v5002_v17 = vrot.slane %v4990_v22, 2  ;;  %v3247_v33 = vld [vmem:[#allocation8 + $0x10] sm:$0xff]   ;;  %v3248_v19 = vld [vmem:[#allocation8 + $0x58] sm:$0xff]  }
 0x308   : > { %3332 = vrcp.f32 %v1112_v3  ;;  %v3323_v36 = vpop.eup %3322  ;;  %v1169_v58 = vmul.f32 %v3321_v11, %v4870_v7  ;;  %2761 = vmatpush3.bf16.msra.mxu0 %v3247_v33  ;;  %v3249_v11 = vld [vmem:[#allocation8 + $0x18] sm:$0xff]  }
 0x309   : > { %3018 = vrot.lane.b32.xlu1 %v4995_v51, %s3572_s26  ;;  %v1114_v34 = vadd.f32 1.0, %v3323_v36  ;;  %3334 = vrcp.f32 %v1113_v61  ;;  %v5008_v41 = vsel %vm1297_vm15, %v5877_v30, %v5002_v17  ;;  %v3325_v60 = vpop.eup %3324  ;;  %v5012_v13 = vsel %vm1297_vm15, %v5002_v17, %v1447_v4  ;;  %2894 = vmatpush3.bf16.msra.mxu1 %v3247_v33 }
 0x30a   : > { %6136 = vst [vmem:[#allocation22_spill] sm:$0xff] %v5008_v41  ;;  %6137 = vst [vmem:[#allocation33_spill] sm:$0xff] %v5012_v13  ;;  %v1101_v27 = vadd.f32 1.0, %v3325_v60  ;;  %v3327_v42 = vpop.eup %3326  ;;  %v5020_v7 = vmul.f32 %v4501_v44, %v1169_v58  ;;  %2762 = vmatprep.subr.bf16.mxu0 %v3248_v19  ;;  %2887 = vmatprep.subr.bf16.mxu1 %v3248_v19  ;;  %v5876_v58 = vrot.slane %v4972_v29, 2 }
 0x30b   : > { %3336 = vrcp.f32 %v1114_v34  ;;  %v1102_v35 = vadd.f32 1.0, %v3327_v42  ;;  %v3250_v42 = vld [vmem:[#allocation8 + $0x60] sm:$0xff]  }
 0x30c   : > { %3338 = vrcp.f32 %v1101_v27  ;;  %6138 = vst [vmem:[#allocation34_spill] sm:$0xff] %v5020_v7  ;;  %2763 = vmatpush3.bf16.msra.mxu0 %v3249_v11  ;;  %v5046_v27 = vsel %vm1297_vm15, %v1447_v4, %v5030_v38  ;;  %v1233_v31 = vrot.slane %v5020_v7, 1 }
 0x30d   : > { %3028 = vrot.lane.b32.xlu1 %v3002_v57, %s3572_s26  ;;  %3340 = vrcp.f32 %v1102_v35  ;;  %6142 = vst [vmem:[#allocation38_spill] sm:$0xff] %v5046_v27  ;;  %2895 = vmatpush3.bf16.msra.mxu1 %v3249_v11  ;;  %v5054_v35 = vsel %vm1297_vm15, %v5030_v38, %v5876_v58  ;;  %v1311_v11 = vrot.slane %v4954_v62, 2  ;;  %v6163_v10 = vpack.i.bf16 %v5030_v38, %v5046_v27 }
 0x30e   : > { %6143 = vst [vmem:[#allocation39_spill] sm:$0xff] %v5054_v35  ;;  %2764 = vmatprep.subr.bf16.mxu0 %v3250_v42  ;;  %2888 = vmatprep.subr.bf16.mxu1 %v3250_v42  ;;  %v3252_v42 = vld [vmem:[#allocation8 + $0x68] sm:$0xff]  }
 0x310   : > { %v3329_v40 = vpop.eup %3328  ;;  %2765 = vmatpush3.bf16.msra.mxu0 %v3251_v12 }
 0x311   : > { %v1170_v3 = vmul.f32 %v3329_v40, %v4889_v28  ;;  %3038 = vrot.lane.b32.xlu1 %v4938_v1, %s3572_s26  ;;  %v3331_v57 = vpop.eup %3330  ;;  %2896 = vmatpush3.bf16.msra.mxu1 %v3251_v12 }
 0x312   : > { %v3333_v61 = vpop.eup %3332  ;;  %v1171_v43 = vmul.f32 %v3331_v57, %v4896_v49  ;;  %2766 = vmatprep.subr.bf16.mxu0 %v3252_v42  ;;  %2889 = vmatprep.subr.bf16.mxu1 %v3252_v42 }
 0x313   : > { %v5025_v36 = vmul.f32 %v4541_v14, %v1170_v3  ;;  %v1172_v28 = vmul.f32 %v3333_v61, %v4899_v2  ;;  %v3335_v1 = vpop.eup %3334  ;;  %v5878_v61 = vrot.slane %v5020_v7, 2 }
 0x314   : > { %v5035_v60 = vmul.f32 %v4581_v25, %v1171_v43  ;;  %v1173_v2 = vmul.f32 %v3335_v1, %v4905_v56  ;;  %v1307_v56 = vrot.slane %v4941_v52, 2 }
 0x315   : > { %6139 = vst [vmem:[#allocation35_spill] sm:$0xff] %v5025_v36  ;;  %v3042_v34 = vpack.i.bf16 %v5025_v36, %v5020_v7  ;;  %3048 = vrot.lane.b32.xlu1 %v4965_v53, %s3572_s26  ;;  %v5041_v49 = vmul.f32 %v4617_v46, %v1172_v28  ;;  %v3337_v33 = vpop.eup %3336  ;;  %v5879_v53 = vrot.slane %v4945_v16, 2  ;;  %v1305_v28 = vrot.slane %v4930_v32, 2 }
 0x316   : > { %6140 = vst [vmem:[#allocation36_spill] sm:$0xff] %v5035_v60  ;;  %v1174_v40 = vmul.f32 %v3337_v33, %v4908_v45  ;;  %v3339_v3 = vpop.eup %3338  ;;  %v5062_v57 = vmul.f32 %v4643_v24, %v1173_v2  ;;  %v1301_v45 = vrot.slane %v4958_v63, 2  ;;  %v1317_v5 = vrot.slane %v5035_v60, 2 }
 0x317   : > { %6141 = vst [vmem:[#allocation37_spill] sm:$0xff] %v5041_v49  ;;  %3043 = vrot.lane.b32.xlu0 %v3042_v34, %s3571_s24  ;;  %v3052_v4 = vpack.i.bf16 %v5041_v49, %v5035_v60  ;;  %v1161_v1 = vmul.f32 %v3339_v3, %v4923_v0  ;;  %v3341_v2 = vpop.eup %3340  ;;  %v5080_v33 = vsel %vm1297_vm15, %v5879_v53, %v1311_v11  ;;  %v3253_v3 = vld [vmem:[#allocation8 + $0x28] sm:$0xff]   ;;  %v1235_v20 = vrot.slane %v5025_v36, 1 }
 0x318   : > { %v5070_v43 = vmul.f32 %v4667_v23, %v1174_v40  ;;  %v5085_v40 = vsel %vm1297_vm15, %v1311_v11, %v5878_v61  ;;  %v1162_v19 = vmul.f32 %v3341_v2, %v4934_v47  ;;  %2767 = vmatpush3.bf16.msra.mxu0 %v3253_v3  ;;  %2897 = vmatpush3.bf16.msra.mxu1 %v3253_v3  ;;  %v1321_v30 = vrot.slane %v5062_v57, 2  ;;  %v3254_v61 = vld [vmem:[#allocation8 + $0x70] sm:$0xff]  }
 0x319   : > { %3058 = vrot.lane.b32.xlu1 %v3042_v34, %s3572_s26  ;;  %v1303_v34 = vrot.slane %v4968_v50, 2  ;;  %v5089_v0 = vmul.f32 %v3977_v6, %v1161_v1  ;;  %v3255_v6 = vld [vmem:[#allocation8 + $0x30] sm:$0xff]   ;;  %v6144_v54 = vrot.slane %v5062_v57, 1  ;;  %2768 = vmatprep.subr.bf16.mxu0 %v3254_v61 }
 0x31a   : > { %v5093_v59 = vpack.i.bf16 %v5070_v43, %v5062_v57  ;;  %v5099_v11 = vmul.f32 %v3980_v8, %v1162_v19  ;;  %v1243_v19 = vrot.slane %v5070_v43, 1  ;;  %v1315_v8 = vrot.slane %v5025_v36, 2  ;;  %2890 = vmatprep.subr.bf16.mxu1 %v3254_v61 }
 0x31b   : > { %3053 = vrot.lane.b32.xlu0 %v3052_v4, %s3571_s24  ;;  %v1298_v47 = vrot.slane %v5089_v0, 2  ;;  %v1304_v12 = vsel %vm1297_vm15, %v1301_v45, %v1303_v34  ;;  %v1218_v42 = vrot.slane %v5089_v0, 1  ;;  %v6150_v61 = vrot.slane %v4958_v63, 1 }
 0x31c   : > { %v1299_v2 = vrot.slane %v5099_v11, 2  ;;  %v1219_v58 = vrot.slane %v5099_v11, 1  ;;  %v5126_v24 = vsel %vm1217_vm12, %v6144_v54, %v1243_v19  ;;  %v6149_v54 = vrot.slane %v4945_v16, 2  ;;  %2769 = vmatpush3.bf16.msra.mxu0 %v3255_v6  ;;  %2898 = vmatpush3.bf16.msra.mxu1 %v3255_v6 }
 0x31d   : > { %3068 = vrot.lane.b32.xlu1 %v3052_v4, %s3572_s26  ;;  %v1306_v4 = vsel %vm1297_vm15, %v1303_v34, %v1305_v28  ;;  %v1323_v34 = vrot.slane %v5070_v43, 2  ;;  %6145 = vst [vmem:[#allocation40_spill] sm:$0xff] %v5126_v24  ;;  %v5158_v46 = vsel %vm1297_vm15, %v1315_v8, %v1317_v5  ;;  %2770 = vmatprep.subr.bf16.mxu0 %v3256_v9 }
 0x31e   : > { %v1300_v53 = vsel %vm1297_vm15, %v1298_v47, %v1299_v2  ;;  %v1302_v1 = vsel %vm1297_vm15, %v1299_v2, %v1301_v45  ;;  %v3077_v3 = vpack.i.bf16 %v1306_v4, %v1304_v12  ;;  %v6146_v47 = vrot.slane %v4984_v21, 1  ;;  %2891 = vmatprep.subr.bf16.mxu1 %v3256_v9 }
 0x31f   : > { %3063 = vrot.lane.b32.xlu0 %v5093_v59, %s3571_s24  ;;  %v3087_v23 = vpack.i.bf16 %v1302_v1, %v1300_v53  ;;  %v1227_v2 = vrot.slane %v4941_v52, 1  ;;  %v5140_v53 = vsel %vm1297_vm15, %v1305_v28, %v1307_v56  ;;  %v5145_v12 = vsel %vm1297_vm15, %v1307_v56, %v6149_v54  ;;  %v3257_v1 = vld [vmem:[#allocation8 + $0x38] sm:$0xff]  }
 0x320   : > { %v5131_v45 = vsel %vm1217_vm12, %v1243_v19, %v6146_v47  ;;  %v1319_v4 = vrot.slane %v5041_v49, 2  ;;  %v1220_v19 = vsel %vm1217_vm12, %v1218_v42, %v1219_v58  ;;  %v6151_v47 = vrot.slane %v5020_v7, 2  ;;  %2771 = vmatpush3.bf16.msra.mxu0 %v3257_v1  ;;  %2899 = vmatpush3.bf16.msra.mxu1 %v3257_v1 }
 0x321   : > { %6147 = vst [vmem:[#allocation41_spill] sm:$0xff] %v5131_v45  ;;  %3088 = vrot.lane.b32.xlu1 %v3087_v23, %s3571_s24  ;;  %v1222_v23 = vsel %vm1217_vm12, %v1219_v58, %v6150_v61  ;;  %v5163_v56 = vpack.i.bf16 %v5131_v45, %v5126_v24  ;;  %v6153_v42 = vrot.slane %v4984_v21, 2 }
 0x322   : > { %v5155_v28 = vsel %vm1297_vm15, %v6151_v47, %v1315_v8  ;;  %v5171_v54 = vsel %vm1297_vm15, %v1317_v5, %v1319_v4  ;;  %v5174_v61 = vsel %vm1297_vm15, %v1319_v4, %v1321_v30  ;;  %v5177_v8 = vsel %vm1217_vm12, %v1225_v55, %v1227_v2 }
 0x323   : > { %3073 = vrot.lane.b32.xlu0 %v4995_v51, %s3571_s24  ;;  %v5137_v51 = vsel %vm1297_vm15, %v1321_v30, %v1323_v34  ;;  %6152 = vst [vmem:[#allocation43_spill] sm:$0xff] %v5155_v28  ;;  %v5168_v58 = vsel %vm1297_vm15, %v1323_v34, %v6153_v42  ;;  %6155 = vst [vmem:[#allocation45_spill] sm:$0xff] %v5171_v54  ;;  %v1223_v47 = vrot.slane %v4968_v50, 1  ;;  %v6157_v30 = vrot.slane %v4945_v16, 1 }
 0x324   : > { %6148 = vst [vmem:[#allocation42_spill] sm:$0xff] %v5137_v51  ;;  %6154 = vst [vmem:[#allocation44_spill] sm:$0xff] %v5168_v58  ;;  %v3082_v25 = vpack.i.bf16 %v1222_v23, %v1220_v19  ;;  %v1603_v23 = vrot.slane %v4980_v18, 2  ;;  %v5199_v42 = vpack.i.bf16 %v5168_v58, %v5137_v51  ;;  %v6158_v5 = vrot.slane %v4958_v63, 1 }
 0x325   : > { %6156 = vst [vmem:[#allocation46_spill] sm:$0xff] %v5174_v61  ;;  %3103 = vrot.lane.b32.xlu1 %v5163_v56, %s3573_s17  ;;  %v5189_v4 = vsel %vm1217_vm12, %v1227_v2, %v6157_v30  ;;  %v5207_v9 = vsel %vm1217_vm12, %v1223_v47, %v1225_v55  ;;  %v6159_v30 = vrot.slane %v4972_v29, 2  ;;  %v1427_v34 = vrot.slane %v4918_v26, 1 }
 0x326   : > { %v5204_v2 = vsel %vm1217_vm12, %v6158_v5, %v1223_v47  ;;  %v5220_v5 = vrot.slane %v4926_v39, 1  ;;  %v1549_v55 = vrot.slane %v4972_v29, 1  ;;  %v1247_v47 = vrot.slane %v4990_v22, 1 }
 0x327   : > { %3078 = vrot.lane.b32.xlu0 %v3077_v3, %s3573_s17  ;;  %v1604_v19 = vsel %vm1297_vm15, %v6159_v30, %v1603_v23  ;;  %v3122_v1 = vpack.i.bf16 %v5207_v9, %v5204_v2  ;;  %v3097_v30 = vpack.i.bf16 %v5012_v13, %v5008_v41  ;;  %v6161_v29 = vrot.slane %v4984_v21, 1  ;;  %vm6181_vm15 = vmmov %vm6121_vm0 }
 0x328   : > { %v5216_v6 = vpack.c.bf16 %v1603_v23, %v1604_v19  ;;  %v5232_v26 = vsel %vm1217_vm12, %v1427_v34, %v5220_v5  ;;  %v1550_v39 = vsel %vm1217_vm12, %v5220_v5, %v1549_v55 }
 0x329   : > { %3108 = vrot.lane.b32.xlu1 %v5199_v42, %s3571_s24  ;;  %v5240_v19 = vsel %vm1217_vm12, %v6161_v29, %v1247_v47  ;;  %v3112_v23 = vpack.i.bf16 %v1550_v39, %v5232_v26  ;;  %v6162_v29 = vrot.slane %v4945_v16, 1  ;;  %v5259_v39 = vld [vmem:[#allocation8 + $0x80] sm:$0xff]  }
 0x32a   : > { %6160 = vst [vmem:[#allocation47_spill] sm:$0xff] %v5216_v6  ;;  %v3142_v44 = vpack.i.bf16 %v1247_v47, %v5240_v19  ;;  %2852 = vmatprep.subr.bf16.mxu1 %v5259_v39 }
 0x32b   : > { %3083 = vrot.lane.b32.xlu0 %v3082_v25, %s3573_s17  ;;  %v3092_v25 = vpack.i.bf16 %v5189_v4, %v5177_v8 }
 0x32d   : > { %3123 = vrot.lane.b32.xlu1 %v3122_v1, %s3573_s17  ;;  %v1231_v1 = vrot.slane %v4954_v62, 1 }
 0x32f   : > { %3093 = vrot.lane.b32.xlu0 %v3092_v25, %s3572_s26  ;;  %v5254_v14 = vsel %vm1217_vm12, %v6162_v29, %v1231_v1  ;;  %v1551_v29 = vrot.slane %v4980_v18, 1  ;;  %v3157_v18 = vpack.i.bf16 %v5085_v40, %v5080_v33 }
 0x331   : > { %3128 = vrot.lane.b32.xlu1 %v3077_v3, %s3571_s24  ;;  %v5257_v3 = vsel %vm1217_vm12, %v1231_v1, %v1233_v31  ;;  %v1552_v1 = vsel %vm1217_vm12, %v1549_v55, %v1551_v29  ;;  %v1239_v55 = vrot.slane %v5041_v49, 1 }
 0x333   : > { %3098 = vrot.lane.b32.xlu0 %v3097_v30, %s3573_s17  ;;  %v3117_v30 = vpack.i.bf16 %v5145_v12, %v5140_v53 }
 0x335   : > { %3143 = vrot.lane.b32.xlu1 %v3142_v44, %s3573_s17  ;;  %v3132_v44 = vpack.i.bf16 %v5257_v3, %v5254_v14 }
 0x337   : > { %3113 = vrot.lane.b32.xlu0 %v3112_v23, %s3572_s26  ;;  %v3147_v23 = vpack.i.bf16 %v5002_v17, %v5008_v41  ;;  %v3152_v17 = vpack.i.bf16 %v1551_v29, %v1552_v1  ;;  %v3197_v1 = vpack.i.bf16 %v5174_v61, %v5171_v54 }
 0x339   : > { %3148 = vrot.lane.b32.xlu1 %v3147_v23, %s3571_s24  ;;  %v1237_v23 = vrot.slane %v5035_v60, 1 }
 0x33b   : > { %3118 = vrot.lane.b32.xlu0 %v3117_v30, %s3573_s17  ;;  %v5287_v38 = vsel %vm1217_vm12, %v1235_v20, %v1237_v23 }
 0x33d   : > { %3163 = vrot.lane.b32.xlu1 %v3092_v25, %s3573_s17  ;;  %v5284_v25 = vsel %vm1217_vm12, %v1233_v31, %v1235_v20  ;;  %v5299_v31 = vsel %vm1217_vm12, %v1237_v23, %v1239_v55  ;;  %v6165_v20 = vrot.slane %v5062_v57, 1 }
 0x33e   : > { %6164 = vst [vmem:[#allocation48_spill] sm:$0xff] %v5299_v31 }
 0x33f   : > { %3133 = vrot.lane.b32.xlu0 %v3132_v44, %s3572_s26 }
 0x341   : > { %3168 = vrot.lane.b32.xlu1 %v3117_v30, %s3571_s24  ;;  %v3177_v30 = vpack.i.bf16 %v5158_v46, %v5155_v28 }
 0x343   : > { %3138 = vrot.lane.b32.xlu0 %v6163_v10, %s3573_s17  ;;  %v3172_v10 = vpack.i.bf16 %v5287_v38, %v5284_v25 }
 0x345   : > { %3183 = vrot.lane.b32.xlu1 %v3132_v44, %s3573_s17  ;;  %v5304_v44 = vsel %vm1217_vm12, %v1239_v55, %v6165_v20 }
 0x346   : > { %6166 = vst [vmem:[#allocation49_spill] sm:$0xff] %v5304_v44  ;;  %v3192_v29 = vpack.i.bf16 %v5304_v44, %v5299_v31 }
 0x347   : > { %3153 = vrot.lane.b32.xlu0 %v3152_v17, %s3572_s26  ;;  %v5321_v17 = vsel %vm1217_vm12, %v1247_v47, %v1427_v34 }
 0x348   : > { %v3232_v23 = vpack.i.bf16 %v5321_v17, %v5240_v19 }
 0x349   : > { %3188 = vrot.lane.b32.xlu1 %v3157_v18, %s3571_s24 }
 0x34b   : > { %3158 = vrot.lane.b32.xlu0 %v3157_v18, %s3573_s17 }
 0x34d   : > { %3203 = vrot.lane.b32.xlu1 %v3172_v10, %s3573_s17 }
 0x34f   : > { %3173 = vrot.lane.b32.xlu0 %v3172_v10, %s3572_s26 }
 0x351   : > { %3208 = vrot.lane.b32.xlu1 %v3177_v30, %s3571_s24 }
 0x353   : > { %3178 = vrot.lane.b32.xlu0 %v3177_v30, %s3573_s17 }
 0x355   : > { %3223 = vrot.lane.b32.xlu1 %v3192_v29, %s3573_s17 }
 0x357   : > { %3193 = vrot.lane.b32.xlu0 %v3192_v29, %s3572_s26 }
 0x359   : > { %3228 = vrot.lane.b32.xlu1 %v3197_v1, %s3571_s24 }
 0x35b   : > { %3198 = vrot.lane.b32.xlu0 %v3197_v1, %s3573_s17 }
 0x35d   : > { %3238 = vrot.lane.b32.xlu1 %v5093_v59, %s3572_s26 }
 0x35f   : > { %3213 = vrot.lane.b32.xlu0 %v5163_v56, %s3572_s26 }
 0x363   : > { %3218 = vrot.lane.b32.xlu0 %v5199_v42, %s3573_s17 }
 0x367   : > { %3233 = vrot.lane.b32.xlu0 %v3232_v23, %s3572_s26 }
 0x371   : > { %v5328_v10 = vpop.permute.xlu0 %3013 }
 0x373   : > { %v3004_v18 = vpop.permute.xlu1 %3003 }
 0x374   : > { %v3006_v49 = vunpack.i.h.bf16 %v3004_v18  ;;  %v3005_v58 = vunpack.i.l.bf16 %v3004_v18 }
 0x375   : > { %v5332_v56 = vpop.permute.xlu0 %3023 }
 0x377   : > { %v3009_v55 = vpop.permute.xlu1 %3008 }
 0x378   : > { %v3011_v54 = vunpack.i.h.bf16 %v3009_v55 }
 0x379   : > { %v5336_v34 = vpop.permute.xlu0 %3033 }
 0x37b   : > { %v5330_v30 = vpop.permute.xlu1 %3018 }
 0x37f   : > { %v5334_v59 = vpop.permute.xlu1 %3028 }
 0x383   : > { %v5338_v47 = vpop.permute.xlu1 %3038 }
 0x387   : > { %v5340_v42 = vpop.permute.xlu1 %3048 }
 0x389   : > { %v5342_v20 = vpop.permute.xlu0 %3043 }
 0x38b   : > { %v5344_v29 = vpop.permute.xlu1 %3058 }
 0x38d   : > { %v5346_v1 = vpop.permute.xlu0 %3053 }
 0x38f   : > { %v5350_v15 = vpop.permute.xlu1 %3068 }
 0x390   : > { %6168 = vst [vmem:[#allocation51_spill] sm:$0xff] %v5350_v15 }
 0x391   : > { %v5348_v23 = vpop.permute.xlu0 %3063 }
 0x392   : > { %6167 = vst [vmem:[#allocation50_spill] sm:$0xff] %v5348_v23  ;;  %v3010_v23 = vunpack.i.l.bf16 %v3009_v55 }
 0x393   : > { %v3089_v37 = vpop.permute.xlu1 %3088 }
 0x394   : > { %v3091_v13 = vunpack.i.h.bf16 %v3089_v37  ;;  %v3090_v24 = vunpack.i.l.bf16 %v3089_v37 }
 0x395   : > { %v5352_v48 = vpop.permute.xlu0 %3073 }
 0x396   : > { %6169 = vst [vmem:[#allocation52_spill] sm:$0xff] %v5352_v48 }
 0x397   : > { %v3104_v35 = vpop.permute.xlu1 %3103 }
 0x398   : > { %v3105_v44 = vunpack.i.l.bf16 %v3104_v35  ;;  %v3106_v15 = vunpack.i.h.bf16 %v3104_v35 }
 0x399   : > { %v3079_v6 = vpop.permute.xlu0 %3078 }
 0x39a   : > { %v3081_v27 = vunpack.i.h.bf16 %v3079_v6  ;;  %v3080_v41 = vunpack.i.l.bf16 %v3079_v6 }
 0x39b   : > { %v3109_v48 = vpop.permute.xlu1 %3108 }
 0x39c   : > { %v1672_v61 = vsel %vm6170_vm3, %v5207_v9, %v3081_v27  ;;  %v1671_v31 = vsel %vm6121_vm0, %v5204_v2, %v3080_v41  ;;  %v3110_v36 = vunpack.i.l.bf16 %v3109_v48  ;;  %v3111_v9 = vunpack.i.h.bf16 %v3109_v48  ;;  %vm6182_vm3 = vmmov %vm6121_vm0 }
 0x39d   : > { %v3084_v45 = vpop.permute.xlu0 %3083  ;;  %v1687_v28 = vsel %vm1637_vm1, %v1671_v31, %v3005_v58  ;;  %v1688_v41 = vsel %vm1637_vm1, %v1672_v61, %v3006_v49 }
 0x39e   : > { %v3086_v60 = vunpack.i.h.bf16 %v3084_v45  ;;  %v3085_v51 = vunpack.i.l.bf16 %v3084_v45 }
 0x3a0   : > { %v1622_v6 = vsel %vm6171_vm11, %v5099_v11, %v3086_v60  ;;  %v1621_v37 = vsel %vm6172_vm4, %v5089_v0, %v3085_v51  ;;  %v3124_v0 = vpop.permute.xlu1 %3123  ;;  %v1634_v51 = vsel %vm6174_vm13, %v5070_v43, %v3106_v15  ;;  %vm6183_vm11 = vmmov %vm6121_vm0 }
 0x3a1   : > { %v1639_v45 = vsel %vm1637_vm1, %v1622_v6, %v3091_v13  ;;  %v1638_v18 = vsel %vm1637_vm1, %v1621_v37, %v3090_v24  ;;  %v3094_v55 = vpop.permute.xlu0 %3093  ;;  %v1633_v13 = vsel %vm6173_vm5, %v5062_v57, %v3105_v44  ;;  %v1651_v49 = vsel %vm1637_vm1, %v1634_v51, %v3111_v9  ;;  %vm6184_vm4 = vmmov %vm6121_vm0 }
 0x3a2   : > { %v3096_v7 = vunpack.i.h.bf16 %v3094_v55  ;;  %v3095_v27 = vunpack.i.l.bf16 %v3094_v55  ;;  %v1655_v60 = vsel %vm1654_vm14, %v1638_v18, %v3010_v23  ;;  %v1656_v11 = vsel %vm1654_vm14, %v1639_v45, %v3011_v54  ;;  %vm6185_vm5 = vmmov %vm6121_vm0 }
 0x3a3   : > { %v1650_v48 = vsel %vm1637_vm1, %v1633_v13, %v3110_v36  ;;  %v1719_v54 = vpack.c.bf16 %v1656_v11, %v1655_v60  ;;  %v3021_v23 = vunpack.i.h.bf16 %v5330_v30  ;;  %v3020_v57 = vunpack.i.l.bf16 %v5330_v30  ;;  %vm6186_vm13 = vmmov %vm6121_vm0 }
 0x3a4   : > { %v1703_v24 = vsel %vm1654_vm14, %v1687_v28, %v3095_v27  ;;  %v1704_v35 = vsel %vm1654_vm14, %v1688_v41, %v3096_v7  ;;  %v3129_v28 = vpop.permute.xlu1 %3128  ;;  %v3016_v7 = vunpack.i.h.bf16 %v5328_v10  ;;  %v3015_v44 = vunpack.i.l.bf16 %v5328_v10 }
 0x3a5   : > { %v3099_v58 = vpop.permute.xlu0 %3098  ;;  %v1720_v2 = vpack.c.bf16 %v1704_v35, %v1703_v24  ;;  %v3126_v43 = vunpack.i.h.bf16 %v3124_v0  ;;  %v3125_v6 = vunpack.i.l.bf16 %v3124_v0  ;;  %v1667_v45 = vsel %vm1654_vm14, %v1650_v48, %v3020_v57 }
 0x3a6   : > { %v3101_v61 = vunpack.i.h.bf16 %v3099_v58  ;;  %v3100_v31 = vunpack.i.l.bf16 %v3099_v58  ;;  %v1668_v30 = vsel %vm1654_vm14, %v1651_v49, %v3021_v23  ;;  %v3131_v27 = vunpack.i.h.bf16 %v3129_v28  ;;  %v3259_v49 = vld [vmem:[#allocation8 + $0x88] sm:$0xff]  }
 0x3a7   : > { %1950 = vmatprep.mubr.bf16.mxu0 %v1720_v2  ;;  %v3130_v9 = vunpack.i.l.bf16 %v3129_v28  ;;  %v1624_v11 = vsel %vm6177_vm2, %v4968_v50, %v3126_v43  ;;  %v1623_v0 = vsel %vm6178_vm6, %v4958_v63, %v3125_v6  ;;  %v1737_v35 = vpack.c.bf16 %v1668_v30, %v1667_v45  ;;  %vm6190_vm2 = vmmov %vm6121_vm0 }
 0x3a8   : > { %v1684_v15 = vsel %vm6175_vm7, %v5321_v17, %v3101_v61  ;;  %v1683_v36 = vsel %vm6176_vm10, %v5240_v19, %v3100_v31  ;;  %1951 = vmatmul.mubr.bf16.vlgmr.msra.gmra.mrb[4].mxu0 %v1719_v54  ;;  %v3144_v17 = vpop.permute.xlu1 %3143  ;;  %v1641_v48 = vsel %vm1637_vm1, %v1624_v11, %v3131_v27  ;;  %v3031_v61 = vunpack.i.h.bf16 %v5334_v59  ;;  %vm6187_vm7 = vmmov %vm6121_vm0 }
 0x3a9   : > { %v3114_v37 = vpop.permute.xlu0 %3113  ;;  %v1699_v10 = vsel %vm1637_vm1, %v1683_v36, %v3015_v44  ;;  %v1700_v41 = vsel %vm1637_vm1, %v1684_v15, %v3016_v7  ;;  %v1640_v51 = vsel %vm1637_vm1, %v1623_v0, %v3130_v9  ;;  %v3030_v31 = vunpack.i.l.bf16 %v5334_v59  ;;  %vm6189_vm10 = vmmov %vm6121_vm0 }
 0x3aa   : > { %v3116_v18 = vunpack.i.h.bf16 %v3114_v37  ;;  %v3115_v55 = vunpack.i.l.bf16 %v3114_v37  ;;  %v3026_v50 = vunpack.i.h.bf16 %v5332_v56  ;;  %v3025_v63 = vunpack.i.l.bf16 %v5332_v56  ;;  %vm6191_vm6 = vmmov %vm6121_vm0 }
 0x3ab   : > { %v3146_v28 = vunpack.i.h.bf16 %v3144_v17  ;;  %v3145_v7 = vunpack.i.l.bf16 %v3144_v17  ;;  %v1657_v15 = vsel %vm1654_vm14, %v1640_v51, %v3030_v31  ;;  %v1658_v59 = vsel %vm1654_vm14, %v1641_v48, %v3031_v61 }
 0x3ac   : > { %v1715_v60 = vsel %vm1654_vm14, %v1699_v10, %v3115_v55  ;;  %v1716_v19 = vsel %vm1654_vm14, %v1700_v41, %v3116_v18  ;;  %v3149_v54 = vpop.permute.xlu1 %3148  ;;  %v1722_v9 = vpack.c.bf16 %v1658_v59, %v1657_v15  ;;  %v3040_v11 = vunpack.i.l.bf16 %v5338_v47 }
 0x3ad   : > { %v3119_v13 = vpop.permute.xlu0 %3118  ;;  %v1738_v24 = vpack.c.bf16 %v1716_v19, %v1715_v60  ;;  %v3151_v6 = vunpack.i.h.bf16 %v3149_v54  ;;  %v3150_v56 = vunpack.i.l.bf16 %v3149_v54  ;;  %v1636_v18 = vsel %vm6181_vm15, %v4990_v22, %v3146_v28  ;;  %vm6195_vm15 = vmmov %vm6121_vm0 }
 0x3ae   : > { %v3121_v58 = vunpack.i.h.bf16 %v3119_v13  ;;  %v3120_v2 = vunpack.i.l.bf16 %v3119_v13  ;;  %v3041_v19 = vunpack.i.h.bf16 %v5338_v47  ;;  %v3036_v22 = vunpack.i.h.bf16 %v5336_v34 }
 0x3af   : > { %1998 = vmatprep.mubr.bf16.mxu1 %v1738_v24  ;;  %v1653_v41 = vsel %vm1637_vm1, %v1636_v18, %v3151_v6  ;;  %v3050_v6 = vunpack.i.l.bf16 %v5340_v42  ;;  %v6188_v18 = vpack.c.bf16 %v5145_v12, %v5140_v53 }
 0x3b0   : > { %v1674_v23 = vsel %vm6179_vm9, %v5189_v4, %v3121_v58  ;;  %v1673_v57 = vsel %vm6180_vm8, %v5177_v8, %v3120_v2  ;;  %1999 = vmatmul.mubr.bf16.vlgmr.msra.gmra.mrb[4].mxu1 %v1737_v35  ;;  %v3164_v8 = vpop.permute.xlu1 %3163  ;;  %v1670_v47 = vsel %vm1654_vm14, %v1653_v41, %v3041_v19  ;;  %vm6192_vm9 = vmmov %vm6121_vm0 }
 0x3b1   : > { %v3134_v44 = vpop.permute.xlu0 %3133  ;;  %2853 = vmatpush3.bf16.msra.mxu1 %v5259_v39  ;;  %v1689_v4 = vsel %vm1637_vm1, %v1673_v57, %v3025_v63  ;;  %v1690_v37 = vsel %vm1637_vm1, %v1674_v23, %v3026_v50  ;;  %v1635_v39 = vsel %vm6182_vm3, %v4984_v21, %v3145_v7  ;;  %v3035_v21 = vunpack.i.l.bf16 %v5336_v34  ;;  %vm6193_vm8 = vmmov %vm6121_vm0 }
 0x3b2   : > { %v3136_v36 = vunpack.i.h.bf16 %v3134_v44  ;;  %v3135_v43 = vunpack.i.l.bf16 %v3134_v44  ;;  %2854 = vmatprep.subr.bf16.mxu1 %v3259_v49  ;;  %v1652_v10 = vsel %vm1637_vm1, %v1635_v39, %v3150_v56  ;;  %v3166_v35 = vunpack.i.h.bf16 %v3164_v8  ;;  %vm6198_vm3 = vmmov %vm6121_vm0 }
 0x3b3   : > { %v3165_v51 = vunpack.i.l.bf16 %v3164_v8  ;;  %v1669_v58 = vsel %vm1654_vm14, %v1652_v10, %v3040_v11 }
 0x3b4   : > { %v1705_v45 = vsel %vm1654_vm14, %v1689_v4, %v3135_v43  ;;  %v1706_v30 = vsel %vm1654_vm14, %v1690_v37, %v3136_v36  ;;  %v3169_v0 = vpop.permute.xlu1 %3168  ;;  %v1626_v63 = vsel %vm6184_vm4, %v4941_v52, %v3166_v35  ;;  %v1740_v7 = vpack.c.bf16 %v1670_v47, %v1669_v58  ;;  %vm6204_vm4 = vmmov %vm6121_vm0 }
 0x3b5   : > { %v3139_v55 = vpop.permute.xlu0 %3138  ;;  %v1723_v27 = vpack.c.bf16 %v1706_v30, %v1705_v45  ;;  %2855 = vmatpush3.bf16.msra.mxu1 %v3259_v49  ;;  %v3171_v61 = vunpack.i.h.bf16 %v3169_v0  ;;  %v3170_v31 = vunpack.i.l.bf16 %v3169_v0  ;;  %v1625_v23 = vsel %vm6185_vm5, %v4930_v32, %v3165_v51  ;;  %vm6206_vm5 = vmmov %vm6121_vm0 }
 0x3b6   : > { %v3141_v17 = vunpack.i.h.bf16 %v3139_v55  ;;  %v3140_v60 = vunpack.i.l.bf16 %v3139_v55  ;;  %v3051_v43 = vunpack.i.h.bf16 %v5340_v42  ;;  %v3046_v52 = vunpack.i.h.bf16 %v5342_v20 }
 0x3b7   : > { %1958 = vmatprep.mubr.bf16.mxu0 %v1723_v27  ;;  %v1642_v44 = vsel %vm1637_vm1, %v1625_v23, %v3170_v31  ;;  %v1643_v15 = vsel %vm1637_vm1, %v1626_v63, %v3171_v61  ;;  %v3045_v4 = vunpack.i.l.bf16 %v5342_v20  ;;  %v3060_v35 = vunpack.i.l.bf16 %v5344_v29  ;;  %v6199_v63 = vld [vmem:[#allocation34_spill] sm:$0xff] }
 0x3b8   : > { %v1686_v13 = vsel %vm6121_vm0, %v5220_v5, %v3141_v17  ;;  %v1685_v24 = vsel %vm6183_vm11, %v5232_v26, %v3140_v60  ;;  %1959 = vmatmul.mubr.bf16.gmra.mrb[8].mxu0 %v1722_v9  ;;  %v3184_v5 = vpop.permute.xlu1 %3183  ;;  %v1659_v42 = vsel %vm1654_vm14, %v1642_v44, %v3050_v6  ;;  %v1660_v39 = vsel %vm1654_vm14, %v1643_v15, %v3051_v43  ;;  %v6200_v44 = vld [vmem:[#allocation35_spill] sm:$0xff]  ;;  %vm6201_vm11 = vmmov %vm6121_vm0 }
 0x3b9   : > { %v3154_v48 = vpop.permute.xlu0 %3153  ;;  %v1701_v34 = vsel %vm1637_vm1, %v1685_v24, %v3035_v21  ;;  %v1702_v54 = vsel %vm1637_vm1, %v1686_v13, %v3036_v22  ;;  %v3186_v8 = vunpack.i.h.bf16 %v3184_v5  ;;  %v3185_v45 = vunpack.i.l.bf16 %v3184_v5  ;;  %v6202_v6 = vld [vmem:[#allocation51_spill] sm:$0xff] }
 0x3ba   : > { %v3156_v2 = vunpack.i.h.bf16 %v3154_v48  ;;  %v3155_v49 = vunpack.i.l.bf16 %v3154_v48  ;;  %v1725_v11 = vpack.c.bf16 %v1660_v39, %v1659_v42  ;;  %v3061_v24 = vunpack.i.h.bf16 %v5344_v29  ;;  %v6208_v42 = vld [vmem:[#allocation45_spill] sm:$0xff] }
 0x3bb   : > { %v1628_v53 = vsel %vm6190_vm2, %v4954_v62, %v3186_v8  ;;  %v1627_v12 = vsel %vm6191_vm6, %v4945_v16, %v3185_v45  ;;  %v3056_v62 = vunpack.i.h.bf16 %v5346_v1  ;;  %v6194_v58 = vpack.c.bf16 %v5085_v40, %v5080_v33  ;;  %v6205_v45 = vld [vmem:[#allocation48_spill] sm:$0xff]  ;;  %vm6219_vm2 = vmmov %vm6121_vm0 }
 0x3bc   : > { %v1717_v50 = vsel %vm1654_vm14, %v1701_v34, %v3155_v49  ;;  %v1718_v26 = vsel %vm1654_vm14, %v1702_v54, %v3156_v2  ;;  %v3189_v56 = vpop.permute.xlu1 %3188  ;;  %v3055_v47 = vunpack.i.l.bf16 %v5346_v1  ;;  %v6196_v49 = vld [vmem:[#allocation43_spill] sm:$0xff]  ;;  %vm6221_vm6 = vmmov %vm6121_vm0 }
 0x3bd   : > { %v3159_v57 = vpop.permute.xlu0 %3158  ;;  %v1741_v28 = vpack.c.bf16 %v1718_v26, %v1717_v50  ;;  %v3191_v27 = vunpack.i.h.bf16 %v3189_v56  ;;  %v6197_v61 = vpack.c.bf16 %v5158_v46, %v6196_v49 }
 0x3be   : > { %v3161_v59 = vunpack.i.h.bf16 %v3159_v57  ;;  %v3160_v36 = vunpack.i.l.bf16 %v3159_v57 }
 0x3bf   : > { %2006 = vmatprep.mubr.bf16.mxu1 %v1741_v28  ;;  %v1645_v22 = vsel %vm1637_vm1, %v1628_v53, %v3191_v27 }
 0x3c0   : > { %v1676_v32 = vsel %vm6186_vm13, %v5257_v3, %v3161_v59  ;;  %v1675_v37 = vsel %vm6187_vm7, %v5254_v14, %v3160_v36  ;;  %2007 = vmatmul.mubr.bf16.gmra.mrb[8].mxu1 %v1740_v7  ;;  %v3190_v3 = vunpack.i.l.bf16 %v3189_v56  ;;  %v3204_v10 = vpop.permute.xlu1 %3203  ;;  %v1662_v31 = vsel %vm1654_vm14, %v1645_v22, %v3061_v24  ;;  %vm6210_vm13 = vmmov %vm6121_vm0 }
 0x3c1   : > { %v3174_v30 = vpop.permute.xlu0 %3173  ;;  %2856 = vmatprep.mubr.msk.bf16.mxu1 %vm6189_vm10, %v6188_v18  ;;  %v1691_v9 = vsel %vm1637_vm1, %v1675_v37, %v3045_v4  ;;  %v1692_v14 = vsel %vm1637_vm1, %v1676_v32, %v3046_v52  ;;  %v3205_v2 = vunpack.i.l.bf16 %v3204_v10  ;;  %v3070_v56 = vunpack.i.l.bf16 %v6202_v6  ;;  %v6203_v37 = vld [vmem:[#allocation49_spill] sm:$0xff]  ;;  %v6207_v18 = vld [vmem:[#allocation46_spill] sm:$0xff]  ;;  %vm6215_vm7 = vmmov %vm6121_vm0 }
 0x3c2   : > { %v3176_v20 = vunpack.i.h.bf16 %v3174_v30  ;;  %v3175_v55 = vunpack.i.l.bf16 %v3174_v30  ;;  %v1644_v0 = vsel %vm1637_vm1, %v1627_v12, %v3190_v3  ;;  %v3071_v32 = vunpack.i.h.bf16 %v6202_v6  ;;  %vm6217_vm10 = vmmov %vm6121_vm0 }
 0x3c3   : > { %v1629_v23 = vsel %vm6121_vm0, %v6199_v63, %v3205_v2  ;;  %v6209_v39 = vpack.c.bf16 %v6207_v18, %v6208_v42  ;;  %v3574_v42 = vmov 0  }
 0x3c4   : > { %v1707_v41 = vsel %vm1654_vm14, %v1691_v9, %v3175_v55  ;;  %v1708_v17 = vsel %vm1654_vm14, %v1692_v14, %v3176_v20  ;;  %v3209_v51 = vpop.permute.xlu1 %3208  ;;  %v6211_v20 = vld [vmem:[#allocation50_spill] sm:$0xff]  ;;  %v6212_v9 = vld [vmem:[#allocation44_spill] sm:$0xff] }
 0x3c5   : > { %v3179_v60 = vpop.permute.xlu0 %3178  ;;  %v1726_v19 = vpack.c.bf16 %v1708_v17, %v1707_v41  ;;  %v3210_v5 = vunpack.i.l.bf16 %v3209_v51  ;;  %v3211_v33 = vunpack.i.h.bf16 %v3209_v51  ;;  %v3066_v55 = vunpack.i.h.bf16 %v6211_v20  ;;  %v6213_v14 = vld [vmem:[#allocation42_spill] sm:$0xff] }
 0x3c6   : > { %v3181_v21 = vunpack.i.h.bf16 %v3179_v60  ;;  %v3180_v13 = vunpack.i.l.bf16 %v3179_v60  ;;  %v3065_v27 = vunpack.i.l.bf16 %v6211_v20 }
 0x3c7   : > { %1966 = vmatprep.mubr.bf16.mxu0 %v1726_v19  ;;  %v1646_v59 = vsel %vm1637_vm1, %v1629_v23, %v3210_v5  ;;  %v6222_v5 = vld [vmem:[#allocation40_spill] sm:$0xff] }
 0x3c8   : > { %v1678_v16 = vsel %vm6192_vm9, %v5287_v38, %v3181_v21  ;;  %v1677_v48 = vsel %vm6193_vm8, %v5284_v25, %v3180_v13  ;;  %1967 = vmatmul.mubr.bf16.gmra.mrb[12].mxu0 %v1725_v11  ;;  %2857 = vmatmul.mubr.msk.bf16.vlgmr.msra.gmra.mrb[12].mxu1 %vm6195_vm15, %v6194_v58  ;;  %v1661_v38 = vsel %vm1654_vm14, %v1644_v0, %v3060_v35  ;;  %v3206_v25 = vunpack.i.h.bf16 %v3204_v10  ;;  %v3224_v50 = vpop.permute.xlu1 %3223  ;;  %v6216_v58 = vld [vmem:[#allocation36_spill] sm:$0xff]  ;;  %vm6223_vm9 = vmmov %vm6121_vm0 }
 0x3c9   : > { %v3194_v29 = vpop.permute.xlu0 %3193  ;;  %2860 = vmatprep.mubr.msk.bf16.mxu1 %vm6198_vm3, %v6197_v61  ;;  %v1693_v40 = vsel %vm1637_vm1, %v1677_v48, %v3055_v47  ;;  %v1694_v1 = vsel %vm1637_vm1, %v1678_v16, %v3056_v62  ;;  %v1728_v7 = vpack.c.bf16 %v1662_v31, %v1661_v38  ;;  %v6214_v10 = vpack.c.bf16 %v6212_v9, %v6213_v14  ;;  %v6218_v61 = vld [vmem:[#allocation37_spill] sm:$0xff]  ;;  %vm6227_vm8 = vmmov %vm6121_vm0 }
 0x3ca   : > { %v3196_v34 = vunpack.i.h.bf16 %v3194_v29  ;;  %v3195_v54 = vunpack.i.l.bf16 %v3194_v29  ;;  %v1630_v15 = vsel %vm6201_vm11, %v6200_v44, %v3206_v25  ;;  %v1663_v41 = vsel %vm1654_vm14, %v1646_v59, %v3070_v56  ;;  %vm6232_vm15 = vmmov %vm6121_vm0 }
 0x3cb   : > { %v1647_v52 = vsel %vm1637_vm1, %v1630_v15, %v3211_v33  ;;  %v3225_v17 = vunpack.i.l.bf16 %v3224_v50  ;;  %v3226_v19 = vunpack.i.h.bf16 %v3224_v50  ;;  %vm6234_vm3 = vmmov %vm6121_vm0  ;;  %vm2194_vm0 = vcmask 253952  }
 0x3cc   : > { %v1709_v26 = vsel %vm1654_vm14, %v1693_v40, %v3195_v54  ;;  %v1710_v46 = vsel %vm1654_vm14, %v1694_v1, %v3196_v34  ;;  %v3229_v4 = vpop.permute.xlu1 %3228  ;;  %v1664_v60 = vsel %vm1654_vm14, %v1647_v52, %v3071_v32  ;;  %v6220_v34 = vld [vmem:[#allocation41_spill] sm:$0xff]  ;;  %v6225_v1 = vld [vmem:[#allocation22_spill] sm:$0xff]  ;;  %vm2195_vm11 = vsmask.f32 256 }
 0x3cd   : > { %v3199_v57 = vpop.permute.xlu0 %3198  ;;  %v1729_v28 = vpack.c.bf16 %v1710_v46, %v1709_v26  ;;  %v3230_v11 = vunpack.i.l.bf16 %v3229_v4  ;;  %v3231_v13 = vunpack.i.h.bf16 %v3229_v4  ;;  %v1631_v47 = vsel %vm6217_vm10, %v6216_v58, %v3225_v17  ;;  %v6224_v40 = vld [vmem:[#allocation33_spill] sm:$0xff]  ;;  %v6228_v26 = vld [vmem:[#allocation52_spill] sm:$0xff] }
 0x3ce   : > { %v3201_v36 = vunpack.i.h.bf16 %v3199_v57  ;;  %v3200_v43 = vunpack.i.l.bf16 %v3199_v57  ;;  %v1731_v49 = vpack.c.bf16 %v1664_v60, %v1663_v41  ;;  %v1632_v38 = vsel %vm6219_vm2, %v6218_v61, %v3226_v19  ;;  %v6229_v57 = vld [vmem:[#allocation39_spill] sm:$0xff] }
 0x3cf   : > { %1974 = vmatprep.mubr.bf16.mxu0 %v1729_v28  ;;  %v1648_v31 = vsel %vm1637_vm1, %v1631_v47, %v3230_v11  ;;  %v1649_v25 = vsel %vm1637_vm1, %v1632_v38, %v3231_v13  ;;  %v6226_v50 = vpack.c.bf16 %v6224_v40, %v6225_v1  ;;  %v3076_v46 = vunpack.i.h.bf16 %v6228_v26  ;;  %v6230_v28 = vld [vmem:[#allocation38_spill] sm:$0xff]  ;;  %v6237_v47 = vld [vmem:[#allocation23_spill] sm:$0xff]  ;;  %v6241_v1 = vld [vmem:[#allocation17_spill] sm:$0xff] }
 0x3d0   : > { %v1680_v8 = vsel %vm6204_vm4, %v6203_v37, %v3201_v36  ;;  %v1679_v30 = vsel %vm6206_vm5, %v6205_v45, %v3200_v43  ;;  %1975 = vmatmul.mubr.bf16.gmra.mrb[16].mxu0 %v1728_v7  ;;  %2861 = vmatmul.mubr.msk.bf16.gmra.mrb[16].mxu1 %vm6210_vm13, %v6209_v39  ;;  %v3239_v21 = vpop.permute.xlu1 %3238  ;;  %v3075_v63 = vunpack.i.l.bf16 %v6228_v26  ;;  %v6231_v7 = vpack.c.bf16 %v6229_v57, %v6230_v28  ;;  %v6233_v37 = vld [vmem:[#allocation47_spill] sm:$0xff]  ;;  %v6243_v57 = vld [vmem:[#allocation18_spill] sm:$0xff] }
 0x3d1   : > { %v3214_v3 = vpop.permute.xlu0 %3213  ;;  %2864 = vmatprep.mubr.msk.bf16.mxu1 %vm6215_vm7, %v6214_v10  ;;  %v1695_v0 = vsel %vm1637_vm1, %v1679_v30, %v3065_v27  ;;  %v1696_v22 = vsel %vm1637_vm1, %v1680_v8, %v3066_v55  ;;  %v3241_v16 = vunpack.i.h.bf16 %v3239_v21  ;;  %v3240_v48 = vunpack.i.l.bf16 %v3239_v21  ;;  %v2197_v8 = vld [vmem:[%s5541_s8 + $0x8] sm:$0x1]  ;;  %v2203_v30 = vld [vmem:[%s5541_s8 + $0x44] sm:$0x8] }
 0x3d2   : > { %v3216_v53 = vunpack.i.h.bf16 %v3214_v3  ;;  %v3215_v12 = vunpack.i.l.bf16 %v3214_v3  ;;  %vm2201_vm4 = vsmask.f32 7950  ;;  %vm2191_vm13 = vcmask 257024  }
 0x3d3   : > { %v1665_v44 = vsel %vm1654_vm14, %v1648_v31, %v3240_v48  ;;  %v1666_v15 = vsel %vm1654_vm14, %v1649_v25, %v3241_v16  ;;  %2192 = vst.msk [vmem:[%s5541_s8] sm:$0xf] %vm2191_vm13, %v3574_v42  ;;  %2193 = vst.msk [vmem:[%s5541_s8 + $0x4] sm:$0xf] %vm2191_vm13, %v3574_v42  ;;  %v6236_v48 = vld [vmem:[#allocation26_spill] sm:$0xff]  ;;  %v6239_v31 = vld [vmem:[#allocation16_spill] sm:$0xff] }
 0x3d4   : > { %v1711_v24 = vsel %vm1654_vm14, %v1695_v0, %v3215_v12  ;;  %v1712_v35 = vsel %vm1654_vm14, %v1696_v22, %v3216_v53  ;;  %v1734_v4 = vpack.c.bf16 %v1666_v15, %v1665_v44  ;;  %2206 = vst.msk [vmem:[%s5541_s8 + $0x48] sm:$0xf] %vm2191_vm13, %v3574_v42  ;;  %2207 = vst.msk [vmem:[%s5541_s8 + $0x4c] sm:$0xf] %vm2191_vm13, %v3574_v42  ;;  %v2133_v58 = vrot.slane %v6236_v48, 1 }
 0x3d5   : > { %v3219_v51 = vpop.permute.xlu0 %3218  ;;  %v1732_v62 = vpack.c.bf16 %v1712_v35, %v1711_v24  ;;  %v6235_v35 = vld [vmem:[#allocation25_spill] sm:$0xff]  ;;  %v2135_v25 = vrot.slane %v6239_v31, 1  ;;  %v2143_v28 = vrot.slane %v6243_v57, 1  ;;  %vm2417_vm7 = vsmask.f32 7938  ;;  %v6250_v31 = vld [vmem:[#allocation31_spill] sm:$0xff] }
 0x3d6   : > { %v3221_v2 = vunpack.i.h.bf16 %v3219_v51  ;;  %v3220_v29 = vunpack.i.l.bf16 %v3219_v51  ;;  %v2131_v51 = vrot.slane %v6235_v35, 1  ;;  %vm2256_vm10 = vsmask.f32 4368  ;;  %vm5619_vm2 = vmand %vm2191_vm13, %vm2417_vm7 }
 0x3d7   : > { %1982 = vmatprep.mubr.bf16.mxu0 %v1732_v62 }
 0x3d8   : > { %v1682_v54 = vsel %vm6221_vm6, %v6220_v34, %v3221_v2  ;;  %v1681_v33 = vsel %vm6223_vm9, %v6222_v5, %v3220_v29  ;;  %1983 = vmatmul.mubr.bf16.gmra.mrb[20].mxu0 %v1731_v49  ;;  %2865 = vmatmul.mubr.msk.bf16.gmra.mrb[20].mxu1 %vm6227_vm8, %v6226_v50  ;;  %v2128_v2 = vrot.slane %v6237_v47, 1  ;;  %v6238_v29 = vld [vmem:[#allocation24_spill] sm:$0xff]  ;;  %v5570_v5 = vld [vmem:[#allocation10] ss:$0 sm:$0xff]  ;;  %v2139_v50 = vrot.slane %v6241_v1, 1  ;;  %vm5628_vm6 = vmor %vm2195_vm11, %vm2256_vm10 }
 0x3d9   : > { %v3234_v23 = vpop.permute.xlu0 %3233  ;;  %2868 = vmatprep.mubr.msk.bf16.mxu1 %vm6232_vm15, %v6231_v7  ;;  %v1697_v43 = vsel %vm1637_vm1, %v1681_v33, %v3075_v63  ;;  %v1698_v6 = vsel %vm1637_vm1, %v1682_v54, %v3076_v46  ;;  %vm2196_vm1 = vmand %vm2194_vm0, %vm2195_vm11  ;;  %v2129_v49 = vrot.slane %v6238_v29, 1  ;;  %v6240_v34 = vld [vmem:[#allocation28_spill] sm:$0xff]  ;;  %v2134_v33 = vsel %vm1217_vm12, %v2131_v51, %v2133_v58  ;;  %v6242_v63 = vld [vmem:[#allocation27_spill] sm:$0xff] }
 0x3da   : > { %v3236_v59 = vunpack.i.h.bf16 %v3234_v23  ;;  %v3235_v36 = vunpack.i.l.bf16 %v3234_v23  ;;  %v2198_v45 = vsel %vm2196_vm1, 0, %v2197_v8  ;;  %v2141_v54 = vrot.slane %v6240_v34, 1 }
 0x3db   : > { %2199 = vst [vmem:[%s5541_s8 + $0x8] sm:$0x1] %v2198_v45  ;;  %v2130_v40 = vsel %vm1217_vm12, %v2128_v2, %v2129_v49  ;;  %v2132_v46 = vsel %vm1217_vm12, %v2129_v49, %v2131_v51  ;;  %v2137_v23 = vrot.slane %v6242_v63, 1  ;;  %v6246_v45 = vld [vmem:[#allocation21_spill] sm:$0xff]  ;;  %v6249_v49 = vld [vmem:[#allocation20_spill] sm:$0xff] }
 0x3dc   : > { %v1713_v56 = vsel %vm1654_vm14, %v1697_v43, %v3235_v36  ;;  %v1714_v52 = vsel %vm1654_vm14, %v1698_v6, %v3236_v59  ;;  %vm2200_vm14 = vcmask 257027   ;;  %v2136_v59 = vsel %vm1217_vm12, %v2133_v58, %v2135_v25  ;;  %v6244_v43 = vld [vmem:[#allocation29_spill] sm:$0xff]  ;;  %v6248_v58 = vld [vmem:[#allocation30_spill] sm:$0xff] }
 0x3dd   : > { %v1735_v32 = vpack.c.bf16 %v1714_v52, %v1713_v56  ;;  %vm2202_vm5 = vmand %vm2200_vm14, %vm2201_vm4  ;;  %v5582_v36 = vsel %vm1217_vm12, %v2139_v50, %v2141_v54  ;;  %v2145_v6 = vrot.slane %v6244_v43, 1  ;;  %v2149_v47 = vrot.slane %v6248_v58, 1 }
 0x3de   : > { %v2204_v18 = vsel %vm2202_vm5, 0, %v2203_v30  ;;  %v2155_v30 = vrot.slane %v6246_v45, 1  ;;  %vm2436_vm9 = vsmask.f32 3328 }
 0x3df   : > { %1990 = vmatprep.mubr.bf16.mxu0 %v1735_v32  ;;  %2205 = vst [vmem:[%s5541_s8 + $0x44] sm:$0x8] %v2204_v18 }
 0x3e0   : > { %1991 = vmatmul.mubr.bf16.gmra.mrb[24].mxu0 %v1734_v4  ;;  %2869 = vmatmul.mubr.msk.bf16.gmra.mrb[24].mxu1 %vm6234_vm3, %v6233_v37  ;;  %v6245_v37 = vld [vmem:[#allocation19_spill] sm:$0xff] }
 0x3e1   : > { %v2147_v8 = vrot.slane %v6245_v37, 1 }
 0x3e3   : > { %v5603_v35 = vsel %vm1217_vm12, %v2145_v6, %v2147_v8 }
 0x47b   : > { %v2772_v39 = vpop.f32.mrb[4].mxu0 }
 0x47c   : > { %v2773_v20 = vpop.f32.mrb[5].mxu0 }
 0x47d   : > { %v2774_v55 = vadd.f32 %v2773_v20, %v2772_v39  ;;  %v2775_v27 = vpop.f32.mrb[6].mxu0 }
 0x47e   : > { %v2776_v3 = vpop.f32.mrb[7].mxu0 }
 0x47f   : > { %v2777_v9 = vadd.f32 %v2776_v3, %v2775_v27  ;;  %v1953_v15 = vadd.f32 %v2774_v55, %v5570_v5  ;;  %v6247_v27 = vld [vmem:[#allocation32_spill] sm:$0xff] }
 0x480   : > { %v2157_v3 = vrot.slane %v6247_v27, 1 }
 0x481   : > { %v1956_v55 = vadd.f32 %v2777_v9, %v5570_v5  ;;  %v5598_v9 = vsel %vm1217_vm12, %v2143_v28, %v2145_v6 }
 0x482   : > { %v5610_v48 = vsel %vm1217_vm12, %v2155_v30, %v2157_v3 }
 0x483   : > { %v2808_v14 = vpop.f32.mrb[4].mxu1 }
 0x484   : > { %v2809_v10 = vpop.f32.mrb[5].mxu1 }
 0x485   : > { %v5556_v41 = vadd.f32 %v2809_v10, %v2808_v14  ;;  %v2811_v17 = vpop.f32.mrb[6].mxu1 }
 0x486   : > { %v2812_v53 = vpop.f32.mrb[7].mxu1 }
 0x487   : > { %v5558_v12 = vadd.f32 %v2812_v53, %v2811_v17 }
 0x48b   : > { %v2778_v60 = vpop.f32.mrb[8].mxu0 }
 0x48c   : > { %v2779_v19 = vpop.f32.mrb[9].mxu0 }
 0x48d   : > { %v2780_v11 = vadd.f32 %v2779_v19, %v2778_v60  ;;  %v2781_v0 = vpop.f32.mrb[10].mxu0  ;;  %v2138_v60 = vsel %vm1217_vm12, %v2135_v25, %v2137_v23  ;;  %v5592_v19 = vsel %vm1217_vm12, %v2141_v54, %v2143_v28  ;;  %v2153_v25 = vrot.slane %v6250_v31, 1 }
 0x48e   : > { %v2782_v22 = vpop.f32.mrb[11].mxu0 }
 0x48f   : > { %v2783_v21 = vadd.f32 %v2782_v22, %v2781_v0  ;;  %v1961_v26 = vadd.f32 %v2780_v11, %v5570_v5 }
 0x491   : > { %v1964_v32 = vadd.f32 %v2783_v21, %v5570_v5  ;;  %v5595_v21 = vsel %vm1217_vm12, %v2137_v23, %v2139_v50 }
 0x493   : > { %v2814_v13 = vpop.f32.mrb[8].mxu1 }
 0x494   : > { %v2815_v24 = vpop.f32.mrb[9].mxu1 }
 0x495   : > { %v5561_v62 = vadd.f32 %v2815_v24, %v2814_v13  ;;  %v2817_v16 = vpop.f32.mrb[10].mxu1 }
 0x496   : > { %v2818_v61 = vpop.f32.mrb[11].mxu1 }
 0x497   : > { %v5566_v38 = vadd.f32 %v2818_v61, %v2817_v16  ;;  %v2151_v61 = vrot.slane %v6249_v49, 1 }
 0x49b   : > { %v2784_v7 = vpop.f32.mrb[12].mxu0  ;;  %v2858_v44 = vpop.f32.mrb[12].mxu1 }
 0x49c   : > { %v2058_v56 = vadd.f32 %v2858_v44, %v1961_v26  ;;  %v2785_v52 = vpop.f32.mrb[13].mxu0  ;;  %v2049_v4 = vpop.f32.mrb[13].mxu1 }
 0x49d   : > { %v2786_v18 = vadd.f32 %v2785_v52, %v2784_v7  ;;  %v2050_v42 = vadd.f32 %v2049_v4, %v1953_v15  ;;  %v2787_v39 = vpop.f32.mrb[14].mxu0  ;;  %v2859_v20 = vpop.f32.mrb[14].mxu1  ;;  %v2419_v4 = vld [vmem:[%s5541_s8 + $0x8] sm:$0xf]  ;;  %v2012_v52 = vadd.f32 %v5566_v38, %v5570_v5 }
 0x49e   : > { %v2177_v14 = vmul.f32 %v2134_v33, %v2058_v56  ;;  %v2061_v10 = vadd.f32 %v2859_v20, %v1964_v32  ;;  %v2788_v17 = vpop.f32.mrb[15].mxu0  ;;  %v2052_v53 = vpop.f32.mrb[15].mxu1 }
 0x49f   : > { %v2175_v11 = vmul.f32 %v2130_v40, %v2050_v42  ;;  %v2789_v0 = vadd.f32 %v2788_v17, %v2787_v39  ;;  %v2053_v22 = vadd.f32 %v2052_v53, %v1956_v55  ;;  %v1969_v1 = vadd.f32 %v2786_v18, %v5570_v5 }
 0x4a0   : > { %v2683_v13 = vpack.c.bf16 %v2177_v14, %v2177_v14  ;;  %v2178_v24 = vmul.f32 %v2136_v59, %v2061_v10 }
 0x4a1   : > { %v2681_v51 = vpack.c.bf16 %v2175_v11, %v2175_v11  ;;  %v2176_v16 = vmul.f32 %v2132_v46, %v2053_v22  ;;  %v1972_v50 = vadd.f32 %v2789_v0, %v5570_v5 }
 0x4a2   : > { %v2276_v2 = vshrl.u32 %v2683_v13, 16  ;;  %v2684_v29 = vpack.c.bf16 %v2178_v24, %v2178_v24  ;;  %v2279_v46 = vshll.u32 %v2683_v13, 16 }
 0x4a3   : > { %v2259_v34 = vshrl.u32 %v2681_v51, 16  ;;  %v2682_v54 = vpack.c.bf16 %v2176_v16, %v2176_v16  ;;  %v2790_v33 = vpop.f32.mrb[16].mxu0  ;;  %v2862_v40 = vpop.f32.mrb[16].mxu1  ;;  %v2262_v63 = vshll.u32 %v2681_v51, 16 }
 0x4a4   : > { %v2278_v26 = vrot.slane %v2276_v2, 7  ;;  %v2285_v23 = vshrl.u32 %v2684_v29, 16  ;;  %v2791_v57 = vpop.f32.mrb[17].mxu0  ;;  %v2065_v28 = vpop.f32.mrb[17].mxu1  ;;  %v2288_v44 = vshll.u32 %v2684_v29, 16 }
 0x4a5   : > { %v2261_v7 = vrot.slane %v2259_v34, 7  ;;  %v2267_v15 = vshrl.u32 %v2682_v54, 16  ;;  %v2792_v59 = vadd.f32 %v2791_v57, %v2790_v33  ;;  %v2793_v43 = vpop.f32.mrb[18].mxu0  ;;  %v2863_v6 = vpop.f32.mrb[18].mxu1  ;;  %v2270_v18 = vshll.u32 %v2682_v54, 16 }
 0x4a6   : > { %v2281_v56 = vor.u32 %v2279_v46, %v2278_v26  ;;  %v5624_v32 = vrot.slane %v2285_v23, 7  ;;  %v2066_v42 = vadd.f32 %v2065_v28, %v1969_v1  ;;  %v2794_v39 = vpop.f32.mrb[19].mxu0  ;;  %v2068_v20 = vpop.f32.mrb[19].mxu1  ;;  %v2283_v55 = vrot.slane %v2278_v26, 4 }
 0x4a7   : > { %v2264_v10 = vor.u32 %v2262_v63, %v2261_v7  ;;  %v2269_v17 = vrot.slane %v2267_v15, 7  ;;  %v1977_v53 = vadd.f32 %v2792_v59, %v5570_v5  ;;  %v2265_v11 = vrot.slane %v2261_v7, 4 }
 0x4a8   : > { %v2290_v0 = vor.u32 %v2288_v44, %v5624_v32  ;;  %v2179_v22 = vmul.f32 %v2138_v60, %v2066_v42  ;;  %v2795_v13 = vadd.f32 %v2794_v39, %v2793_v43  ;;  %v2069_v33 = vadd.f32 %v2068_v20, %v1972_v50 }
 0x4a9   : > { %v2420_v24 = vsel %vm5619_vm2, %v2264_v10, %v2419_v4  ;;  %v2272_v51 = vor.u32 %v2270_v18, %v2269_v17  ;;  %v2274_v16 = vrot.slane %v2269_v17, 4  ;;  %v2074_v2 = vadd.f32 %v2862_v40, %v1977_v53 }
 0x4aa   : > { %2421 = vst [vmem:[%s5541_s8 + $0x8] sm:$0xf] %v2420_v24  ;;  %v2291_v29 = vsel %vm5628_vm6, %v2283_v55, %v2290_v0  ;;  %v2685_v34 = vpack.c.bf16 %v2179_v22, %v2179_v22  ;;  %v1980_v54 = vadd.f32 %v2795_v13, %v5570_v5  ;;  %v5654_v63 = vsel %vm1217_vm12, %v2151_v61, %v2153_v25 }
 0x4ab   : > { %2424 = vst.msk [vmem:[%s5541_s8 + $0x14] sm:$0xf] %vm2191_vm13, %v2291_v29  ;;  %v2273_v60 = vsel %vm5628_vm6, %v2265_v11, %v2272_v51  ;;  %v2282_v1 = vsel %vm5628_vm6, %v2274_v16, %v2281_v56  ;;  %v2181_v26 = vmul.f32 %v5582_v36, %v2074_v2  ;;  %v2796_v46 = vpop.f32.mrb[20].mxu0  ;;  %v5647_v40 = vpop.f32.mrb[20].mxu1  ;;  %v2180_v57 = vmul.f32 %v5595_v21, %v2069_v33 }
 0x4ac   : > { %2422 = vst.msk [vmem:[%s5541_s8 + $0xc] sm:$0xf] %vm2191_vm13, %v2273_v60  ;;  %2423 = vst.msk [vmem:[%s5541_s8 + $0x10] sm:$0xf] %vm2191_vm13, %v2282_v1  ;;  %v2294_v50 = vshrl.u32 %v2685_v34, 16  ;;  %v2077_v23 = vadd.f32 %v2863_v6, %v1980_v54  ;;  %v2797_v28 = vpop.f32.mrb[21].mxu0  ;;  %v2001_v7 = vadd.f32 %v5556_v41, %v5570_v5  ;;  %v2009_v56 = vadd.f32 %v5561_v62, %v5570_v5 }
 0x4ad   : > { %v2081_v36 = vpop.f32.mrb[21].mxu1  ;;  %v2687_v44 = vpack.c.bf16 %v2181_v26, %v2181_v26  ;;  %v2798_v15 = vadd.f32 %v2797_v28, %v2796_v46  ;;  %v2799_v59 = vpop.f32.mrb[22].mxu0  ;;  %v2297_v6 = vshll.u32 %v2685_v34, 16  ;;  %v2686_v18 = vpack.c.bf16 %v2180_v57, %v2180_v57 }
 0x4ae   : > { %v5663_v43 = vpop.f32.mrb[22].mxu1  ;;  %v2296_v4 = vrot.slane %v2294_v50, 7  ;;  %v2182_v21 = vmul.f32 %v5592_v19, %v2077_v23  ;;  %v2800_v42 = vpop.f32.mrb[23].mxu0  ;;  %v2292_v41 = vrot.slane %v5624_v32, 4 }
 0x4af   : > { %v2084_v39 = vpop.f32.mrb[23].mxu1  ;;  %v2312_v20 = vshrl.u32 %v2687_v44, 16  ;;  %v1985_v55 = vadd.f32 %v2798_v15, %v5570_v5  ;;  %v2801_v10 = vadd.f32 %v2800_v42, %v2799_v59  ;;  %v2315_v17 = vshll.u32 %v2687_v44, 16 }
 0x4b0   : > { %v2299_v53 = vor.u32 %v2297_v6, %v2296_v4  ;;  %v2688_v62 = vpack.c.bf16 %v2182_v21, %v2182_v21  ;;  %v2303_v11 = vshrl.u32 %v2686_v18, 16  ;;  %v2301_v38 = vrot.slane %v2296_v4, 4 }
 0x4b1   : > { %v2314_v0 = vrot.slane %v2312_v20, 7  ;;  %v2082_v22 = vadd.f32 %v2081_v36, %v1985_v55  ;;  %v1988_v13 = vadd.f32 %v2801_v10, %v5570_v5  ;;  %v2306_v32 = vshll.u32 %v2686_v18, 16 }
 0x4b2   : > { %v2300_v19 = vsel %vm5628_vm6, %v2292_v41, %v2299_v53  ;;  %v2321_v24 = vshrl.u32 %v2688_v62, 16  ;;  %v2305_v51 = vrot.slane %v2303_v11, 7  ;;  %v2324_v2 = vshll.u32 %v2688_v62, 16 }
 0x4b3   : > { %v2317_v16 = vor.u32 %v2315_v17, %v2314_v0  ;;  %2425 = vst.msk [vmem:[%s5541_s8 + $0x18] sm:$0xf] %vm2191_vm13, %v2300_v19  ;;  %v2183_v29 = vmul.f32 %v5598_v9, %v2082_v22  ;;  %v2085_v34 = vadd.f32 %v2084_v39, %v1988_v13  ;;  %v2802_v54 = vpop.f32.mrb[24].mxu0  ;;  %v2870_v33 = vpop.f32.mrb[24].mxu1  ;;  %v2319_v4 = vrot.slane %v2314_v0, 4 }
 0x4b4   : > { %v2323_v60 = vrot.slane %v2321_v24, 7  ;;  %v2308_v1 = vor.u32 %v2306_v32, %v2305_v51  ;;  %v2310_v26 = vrot.slane %v2305_v51, 4  ;;  %v2106_v46 = vadd.f32 %v2870_v33, %v2009_v56  ;;  %v2803_v50 = vpop.f32.mrb[25].mxu0  ;;  %v2097_v23 = vpop.f32.mrb[25].mxu1 }
 0x4b5   : > { %v2689_v57 = vpack.c.bf16 %v2183_v29, %v2183_v29  ;;  %v2184_v28 = vmul.f32 %v5603_v35, %v2085_v34  ;;  %v2804_v36 = vadd.f32 %v2803_v50, %v2802_v54  ;;  %v2098_v44 = vadd.f32 %v2097_v23, %v2001_v7  ;;  %v2805_v15 = vpop.f32.mrb[26].mxu0  ;;  %v2871_v59 = vpop.f32.mrb[26].mxu1 }
 0x4b6   : > { %v2326_v9 = vor.u32 %v2324_v2, %v2323_v60  ;;  %v2309_v6 = vsel %vm5628_vm6, %v2301_v38, %v2308_v1  ;;  %v2318_v21 = vsel %vm5628_vm6, %v2310_v26, %v2317_v16  ;;  %v2806_v56 = vpop.f32.mrb[27].mxu0  ;;  %v2100_v18 = vpop.f32.mrb[27].mxu1  ;;  %v2189_v7 = vmul.f32 %v5610_v48, %v2106_v46 }
 0x4b7   : > { %2426 = vst.msk [vmem:[%s5541_s8 + $0x1c] sm:$0xf] %vm2191_vm13, %v2309_v6  ;;  %2427 = vst.msk [vmem:[%s5541_s8 + $0x20] sm:$0xf] %vm2191_vm13, %v2318_v21  ;;  %v2330_v35 = vshrl.u32 %v2689_v57, 16  ;;  %v2690_v42 = vpack.c.bf16 %v2184_v28, %v2184_v28  ;;  %v2150_v39 = vsel %vm1217_vm12, %v2147_v8, %v2149_v47  ;;  %v1993_v20 = vadd.f32 %v2804_v36, %v5570_v5 }
 0x4b8   : > { %v2327_v41 = vsel %vm5628_vm6, %v2319_v4, %v2326_v9  ;;  %v2187_v55 = vmul.f32 %v5654_v63, %v2098_v44  ;;  %v2109_v10 = vadd.f32 %v2871_v59, %v2012_v52  ;;  %v2333_v53 = vshll.u32 %v2689_v57, 16 }
 0x4b9   : > { %2428 = vst.msk [vmem:[%s5541_s8 + $0x24] sm:$0xf] %vm2191_vm13, %v2327_v41  ;;  %v2332_v17 = vrot.slane %v2330_v35, 7  ;;  %v2339_v62 = vshrl.u32 %v2690_v42, 16  ;;  %v2695_v48 = vpack.c.bf16 %v2189_v7, %v2189_v7  ;;  %v2090_v11 = vadd.f32 %v5647_v40, %v1993_v20 }
 0x4ba   : > { %v2190_v37 = vmul.f32 %v2157_v3, %v2109_v10  ;;  %v2807_v8 = vadd.f32 %v2806_v56, %v2805_v15  ;;  %v2328_v0 = vrot.slane %v2323_v60, 4  ;;  %v2342_v13 = vshll.u32 %v2690_v42, 16 }
 0x4bb   : > { %v2335_v38 = vor.u32 %v2333_v53, %v2332_v17  ;;  %v2341_v22 = vrot.slane %v2339_v62, 7  ;;  %v2185_v63 = vmul.f32 %v2150_v39, %v2090_v11  ;;  %v2693_v52 = vpack.c.bf16 %v2187_v55, %v2187_v55 }
 0x4bc   : > { %v2004_v19 = vadd.f32 %v5558_v12, %v5570_v5  ;;  %v2337_v51 = vrot.slane %v2332_v17, 4  ;;  %v2384_v40 = vshrl.u32 %v2695_v48, 16  ;;  %v2696_v3 = vpack.c.bf16 %v2190_v37, %v2190_v37 }
 0x4bd   : > { %v2336_v24 = vsel %vm5628_vm6, %v2328_v0, %v2335_v38  ;;  %v2344_v32 = vor.u32 %v2342_v13, %v2341_v22  ;;  %v2691_v27 = vpack.c.bf16 %v2185_v63, %v2185_v63  ;;  %v1996_v16 = vadd.f32 %v2807_v8, %v5570_v5 }
 0x4be   : > { %2429 = vst.msk [vmem:[%s5541_s8 + $0x28] sm:$0xf] %vm2191_vm13, %v2336_v24  ;;  %v2156_v2 = vsel %vm1217_vm12, %v2153_v25, %v2155_v30  ;;  %v2101_v29 = vadd.f32 %v2100_v18, %v2004_v19  ;;  %v2366_v54 = vshrl.u32 %v2693_v52, 16  ;;  %v2152_v5 = vsel %vm1217_vm12, %v2149_v47, %v2151_v61  ;;  %vm5725_vm12 = vmand %vm2191_vm13, %vm2436_vm9  ;;  %v2438_v61 = vld [vmem:[%s5541_s8 + $0x44] sm:$0xf] }
 0x4bf   : > { %v2345_v12 = vsel %vm5628_vm6, %v2337_v51, %v2344_v32  ;;  %v2348_v34 = vshrl.u32 %v2691_v27, 16  ;;  %v2386_v33 = vrot.slane %v2384_v40, 7  ;;  %v2393_v45 = vshrl.u32 %v2696_v3, 16 }
 0x4c0   : > { %2430 = vst.msk [vmem:[%s5541_s8 + $0x2c] sm:$0xf] %vm2191_vm13, %v2345_v12  ;;  %v2093_v31 = vadd.f32 %v5663_v43, %v1996_v16  ;;  %v2188_v30 = vmul.f32 %v2156_v2, %v2101_v29  ;;  %v2351_v60 = vshll.u32 %v2691_v27, 16  ;;  %v2396_v26 = vshll.u32 %v2696_v3, 16 }
 0x4c1   : > { %v2350_v25 = vrot.slane %v2348_v34, 7  ;;  %v2395_v1 = vrot.slane %v2393_v45, 7  ;;  %v2346_v23 = vrot.slane %v2341_v22, 4  ;;  %v2368_v57 = vrot.slane %v2366_v54, 7 }
 0x4c2   : > { %v2186_v46 = vmul.f32 %v2152_v5, %v2093_v31  ;;  %v2694_v50 = vpack.c.bf16 %v2188_v30, %v2188_v30  ;;  %v2391_v58 = vrot.slane %v2386_v33, 4  ;;  %v2387_v44 = vshll.u32 %v2695_v48, 16 }
 0x4c3   : > { %v2353_v49 = vor.u32 %v2351_v60, %v2350_v25  ;;  %v2398_v28 = vor.u32 %v2396_v26, %v2395_v1  ;;  %v2369_v56 = vshll.u32 %v2693_v52, 16  ;;  %v2373_v18 = vrot.slane %v2368_v57, 4 }
 0x4c4   : > { %v2692_v43 = vpack.c.bf16 %v2186_v46, %v2186_v46  ;;  %v2375_v36 = vshrl.u32 %v2694_v50, 16  ;;  %v2378_v6 = vshll.u32 %v2694_v50, 16  ;;  %v2389_v21 = vor.u32 %v2387_v44, %v2386_v33 }
 0x4c5   : > { %v2354_v15 = vsel %vm5628_vm6, %v2346_v23, %v2353_v49  ;;  %v2399_v59 = vsel %vm5628_vm6, %v2391_v58, %v2398_v28  ;;  %v2355_v20 = vrot.slane %v2350_v25, 4  ;;  %v2371_v55 = vor.u32 %v2369_v56, %v2368_v57 }
 0x4c6   : > { %2431 = vst.msk [vmem:[%s5541_s8 + $0x30] sm:$0xf] %vm2191_vm13, %v2354_v15  ;;  %v2357_v4 = vshrl.u32 %v2692_v43, 16  ;;  %v2377_v9 = vrot.slane %v2375_v36, 7  ;;  %v2439_v35 = vsel %vm5725_vm12, %v2399_v59, %v2438_v61  ;;  %v2360_v7 = vshll.u32 %v2692_v43, 16 }
 0x4c7   : > { %2440 = vst [vmem:[%s5541_s8 + $0x44] sm:$0xf] %v2439_v35 }
 0x4c8   : > { %v2359_v42 = vrot.slane %v2357_v4, 7  ;;  %v2380_v39 = vor.u32 %v2378_v6, %v2377_v9  ;;  %v2382_v41 = vrot.slane %v2377_v9, 4 }
 0x4ca   : > { %v2362_v10 = vor.u32 %v2360_v7, %v2359_v42  ;;  %v2364_v17 = vrot.slane %v2359_v42, 4  ;;  %v2381_v53 = vsel %vm5628_vm6, %v2373_v18, %v2380_v39  ;;  %v2390_v62 = vsel %vm5628_vm6, %v2382_v41, %v2389_v21 }
 0x4cb   : > { %2434 = vst.msk [vmem:[%s5541_s8 + $0x3c] sm:$0xf] %vm2191_vm13, %v2381_v53  ;;  %2435 = vst.msk [vmem:[%s5541_s8 + $0x40] sm:$0xf] %vm2191_vm13, %v2390_v62 }
 0x4cc   : > { %v2363_v48 = vsel %vm5628_vm6, %v2355_v20, %v2362_v10  ;;  %v2372_v11 = vsel %vm5628_vm6, %v2364_v17, %v2371_v55 }
 0x4cd   : > { %2432 = vst.msk [vmem:[%s5541_s8 + $0x34] sm:$0xf] %vm2191_vm13, %v2363_v48  ;;  %2433 = vst.msk [vmem:[%s5541_s8 + $0x38] sm:$0xf] %vm2191_vm13, %v2372_v11 }
 0x4ce   : > { %3497 = shalt.err (!%p3494_p13)
}
 0x4cf   : > { %s3498_s13 = scalar_lea.hbm %s5752_s10, 1280  ;;  %s3502_s17 = scalar_lea.hbm %s5813_s5, 2560 }
 0x4d0   : > { %p3499_p0 = scmp.ne.s32.totalorder %s5752_s10, %s3498_s13  ;;  %p3503_p9 = scmp.lt.u32.totalorder %s5752_s10, %s5813_s5 }
 0x4d1   : > { %p3504_p12 = scmp.lt.u32.totalorder %s3502_s17, %s3498_s13  ;;  %p3506_p4 = scmp.lt.u32.totalorder %s3498_s13, %s5752_s10 }
 0x4d2   : > { %p3500_p5 = pnand %p3499_p0, %p3762_p1 }
 0x4d3   : > { %p3505_p2 = por %p3504_p12, %p3503_p9 }
 0x4d4   : > { %p3501_p11 = pneg %p3500_p5 }
 0x4d5   : > { %p3507_p6 = por %p3506_p4, %p3505_p2 }
 0x4d7   : > { %p3508_p8 = pnand %p3507_p6, %p3501_p11 }
 0x4d9   : > { %3511 = shalt.err (!%p3508_p8)
}
 0x4da   : > { %s3576_s22 = smov 4  }
 0x4db   : > { %2922 = dma.vmem_to_hbm [thread:$0]  (%p3762_p1), %s5754_s23, 1280, %s5752_s10, %s2442_s11, %s3571_s24, %s3571_s24, %s3576_s22  }
 0x4dc PF: > { %s2470_s15 = sand.u32 1, %s3546_s18   ;;  %p6257_p3 = scmp.ne.s32.totalorder %s5923_s25, 0 }
 0x4dd   : > { %p6258_p7 = scmp.ge.s32.totalorder %s3558_s21, 2  ;;  %s2471_s30 = scalar_lea.sflag [#allocation4], %s2470_s15 }
 0x4df   : > { %p2942_p10 = pnand %p6258_p7, %p6257_p3 }
 0x4e1   : > { %3541 = dma.done.wait (!%p2942_p10), %s2471_s30, 1280  }
 0x4e2   : > { %3543 = vsyncadd (!%p2942_p10), %s2471_s30, 4294966016  ;;  %p20_p13 = scmp.ge.s32.totalorder %s3752_s14, 4   ;;  %s6259_s18 = smov %s3550_s19 }
 0x4e3   : > { %s6260_s19 = smov %s3554_s20  ;;  %s6261_s20 = smov %s3768_s9 }
 0x4e4   : > { %s6262_s21 = smov %s3752_s14  ;;  %22 = sbr.rel (!%p20_p13) target bundleno = 7 (0x7), region = 101 }
 0x4eb   :  { %2476 = vsyncpa [#allocation3], 1 }
 0x4ec   :  { %2478 = vsyncpa [#allocation3 + $0x1], 1 }
 0x4ed   :  { %2479 = vsyncpa [#allocation6], 1 }
 0x4ee   :  { %2480 = vsyncpa [#allocation9], 1 }
 0x4ef   :  { %2481 = vsyncpa [#allocation4], 1 }
 0x4f0   :  { %2483 = vsyncpa [#allocation4 + $0x1], 1 }

// kernel: pose_encoder_forward.8
= control target key start
LH: loop header
LB: loop body
LE: loop exit
PB: predicated region body
PF: predicated region fallthrough
CT: control target
= control target key end

     0   :  { %10 = vsyncpa [#allocation3], 0  ;;  %s2607_s0 = inlined_call_operand.hbm [shape: bf16[2,48,32], index: 0, kind: input, shape index: {}]   ;;  %s2608_s1 = inlined_call_operand.hbm [shape: f32[1,32], index: 1, kind: input, shape index: {}]   ;;  %s2609_s2 = inlined_call_operand.hbm [shape: f32[1,32], index: 2, kind: input, shape index: {}]   ;;  %s2610_s3 = inlined_call_operand.hbm [shape: bf16[288,64], index: 3, kind: input, shape index: {}]   ;;  %s2611_s4 = inlined_call_operand.hbm [shape: f32[1,64], index: 4, kind: input, shape index: {}]   ;;  %s2612_s5 = inlined_call_operand.hbm [shape: bf16[2,48,64], index: 5, kind: output, shape index: {}]  }
   0x1   :  { %12 = vsyncpa [#allocation3 + $0x1], 0 }
   0x2   :  { %13 = vsyncpa [#allocation6], 0 }
   0x3   :  { %14 = vsyncpa [#allocation9], 0 }
   0x4   :  { %15 = vsyncpa [#allocation4], 0 }
   0x5   :  { %17 = vsyncpa [#allocation4 + $0x1], 0  ;;  %s1974_s18 = smov 0   ;;  %s1976_s19 = smov 0  }
   0x6   :  { %s1978_s20 = smov 0   ;;  %s1980_s21 = smov 0  }
   0x7 LB: > { %s1995_s22 = sadd.s32 4294967295, %s1925_s21   ;;  %s1332_s23 = sadd.s32 4294967294, %s1925_s21   ;;  %s1925_s21 = sphi %s1980_s21, %s2673_s21   ;;  %s1921_s20 = sphi %s1978_s20, %s2672_s20   ;;  %s1917_s19 = sphi %s1976_s19, %s2671_s19   ;;  %s1913_s18 = sphi %s1974_s18, %s2670_s18  }
   0x8   : > { %p43_p0 = scmp.ne.s32.totalorder %s1917_s19, %s1913_s18  ;;  %p2613_p1 = scmp.eq.s32.totalorder %s1995_s22, 0 }
   0x9   : > { %p157_p3 = scmp.eq.s32.totalorder %s1332_s23, 1  ;;  %p1333_p5 = scmp.ge.s32.totalorder %s1925_s21, 1 }
   0xa   : > { %p2004_p4 = por %p2613_p1, %p43_p0  ;;  %p164_p7 = scmp.lt.s32.totalorder %s1925_s21, 3 }
   0xb   : > { %p2009_p6 = por %p157_p3, %p43_p0  ;;  %s1927_s27 = smov [#allocation5]  }
   0xc   : > { %s2618_s24 = scalar_select %p2004_p4, 1, 0 }
   0xd   : > { %s2619_s25 = scalar_select %p2009_p6, 1, 0 }
   0xe   : > { %p2014_p8 = pnand %p1333_p5, %p164_p7  ;;  %s177_s28 = sshll.u32 %s1927_s27, 4  ;;  %s178_s28 = int_to_ptr.vmem [resolvable:$true] %s177_s28 }
   0xf   : > { %s1928_s29 = smov [#allocation8]   ;;  %s1929_s7 = smov [#allocation7]  }
  0x10   : > { %s2620_s26 = scalar_select %p2014_p8, 1, 0 }
  0x11   : > { %p1527_p10 = pneg %p2014_p8  ;;  %s198_s30 = sshll.u32 %s1928_s29, 4  ;;  %s2027_s30 = int_to_ptr.vmem [resolvable:$true] %s198_s30 }
  0x12   : > { %s2029_s8 = sshll.u32 %s1929_s7, 4  ;;  %s1709_s11 = scalar_lea.hbm %s2608_s1, 16  ;;  %s189_s8 = int_to_ptr.vmem [resolvable:$true] %s2029_s8 }
  0x13   : > { %p2023_p11 = pnand %p1527_p10, %p2613_p1  ;;  %p1710_p12 = scmp.ne.s32.totalorder %s2608_s1, %s1709_s11 }
  0x14   : > { %p1716_p5 = scmp.lt.u32.totalorder %s1709_s11, %s2608_s1 }
  0x15   : > { %p2039_p13 = pneg %p2023_p11 }
  0x17   : > { %p1712_p0 = pnand %p2039_p13, %p1710_p12 }
  0x19   : > { %p1713_p3 = pneg %p1712_p0 }
  0x1b   : > { %p1718_p7 = pnand %p1716_p5, %p1713_p3 }
  0x1d   : > { %1721 = shalt.err (!%p1718_p7)
}
  0x1e   : > { %s1722_s17 = scalar_lea.vmem %s178_s28, 16  ;;  %s1729_s23 = scalar_lea.vmem %s178_s28, 32 }
  0x1f   : > { %p1723_p10 = scmp.ne.s32.totalorder %s178_s28, %s1722_s17  ;;  %p1730_p2 = scmp.lt.s32.totalorder %s178_s28, %s178_s28 }
  0x20   : > { %p1731_p6 = scmp.lt.s32.totalorder %s1729_s23, %s1722_s17 }
  0x21   : > { %p1725_p9 = pnand %p1723_p10, %p2039_p13 }
  0x22   : > { %p1732_p4 = por %p1731_p6, %p1730_p2 }
  0x23   : > { %p1726_p1 = pneg %p1725_p9 }
  0x25   : > { %p1733_p8 = pnand %p1732_p4, %p1726_p1 }
  0x27   : > { %1736 = shalt.err (!%p1733_p8)
}
  0x28   : > { %1530 = dma.hbm_to_vmem [thread:$0]  (!%p2023_p11), %s2608_s1, 16, %s178_s28, [#allocation6]  }
  0x29   : > { %s1737_s10 = scalar_lea.hbm %s2610_s3, 2304 }
  0x2a   : > { %p1738_p9 = scmp.ne.s32.totalorder %s2610_s3, %s1737_s10  ;;  %p1744_p1 = scmp.lt.u32.totalorder %s1737_s10, %s2610_s3 }
  0x2c   : > { %p1740_p12 = pnand %p1738_p9, %p2039_p13 }
  0x2e   : > { %p1741_p2 = pneg %p1740_p12 }
  0x30   : > { %p1746_p4 = pnand %p1744_p1, %p1741_p2 }
  0x32   : > { %1749 = shalt.err (!%p1746_p4)
}
  0x33   : > { %s1750_s28 = scalar_lea.vmem %s2027_s30, 2304  ;;  %p1758_p3 = scmp.lt.s32.totalorder %s2027_s30, %s2027_s30 }
  0x34   : > { %p1751_p6 = scmp.ne.s32.totalorder %s2027_s30, %s1750_s28  ;;  %p1759_p5 = scmp.lt.s32.totalorder %s1750_s28, %s1750_s28 }
  0x36   : > { %p1753_p8 = pnand %p1751_p6, %p2039_p13  ;;  %p1760_p7 = por %p1759_p5, %p1758_p3 }
  0x38   : > { %p1754_p0 = pneg %p1753_p8 }
  0x3a   : > { %p1761_p10 = pnand %p1760_p7, %p1754_p0 }
  0x3c   : > { %1764 = shalt.err (!%p1761_p10)
}
  0x3d   : > { %s2616_s16 = smov 64   ;;  %s1931_s17 = smov 4  }
  0x3e   : > { %1536 = dma.hbm_to_vmem [thread:$0]  (!%p2023_p11), %s2610_s3, 2304, %s2027_s30, [#allocation9], %s2616_s16, %s2616_s16, %s1931_s17  }
  0x3f   : > { %s1765_s9 = scalar_lea.hbm %s2609_s2, 16 }
  0x40   : > { %p1766_p9 = scmp.ne.s32.totalorder %s2609_s2, %s1765_s9  ;;  %p1772_p1 = scmp.lt.u32.totalorder %s1765_s9, %s2609_s2 }
  0x42   : > { %p1768_p12 = pnand %p1766_p9, %p2039_p13 }
  0x44   : > { %p1769_p2 = pneg %p1768_p12 }
  0x46   : > { %p1774_p4 = pnand %p1772_p1, %p1769_p2 }
  0x48   : > { %1777 = shalt.err (!%p1774_p4)
}
  0x49   : > { %s1778_s15 = scalar_lea.vmem %s189_s8, 16  ;;  %s1785_s30 = scalar_lea.vmem %s189_s8, 32 }
  0x4a   : > { %p1779_p6 = scmp.ne.s32.totalorder %s189_s8, %s1778_s15  ;;  %p1786_p3 = scmp.lt.s32.totalorder %s189_s8, %s189_s8 }
  0x4b   : > { %p1787_p5 = scmp.lt.s32.totalorder %s1785_s30, %s1778_s15 }
  0x4c   : > { %p1781_p8 = pnand %p1779_p6, %p2039_p13 }
  0x4d   : > { %p1788_p7 = por %p1787_p5, %p1786_p3 }
  0x4e   : > { %p1782_p0 = pneg %p1781_p8 }
  0x50   : > { %p1789_p10 = pnand %p1788_p7, %p1782_p0 }
  0x52   : > { %1792 = shalt.err (!%p1789_p10)
}
  0x53   : > { %1533 = dma.hbm_to_vmem [thread:$0]  (!%p2023_p11), %s2609_s2, 16, %s189_s8, [#allocation6]  }
  0x54   : > { %s1932_s27 = smov [#allocation10]   ;;  %s1793_s10 = scalar_lea.hbm %s2611_s4, 16 }
  0x55   : > { %s212_s29 = sshll.u32 %s1932_s27, 4  ;;  %p1794_p9 = scmp.ne.s32.totalorder %s2611_s4, %s1793_s10  ;;  %s213_s29 = int_to_ptr.vmem [resolvable:$true] %s212_s29 }
  0x56   : > { %p1800_p1 = scmp.lt.u32.totalorder %s1793_s10, %s2611_s4 }
  0x57   : > { %p1796_p12 = pnand %p1794_p9, %p2039_p13 }
  0x59   : > { %p1797_p2 = pneg %p1796_p12 }
  0x5b   : > { %p1802_p4 = pnand %p1800_p1, %p1797_p2 }
  0x5d   : > { %1805 = shalt.err (!%p1802_p4)
}
  0x5e   : > { %s1806_s8 = scalar_lea.vmem %s213_s29, 16  ;;  %s1813_s30 = scalar_lea.vmem %s213_s29, 32 }
  0x5f   : > { %p1807_p6 = scmp.ne.s32.totalorder %s213_s29, %s1806_s8  ;;  %p1814_p3 = scmp.lt.s32.totalorder %s213_s29, %s213_s29 }
  0x60   : > { %p1815_p5 = scmp.lt.s32.totalorder %s1813_s30, %s1806_s8 }
  0x61   : > { %p1809_p8 = pnand %p1807_p6, %p2039_p13 }
  0x62   : > { %p1816_p7 = por %p1815_p5, %p1814_p3 }
  0x63   : > { %p1810_p0 = pneg %p1809_p8 }
  0x65   : > { %p1817_p10 = pnand %p1816_p7, %p1810_p0 }
  0x67   : > { %1820 = shalt.err (!%p1817_p10)
}
  0x68   : > { %1539 = dma.hbm_to_vmem [thread:$0]  (!%p2023_p11), %s2611_s4, 16, %s213_s29, [#allocation9]  }
  0x69   : > { %s2119_s14 = sadd.s32 1, %s1925_s21   ;;  %s30_s27 = sadd.s32 1, %s1921_s20 }
  0x6a   : > { %s27_s6 = ssub.s32 %s1925_s21, %s2119_s14  ;;  %p37_p13 = scmp.ne.s32.totalorder %s1921_s20, %s1917_s19 }
  0x6b   : > { %p28_p9 = scmp.eq.s32.totalorder %s27_s6, 0  ;;  %p38_p12 = scmp.eq.s32.totalorder %s1925_s21, 0 }
  0x6c   : > { %p2623_p2 = scmp.eq.s32.totalorder %s1995_s22, 1  ;;  %p1552_p4 = scmp.lt.s32.totalorder %s1925_s21, 2 }
  0x6d   : > { %s2135_s9 = scalar_select %p28_p9, %s1921_s20, %s30_s27  }
  0x6e   : > { %p2129_p1 = por %p2623_p2, %p37_p13  ;;  %p39_p6 = por %p38_p12, %p37_p13 }
  0x6f   : > { %s223_s10 = sand.u32 1, %s1921_s20   ;;  %s1504_s29 = smul.u32 384, %s1925_s21 }
  0x70   : > { %s1503_s11 = smul.u32 24, %s223_s10  ;;  %p2139_p11 = pnand %p1552_p4, %p39_p6 }
  0x71   : > { %s2146_s8 = scalar_lea.hbm %s2607_s0, %s1504_s29  ;;  %s2150_s23 = scalar_lea.sflag [#allocation3], %s223_s10 }
  0x72   : > { %s227_s30 = scalar_lea.vmem [#allocation2], %s1503_s11  ;;  %s1821_s27 = scalar_lea.hbm %s2146_s8, 384 }
  0x73   : > { %s234_s28 = sshll.u32 %s227_s30, 4  ;;  %p1822_p8 = scmp.ne.s32.totalorder %s2146_s8, %s1821_s27  ;;  %s2148_s28 = int_to_ptr.vmem [resolvable:$true] %s234_s28 }
  0x74   : > { %p1823_p0 = pneg %p2139_p11  ;;  %s1826_s13 = scalar_lea.hbm %s2607_s0, 768 }
  0x75   : > { %p1827_p7 = scmp.lt.u32.totalorder %s2146_s8, %s2607_s0  ;;  %p1828_p10 = scmp.lt.u32.totalorder %s1826_s13, %s1821_s27 }
  0x76   : > { %p1824_p3 = pnand %p1823_p0, %p1822_p8  ;;  %p1830_p9 = scmp.lt.u32.totalorder %s1821_s27, %s2146_s8 }
  0x77   : > { %p1829_p13 = por %p1828_p10, %p1827_p7 }
  0x78   : > { %p1825_p5 = pneg %p1824_p3 }
  0x79   : > { %p1831_p12 = por %p1830_p9, %p1829_p13 }
  0x7b   : > { %p1832_p2 = pnand %p1831_p12, %p1825_p5 }
  0x7d   : > { %1835 = shalt.err (!%p1832_p2)
}
  0x7e   : > { %s1836_s10 = scalar_lea.vmem %s2148_s28, 384  ;;  %s1933_s11 = smov [#allocation2]  }
  0x7f   : > { %p1837_p4 = scmp.ne.s32.totalorder %s2148_s28, %s1836_s10  ;;  %s1841_s30 = sshll.u32 %s1933_s11, 4  ;;  %s1842_s30 = int_to_ptr.vmem [resolvable:$false] %s1841_s30 }
  0x80   : > { %s1843_s16 = scalar_lea.vmem %s1842_s30, 768  ;;  %p1844_p3 = scmp.lt.s32.totalorder %s2148_s28, %s1842_s30 }
  0x81   : > { %p1839_p6 = pnand %p1837_p4, %p1823_p0  ;;  %p1845_p7 = scmp.lt.s32.totalorder %s1843_s16, %s1836_s10 }
  0x83   : > { %p1840_p8 = pneg %p1839_p6  ;;  %p1846_p10 = por %p1845_p7, %p1844_p3 }
  0x85   : > { %p1847_p13 = pnand %p1846_p10, %p1840_p8 }
  0x87   : > { %1850 = shalt.err (!%p1847_p13)
}
  0x88   : > { %s2626_s27 = smov 64   ;;  %p2627_p0 = scmp.ne.s32.totalorder %s2620_s26, 0 }
  0x89   : > { %1543 = dma.hbm_to_vmem [thread:$0]  (!%p2139_p11), %s2146_s8, 384, %s2148_s28, %s2150_s23, %s2626_s27, %s2626_s27, %s1931_s17  }
  0x8a   : > { %246 = sbr.rel (%p2627_p0) target bundleno = 1085 (0x43d), region = 40  ;;  %s2184_s6 = sand.u32 (!%p2627_p0), 1, %s1917_s19  }
  0x8b   : > { %s1505_s29 = smul.u32 (!%p2627_p0), 24, %s2184_s6  ;;  %s249_s13 = scalar_lea.sflag (!%p2627_p0), [#allocation3], %s2184_s6 }
  0x8c   : > { %p2628_p5 = scmp.ne.s32.totalorder (!%p2627_p0), %s2618_s24, 0 }
  0x8d   : > { %s2190_s12 = scalar_lea.vmem (!%p2627_p0), [#allocation2], %s1505_s29 }
  0x91   : > { %1896 = dma.done.wait (%p2628_p5), %s249_s13, 384  }
  0x92   : > { %1898 = vsyncadd (%p2628_p5), %s249_s13, 4294966912  ;;  %p2629_p11 = scmp.eq.s32.totalorder %s1995_s22, 0 }
  0x94   : > { %1900 = dma.done.wait (%p2629_p11), [#allocation6], 32   ;;  %p2630_p9 = pmov %p2629_p11 }
  0x96   : > { %1902 = vsyncadd (%p2630_p9), [#allocation6], 4294967264  ;;  %p2631_p12 = pmov %p2630_p9 }
  0x97   : > { %p2632_p2 = pmov %p2630_p9 }
  0x98   : > { %1904 = dma.done.wait (%p2631_p12), [#allocation9], 2320  }
  0x99   : > { %1906 = vsyncadd (%p2632_p2), [#allocation9], 4294964976  ;;  %v308_v0 = vlaneseq  ;;  %v1934_v1 = vmov 0.0|0.0   ;;  %vm1935_vm0 = vmmov 0   ;;  %v1936_v4 = vmov 0.0   ;;  %v2236_v17 = vld [vmem:[%s2190_s12] sm:$0xff]  }
  0x9a   : > { %1491 = vmatprep.subr.bf16.mxu1 %v1934_v1  ;;  %1469 = vmatprep.mubr.msk.f32.mxu1 %vm1935_vm0, %v1936_v4  ;;  %v1937_v16 = vmov 1.0|1.0   ;;  %v2243_v20 = vld [vmem:[%s2190_s12 + $0x8] sm:$0xff]   ;;  %v1407_v21 = vunpack.c.l.bf16 %v2236_v17  ;;  %v1408_v22 = vunpack.c.h.bf16 %v2236_v17  ;;  %v2248_v23 = vld [vmem:[%s2190_s12 + $0x10] sm:$0xff]   ;;  %vm2617_vm4 = vcmask 261120   ;;  %s1938_s24 = smov 64  }
  0x9b   : > { %v2204_v2 = vshrl.u32 %v308_v0, 7  ;;  %v401_v3 = vand.u32 127, %v308_v0  ;;  %v1411_v26 = vunpack.c.l.bf16 %v2243_v20  ;;  %v1412_v27 = vunpack.c.h.bf16 %v2243_v20  ;;  %s1939_s26 = smov 96   ;;  %s1940_s17 = smov 32  }
  0x9c   : > { %v1415_v28 = vunpack.c.l.bf16 %v2248_v23  ;;  %v421_v29 = vsel %vm2617_vm4, %v1407_v21, 0.0  ;;  %v422_v30 = vsel %vm2617_vm4, %v1408_v22, 0.0  ;;  %v1416_v33 = vunpack.c.h.bf16 %v2248_v23  ;;  %s2514_s8 = scalar_lea.vmem [#allocation11], %s1505_s29  ;;  %s1506_s28 = smul.u32 384, %s1995_s22 }
  0x9d   : > { %v310_v5 = vadd.s32 8, %v2204_v2  ;;  %v2210_v6 = vcvt.s32.f32 %v2204_v2  ;;  %v402_v7 = vcvt.s32.f32 %v401_v3  ;;  %v311_v13 = vadd.s32 16, %v2204_v2  ;;  %s1221_s23 = sshll.u32 %s2514_s8, 4  ;;  %s1208_s22 = scalar_lea.sflag [#allocation4], %s2184_s6  ;;  %s2560_s23 = int_to_ptr.vmem [resolvable:$true] %s1221_s23 }
  0x9e   : > { %v312_v14 = vadd.s32 24, %v2204_v2  ;;  %v423_v31 = vadd.f32 %v422_v30, %v421_v29  ;;  %v424_v32 = vsel %vm2617_vm4, %v1411_v26, 0.0  ;;  %v426_v34 = vsel %vm2617_vm4, %v1412_v27, 0.0  ;;  %s2558_s11 = scalar_lea.hbm %s2612_s5, %s1506_s28  ;;  %s1851_s30 = scalar_lea.vmem %s2560_s23, 384 }
  0x9f   : > { %v2212_v8 = vcvt.s32.f32 %v310_v5  ;;  %v403_v9 = vfloor.f32 %v2210_v6  ;;  %v407_v10 = vfloor.f32 %v402_v7  ;;  %v2238_v18 = vcvt.s32.f32 %v311_v13  ;;  %p1852_p4 = scmp.ne.s32.totalorder %s2560_s23, %s1851_s30  ;;  %s1942_s16 = smov [#allocation11]  }
  0xa0   : > { %v2240_v19 = vcvt.s32.f32 %v312_v14  ;;  %v425_v37 = vadd.f32 %v424_v32, %v423_v31  ;;  %v428_v38 = vsel %vm2617_vm4, %v1415_v28, 0.0  ;;  %v430_v40 = vsel %vm2617_vm4, %v1416_v33, 0.0  ;;  %s1855_s27 = sshll.u32 %s1942_s16, 4  ;;  %s1856_s27 = int_to_ptr.vmem [resolvable:$false] %s1855_s27 }
  0xa1   : > { %v404_v11 = vfloor.f32 %v2212_v8  ;;  %vm2216_vm1 = vcmp.eq.f32.partialorder %v403_v9, %v407_v10  ;;  %v405_v24 = vfloor.f32 %v2238_v18  ;;  %v322_v49 = vmul.f32 0.125, %v2210_v6  ;;  %p1853_p6 = pnand %p1852_p4, %p2129_p1  ;;  %s1857_s29 = scalar_lea.vmem %s1856_s27, 768 }
  0xa2   : > { %v406_v25 = vfloor.f32 %v2240_v19  ;;  %v427_v39 = vadd.f32 %v426_v34, %v425_v37  ;;  %v323_v50 = vmul.f32 0.125, %v2212_v8  ;;  %v313_v51 = vadd.s32 32, %v2204_v2  ;;  %p1858_p3 = scmp.lt.s32.totalorder %s2560_s23, %s1856_s27  ;;  %p1859_p7 = scmp.lt.s32.totalorder %s1857_s29, %s1851_s30 }
  0xa3   : > { %vm2222_vm2 = vcmp.eq.f32.partialorder %v404_v11, %v407_v10  ;;  %vm2268_vm5 = vcmp.eq.f32.partialorder %v405_v24, %v407_v10  ;;  %v328_v52 = vfloor.f32 %v322_v49  ;;  %v314_v53 = vadd.s32 40, %v2204_v2  ;;  %p1854_p8 = pneg %p1853_p6 }
  0xa4   : > { %vm1492_vm3 = vmpackc.low %vm2222_vm2, %vm2216_vm1  ;;  %vm2272_vm6 = vcmp.eq.f32.partialorder %v406_v25, %v407_v10  ;;  %v429_v41 = vadd.f32 %v428_v38, %v427_v39  ;;  %v329_v54 = vfloor.f32 %v323_v50  ;;  %v324_v55 = vmul.f32 0.125, %v2238_v18  ;;  %p1860_p10 = por %p1859_p7, %p1858_p3 }
  0xa5   : > { %1493 = vmatpush3.bf16.msk.msra.mxu1 %vm1492_vm3, %v1937_v16  ;;  %vm1495_vm7 = vmpackc.low %vm2272_vm6, %vm2268_vm5  ;;  %v325_v56 = vmul.f32 0.125, %v2240_v19  ;;  %v319_v57 = vcvt.s32.f32 %v313_v51  ;;  %v334_v58 = vmul.f32 8.0, %v328_v52  ;;  %v320_v59 = vcvt.s32.f32 %v314_v53 }
  0xa6   : > { %1494 = vmatprep.subr.bf16.mxu1 %v1934_v1  ;;  %v431_v42 = vadd.f32 %v430_v40, %v429_v41  ;;  %v335_v60 = vmul.f32 8.0, %v329_v54  ;;  %v330_v61 = vfloor.f32 %v324_v55  ;;  %vm346_vm8 = vcmp.ge.f32.partialorder %v328_v52, 1.0  ;;  %p1861_p13 = pnand %p1860_p10, %p1854_p8 }
  0xa7   : > { %v331_v62 = vfloor.f32 %v325_v56  ;;  %v326_v63 = vmul.f32 0.125, %v319_v57  ;;  %v340_v0 = vsub.f32 %v2210_v6, %v334_v58  ;;  %vm352_vm9 = vcmp.le.f32.partialorder %v328_v52, 4.0 }
  0xa8   : > { %v432_v43 = vrot.slane %v431_v42, 4  ;;  %v341_v3 = vsub.f32 %v2212_v8, %v335_v60  ;;  %v336_v5 = vmul.f32 8.0, %v330_v61  ;;  %vm347_vm10 = vcmp.ge.f32.partialorder %v329_v54, 1.0  ;;  %vm358_vm12 = vmand %vm346_vm8, %vm352_vm9 }
  0xa9   : > { %1496 = vmatpush3.bf16.msk.msra.mxu1 %vm1495_vm7, %v1937_v16  ;;  %vm353_vm11 = vcmp.le.f32.partialorder %v329_v54, 4.0  ;;  %v337_v7 = vmul.f32 8.0, %v331_v62  ;;  %v332_v9 = vfloor.f32 %v326_v63  ;;  %vm364_vm13 = vcmp.ge.f32.partialorder %v340_v0, 1.0  ;;  %v1665_v63 = vld [vmem:[#allocation8 + $0x80] sm:$0xff]  }
  0xaa   : > { %1497 = vmatprep.subr.bf16.mxu1 %v1934_v1  ;;  %v433_v44 = vadd.f32 %v432_v43, %v431_v42  ;;  %vm359_vm14 = vmand %vm347_vm10, %vm353_vm11  ;;  %vm365_vm15 = vcmp.ge.f32.partialorder %v341_v3, 1.0  ;;  %v342_v11 = vsub.f32 %v2238_v18, %v336_v5  ;;  %vm354_vm1 = vcmp.le.f32.partialorder %v330_v61, 4.0  ;;  %v1669_v5 = vld [vmem:[#allocation8 + $0x48] sm:$0xff]   ;;  %v1365_v18 = vld [vmem:[#allocation5] ss:$0 sm:$0xff] }
  0xab   : > { %v343_v12 = vsub.f32 %v2240_v19, %v337_v7  ;;  %v338_v6 = vmul.f32 8.0, %v332_v9  ;;  %vm370_vm2 = vmand %vm358_vm12, %vm364_vm13  ;;  %vm349_vm5 = vcmp.ge.f32.partialorder %v331_v62, 1.0  ;;  %vm355_vm6 = vcmp.le.f32.partialorder %v331_v62, 4.0  ;;  %v1670_v7 = vld [vmem:[#allocation8 + $0x8] sm:$0xff]  }
  0xac   : > { %v434_v45 = vrot.slane %v433_v44, 2  ;;  %vm366_vm9 = vcmp.ge.f32.partialorder %v342_v11, 1.0  ;;  %v2641_v13 = vmov 0  ;;  %vm361_vm11 = vmand %vm349_vm5, %vm355_vm6  ;;  %v2643_v15 = vmov 0 }
  0xad   : > { %vm367_vm12 = vcmp.ge.f32.partialorder %v343_v12, 1.0  ;;  %v344_v14 = vsub.f32 %v319_v57, %v338_v6  ;;  %v514_v19 = vsub.s32 0, %v2204_v2 }
  0xae   : > { %v435_v46 = vadd.f32 %v434_v45, %v433_v44 }
  0xaf   : > { %vm368_vm6 = vcmp.ge.f32.partialorder %v344_v14, 1.0 }
  0xb0   : > { %v436_v47 = vrot.slane %v435_v46, 1 }
  0xb2   : > { %v437_v48 = vadd.f32 %v436_v47, %v435_v46 }
  0xb4   : > { %1470 = vmatmul.mubr.msk.f32.vlgmr.msra.gmra.mrb[0].mxu1 %vm2617_vm4, %v437_v48  ;;  %vm377_vm4 = vcmp.le.f32.partialorder %v341_v3, 4.0  ;;  %v1668_v3 = vld [vmem:[#allocation8] sm:$0xff]  }
  0xb5   : > { %1499 = vmatpush3.bf16.msk.msra.mxu1 %vm1492_vm3, %v1937_v16  ;;  %1480 = vmatprep.mubr.msk.f32.mxu1 %vm1935_vm0, %v1936_v4  ;;  %vm348_vm0 = vcmp.ge.f32.partialorder %v330_v61, 1.0  ;;  %vm376_vm3 = vcmp.le.f32.partialorder %v340_v0, 4.0  ;;  %v1666_v0 = vld [vmem:[#allocation8 + $0x88] sm:$0xff]  }
  0xb6   : > { %1500 = vmatprep.subr.bf16.mxu1 %v1934_v1  ;;  %v327_v1 = vmul.f32 0.125, %v320_v59  ;;  %vm360_vm8 = vmand %vm348_vm0, %vm354_vm1  ;;  %vm378_vm1 = vcmp.le.f32.partialorder %v342_v11, 4.0  ;;  %v1673_v11 = vld [vmem:[#allocation8 + $0x58] sm:$0xff]  }
  0xb7   : > { %vm2314_vm10 = vmand %vm370_vm2, %vm376_vm3 }
  0xb8   : > { %v333_v10 = vfloor.f32 %v327_v1  ;;  %v2642_v13 = vsel %vm2314_vm10, 4294967295, %v2641_v13  ;;  %vm372_vm0 = vmand %vm360_vm8, %vm366_vm9  ;;  %v1667_v1 = vld [vmem:[#allocation8 + $0x40] sm:$0xff]  }
  0xb9   : > { %1502 = vmatpush3.bf16.msk.msra.mxu1 %vm1495_vm7, %v1937_v16  ;;  %vm371_vm7 = vmand %vm359_vm14, %vm365_vm15  ;;  %vm350_vm14 = vcmp.ge.f32.partialorder %v332_v9, 1.0  ;;  %vm356_vm15 = vcmp.le.f32.partialorder %v332_v9, 4.0  ;;  %1429 = vmatprep.subr.bf16.mxu0 %v1667_v1  ;;  %v1671_v9 = vld [vmem:[#allocation8 + $0x50] sm:$0xff]  }
  0xba   : > { %v339_v8 = vmul.f32 8.0, %v333_v10  ;;  %vm2318_vm13 = vmand %vm371_vm7, %vm377_vm4  ;;  %vm351_vm3 = vcmp.ge.f32.partialorder %v333_v10, 1.0  ;;  %vm357_vm10 = vcmp.le.f32.partialorder %v333_v10, 4.0  ;;  %vm379_vm4 = vcmp.le.f32.partialorder %v343_v12, 4.0  ;;  %1483 = vmatprep.subr.bf16.mxu1 %v1665_v63  ;;  %1430 = vmatpush3.bf16.msra.mxu0 %v1668_v3  ;;  %v1672_v10 = vld [vmem:[#allocation8 + $0x10] sm:$0xff]   ;;  %v1674_v12 = vld [vmem:[#allocation8 + $0x18] sm:$0xff]  }
  0xbb   : > { %v2644_v15 = vsel %vm2318_vm13, 4294967295, %v2643_v15  ;;  %vm373_vm2 = vmand %vm361_vm11, %vm367_vm12  ;;  %vm380_vm11 = vcmp.le.f32.partialorder %v344_v14, 4.0  ;;  %1431 = vmatprep.subr.bf16.mxu0 %v1669_v5  ;;  %v1677_v3 = vld [vmem:[#allocation8 + $0x68] sm:$0xff]  }
  0xbc   : > { %v345_v16 = vsub.f32 %v320_v59, %v339_v8  ;;  %vm362_vm5 = vmand %vm350_vm14, %vm356_vm15  ;;  %v1678_v5 = vld [vmem:[#allocation8 + $0x28] sm:$0xff]  }
  0xbd   : > { %vm2322_vm7 = vmand %vm372_vm0, %vm378_vm1  ;;  %vm2647_vm1 = vnez %v2642_v13 }
  0xbe   : > { %vm363_vm13 = vmand %vm351_vm3, %vm357_vm10  ;;  %vm369_vm8 = vcmp.ge.f32.partialorder %v345_v16, 1.0  ;;  %vm381_vm15 = vcmp.le.f32.partialorder %v345_v16, 4.0  ;;  %v2332_v31 = vsel %vm2647_vm1, 1.0, %v1936_v4  ;;  %vm2648_vm10 = vnez %v2644_v15  ;;  %1432 = vmatpush3.bf16.msra.mxu0 %v1670_v7 }
  0xbf   : > { %vm374_vm9 = vmand %vm362_vm5, %vm368_vm6  ;;  %v2337_v32 = vsel %vm2648_vm10, 1.0, %v1936_v4  ;;  %v2342_v34 = vsel %vm2322_vm7, 1.0, %v1936_v4  ;;  %1433 = vmatprep.subr.bf16.mxu0 %v1671_v9 }
  0xc0   : > { %vm385_vm12 = vmand %vm373_vm2, %vm379_vm4  ;;  %vm2649_vm2 = vcmask 261120  }
  0xc1   : > { %vm375_vm14 = vmand %vm363_vm13, %vm369_vm8  ;;  %v2345_v35 = vsel %vm385_vm12, 1.0, %v1936_v4 }
  0xc2   : > { %vm386_vm0 = vmand %vm374_vm9, %vm380_vm11  ;;  %1434 = vmatpush3.bf16.msra.mxu0 %v1672_v10  ;;  %vm735_vm9 = vcmask 1045504   ;;  %vm715_vm11 = vcmask 1046528  }
  0xc3   : > { %vm387_vm13 = vmand %vm375_vm14, %vm381_vm15  ;;  %v2372_v17 = vsel %vm386_vm0, 1.0, %v1936_v4  ;;  %1435 = vmatprep.subr.bf16.mxu0 %v1673_v11  ;;  %vm825_vm15 = vcmask 523264   ;;  %vm830_vm0 = vcmask 785408  }
  0xc4   : > { %vm2650_vm3 = vmmov %vm2649_vm2 }
  0xc5   : > { %vm2651_vm5 = vmmov %vm2649_vm2 }
  0xc6   : > { %vm2652_vm6 = vmmov %vm2649_vm2  ;;  %1436 = vmatpush3.bf16.msra.mxu0 %v1674_v12 }
  0xc7   : > { %vm2653_vm4 = vmmov %vm2649_vm2 }
  0xc8   : > { %vm2654_vm7 = vmmov %vm2649_vm2 }
  0xc9   : > { %vm2655_vm8 = vmmov %vm2649_vm2 }
  0xca   : > { %vm2656_vm12 = vmmov %vm2649_vm2 }
  0xcb   : > { %vm2657_vm14 = vmmov %vm2649_vm2 }
  0xcc   : > { %vm2658_vm1 = vmmov %vm2649_vm2 }
  0xcd   : > { %vm2659_vm10 = vmmov %vm2658_vm1 }
 0x187   : > { %v507_v24 = vpop.f32.mrb[0].mxu1 }
 0x188   : > { %v511_v25 = vmul.f32 0.0625, %v507_v24  ;;  %v1471_v29 = vpop.f32.mrb[1].mxu1 }
 0x18a   : > { %v515_v30 = vrot.slane %v511_v25, %v514_v19 }
 0x18c   : > { %v2349_v36 = vsub.f32 %v1407_v21, %v515_v30  ;;  %v2353_v37 = vsub.f32 %v1408_v22, %v515_v30  ;;  %v2357_v38 = vsub.f32 %v1411_v26, %v515_v30  ;;  %v2361_v39 = vsub.f32 %v1412_v27, %v515_v30 }
 0x18d   : > { %v2365_v40 = vsub.f32 %v1415_v28, %v515_v30  ;;  %v2369_v21 = vsub.f32 %v1416_v33, %v515_v30  ;;  %v2383_v28 = vsel %vm387_vm13, 1.0, %v1936_v4  ;;  %vm2660_vm13 = vmmov %vm2658_vm1 }
 0x18e   : > { %v522_v22 = vmul.f32 %v2332_v31, %v2349_v36  ;;  %v523_v20 = vmul.f32 %v2337_v32, %v2353_v37  ;;  %v524_v26 = vmul.f32 %v2342_v34, %v2357_v38  ;;  %v525_v27 = vmul.f32 %v2345_v35, %v2361_v39 }
 0x18f   : > { %v526_v41 = vmul.f32 %v2372_v17, %v2365_v40  ;;  %v527_v43 = vmul.f32 %v2383_v28, %v2369_v21 }
 0x190   : > { %v528_v23 = vmul.f32 %v522_v22, %v2349_v36  ;;  %v529_v33 = vmul.f32 %v523_v20, %v2353_v37  ;;  %v530_v42 = vmul.f32 %v524_v26, %v2357_v38  ;;  %v531_v44 = vmul.f32 %v525_v27, %v2361_v39  ;;  %v1366_v22 = vld [vmem:[#allocation7] ss:$0 sm:$0xff] }
 0x191   : > { %v532_v47 = vmul.f32 %v526_v41, %v2365_v40  ;;  %v533_v50 = vmul.f32 %v527_v43, %v2369_v21 }
 0x192   : > { %v534_v45 = vsel %vm2649_vm2, %v528_v23, 0.0  ;;  %v535_v46 = vsel %vm2650_vm3, %v529_v33, 0.0  ;;  %v537_v48 = vsel %vm2651_vm5, %v530_v42, 0.0  ;;  %v539_v51 = vsel %vm2652_vm6, %v531_v44, 0.0  ;;  %vm2661_vm2 = vmmov %vm2658_vm1 }
 0x193   : > { %v536_v4 = vadd.f32 %v535_v46, %v534_v45  ;;  %v541_v53 = vsel %vm2653_vm4, %v532_v47, 0.0  ;;  %v543_v55 = vsel %vm2654_vm7, %v533_v50, 0.0  ;;  %vm2662_vm3 = vmmov %vm2658_vm1  ;;  %vm1129_vm7 = vcmask 516096  }
 0x194   : > { %vm2663_vm5 = vmmov %vm2658_vm1 }
 0x195   : > { %v538_v49 = vadd.f32 %v537_v48, %v536_v4  ;;  %vm2664_vm6 = vmmov %vm2658_vm1 }
 0x196   : > { %vm2665_vm4 = vmmov %vm2658_vm1 }
 0x197   : > { %v540_v52 = vadd.f32 %v539_v51, %v538_v49 }
 0x199   : > { %v542_v54 = vadd.f32 %v541_v53, %v540_v52 }
 0x19b   : > { %v544_v56 = vadd.f32 %v543_v55, %v542_v54 }
 0x19d   : > { %v545_v57 = vrot.slane %v544_v56, 4 }
 0x19f   : > { %v546_v58 = vadd.f32 %v545_v57, %v544_v56 }
 0x1a1   : > { %v547_v59 = vrot.slane %v546_v58, 2 }
 0x1a3   : > { %v548_v60 = vadd.f32 %v547_v59, %v546_v58  ;;  %v1675_v59 = vld [vmem:[#allocation8 + $0x60] sm:$0xff]  }
 0x1a4   : > { %1437 = vmatprep.subr.bf16.mxu0 %v1675_v59 }
 0x1a5   : > { %v549_v61 = vrot.slane %v548_v60, 1 }
 0x1a7   : > { %v550_v62 = vadd.f32 %v549_v61, %v548_v60  ;;  %v1676_v60 = vld [vmem:[#allocation8 + $0x20] sm:$0xff]  }
 0x1a8   : > { %1438 = vmatpush3.bf16.msra.mxu0 %v1676_v60 }
 0x1a9   : > { %1481 = vmatmul.mubr.msk.f32.vlgmr.msra.gmra.mrb[2].mxu1 %vm2655_vm8, %v550_v62  ;;  %1439 = vmatprep.subr.bf16.mxu0 %v1677_v3  ;;  %vm1130_vm8 = vsmask.f32 256 }
 0x1aa   : > { %1484 = vmatpush3.bf16.msra.mxu1 %v1665_v63 }
 0x1ab   : > { %1485 = vmatprep.subr.bf16.mxu1 %v1666_v0 }
 0x1ac   : > { %1440 = vmatpush3.bf16.msra.mxu0 %v1678_v5 }
 0x1ae   : > { %1486 = vmatpush3.bf16.msra.mxu1 %v1666_v0 }
 0x27c   : > { %v620_v6 = vpop.f32.mrb[2].mxu1 }
 0x27d   : > { %v624_v8 = vmul.f32 0.0625, %v620_v6  ;;  %v1482_v13 = vpop.f32.mrb[3].mxu1 }
 0x27f   : > { %v625_v14 = vadd.f32 1e-06, %v624_v8 }
 0x281   : > { %1683 = vrsqrt.f32 %v625_v14 }
 0x28b   : > { %v1684_v15 = vpop.eup %1683 }
 0x28c   : > { %v630_v16 = vrot.slane %v1684_v15, %v514_v19 }
 0x28e   : > { %v635_v24 = vmul.f32 %v630_v16, %v2365_v40  ;;  %v636_v25 = vmul.f32 %v630_v16, %v2369_v21  ;;  %v633_v29 = vmul.f32 %v630_v16, %v2357_v38  ;;  %v634_v30 = vmul.f32 %v630_v16, %v2361_v39 }
 0x28f   : > { %v632_v20 = vmul.f32 %v630_v16, %v2353_v37  ;;  %v631_v26 = vmul.f32 %v630_v16, %v2349_v36 }
 0x290   : > { %v648_v27 = vmul.f32 %v1365_v18, %v635_v24  ;;  %v649_v23 = vmul.f32 %v1365_v18, %v636_v25  ;;  %v646_v33 = vmul.f32 %v1365_v18, %v633_v29  ;;  %v647_v41 = vmul.f32 %v1365_v18, %v634_v30 }
 0x291   : > { %v645_v2 = vmul.f32 %v1365_v18, %v632_v20  ;;  %v644_v19 = vmul.f32 %v1365_v18, %v631_v26 }
 0x292   : > { %v661_v42 = vadd.f32 %v1366_v22, %v648_v27  ;;  %v662_v43 = vadd.f32 %v1366_v22, %v649_v23  ;;  %v659_v40 = vadd.f32 %v1366_v22, %v646_v33  ;;  %v660_v44 = vadd.f32 %v1366_v22, %v647_v41  ;;  %v1679_v27 = vld [vmem:[#allocation8 + $0x70] sm:$0xff]  }
 0x293   : > { %v658_v21 = vadd.f32 %v1366_v22, %v645_v2  ;;  %v657_v45 = vadd.f32 %v1366_v22, %v644_v19  ;;  %v1680_v23 = vld [vmem:[#allocation8 + $0x30] sm:$0xff]   ;;  %1441 = vmatprep.subr.bf16.mxu0 %v1679_v27 }
 0x294   : > { %v1371_v38 = vmul.f32 -1.442695, %v661_v42  ;;  %v1372_v46 = vmul.f32 -1.442695, %v662_v43  ;;  %v1369_v39 = vmul.f32 -1.442695, %v659_v40  ;;  %1442 = vmatpush3.bf16.msra.mxu0 %v1680_v23 }
 0x295   : > { %v1370_v4 = vmul.f32 -1.442695, %v660_v44  ;;  %v1368_v37 = vmul.f32 -1.442695, %v658_v21  ;;  %v1367_v36 = vmul.f32 -1.442695, %v657_v45 }
 0x296   : > { %1685 = vpow2.f32 %v1371_v38 }
 0x297   : > { %1687 = vpow2.f32 %v1372_v46 }
 0x298   : > { %1689 = vpow2.f32 %v1369_v39  ;;  %v1682_v39 = vld [vmem:[#allocation8 + $0x38] sm:$0xff]  }
 0x299   : > { %1691 = vpow2.f32 %v1370_v4 }
 0x29a   : > { %1693 = vpow2.f32 %v1368_v37 }
 0x29b   : > { %1695 = vpow2.f32 %v1367_v36 }
 0x2a0   : > { %v1686_v47 = vpop.eup %1685 }
 0x2a1   : > { %v1688_v48 = vpop.eup %1687  ;;  %v685_v49 = vadd.f32 1.0, %v1686_v47 }
 0x2a2   : > { %v1690_v50 = vpop.eup %1689  ;;  %v686_v51 = vadd.f32 1.0, %v1688_v48 }
 0x2a3   : > { %v1692_v52 = vpop.eup %1691  ;;  %1697 = vrcp.f32 %v685_v49  ;;  %v683_v53 = vadd.f32 1.0, %v1690_v50 }
 0x2a4   : > { %v1694_v54 = vpop.eup %1693  ;;  %1699 = vrcp.f32 %v686_v51  ;;  %v684_v55 = vadd.f32 1.0, %v1692_v52 }
 0x2a5   : > { %v1696_v56 = vpop.eup %1695  ;;  %1701 = vrcp.f32 %v683_v53  ;;  %v682_v57 = vadd.f32 1.0, %v1694_v54 }
 0x2a6   : > { %1703 = vrcp.f32 %v684_v55  ;;  %v681_v58 = vadd.f32 1.0, %v1696_v56 }
 0x2a7   : > { %1705 = vrcp.f32 %v682_v57 }
 0x2a8   : > { %1707 = vrcp.f32 %v681_v58 }
 0x2ad   : > { %v1698_v61 = vpop.eup %1697 }
 0x2ae   : > { %v1700_v62 = vpop.eup %1699  ;;  %v703_v63 = vmul.f32 %v1698_v61, %v661_v42 }
 0x2af   : > { %v1702_v0 = vpop.eup %1701  ;;  %v704_v1 = vmul.f32 %v1700_v62, %v662_v43 }
 0x2b0   : > { %v1704_v7 = vpop.eup %1703  ;;  %v2411_v9 = vmul.f32 %v2372_v17, %v703_v63  ;;  %v701_v10 = vmul.f32 %v1702_v0, %v659_v40 }
 0x2b1   : > { %v1706_v11 = vpop.eup %1705  ;;  %v2414_v12 = vmul.f32 %v2383_v28, %v704_v1  ;;  %v702_v6 = vmul.f32 %v1704_v7, %v660_v44 }
 0x2b2   : > { %v1708_v8 = vpop.eup %1707  ;;  %v2417_v13 = vmul.f32 %v2342_v34, %v701_v10  ;;  %v2420_v14 = vrot.slane %v2411_v9, 2  ;;  %v700_v15 = vmul.f32 %v1706_v11, %v658_v21  ;;  %v2460_v48 = vrot.slane %v2411_v9, 1 }
 0x2b3   : > { %v815_v16 = vrot.slane %v2414_v12, 2  ;;  %v1615_v18 = vpack.i.bf16 %v2414_v12, %v2411_v9  ;;  %v2426_v28 = vmul.f32 %v2345_v35, %v702_v6  ;;  %v699_v24 = vmul.f32 %v1708_v8, %v657_v45  ;;  %v1681_v45 = vld [vmem:[#allocation8 + $0x78] sm:$0xff]  }
 0x2b4   : > { %v739_v25 = vrot.slane %v2417_v13, 2  ;;  %v2430_v29 = vmul.f32 %v2337_v32, %v700_v15  ;;  %v719_v19 = vrot.slane %v2417_v13, 1  ;;  %1443 = vmatprep.subr.bf16.mxu0 %v1681_v45  ;;  %v801_v55 = vrot.slane %v2414_v12, 1 }
 0x2b5   : > { %1616 = vrot.lane.b32.xlu0 %v1615_v18, %s1938_s24  ;;  %v1605_v30 = vpack.i.bf16 %v2426_v28, %v2417_v13  ;;  %v741_v22 = vrot.slane %v2426_v28, 2  ;;  %v816_v20 = vsel %vm735_vm9, %v2420_v14, %v815_v16  ;;  %v2439_v26 = vmul.f32 %v2332_v31, %v699_v24  ;;  %1444 = vmatpush3.bf16.msra.mxu0 %v1682_v39 }
 0x2b6   : > { %v852_v33 = vpack.c.bf16 %v815_v16, %v816_v20  ;;  %v737_v41 = vrot.slane %v2430_v29, 2  ;;  %v717_v2 = vrot.slane %v2430_v29, 1  ;;  %v1610_v38 = vpack.i.bf16 %v2417_v13, %v2430_v29 }
 0x2b7   : > { %1606 = vrot.lane.b32.xlu1 %v1605_v30, %s1938_s24  ;;  %v742_v42 = vsel %vm735_vm9, %v739_v25, %v741_v22  ;;  %v775_v43 = vsel %vm735_vm9, %v741_v22, %v2420_v14  ;;  %v736_v40 = vrot.slane %v2439_v26, 2  ;;  %v716_v31 = vrot.slane %v2439_v26, 1 }
 0x2b8   : > { %v849_v44 = vpack.c.bf16 %v775_v43, %v742_v42  ;;  %v740_v21 = vsel %vm735_vm9, %v737_v41, %v739_v25  ;;  %v721_v37 = vrot.slane %v2426_v28, 1  ;;  %v720_v47 = vsel %vm715_vm11, %v717_v2, %v719_v19 }
 0x2b9   : > { %v1620_v46 = vpack.i.bf16 %v742_v42, %v740_v21  ;;  %v738_v4 = vsel %vm735_vm9, %v736_v40, %v737_v41  ;;  %v718_v36 = vsel %vm715_vm11, %v716_v31, %v717_v2  ;;  %v1650_v56 = vpack.i.bf16 %v741_v22, %v742_v42  ;;  %vm1131_vm9 = vmand %vm1129_vm7, %vm1130_vm8 }
 0x2ba   : > { %1487 = vmatprep.mubr.msk.bf16.mxu1 %vm2656_vm12, %v849_v44  ;;  %v1630_v49 = vpack.i.bf16 %v740_v21, %v738_v4  ;;  %v1625_v50 = vpack.i.bf16 %v720_v47, %v718_v36  ;;  %v722_v51 = vsel %vm715_vm11, %v719_v19, %v721_v37  ;;  %v2466_v52 = vsel %vm715_vm11, %v721_v37, %v2460_v48 }
 0x2bb   : > { %1488 = vmatmul.mubr.msk.bf16.vlgmr.msra.gmra.mrb[4].mxu1 %vm2657_vm14, %v852_v33  ;;  %1611 = vrot.lane.b32.xlu1 %v1610_v38, %s1939_s26  ;;  %v1645_v53 = vpack.i.bf16 %v721_v37, %v722_v51  ;;  %v1635_v54 = vpack.i.bf16 %v2466_v52, %v722_v51  ;;  %v1640_v57 = vpack.i.bf16 %v2420_v14, %v775_v43  ;;  %vm1135_vm12 = vcmask 519171  }
 0x2bc   : > { %1621 = vrot.lane.b32.xlu0 %v1620_v46, %s1940_s17  ;;  %v802_v58 = vsel %vm715_vm11, %v2460_v48, %v801_v55  ;;  %v1660_v59 = vpack.i.bf16 %v2411_v9, %v2426_v28  ;;  %vm1136_vm14 = vsmask.f32 7950 }
 0x2bd   : > { %v1655_v60 = vpack.i.bf16 %v801_v55, %v802_v58 }
 0x2bf   : > { %1631 = vrot.lane.b32.xlu1 %v1630_v49, %s1938_s24 }
 0x2c0   : > { %1626 = vrot.lane.b32.xlu0 %v1625_v50, %s1940_s17 }
 0x2c3   : > { %1646 = vrot.lane.b32.xlu1 %v1645_v53, %s1940_s17 }
 0x2c4   : > { %1636 = vrot.lane.b32.xlu0 %v1635_v54, %s1939_s26 }
 0x2c7   : > { %1651 = vrot.lane.b32.xlu1 %v1650_v56, %s1938_s24 }
 0x2c8   : > { %1641 = vrot.lane.b32.xlu0 %v1640_v57, %s1940_s17 }
 0x2cb   : > { %1661 = vrot.lane.b32.xlu1 %v1660_v59, %s1939_s26 }
 0x2cc   : > { %1656 = vrot.lane.b32.xlu0 %v1655_v60, %s1939_s26 }
 0x327   : > { %v2476_v61 = vpop.permute.xlu0 %1616 }
 0x328   : > { %v1619_v37 = vunpack.i.h.bf16 %v2476_v61  ;;  %v1618_v36 = vunpack.i.l.bf16 %v2476_v61 }
 0x329   : > { %v1607_v62 = vpop.permute.xlu1 %1606 }
 0x32a   : > { %v1609_v25 = vunpack.i.h.bf16 %v1607_v62  ;;  %v1608_v30 = vunpack.i.l.bf16 %v1607_v62 }
 0x32d   : > { %v1612_v63 = vpop.permute.xlu1 %1611 }
 0x32e   : > { %v1622_v0 = vpop.permute.xlu0 %1621  ;;  %v1614_v8 = vunpack.i.h.bf16 %v1612_v63  ;;  %v1613_v14 = vunpack.i.l.bf16 %v1612_v63 }
 0x32f   : > { %v1624_v1 = vunpack.i.h.bf16 %v1622_v0  ;;  %v1623_v3 = vunpack.i.l.bf16 %v1622_v0 }
 0x331   : > { %v1632_v5 = vpop.permute.xlu1 %1631  ;;  %v835_v18 = vsel %vm2660_vm13, %v720_v47, %v1623_v3  ;;  %v836_v24 = vsel %vm2661_vm2, %v722_v51, %v1624_v1 }
 0x332   : > { %v1634_v7 = vunpack.i.h.bf16 %v1632_v5  ;;  %v1633_v10 = vunpack.i.l.bf16 %v1632_v5  ;;  %v1627_v11 = vpop.permute.xlu0 %1626  ;;  %v840_v2 = vsel %vm825_vm15, %v836_v24, %v1609_v25 }
 0x333   : > { %v1629_v12 = vunpack.i.h.bf16 %v1627_v11  ;;  %v1628_v6 = vunpack.i.l.bf16 %v1627_v11 }
 0x335   : > { %v822_v9 = vsel %vm2658_vm1, %v2430_v29, %v1629_v12  ;;  %v821_v15 = vsel %vm2659_vm10, %v2439_v26, %v1628_v6  ;;  %v1647_v16 = vpop.permute.xlu1 %1646  ;;  %v839_v26 = vsel %vm825_vm15, %v835_v18, %v1608_v30  ;;  %v1138_v12 = vld [vmem:[%s2514_s8 + $0x10] sm:$0x8]  ;;  %v1113_v18 = vrot.slane %v2342_v34, 1 }
 0x336   : > { %v1637_v22 = vpop.permute.xlu0 %1636  ;;  %v826_v20 = vsel %vm825_vm15, %v821_v15, %v1633_v10  ;;  %v827_v27 = vsel %vm825_vm15, %v822_v9, %v1634_v7  ;;  %v1649_v40 = vunpack.i.h.bf16 %v1647_v16  ;;  %v1648_v31 = vunpack.i.l.bf16 %v1647_v16  ;;  %v1132_v10 = vld [vmem:[%s2514_s8 + $0x4] sm:$0x1]  ;;  %v1373_v9 = vld [vmem:[#allocation10] ss:$0 sm:$0xff] }
 0x337   : > { %v1639_v23 = vunpack.i.h.bf16 %v1637_v22  ;;  %v1638_v33 = vunpack.i.l.bf16 %v1637_v22  ;;  %v831_v41 = vsel %vm830_vm0, %v826_v20, %v1613_v14  ;;  %v832_v29 = vsel %vm830_vm0, %v827_v27, %v1614_v8 }
 0x338   : > { %v847_v45 = vpack.c.bf16 %v832_v29, %v831_v41  ;;  %v824_v51 = vsel %vm2664_vm6, %v2426_v28, %v1649_v40  ;;  %v823_v53 = vsel %vm2665_vm4, %v2417_v13, %v1648_v31  ;;  %v1133_v11 = vsel %vm1131_vm9, 0, %v1132_v10 }
 0x339   : > { %v1652_v19 = vpop.permute.xlu1 %1651  ;;  %v843_v42 = vsel %vm830_vm0, %v839_v26, %v1638_v33  ;;  %v844_v43 = vsel %vm830_vm0, %v840_v2, %v1639_v23  ;;  %1134 = vst [vmem:[%s2514_s8 + $0x4] sm:$0x1] %v1133_v11  ;;  %v1941_v8 = vmov 0   ;;  %v1112_v16 = vrot.slane %v2337_v32, 1 }
 0x33a   : > { %v1642_v44 = vpop.permute.xlu0 %1641  ;;  %v848_v21 = vpack.c.bf16 %v844_v43, %v843_v42  ;;  %v1654_v38 = vunpack.i.h.bf16 %v1652_v19  ;;  %v1653_v46 = vunpack.i.l.bf16 %v1652_v19  ;;  %v1115_v22 = vrot.slane %v2345_v35, 1 }
 0x33b   : > { %v1644_v39 = vunpack.i.h.bf16 %v1642_v44  ;;  %v1643_v4 = vunpack.i.l.bf16 %v1642_v44  ;;  %v1114_v23 = vsel %vm715_vm11, %v1112_v16, %v1113_v18  ;;  %v1117_v32 = vrot.slane %v2372_v17, 1 }
 0x33c   : > { %1042 = vmatprep.mubr.bf16.mxu0 %v848_v21  ;;  %v828_v57 = vsel %vm825_vm15, %v823_v53, %v1653_v46  ;;  %v829_v58 = vsel %vm825_vm15, %v824_v51, %v1654_v38  ;;  %v1116_v29 = vsel %vm715_vm11, %v1113_v18, %v1115_v22  ;;  %vm1195_vm1 = vsmask.f32 7938 }
 0x33d   : > { %v838_v47 = vsel %vm2662_vm3, %v2460_v48, %v1644_v39  ;;  %v837_v49 = vsel %vm2663_vm5, %v2466_v52, %v1643_v4  ;;  %1043 = vmatmul.mubr.bf16.vlgmr.msra.gmra.mrb[0].mxu0 %v847_v45  ;;  %v1662_v50 = vpop.permute.xlu1 %1661  ;;  %vm1154_vm10 = vsmask.f32 4368  ;;  %v1118_v38 = vsel %vm715_vm11, %v1115_v22, %v1117_v32 }
 0x33e   : > { %v1664_v54 = vunpack.i.h.bf16 %v1662_v50  ;;  %v1663_v55 = vunpack.i.l.bf16 %v1662_v50  ;;  %v1657_v56 = vpop.permute.xlu0 %1656  ;;  %v841_v60 = vsel %vm825_vm15, %v837_v49, %v1618_v36  ;;  %v842_v52 = vsel %vm825_vm15, %v838_v47, %v1619_v37  ;;  %vm1137_vm15 = vmand %vm1135_vm12, %vm1136_vm14 }
 0x33f   : > { %v1659_v59 = vunpack.i.h.bf16 %v1657_v56  ;;  %v1658_v48 = vunpack.i.l.bf16 %v1657_v56  ;;  %v1139_v6 = vsel %vm1137_vm15, 0, %v1138_v12  ;;  %vm2535_vm2 = vmor %vm1130_vm8, %vm1154_vm10  ;;  %vm1202_vm11 = vsmask.f32 3328 }
 0x340   : > { %v833_v61 = vsel %vm830_vm0, %v828_v57, %v1663_v55  ;;  %v834_v28 = vsel %vm830_vm0, %v829_v58, %v1664_v54  ;;  %1140 = vst [vmem:[%s2514_s8 + $0x10] sm:$0x8] %v1139_v6  ;;  %v1197_v17 = vld [vmem:[%s2514_s8 + $0x4] sm:$0xf] }
 0x341   : > { %v845_v13 = vsel %vm830_vm0, %v841_v60, %v1658_v48  ;;  %v846_v62 = vsel %vm830_vm0, %v842_v52, %v1659_v59  ;;  %v850_v63 = vpack.c.bf16 %v834_v28, %v833_v61  ;;  %vm1127_vm0 = vcmask 519168  }
 0x342   : > { %v851_v0 = vpack.c.bf16 %v846_v62, %v845_v13  ;;  %1128 = vst.msk [vmem:[%s2514_s8] sm:$0xf] %vm1127_vm0, %v1941_v8  ;;  %1141 = vst.msk [vmem:[%s2514_s8 + $0x14] sm:$0xf] %vm1127_vm0, %v1941_v8 }
 0x343   : > { %vm1196_vm13 = vmand %vm1127_vm0, %vm1195_vm1 }
 0x344   : > { %1050 = vmatprep.mubr.bf16.mxu0 %v851_v0  ;;  %vm1203_vm3 = vmand %vm1127_vm0, %vm1202_vm11 }
 0x345   : > { %1051 = vmatmul.mubr.bf16.gmra.mrb[4].mxu0 %v850_v63 }
 0x347   : > { %v1204_v11 = vld [vmem:[%s2514_s8 + $0x10] sm:$0xf] }
 0x38e   : > { %v1489_v1 = vpop.f32.mrb[4].mxu1 }
 0x38f   : > { %v1093_v3 = vpop.f32.mrb[5].mxu1 }
 0x390   : > { %v2510_v5 = vpop.f32.mrb[6].mxu1 }
 0x391   : > { %v1096_v7 = vpop.f32.mrb[7].mxu1 }
 0x410   : > { %v1445_v14 = vpop.f32.mrb[0].mxu0 }
 0x411   : > { %v1446_v15 = vpop.f32.mrb[1].mxu0 }
 0x412   : > { %v1447_v24 = vadd.f32 %v1446_v15, %v1445_v14  ;;  %v1448_v25 = vpop.f32.mrb[2].mxu0 }
 0x413   : > { %v1449_v30 = vpop.f32.mrb[3].mxu0 }
 0x414   : > { %v1045_v20 = vadd.f32 %v1447_v24, %v1373_v9  ;;  %v1450_v27 = vadd.f32 %v1449_v30, %v1448_v25 }
 0x416   : > { %v1094_v33 = vadd.f32 %v1093_v3, %v1045_v20  ;;  %v1048_v41 = vadd.f32 %v1450_v27, %v1373_v9 }
 0x418   : > { %v1123_v26 = vmul.f32 %v1114_v23, %v1094_v33  ;;  %v1097_v2 = vadd.f32 %v1096_v7, %v1048_v41  ;;  %v1451_v19 = vpop.f32.mrb[4].mxu0 }
 0x419   : > { %v1452_v42 = vpop.f32.mrb[5].mxu0 }
 0x41a   : > { %v1401_v34 = vpack.c.bf16 %v1123_v26, %v1123_v26  ;;  %v1124_v43 = vmul.f32 %v1116_v29, %v1097_v2  ;;  %v1453_v40 = vadd.f32 %v1452_v42, %v1451_v19  ;;  %v1454_v31 = vpop.f32.mrb[6].mxu0 }
 0x41b   : > { %v1455_v35 = vpop.f32.mrb[7].mxu0 }
 0x41c   : > { %v1157_v44 = vshrl.u32 %v1401_v34, 16  ;;  %v1402_v21 = vpack.c.bf16 %v1124_v43, %v1124_v43  ;;  %v1053_v45 = vadd.f32 %v1453_v40, %v1373_v9  ;;  %v1456_v46 = vadd.f32 %v1455_v35, %v1454_v31 }
 0x41d   : > { %v1160_v4 = vshll.u32 %v1401_v34, 16 }
 0x41e   : > { %v1159_v39 = vrot.slane %v1157_v44, 7  ;;  %v1165_v37 = vshrl.u32 %v1402_v21, 16  ;;  %v1102_v36 = vadd.f32 %v1489_v1, %v1053_v45  ;;  %v1056_v47 = vadd.f32 %v1456_v46, %v1373_v9 }
 0x41f   : > { %v1168_v51 = vshll.u32 %v1402_v21, 16 }
 0x420   : > { %v1162_v49 = vor.u32 %v1160_v4, %v1159_v39  ;;  %v1167_v50 = vrot.slane %v1165_v37, 7  ;;  %v1125_v53 = vmul.f32 %v1118_v38, %v1102_v36  ;;  %v1105_v55 = vadd.f32 %v2510_v5, %v1056_v47 }
 0x421   : > { %v1163_v56 = vrot.slane %v1159_v39, 4 }
 0x422   : > { %v1198_v57 = vsel %vm1196_vm13, %v1162_v49, %v1197_v17  ;;  %v1170_v58 = vor.u32 %v1168_v51, %v1167_v50  ;;  %v1403_v59 = vpack.c.bf16 %v1125_v53, %v1125_v53  ;;  %v1126_v48 = vmul.f32 %v1117_v32, %v1105_v55 }
 0x423   : > { %1199 = vst [vmem:[%s2514_s8 + $0x4] sm:$0xf] %v1198_v57  ;;  %v1172_v63 = vrot.slane %v1167_v50, 4 }
 0x424   : > { %v1171_v60 = vsel %vm2535_vm2, %v1163_v56, %v1170_v58  ;;  %v1174_v52 = vshrl.u32 %v1403_v59, 16  ;;  %v1404_v61 = vpack.c.bf16 %v1126_v48, %v1126_v48  ;;  %v1177_v13 = vshll.u32 %v1403_v59, 16 }
 0x425   : > { %1200 = vst.msk [vmem:[%s2514_s8 + $0x8] sm:$0xf] %vm1127_vm0, %v1171_v60 }
 0x426   : > { %v1176_v28 = vrot.slane %v1174_v52, 7  ;;  %v1183_v62 = vshrl.u32 %v1404_v61, 16  ;;  %v1186_v3 = vshll.u32 %v1404_v61, 16 }
 0x428   : > { %v1179_v0 = vor.u32 %v1177_v13, %v1176_v28  ;;  %v1185_v1 = vrot.slane %v1183_v62, 7  ;;  %v1181_v7 = vrot.slane %v1176_v28, 4 }
 0x42a   : > { %v1180_v5 = vsel %vm2535_vm2, %v1172_v63, %v1179_v0  ;;  %v1188_v10 = vor.u32 %v1186_v3, %v1185_v1 }
 0x42b   : > { %1201 = vst.msk [vmem:[%s2514_s8 + $0xc] sm:$0xf] %vm1127_vm0, %v1180_v5 }
 0x42c   : > { %v1189_v12 = vsel %vm2535_vm2, %v1181_v7, %v1188_v10 }
 0x42d   : > { %v1205_v6 = vsel %vm1203_vm3, %v1189_v12, %v1204_v11 }
 0x42e   : > { %1206 = vst [vmem:[%s2514_s8 + $0x10] sm:$0xf] %v1205_v6 }
 0x42f   : > { %1864 = shalt.err (!%p1861_p13)
}
 0x430   : > { %s1865_s13 = scalar_lea.hbm %s2558_s11, 384  ;;  %s1869_s17 = scalar_lea.hbm %s2612_s5, 768 }
 0x431   : > { %p1866_p0 = scmp.ne.s32.totalorder %s2558_s11, %s1865_s13  ;;  %p1870_p9 = scmp.lt.u32.totalorder %s2558_s11, %s2612_s5 }
 0x432   : > { %p1871_p12 = scmp.lt.u32.totalorder %s1869_s17, %s1865_s13  ;;  %p1873_p4 = scmp.lt.u32.totalorder %s1865_s13, %s2558_s11 }
 0x433   : > { %p1867_p5 = pnand %p1866_p0, %p2129_p1 }
 0x434   : > { %p1872_p2 = por %p1871_p12, %p1870_p9 }
 0x435   : > { %p1868_p11 = pneg %p1867_p5 }
 0x436   : > { %p1874_p6 = por %p1873_p4, %p1872_p2 }
 0x438   : > { %p1875_p8 = pnand %p1874_p6, %p1868_p11 }
 0x43a   : > { %1878 = shalt.err (!%p1875_p8)
}
 0x43b   : > { %s1943_s15 = smov 4  }
 0x43c   : > { %1525 = dma.vmem_to_hbm [thread:$0]  (%p2129_p1), %s2560_s23, 384, %s2558_s11, %s1208_s22, %s1938_s24, %s1938_s24, %s1943_s15  }
 0x43d PF: > { %s1236_s10 = sand.u32 1, %s1913_s18   ;;  %p2668_p3 = scmp.ne.s32.totalorder %s2619_s25, 0 }
 0x43e   : > { %p2669_p7 = scmp.ge.s32.totalorder %s1925_s21, 2  ;;  %s1237_s30 = scalar_lea.sflag [#allocation4], %s1236_s10 }
 0x440   : > { %p1545_p10 = pnand %p2669_p7, %p2668_p3 }
 0x442   : > { %1908 = dma.done.wait (!%p1545_p10), %s1237_s30, 384  }
 0x443   : > { %1910 = vsyncadd (!%p1545_p10), %s1237_s30, 4294966912  ;;  %p20_p13 = scmp.ge.s32.totalorder %s2119_s14, 4   ;;  %s2670_s18 = smov %s1917_s19 }
 0x444   : > { %s2671_s19 = smov %s1921_s20  ;;  %s2672_s20 = smov %s2135_s9 }
 0x445   : > { %s2673_s21 = smov %s2119_s14  ;;  %22 = sbr.rel (!%p20_p13) target bundleno = 7 (0x7), region = 101 }
 0x44c   :  { %1242 = vsyncpa [#allocation3], 1 }
 0x44d   :  { %1244 = vsyncpa [#allocation3 + $0x1], 1 }
 0x44e   :  { %1245 = vsyncpa [#allocation6], 1 }
 0x44f   :  { %1246 = vsyncpa [#allocation9], 1 }
 0x450   :  { %1247 = vsyncpa [#allocation4], 1 }
 0x451   :  { %1249 = vsyncpa [#allocation4 + $0x1], 1 }

// kernel: pose_encoder_forward.9
= control target key start
LH: loop header
LB: loop body
LE: loop exit
PB: predicated region body
PF: predicated region fallthrough
CT: control target
= control target key end

     0   :  { %s3512_s0 = inlined_call_operand.hbm [shape: bf16[2,48,64], index: 0, kind: input, shape index: {}]   ;;  %s3513_s1 = inlined_call_operand.hbm [shape: f32[1,64], index: 1, kind: input, shape index: {}]   ;;  %s3514_s2 = inlined_call_operand.hbm [shape: f32[1,64], index: 2, kind: input, shape index: {}]   ;;  %s3515_s3 = inlined_call_operand.hbm [shape: bf16[576,64], index: 3, kind: input, shape index: {}]   ;;  %s3516_s4 = inlined_call_operand.hbm [shape: f32[1,64], index: 4, kind: input, shape index: {}]   ;;  %s3517_s5 = inlined_call_operand.hbm [shape: bf16[2,48,32], index: 5, kind: input, shape index: {}]   ;;  %s3518_s6 = inlined_call_operand.hbm [shape: bf16[32,64], index: 6, kind: input, shape index: {}]   ;;  %s3519_s7 = inlined_call_operand.hbm [shape: f32[1,64], index: 7, kind: input, shape index: {}]   ;;  %s3520_s8 = inlined_call_operand.hbm [shape: bf16[2,48,64], index: 8, kind: output, shape index: {}]  }
   0x1   :  { %3530 = sst [smem:[#allocation24_spill]] %s3512_s0 }
   0x2   :  { %3531 = sst [smem:[#allocation25_spill]] %s3513_s1 }
   0x3   :  { %3532 = sst [smem:[#allocation26_spill]] %s3514_s2 }
   0x4   :  { %3533 = sst [smem:[#allocation27_spill]] %s3515_s3 }
   0x5   :  { %3534 = sst [smem:[#allocation28_spill]] %s3516_s4 }
   0x6   :  { %13 = vsyncpa [#allocation3], 0 }
   0x7   :  { %15 = vsyncpa [#allocation3 + $0x1], 0 }
   0x8   :  { %16 = vsyncpa [#allocation6], 0 }
   0x9   :  { %17 = vsyncpa [#allocation9], 0 }
   0xa   :  { %18 = vsyncpa [#allocation12], 0 }
   0xb   :  { %20 = vsyncpa [#allocation12 + $0x1], 0 }
   0xc   :  { %21 = vsyncpa [#allocation15], 0 }
   0xd   :  { %22 = vsyncpa [#allocation4], 0 }
   0xe   :  { %24 = vsyncpa [#allocation4 + $0x1], 0  ;;  %s2741_s27 = smov 0   ;;  %s2743_s28 = smov 0  }
   0xf   :  { %s2745_s29 = smov 0   ;;  %s2747_s30 = smov 0  }
  0x10 LB: > { %s2678_s9 = smov [#allocation5]   ;;  %s2762_s11 = sadd.s32 4294967295, %s2676_s30   ;;  %s2676_s30 = sphi %s2747_s30, %s3611_s30   ;;  %s2672_s29 = sphi %s2745_s29, %s3610_s29   ;;  %s2668_s28 = sphi %s2743_s28, %s3609_s28   ;;  %s2664_s27 = sphi %s2741_s27, %s3608_s27  }
  0x11   : > { %s252_s10 = sshll.u32 %s2678_s9, 4  ;;  %p1828_p0 = scmp.ge.s32.totalorder %s2676_s30, 1  ;;  %s2767_s10 = int_to_ptr.vmem [resolvable:$true] %s252_s10 }
  0x12   : > { %p3521_p1 = scmp.eq.s32.totalorder %s2762_s11, 0  ;;  %p239_p2 = scmp.lt.s32.totalorder %s2676_s30, 3 }
  0x13   : > { %s2679_s13 = smov [#allocation8]   ;;  %s2680_s16 = smov [#allocation13]  }
  0x14   : > { %p2769_p3 = pnand %p1828_p0, %p239_p2  ;;  %s273_s14 = sshll.u32 %s2679_s13, 4  ;;  %s2776_s14 = int_to_ptr.vmem [resolvable:$true] %s273_s14 }
  0x15   : > { %s297_s17 = sshll.u32 %s2680_s16, 4  ;;  %s3537_s1 = sld [smem:[#allocation25_spill]]  ;;  %s2784_s17 = int_to_ptr.vmem [resolvable:$true] %s297_s17 }
  0x16   : > { %s3535_s12 = scalar_select %p2769_p3, 1, 0 }
  0x17   : > { %p2170_p5 = pneg %p2769_p3 }
  0x19   : > { %p2780_p6 = pnand %p2170_p5, %p3521_p1 }
  0x1b   : > { %s2362_s20 = scalar_lea.hbm %s3537_s1, 16  ;;  %p2794_p8 = pneg %p2780_p6 }
  0x1c   : > { %p2363_p7 = scmp.ne.s32.totalorder %s3537_s1, %s2362_s20  ;;  %p2369_p11 = scmp.lt.u32.totalorder %s2362_s20, %s3537_s1 }
  0x1e   : > { %p2365_p9 = pnand %p2794_p8, %p2363_p7 }
  0x20   : > { %p2366_p10 = pneg %p2365_p9 }
  0x22   : > { %p2371_p12 = pnand %p2369_p11, %p2366_p10 }
  0x24   : > { %2374 = shalt.err (!%p2371_p12)
}
  0x25   : > { %s2375_s26 = scalar_lea.vmem %s2767_s10, 16  ;;  %s2382_s9 = scalar_lea.vmem %s2767_s10, 32 }
  0x26   : > { %p2376_p13 = scmp.ne.s32.totalorder %s2767_s10, %s2375_s26  ;;  %p2383_p5 = scmp.lt.s32.totalorder %s2767_s10, %s2767_s10 }
  0x27   : > { %p2384_p7 = scmp.lt.s32.totalorder %s2382_s9, %s2375_s26 }
  0x28   : > { %p2378_p0 = pnand %p2376_p13, %p2794_p8 }
  0x29   : > { %p2385_p9 = por %p2384_p7, %p2383_p5 }
  0x2a   : > { %p2379_p2 = pneg %p2378_p0 }
  0x2c   : > { %p2386_p4 = pnand %p2385_p9, %p2379_p2 }
  0x2e   : > { %2389 = shalt.err (!%p2386_p4)
}
  0x2f   : > { %2173 = dma.hbm_to_vmem [thread:$0]  (!%p2780_p6), %s3537_s1, 16, %s2767_s10, [#allocation6]  }
  0x30   : > { %s3539_s3 = sld [smem:[#allocation27_spill]] }
  0x36   : > { %s2390_s20 = scalar_lea.hbm %s3539_s3, 4608 }
  0x37   : > { %p2391_p10 = scmp.ne.s32.totalorder %s3539_s3, %s2390_s20  ;;  %p2397_p4 = scmp.lt.u32.totalorder %s2390_s20, %s3539_s3 }
  0x39   : > { %p2393_p11 = pnand %p2391_p10, %p2794_p8 }
  0x3b   : > { %p2394_p12 = pneg %p2393_p11 }
  0x3d   : > { %p2399_p13 = pnand %p2397_p4, %p2394_p12 }
  0x3f   : > { %2402 = shalt.err (!%p2399_p13)
}
  0x40   : > { %s2403_s10 = scalar_lea.vmem %s2776_s14, 4608  ;;  %p2411_p7 = scmp.lt.s32.totalorder %s2776_s14, %s2776_s14 }
  0x41   : > { %p2404_p0 = scmp.ne.s32.totalorder %s2776_s14, %s2403_s10  ;;  %p2412_p9 = scmp.lt.s32.totalorder %s2403_s10, %s2403_s10 }
  0x43   : > { %p2406_p2 = pnand %p2404_p0, %p2794_p8  ;;  %p2413_p10 = por %p2412_p9, %p2411_p7 }
  0x45   : > { %p2407_p5 = pneg %p2406_p2 }
  0x47   : > { %p2414_p11 = pnand %p2413_p10, %p2407_p5 }
  0x49   : > { %2417 = shalt.err (!%p2414_p11)
}
  0x4a   : > { %s3523_s26 = smov 64   ;;  %s3525_s9 = smov 4  }
  0x4b   : > { %2179 = dma.hbm_to_vmem [thread:$0]  (!%p2780_p6), %s3539_s3, 4608, %s2776_s14, [#allocation9], %s3523_s26, %s3523_s26, %s3525_s9  }
  0x4c   : > { %s2418_s20 = scalar_lea.hbm %s3518_s6, 256 }
  0x4d   : > { %p2419_p12 = scmp.ne.s32.totalorder %s3518_s6, %s2418_s20  ;;  %p2425_p0 = scmp.lt.u32.totalorder %s2418_s20, %s3518_s6 }
  0x4f   : > { %p2421_p4 = pnand %p2419_p12, %p2794_p8 }
  0x51   : > { %p2422_p13 = pneg %p2421_p4 }
  0x53   : > { %p2427_p2 = pnand %p2425_p0, %p2422_p13 }
  0x55   : > { %2430 = shalt.err (!%p2427_p2)
}
  0x56   : > { %s2431_s14 = scalar_lea.vmem %s2784_s17, 256  ;;  %p2439_p10 = scmp.lt.s32.totalorder %s2784_s17, %s2784_s17 }
  0x57   : > { %p2432_p5 = scmp.ne.s32.totalorder %s2784_s17, %s2431_s14  ;;  %p2440_p11 = scmp.lt.s32.totalorder %s2431_s14, %s2431_s14 }
  0x59   : > { %p2434_p7 = pnand %p2432_p5, %p2794_p8  ;;  %p2441_p12 = por %p2440_p11, %p2439_p10 }
  0x5b   : > { %p2435_p9 = pneg %p2434_p7 }
  0x5d   : > { %p2442_p4 = pnand %p2441_p12, %p2435_p9 }
  0x5f   : > { %2445 = shalt.err (!%p2442_p4)
}
  0x60   : > { %2185 = dma.hbm_to_vmem [thread:$0]  (!%p2780_p6), %s3518_s6, 256, %s2784_s17, [#allocation12], %s3523_s26, %s3523_s26, %s3525_s9  }
  0x61   : > { %s2683_s16 = smov [#allocation7]   ;;  %s2684_s19 = smov [#allocation10]  }
  0x62   : > { %s263_s18 = sshll.u32 %s2683_s16, 4  ;;  %s287_s20 = sshll.u32 %s2684_s19, 4  ;;  %s264_s18 = int_to_ptr.vmem [resolvable:$true] %s263_s18  ;;  %s288_s20 = int_to_ptr.vmem [resolvable:$true] %s287_s20 }
  0x63   : > { %s3540_s2 = sld [smem:[#allocation26_spill]] }
  0x69   : > { %s2446_s24 = scalar_lea.hbm %s3540_s2, 16 }
  0x6a   : > { %p2447_p13 = scmp.ne.s32.totalorder %s3540_s2, %s2446_s24  ;;  %p2453_p5 = scmp.lt.u32.totalorder %s2446_s24, %s3540_s2 }
  0x6c   : > { %p2449_p0 = pnand %p2447_p13, %p2794_p8 }
  0x6e   : > { %p2450_p2 = pneg %p2449_p0 }
  0x70   : > { %p2455_p7 = pnand %p2453_p5, %p2450_p2 }
  0x72   : > { %2458 = shalt.err (!%p2455_p7)
}
  0x73   : > { %s2459_s17 = scalar_lea.vmem %s264_s18, 16  ;;  %s2466_s13 = scalar_lea.vmem %s264_s18, 32 }
  0x74   : > { %p2460_p9 = scmp.ne.s32.totalorder %s264_s18, %s2459_s17  ;;  %p2467_p12 = scmp.lt.s32.totalorder %s264_s18, %s264_s18 }
  0x75   : > { %p2468_p4 = scmp.lt.s32.totalorder %s2466_s13, %s2459_s17 }
  0x76   : > { %p2462_p10 = pnand %p2460_p9, %p2794_p8 }
  0x77   : > { %p2469_p1 = por %p2468_p4, %p2467_p12 }
  0x78   : > { %p2463_p11 = pneg %p2462_p10 }
  0x7a   : > { %p2470_p3 = pnand %p2469_p1, %p2463_p11 }
  0x7c   : > { %2473 = shalt.err (!%p2470_p3)
}
  0x7d   : > { %2176 = dma.hbm_to_vmem [thread:$0]  (!%p2780_p6), %s3540_s2, 16, %s264_s18, [#allocation6]  }
  0x7e   : > { %s3541_s4 = sld [smem:[#allocation28_spill]] }
  0x84   : > { %s2474_s22 = scalar_lea.hbm %s3541_s4, 16 }
  0x85   : > { %p2475_p13 = scmp.ne.s32.totalorder %s3541_s4, %s2474_s22  ;;  %p2481_p3 = scmp.lt.u32.totalorder %s2474_s22, %s3541_s4 }
  0x87   : > { %p2477_p0 = pnand %p2475_p13, %p2794_p8 }
  0x89   : > { %p2478_p1 = pneg %p2477_p0 }
  0x8b   : > { %p2483_p2 = pnand %p2481_p3, %p2478_p1 }
  0x8d   : > { %2486 = shalt.err (!%p2483_p2)
}
  0x8e   : > { %s2487_s17 = scalar_lea.vmem %s288_s20, 16  ;;  %s2494_s18 = scalar_lea.vmem %s288_s20, 32 }
  0x8f   : > { %p2488_p5 = scmp.ne.s32.totalorder %s288_s20, %s2487_s17  ;;  %p2495_p10 = scmp.lt.s32.totalorder %s288_s20, %s288_s20 }
  0x90   : > { %p2496_p11 = scmp.lt.s32.totalorder %s2494_s18, %s2487_s17 }
  0x91   : > { %p2490_p7 = pnand %p2488_p5, %p2794_p8 }
  0x92   : > { %p2497_p12 = por %p2496_p11, %p2495_p10 }
  0x93   : > { %p2491_p9 = pneg %p2490_p7 }
  0x95   : > { %p2498_p4 = pnand %p2497_p12, %p2491_p9 }
  0x97   : > { %2501 = shalt.err (!%p2498_p4)
}
  0x98   : > { %2182 = dma.hbm_to_vmem [thread:$0]  (!%p2780_p6), %s3541_s4, 16, %s288_s20, [#allocation9]  }
  0x99   : > { %s2685_s19 = smov [#allocation14]   ;;  %s2502_s24 = scalar_lea.hbm %s3519_s7, 16 }
  0x9a   : > { %s311_s1 = sshll.u32 %s2685_s19, 4  ;;  %p2503_p13 = scmp.ne.s32.totalorder %s3519_s7, %s2502_s24  ;;  %s312_s1 = int_to_ptr.vmem [resolvable:$true] %s311_s1 }
  0x9b   : > { %p2509_p3 = scmp.lt.u32.totalorder %s2502_s24, %s3519_s7 }
  0x9c   : > { %p2505_p0 = pnand %p2503_p13, %p2794_p8 }
  0x9e   : > { %p2506_p1 = pneg %p2505_p0 }
  0xa0   : > { %p2511_p2 = pnand %p2509_p3, %p2506_p1 }
  0xa2   : > { %2514 = shalt.err (!%p2511_p2)
}
  0xa3   : > { %s2515_s20 = scalar_lea.vmem %s312_s1, 16  ;;  %s2522_s18 = scalar_lea.vmem %s312_s1, 32 }
  0xa4   : > { %p2516_p5 = scmp.ne.s32.totalorder %s312_s1, %s2515_s20  ;;  %p2523_p10 = scmp.lt.s32.totalorder %s312_s1, %s312_s1 }
  0xa5   : > { %p2524_p11 = scmp.lt.s32.totalorder %s2522_s18, %s2515_s20 }
  0xa6   : > { %p2518_p7 = pnand %p2516_p5, %p2794_p8 }
  0xa7   : > { %p2525_p12 = por %p2524_p11, %p2523_p10 }
  0xa8   : > { %p2519_p9 = pneg %p2518_p7 }
  0xaa   : > { %p2526_p4 = pnand %p2525_p12, %p2519_p9 }
  0xac   : > { %2529 = shalt.err (!%p2526_p4)
}
  0xad   : > { %2188 = dma.hbm_to_vmem [thread:$0]  (!%p2780_p6), %s3519_s7, 16, %s312_s1, [#allocation15]  }
  0xae   : > { %s1827_s23 = sadd.s32 4294967294, %s2676_s30   ;;  %s2924_s15 = sadd.s32 1, %s2676_s30  }
  0xaf   : > { %s34_s19 = ssub.s32 %s2676_s30, %s2924_s15  ;;  %s37_s21 = sadd.s32 1, %s2672_s29 }
  0xb0   : > { %p35_p8 = scmp.eq.s32.totalorder %s34_s19, 0  ;;  %p44_p13 = scmp.ne.s32.totalorder %s2672_s29, %s2668_s28 }
  0xb1   : > { %p45_p0 = scmp.eq.s32.totalorder %s2676_s30, 0  ;;  %p50_p1 = scmp.ne.s32.totalorder %s2668_s28, %s2664_s27 }
  0xb2   : > { %s2935_s22 = scalar_select %p35_p8, %s2672_s29, %s37_s21  }
  0xb3   : > { %p46_p3 = por %p45_p0, %p44_p13  ;;  %p3542_p2 = scmp.eq.s32.totalorder %s2762_s11, 0 }
  0xb4   : > { %p226_p6 = scmp.eq.s32.totalorder %s2762_s11, 1  ;;  %p232_p7 = scmp.eq.s32.totalorder %s1827_s23, 1 }
  0xb5   : > { %p2939_p5 = por %p3542_p2, %p50_p1  ;;  %p2206_p9 = scmp.lt.s32.totalorder %s2676_s30, 2 }
  0xb6   : > { %s322_s1 = sand.u32 1, %s2672_s29   ;;  %p2946_p10 = por %p226_p6, %p44_p13 }
  0xb7   : > { %p2950_p11 = por %p232_p7, %p50_p1  ;;  %s2954_s10 = smul.u32 24, %s322_s1 }
  0xb8   : > { %s3544_s25 = scalar_select %p2946_p10, 1, 0 }
  0xb9   : > { %s3545_s14 = scalar_select %p2950_p11, 1, 0 }
  0xba   : > { %s3527_s17 = smul.u32 384, %s2676_s30  ;;  %p2957_p12 = pnand %p2206_p9, %p46_p3 }
  0xbb   : > { %s3547_s0 = sld [smem:[#allocation24_spill]]  ;;  %s326_s19 = scalar_lea.vmem [#allocation2], %s2954_s10 }
  0xbc   : > { %s333_s21 = sshll.u32 %s326_s19, 4  ;;  %s2972_s26 = scalar_lea.sflag [#allocation3], %s322_s1  ;;  %s2970_s21 = int_to_ptr.vmem [resolvable:$true] %s333_s21 }
  0xbd   : > { %p2532_p8 = pneg %p2957_p12 }
  0xc1   : > { %s2967_s23 = scalar_lea.hbm %s3547_s0, %s3527_s17  ;;  %s2535_s18 = scalar_lea.hbm %s3547_s0, 768 }
  0xc2   : > { %s2530_s9 = scalar_lea.hbm %s2967_s23, 384  ;;  %p2536_p1 = scmp.lt.u32.totalorder %s2967_s23, %s3547_s0 }
  0xc3   : > { %p2531_p4 = scmp.ne.s32.totalorder %s2967_s23, %s2530_s9  ;;  %p2537_p3 = scmp.lt.u32.totalorder %s2535_s18, %s2530_s9 }
  0xc4   : > { %p2539_p6 = scmp.lt.u32.totalorder %s2530_s9, %s2967_s23 }
  0xc5   : > { %p2533_p13 = pnand %p2532_p8, %p2531_p4  ;;  %p2538_p2 = por %p2537_p3, %p2536_p1 }
  0xc7   : > { %p2534_p0 = pneg %p2533_p13  ;;  %p2540_p7 = por %p2539_p6, %p2538_p2 }
  0xc9   : > { %p2541_p9 = pnand %p2540_p7, %p2534_p0 }
  0xcb   : > { %2544 = shalt.err (!%p2541_p9)
}
  0xcc   : > { %s2545_s1 = scalar_lea.vmem %s2970_s21, 384  ;;  %s2686_s19 = smov [#allocation2]  }
  0xcd   : > { %p2546_p4 = scmp.ne.s32.totalorder %s2970_s21, %s2545_s1  ;;  %s2550_s13 = sshll.u32 %s2686_s19, 4  ;;  %s2551_s13 = int_to_ptr.vmem [resolvable:$false] %s2550_s13 }
  0xce   : > { %s2552_s2 = scalar_lea.vmem %s2551_s13, 768  ;;  %p2553_p10 = scmp.lt.s32.totalorder %s2970_s21, %s2551_s13 }
  0xcf   : > { %p2548_p13 = pnand %p2546_p4, %p2532_p8  ;;  %p2554_p1 = scmp.lt.s32.totalorder %s2552_s2, %s2545_s1 }
  0xd1   : > { %p2549_p11 = pneg %p2548_p13  ;;  %p2555_p3 = por %p2554_p1, %p2553_p10 }
  0xd3   : > { %p2556_p2 = pnand %p2555_p3, %p2549_p11 }
  0xd5   : > { %2559 = shalt.err (!%p2556_p2)
}
  0xd6   : > { %s3548_s9 = smov 4   ;;  %s3549_s17 = smov 64  }
  0xd7   : > { %2192 = dma.hbm_to_vmem [thread:$0]  (!%p2957_p12), %s2967_s23, 384, %s2970_s21, %s2972_s26, %s3549_s17, %s3549_s17, %s3548_s9  }
  0xd8   : > { %s3550_s18 = smul.u32 384, %s2676_s30  ;;  %s347_s13 = scalar_lea.vmem [#allocation11], %s2954_s10 }
  0xd9   : > { %s354_s2 = sshll.u32 %s347_s13, 4  ;;  %s3551_s0 = sand.u32 1, %s2676_s30   ;;  %s3011_s2 = int_to_ptr.vmem [resolvable:$true] %s354_s2 }
  0xda   : > { %s3008_s1 = scalar_lea.hbm %s3517_s5, %s3550_s18  ;;  %s3015_s3 = scalar_lea.sflag [#allocation12], %s3551_s0 }
  0xdb   : > { %s2560_s4 = scalar_lea.hbm %s3008_s1, 384  ;;  %s2565_s21 = scalar_lea.hbm %s3517_s5, 768 }
  0xdc   : > { %p2561_p10 = scmp.ne.s32.totalorder %s3008_s1, %s2560_s4  ;;  %p2566_p6 = scmp.lt.u32.totalorder %s3008_s1, %s3517_s5 }
  0xdd   : > { %p2567_p7 = scmp.lt.u32.totalorder %s2565_s21, %s2560_s4  ;;  %p2569_p4 = scmp.lt.u32.totalorder %s2560_s4, %s3008_s1 }
  0xde   : > { %p2563_p11 = pnand %p2561_p10, %p2532_p8 }
  0xdf   : > { %p2568_p9 = por %p2567_p7, %p2566_p6 }
  0xe0   : > { %p2564_p0 = pneg %p2563_p11 }
  0xe1   : > { %p2570_p13 = por %p2569_p4, %p2568_p9 }
  0xe3   : > { %p2571_p1 = pnand %p2570_p13, %p2564_p0 }
  0xe5   : > { %2574 = shalt.err (!%p2571_p1)
}
  0xe6   : > { %s2575_s0 = scalar_lea.vmem %s3011_s2, 384  ;;  %s2687_s10 = smov [#allocation11]  }
  0xe7   : > { %p2576_p3 = scmp.ne.s32.totalorder %s3011_s2, %s2575_s0  ;;  %s2580_s19 = sshll.u32 %s2687_s10, 4  ;;  %s2581_s19 = int_to_ptr.vmem [resolvable:$false] %s2580_s19 }
  0xe8   : > { %s2582_s13 = scalar_lea.vmem %s2581_s19, 768  ;;  %p2583_p11 = scmp.lt.s32.totalorder %s3011_s2, %s2581_s19 }
  0xe9   : > { %p2578_p2 = pnand %p2576_p3, %p2532_p8  ;;  %p2584_p6 = scmp.lt.s32.totalorder %s2582_s13, %s2575_s0 }
  0xeb   : > { %p2579_p10 = pneg %p2578_p2  ;;  %p2585_p7 = por %p2584_p6, %p2583_p11 }
  0xed   : > { %p2586_p9 = pnand %p2585_p7, %p2579_p10 }
  0xef   : > { %2589 = shalt.err (!%p2586_p9)
}
  0xf0   : > { %2195 = dma.hbm_to_vmem [thread:$0]  (!%p2957_p12), %s3008_s1, 384, %s3011_s2, %s3015_s3, %s3549_s17, %s3549_s17, %s3548_s9  }
  0xf1   : > { %p3552_p8 = scmp.ne.s32.totalorder %s3535_s12, 0 }
  0xf2   : > { %s3047_s4 = sand.u32 (!%p3552_p8), 1, %s2668_s28  }
  0xf3   : > { %366 = sbr.rel (%p3552_p8) target bundleno = 1208 (0x4b8), region = 52  ;;  %s369_s20 = scalar_lea.sflag (!%p3552_p8), [#allocation3], %s3047_s4 }
  0xf4   : > { %s3050_s26 = smul.u32 (!%p3552_p8), 24, %s3047_s4 }
  0xf6   : > { %s3054_s23 = scalar_lea.vmem (!%p3552_p8), [#allocation2], %s3050_s26 }
  0xfa   : > { %2635 = dma.done.wait (%p2939_p5), %s369_s20, 384  }
  0xfb   : > { %2637 = vsyncadd (%p2939_p5), %s369_s20, 4294966912  ;;  %p3553_p12 = scmp.eq.s32.totalorder %s2762_s11, 0 }
  0xfd   : > { %2639 = dma.done.wait (%p3553_p12), [#allocation6], 32   ;;  %p3554_p0 = pmov %p3553_p12 }
  0xff   : > { %2641 = vsyncadd (%p3554_p0), [#allocation6], 4294967264  ;;  %p3555_p4 = pmov %p3554_p0 }
 0x100   : > { %p3556_p13 = pmov %p3554_p0 }
 0x101   : > { %2643 = dma.done.wait (%p3555_p4), [#allocation9], 4624  }
 0x102   : > { %2645 = vsyncadd (%p3556_p13), [#allocation9], 4294962672  ;;  %s393_s3 = sand.u32 1, %s2762_s11   ;;  %s397_s9 = scalar_lea.vmem [#allocation11], %s3050_s26 }
 0x103   : > { %s394_s12 = scalar_lea.sflag [#allocation12], %s393_s3 }
 0x104   : > { %2647 = dma.done.wait (%p2939_p5), %s394_s12, 384  }
 0x105   : > { %2649 = vsyncadd (%p2939_p5), %s394_s12, 4294966912  ;;  %p3557_p1 = pmov %p3554_p0 }
 0x106   : > { %p3558_p3 = pmov %p3554_p0 }
 0x107   : > { %2651 = dma.done.wait (%p3557_p1), [#allocation12], 256  }
 0x108   : > { %2653 = vsyncadd (%p3558_p3), [#allocation12], 4294967040  ;;  %p3559_p2 = pmov %p3554_p0 }
 0x109   : > { %p3560_p10 = pmov %p3554_p0 }
 0x10a   : > { %2655 = dma.done.wait (%p3559_p2), [#allocation15], 16  }
 0x10b   : > { %2657 = vsyncadd (%p3560_p10), [#allocation15], 4294967280  ;;  %v456_v0 = vlaneseq  ;;  %v2688_v1 = vmov 0.0|0.0   ;;  %vm2689_vm0 = vmmov 0   ;;  %v2690_v4 = vmov 0.0   ;;  %v3115_v31 = vld [vmem:[%s3054_s23] sm:$0xff]  }
 0x10c   : > { %2098 = vmatprep.subr.bf16.mxu0 %v2688_v1  ;;  %2110 = vmatprep.subr.bf16.mxu1 %v2688_v1  ;;  %v2691_v22 = vmov 1.0|1.0   ;;  %v3128_v38 = vld [vmem:[%s3054_s23 + $0x8] sm:$0xff]   ;;  %v1944_v39 = vunpack.c.l.bf16 %v3115_v31  ;;  %vm3529_vm6 = vcmask 523264   ;;  %v3132_v41 = vld [vmem:[%s3054_s23 + $0x10] sm:$0xff]   ;;  %v1945_v44 = vunpack.c.h.bf16 %v3115_v31  ;;  %s2692_s24 = smov 64  }
 0x10d   : > { %v3084_v2 = vshrl.u32 %v456_v0, 7  ;;  %v553_v3 = vand.u32 127, %v456_v0  ;;  %2056 = vmatprep.mubr.msk.f32.mxu0 %vm2689_vm0, %v2690_v4  ;;  %2075 = vmatprep.mubr.msk.f32.mxu1 %vm2689_vm0, %v2690_v4  ;;  %v1948_v45 = vunpack.c.l.bf16 %v3128_v38  ;;  %v1949_v47 = vunpack.c.h.bf16 %v3128_v38  ;;  %s3414_s17 = scalar_lea.vmem [#allocation16], %s3050_s26  ;;  %s2139_s1 = smul.u32 384, %s2762_s11 }
 0x10e   : > { %v599_v49 = vsel %vm3529_vm6, %v1944_v39, 0.0  ;;  %v1952_v50 = vunpack.c.l.bf16 %v3132_v41  ;;  %v600_v51 = vsel %vm3529_vm6, %v1945_v44, 0.0  ;;  %v1953_v53 = vunpack.c.h.bf16 %v3132_v41  ;;  %s1674_s2 = sshll.u32 %s3414_s17, 4  ;;  %s1661_s16 = scalar_lea.sflag [#allocation4], %s3047_s4  ;;  %s3457_s2 = int_to_ptr.vmem [resolvable:$true] %s1674_s2 }
 0x10f   : > { %v458_v5 = vadd.s32 8, %v3084_v2  ;;  %v3090_v6 = vcvt.s32.f32 %v3084_v2  ;;  %v554_v7 = vcvt.s32.f32 %v553_v3  ;;  %v459_v11 = vadd.s32 16, %v3084_v2  ;;  %s3455_s18 = scalar_lea.hbm %s3520_s8, %s2139_s1  ;;  %s2590_s0 = scalar_lea.vmem %s3457_s2, 384 }
 0x110   : > { %v460_v14 = vadd.s32 24, %v3084_v2  ;;  %v461_v19 = vadd.s32 32, %v3084_v2  ;;  %v462_v20 = vadd.s32 40, %v3084_v2  ;;  %v548_v23 = vadd.s32 48, %v3084_v2  ;;  %p2591_p5 = scmp.ne.s32.totalorder %s3457_s2, %s2590_s0  ;;  %p3605_p11 = scmp.ne.s32.totalorder %s3544_s25, 0 }
 0x111   : > { %v3092_v8 = vcvt.s32.f32 %v458_v5  ;;  %v556_v9 = vmul.f32 0.5, %v3090_v6  ;;  %v572_v10 = vmul.f32 0.5, %v554_v7  ;;  %v3098_v16 = vcvt.s32.f32 %v459_v11  ;;  %s2694_s10 = smov [#allocation16]  }
 0x112   : > { %v3100_v18 = vcvt.s32.f32 %v460_v14  ;;  %v3109_v25 = vcvt.s32.f32 %v461_v19  ;;  %v3111_v26 = vcvt.s32.f32 %v462_v20  ;;  %v549_v29 = vadd.s32 56, %v3084_v2  ;;  %p2592_p6 = pnand %p2591_p5, %p3605_p11  ;;  %s2594_s19 = sshll.u32 %s2694_s10, 4  ;;  %s2595_s19 = int_to_ptr.vmem [resolvable:$false] %s2594_s19 }
 0x113   : > { %v557_v12 = vmul.f32 0.5, %v3092_v8  ;;  %v564_v13 = vfloor.f32 %v556_v9  ;;  %v573_v15 = vfloor.f32 %v572_v10  ;;  %v558_v21 = vmul.f32 0.5, %v3098_v16  ;;  %s2596_s13 = scalar_lea.vmem %s2595_s19, 768  ;;  %p2597_p9 = scmp.lt.s32.totalorder %s3457_s2, %s2595_s19 }
 0x114   : > { %v559_v24 = vmul.f32 0.5, %v3100_v18  ;;  %v550_v30 = vcvt.s32.f32 %v548_v23  ;;  %v560_v32 = vmul.f32 0.5, %v3109_v25  ;;  %v561_v33 = vmul.f32 0.5, %v3111_v26  ;;  %p2593_p7 = pneg %p2592_p6  ;;  %p2598_p8 = scmp.lt.s32.totalorder %s2596_s13, %s2590_s0 }
 0x115   : > { %v565_v17 = vfloor.f32 %v557_v12  ;;  %vm574_vm1 = vcmp.eq.f32.partialorder %v564_v13, %v573_v15  ;;  %v566_v27 = vfloor.f32 %v558_v21  ;;  %v551_v34 = vcvt.s32.f32 %v549_v29 }
 0x116   : > { %v567_v28 = vfloor.f32 %v559_v24  ;;  %v562_v37 = vmul.f32 0.5, %v550_v30  ;;  %v568_v42 = vfloor.f32 %v560_v32  ;;  %v569_v43 = vfloor.f32 %v561_v33  ;;  %p2599_p12 = por %p2598_p8, %p2597_p9 }
 0x117   : > { %vm575_vm2 = vcmp.eq.f32.partialorder %v565_v17, %v573_v15  ;;  %vm3119_vm4 = vcmp.eq.f32.partialorder %v566_v27, %v573_v15  ;;  %v563_v40 = vmul.f32 0.5, %v551_v34  ;;  %v602_v52 = vsel %vm3529_vm6, %v1948_v45, 0.0 }
 0x118   : > { %vm2099_vm3 = vmpackc.low %vm575_vm2, %vm574_vm1  ;;  %vm3123_vm5 = vcmp.eq.f32.partialorder %v567_v28, %v573_v15  ;;  %v570_v46 = vfloor.f32 %v562_v37  ;;  %vm578_vm8 = vcmp.eq.f32.partialorder %v568_v42, %v573_v15  ;;  %vm579_vm9 = vcmp.eq.f32.partialorder %v569_v43, %v573_v15  ;;  %v2311_v37 = vld [vmem:[#allocation8 + $0xe0] sm:$0xff]   ;;  %p2600_p0 = pnand %p2599_p12, %p2593_p7 }
 0x119   : > { %2100 = vmatpush3.bf16.msk.msra.mxu0 %vm2099_vm3, %v2691_v22  ;;  %2112 = vmatpush3.bf16.msk.msra.mxu1 %vm2099_vm3, %v2691_v22  ;;  %vm2102_vm7 = vmpackc.low %vm3123_vm5, %vm3119_vm4  ;;  %v571_v48 = vfloor.f32 %v563_v40  ;;  %v601_v54 = vadd.f32 %v600_v51, %v599_v49  ;;  %v604_v57 = vsel %vm3529_vm6, %v1949_v47, 0.0  ;;  %v606_v59 = vsel %vm3529_vm6, %v1952_v50, 0.0 }
 0x11a   : > { %2101 = vmatprep.subr.bf16.mxu0 %v2688_v1  ;;  %2113 = vmatprep.subr.bf16.mxu1 %v2688_v1  ;;  %vm3154_vm10 = vcmp.eq.f32.partialorder %v570_v46, %v573_v15  ;;  %vm2105_vm12 = vmpackc.low %vm579_vm9, %vm578_vm8  ;;  %v608_v61 = vsel %vm3529_vm6, %v1953_v53, 0.0  ;;  %v470_v11 = vmul.f32 0.125, %v3090_v6  ;;  %v471_v12 = vmul.f32 0.125, %v3092_v8 }
 0x11b   : > { %vm3158_vm11 = vcmp.eq.f32.partialorder %v571_v48, %v573_v15  ;;  %v603_v58 = vadd.f32 %v602_v52, %v601_v54  ;;  %v473_v15 = vmul.f32 0.125, %v3100_v18  ;;  %v475_v24 = vmul.f32 0.125, %v3111_v26 }
 0x11c   : > { %vm2108_vm13 = vmpackc.low %vm3158_vm11, %vm3154_vm10  ;;  %v476_v13 = vfloor.f32 %v470_v11  ;;  %v477_v14 = vfloor.f32 %v471_v12  ;;  %v3569_v35 = vmov 0 }
 0x11d   : > { %2103 = vmatpush3.bf16.msk.msra.mxu0 %vm2102_vm7, %v2691_v22  ;;  %2115 = vmatpush3.bf16.msk.msra.mxu1 %vm2102_vm7, %v2691_v22  ;;  %v605_v60 = vadd.f32 %v604_v57, %v603_v58  ;;  %v479_v21 = vfloor.f32 %v473_v15  ;;  %v481_v32 = vfloor.f32 %v475_v24  ;;  %v2298_v24 = vld [vmem:[#allocation8 + $0x40] sm:$0xff]  }
 0x11e   : > { %2104 = vmatprep.subr.bf16.mxu0 %v2688_v1  ;;  %2116 = vmatprep.subr.bf16.mxu1 %v2688_v1  ;;  %v482_v17 = vmul.f32 8.0, %v476_v13  ;;  %v483_v19 = vmul.f32 8.0, %v477_v14  ;;  %vm494_vm14 = vcmp.ge.f32.partialorder %v476_v13, 1.0  ;;  %vm500_vm15 = vcmp.le.f32.partialorder %v476_v13, 4.0 }
 0x11f   : > { %v607_v62 = vadd.f32 %v606_v59, %v605_v60  ;;  %vm495_vm0 = vcmp.ge.f32.partialorder %v477_v14, 1.0  ;;  %vm501_vm1 = vcmp.le.f32.partialorder %v477_v14, 4.0  ;;  %v485_v29 = vmul.f32 8.0, %v479_v21  ;;  %vm506_vm2 = vmand %vm494_vm14, %vm500_vm15 }
 0x120   : > { %v488_v23 = vsub.f32 %v3090_v6, %v482_v17  ;;  %v489_v27 = vsub.f32 %v3092_v8, %v483_v19  ;;  %vm507_vm4 = vmand %vm495_vm0, %vm501_vm1  ;;  %vm497_vm11 = vcmp.ge.f32.partialorder %v479_v21, 1.0  ;;  %v487_v8 = vmul.f32 8.0, %v481_v32 }
 0x121   : > { %2106 = vmatpush3.bf16.msk.msra.mxu0 %vm2105_vm12, %v2691_v22  ;;  %2118 = vmatpush3.bf16.msk.msra.mxu1 %vm2105_vm12, %v2691_v22  ;;  %v609_v63 = vadd.f32 %v608_v61, %v607_v62  ;;  %v491_v6 = vsub.f32 %v3100_v18, %v485_v29  ;;  %vm503_vm12 = vcmp.le.f32.partialorder %v479_v21, 4.0  ;;  %v3571_v18 = vmov 0  ;;  %v2302_v29 = vld [vmem:[#allocation8 + $0x48] sm:$0xff]  }
 0x122   : > { %2107 = vmatprep.subr.bf16.mxu0 %v2688_v1  ;;  %2119 = vmatprep.subr.bf16.mxu1 %v2688_v1  ;;  %v472_v1 = vmul.f32 0.125, %v3098_v16  ;;  %vm512_vm3 = vcmp.ge.f32.partialorder %v488_v23, 1.0  ;;  %vm513_vm5 = vcmp.ge.f32.partialorder %v489_v27, 1.0  ;;  %vm524_vm10 = vcmp.le.f32.partialorder %v488_v23, 4.0  ;;  %vm509_vm1 = vmand %vm497_vm11, %vm503_vm12  ;;  %v2297_v23 = vld [vmem:[#allocation8 + $0x80] sm:$0xff]  }
 0x123   : > { %v610_v0 = vrot.slane %v609_v63, 4  ;;  %vm518_vm9 = vmand %vm506_vm2, %vm512_vm3  ;;  %vm515_vm2 = vcmp.ge.f32.partialorder %v491_v6, 1.0  ;;  %v493_v36 = vsub.f32 %v3111_v26, %v487_v8  ;;  %v2308_v8 = vld [vmem:[#allocation8 + $0x10] sm:$0xff]  }
 0x124   : > { %v478_v20 = vfloor.f32 %v472_v1  ;;  %vm3188_vm0 = vmand %vm518_vm9, %vm524_vm10  ;;  %vm499_vm10 = vcmp.ge.f32.partialorder %v481_v32, 1.0 }
 0x125   : > { %2109 = vmatpush3.bf16.msk.msra.mxu0 %vm2108_vm13, %v2691_v22  ;;  %2121 = vmatpush3.bf16.msk.msra.mxu1 %vm2108_vm13, %v2691_v22  ;;  %v611_v3 = vadd.f32 %v610_v0, %v609_v63  ;;  %v474_v22 = vmul.f32 0.125, %v3109_v25  ;;  %vm519_vm13 = vmand %vm507_vm4, %vm513_vm5  ;;  %v3570_v35 = vsel %vm3188_vm0, 4294967295, %v3569_v35  ;;  %vm505_vm0 = vcmp.le.f32.partialorder %v481_v32, 4.0  ;;  %v2304_v32 = vld [vmem:[#allocation8 + $0x8] sm:$0xff]  }
 0x126   : > { %v484_v28 = vmul.f32 8.0, %v478_v20  ;;  %vm496_vm7 = vcmp.ge.f32.partialorder %v478_v20, 1.0  ;;  %vm502_vm8 = vcmp.le.f32.partialorder %v478_v20, 4.0  ;;  %vm521_vm9 = vmand %vm509_vm1, %vm515_vm2  ;;  %1974 = vmatprep.subr.bf16.mxu0 %v2298_v24 }
 0x127   : > { %v612_v5 = vrot.slane %v611_v3, 2  ;;  %v480_v30 = vfloor.f32 %v474_v22  ;;  %vm508_vm14 = vmand %vm496_vm7, %vm502_vm8  ;;  %v2296_v22 = vld [vmem:[#allocation8 + $0xc0] sm:$0xff]  }
 0x128   : > { %v490_v33 = vsub.f32 %v3098_v16, %v484_v28  ;;  %v2300_v28 = vld [vmem:[#allocation8] sm:$0xff]   ;;  %2002 = vmatprep.subr.bf16.mxu1 %v2296_v22 }
 0x129   : > { %v613_v7 = vadd.f32 %v612_v5, %v611_v3  ;;  %v486_v34 = vmul.f32 8.0, %v480_v30  ;;  %vm498_vm4 = vcmp.ge.f32.partialorder %v480_v30, 1.0  ;;  %vm504_vm5 = vcmp.le.f32.partialorder %v480_v30, 4.0  ;;  %v2301_v30 = vld [vmem:[#allocation8 + $0x88] sm:$0xff]  }
 0x12a   : > { %vm514_vm15 = vcmp.ge.f32.partialorder %v490_v33, 1.0  ;;  %vm526_vm8 = vcmp.le.f32.partialorder %v490_v33, 4.0  ;;  %vm510_vm11 = vmand %vm498_vm4, %vm504_vm5  ;;  %vm529_vm5 = vcmp.le.f32.partialorder %v493_v36, 4.0  ;;  %v2303_v33 = vld [vmem:[#allocation8 + $0xd0] sm:$0xff]  }
 0x12b   : > { %v614_v9 = vrot.slane %v613_v7, 1  ;;  %v492_v16 = vsub.f32 %v3109_v25, %v486_v34  ;;  %vm520_vm7 = vmand %vm508_vm14, %vm514_vm15  ;;  %vm517_vm14 = vcmp.ge.f32.partialorder %v493_v36, 1.0  ;;  %v692_v25 = vsub.s32 0, %v3084_v2  ;;  %v2305_v34 = vld [vmem:[#allocation8 + $0x90] sm:$0xff]   ;;  %v2312_v36 = vld [vmem:[#allocation8 + $0x18] sm:$0xff]  }
 0x12d   : > { %v615_v10 = vadd.f32 %v614_v9, %v613_v7  ;;  %vm516_vm12 = vcmp.ge.f32.partialorder %v492_v16, 1.0  ;;  %vm528_vm1 = vcmp.le.f32.partialorder %v492_v16, 4.0  ;;  %v2310_v16 = vld [vmem:[#allocation8 + $0x58] sm:$0xff]  }
 0x12e   : > { %vm522_vm15 = vmand %vm510_vm11, %vm516_vm12 }
 0x12f   : > { %2057 = vmatmul.mubr.msk.f32.vlgmr.msra.gmra.mrb[0].mxu0 %vm3529_vm6, %v615_v10  ;;  %vm525_vm6 = vcmp.le.f32.partialorder %v489_v27, 4.0  ;;  %v2299_v27 = vld [vmem:[#allocation8 + $0xc8] sm:$0xff]  }
 0x130   : > { %vm3193_vm3 = vmand %vm519_vm13, %vm525_vm6  ;;  %vm527_vm6 = vcmp.le.f32.partialorder %v491_v6, 4.0  ;;  %1975 = vmatpush3.bf16.msra.mxu0 %v2300_v28  ;;  %v2306_v6 = vld [vmem:[#allocation8 + $0x50] sm:$0xff]  }
 0x131   : > { %v3572_v18 = vsel %vm3193_vm3, 4294967295, %v3571_v18  ;;  %vm3198_vm13 = vmand %vm520_vm7, %vm526_vm8  ;;  %vm3575_vm8 = vnez %v3570_v35  ;;  %1976 = vmatprep.subr.bf16.mxu0 %v2302_v29  ;;  %v2307_v35 = vld [vmem:[#allocation8 + $0xd8] sm:$0xff]  }
 0x132   : > { %vm511_vm3 = vmand %vm499_vm10, %vm505_vm0  ;;  %v3208_v46 = vsel %vm3575_vm8, 1.0, %v2690_v4  ;;  %vm3576_vm0 = vnez %v3572_v18  ;;  %v3218_v49 = vsel %vm3198_vm13, 1.0, %v2690_v4  ;;  %v2309_v18 = vld [vmem:[#allocation8 + $0x98] sm:$0xff]  }
 0x133   : > { %vm533_vm2 = vmand %vm521_vm9, %vm527_vm6  ;;  %v3213_v48 = vsel %vm3576_vm0, 1.0, %v2690_v4  ;;  %vm3577_vm9 = vcmask 523264  }
 0x134   : > { %vm523_vm4 = vmand %vm511_vm3, %vm517_vm14  ;;  %v3221_v51 = vsel %vm533_vm2, 1.0, %v2690_v4  ;;  %1977 = vmatpush3.bf16.msra.mxu0 %v2304_v32 }
 0x135   : > { %vm534_vm7 = vmand %vm522_vm15, %vm528_vm1  ;;  %1978 = vmatprep.subr.bf16.mxu0 %v2306_v6  ;;  %vm893_vm15 = vcmask 1046528   ;;  %vm913_vm1 = vcmask 1045504  }
 0x136   : > { %vm535_vm3 = vmand %vm523_vm4, %vm529_vm5  ;;  %v3248_v31 = vsel %vm534_vm7, 1.0, %v2690_v4 }
 0x137   : > { %vm3578_vm10 = vmmov %vm3577_vm9 }
 0x138   : > { %vm3579_vm11 = vmmov %vm3577_vm9  ;;  %1979 = vmatpush3.bf16.msra.mxu0 %v2308_v8 }
 0x139   : > { %vm3580_vm12 = vmmov %vm3577_vm9  ;;  %1980 = vmatprep.subr.bf16.mxu0 %v2310_v16 }
 0x13a   : > { %vm3581_vm6 = vmmov %vm3577_vm9 }
 0x13b   : > { %vm3582_vm13 = vmmov %vm3581_vm6 }
 0x13c   : > { %vm3583_vm14 = vmmov %vm3581_vm6  ;;  %1981 = vmatpush3.bf16.msra.mxu0 %v2312_v36 }
 0x13d   : > { %vm3584_vm2 = vmmov %vm3581_vm6 }
 0x13e   : > { %vm3585_vm4 = vmmov %vm3584_vm2 }
 0x13f   : > { %vm3586_vm5 = vmmov %vm3584_vm2 }
 0x140   : > { %vm3587_vm7 = vmmov %vm3584_vm2 }
 0x141   : > { %vm3588_vm8 = vmmov %vm3584_vm2 }
 0x142   : > { %vm3589_vm0 = vmmov %vm3584_vm2 }
 0x202   : > { %v685_v40 = vpop.f32.mrb[0].mxu0 }
 0x203   : > { %v689_v42 = vmul.f32 0.03125, %v685_v40  ;;  %v2058_v26 = vpop.f32.mrb[1].mxu0  ;;  %v2314_v40 = vld [vmem:[#allocation8 + $0x60] sm:$0xff]  }
 0x204   : > { %v2316_v26 = vld [vmem:[#allocation8 + $0x20] sm:$0xff]   ;;  %1982 = vmatprep.subr.bf16.mxu0 %v2314_v40 }
 0x205   : > { %v693_v43 = vrot.slane %v689_v42, %v692_v25  ;;  %v2313_v42 = vld [vmem:[#allocation8 + $0xa0] sm:$0xff]   ;;  %1983 = vmatpush3.bf16.msra.mxu0 %v2316_v26 }
 0x207   : > { %v3225_v52 = vsub.f32 %v1944_v39, %v693_v43  ;;  %v3229_v54 = vsub.f32 %v1945_v44, %v693_v43  ;;  %v3233_v55 = vsub.f32 %v1948_v45, %v693_v43  ;;  %v3237_v56 = vsub.f32 %v1949_v47, %v693_v43 }
 0x208   : > { %v3241_v57 = vsub.f32 %v1952_v50, %v693_v43  ;;  %v3245_v39 = vsub.f32 %v1953_v53, %v693_v43  ;;  %v3259_v50 = vsel %vm535_vm3, 1.0, %v2690_v4  ;;  %v2315_v43 = vld [vmem:[#allocation8 + $0xe8] sm:$0xff]   ;;  %vm3590_vm3 = vmmov %vm3589_vm0 }
 0x209   : > { %v700_v44 = vmul.f32 %v3208_v46, %v3225_v52  ;;  %v701_v45 = vmul.f32 %v3213_v48, %v3229_v54  ;;  %v702_v38 = vmul.f32 %v3218_v49, %v3233_v55  ;;  %v703_v47 = vmul.f32 %v3221_v51, %v3237_v56 }
 0x20a   : > { %v704_v41 = vmul.f32 %v3248_v31, %v3241_v57  ;;  %v705_v60 = vmul.f32 %v3259_v50, %v3245_v39 }
 0x20b   : > { %v706_v53 = vmul.f32 %v700_v44, %v3225_v52  ;;  %v707_v58 = vmul.f32 %v701_v45, %v3229_v54  ;;  %v708_v59 = vmul.f32 %v702_v38, %v3233_v55  ;;  %v709_v61 = vmul.f32 %v703_v47, %v3237_v56  ;;  %v2318_v44 = vld [vmem:[#allocation8 + $0x68] sm:$0xff]   ;;  %v2319_v47 = vld [vmem:[#allocation8 + $0xf0] sm:$0xff]  }
 0x20c   : > { %v710_v0 = vmul.f32 %v704_v41, %v3241_v57  ;;  %v711_v7 = vmul.f32 %v705_v60, %v3245_v39  ;;  %v2317_v45 = vld [vmem:[#allocation8 + $0xa8] sm:$0xff]   ;;  %1984 = vmatprep.subr.bf16.mxu0 %v2318_v44  ;;  %v2321_v41 = vld [vmem:[#allocation8 + $0xb0] sm:$0xff]   ;;  %v2323_v44 = vld [vmem:[#allocation8 + $0xf8] sm:$0xff]  }
 0x20d   : > { %v712_v62 = vsel %vm3577_vm9, %v706_v53, 0.0  ;;  %v713_v63 = vsel %vm3578_vm10, %v707_v58, 0.0  ;;  %v715_v3 = vsel %vm3579_vm11, %v708_v59, 0.0  ;;  %v717_v9 = vsel %vm3580_vm12, %v709_v61, 0.0  ;;  %v2320_v38 = vld [vmem:[#allocation8 + $0x28] sm:$0xff]   ;;  %vm3591_vm9 = vmmov %vm3589_vm0 }
 0x20e   : > { %v714_v4 = vadd.f32 %v713_v63, %v712_v62  ;;  %v719_v11 = vsel %vm3581_vm6, %v710_v0, 0.0  ;;  %v721_v13 = vsel %vm3582_vm13, %v711_v7, 0.0  ;;  %1985 = vmatpush3.bf16.msra.mxu0 %v2320_v38  ;;  %v1877_v63 = vld [vmem:[#allocation5] ss:$0 sm:$0xff]  ;;  %v1878_v7 = vld [vmem:[#allocation7] ss:$0 sm:$0xff]  ;;  %vm3592_vm10 = vmmov %vm3589_vm0 }
 0x20f   : > { %vm3593_vm11 = vmmov %vm3589_vm0 }
 0x210   : > { %v716_v5 = vadd.f32 %v715_v3, %v714_v4  ;;  %vm3594_vm12 = vmmov %vm3589_vm0 }
 0x211   : > { %vm3595_vm6 = vmmov %vm3589_vm0 }
 0x212   : > { %v718_v10 = vadd.f32 %v717_v9, %v716_v5  ;;  %vm3596_vm13 = vmmov %vm3589_vm0 }
 0x214   : > { %v720_v12 = vadd.f32 %v719_v11, %v718_v10 }
 0x216   : > { %v722_v14 = vadd.f32 %v721_v13, %v720_v12 }
 0x218   : > { %v723_v1 = vrot.slane %v722_v14, 4 }
 0x21a   : > { %v724_v15 = vadd.f32 %v723_v1, %v722_v14 }
 0x21c   : > { %v725_v17 = vrot.slane %v724_v15, 2 }
 0x21e   : > { %v726_v19 = vadd.f32 %v725_v17, %v724_v15 }
 0x220   : > { %v727_v20 = vrot.slane %v726_v19, 1 }
 0x222   : > { %v728_v21 = vadd.f32 %v727_v20, %v726_v19 }
 0x224   : > { %2076 = vmatmul.mubr.msk.f32.vlgmr.msra.gmra.mrb[0].mxu1 %vm3583_vm14, %v728_v21  ;;  %vm1473_vm14 = vsmask.f32 7424 }
 0x225   : > { %2003 = vmatpush3.bf16.msra.mxu1 %v2297_v23 }
 0x226   : > { %2004 = vmatprep.subr.bf16.mxu1 %v2299_v27 }
 0x229   : > { %2005 = vmatpush3.bf16.msra.mxu1 %v2301_v30 }
 0x22a   : > { %2006 = vmatprep.subr.bf16.mxu1 %v2303_v33 }
 0x22d   : > { %2007 = vmatpush3.bf16.msra.mxu1 %v2305_v34 }
 0x22e   : > { %2008 = vmatprep.subr.bf16.mxu1 %v2307_v35 }
 0x231   : > { %2009 = vmatpush3.bf16.msra.mxu1 %v2309_v18 }
 0x232   : > { %2010 = vmatprep.subr.bf16.mxu1 %v2311_v37 }
 0x235   : > { %2011 = vmatpush3.bf16.msra.mxu1 %v2313_v42 }
 0x236   : > { %2012 = vmatprep.subr.bf16.mxu1 %v2315_v43  ;;  %v2322_v43 = vld [vmem:[#allocation8 + $0x70] sm:$0xff]  }
 0x237   : > { %1986 = vmatprep.subr.bf16.mxu0 %v2322_v43 }
 0x239   : > { %2013 = vmatpush3.bf16.msra.mxu1 %v2317_v45  ;;  %v2324_v45 = vld [vmem:[#allocation8 + $0x30] sm:$0xff]  }
 0x23a   : > { %2014 = vmatprep.subr.bf16.mxu1 %v2319_v47  ;;  %1987 = vmatpush3.bf16.msra.mxu0 %v2324_v45 }
 0x23d   : > { %2015 = vmatpush3.bf16.msra.mxu1 %v2321_v41 }
 0x23e   : > { %2016 = vmatprep.subr.bf16.mxu1 %v2323_v44 }
 0x2f7   : > { %v798_v53 = vpop.f32.mrb[0].mxu1 }
 0x2f8   : > { %v802_v58 = vmul.f32 0.03125, %v798_v53  ;;  %v2077_v59 = vpop.f32.mrb[1].mxu1  ;;  %v2325_v53 = vld [vmem:[#allocation8 + $0xb8] sm:$0xff]  }
 0x2f9   : > { %2017 = vmatpush3.bf16.msra.mxu1 %v2325_v53 }
 0x2fa   : > { %v803_v60 = vadd.f32 1e-06, %v802_v58 }
 0x2fc   : > { %2336 = vrsqrt.f32 %v803_v60 }
 0x306   : > { %v2337_v61 = vpop.eup %2336 }
 0x307   : > { %v808_v62 = vrot.slane %v2337_v61, %v692_v25 }
 0x309   : > { %v811_v4 = vmul.f32 %v808_v62, %v3233_v55  ;;  %v812_v0 = vmul.f32 %v808_v62, %v3237_v56  ;;  %v813_v3 = vmul.f32 %v808_v62, %v3241_v57  ;;  %v810_v5 = vmul.f32 %v808_v62, %v3229_v54 }
 0x30a   : > { %v809_v9 = vmul.f32 %v808_v62, %v3225_v52  ;;  %v814_v10 = vmul.f32 %v808_v62, %v3245_v39 }
 0x30b   : > { %v824_v11 = vmul.f32 %v1877_v63, %v811_v4  ;;  %v825_v12 = vmul.f32 %v1877_v63, %v812_v0  ;;  %v826_v13 = vmul.f32 %v1877_v63, %v813_v3  ;;  %v823_v14 = vmul.f32 %v1877_v63, %v810_v5 }
 0x30c   : > { %v822_v2 = vmul.f32 %v1877_v63, %v809_v9  ;;  %v827_v25 = vmul.f32 %v1877_v63, %v814_v10  ;;  %v2326_v9 = vld [vmem:[#allocation8 + $0x78] sm:$0xff]  }
 0x30d   : > { %v837_v1 = vadd.f32 %v1878_v7, %v824_v11  ;;  %v838_v15 = vadd.f32 %v1878_v7, %v825_v12  ;;  %v839_v55 = vadd.f32 %v1878_v7, %v826_v13  ;;  %v836_v17 = vadd.f32 %v1878_v7, %v823_v14  ;;  %v2327_v10 = vld [vmem:[#allocation8 + $0x38] sm:$0xff]   ;;  %v3316_v14 = vld [vmem:[#allocation8 + $0x100] sm:$0xff]   ;;  %1988 = vmatprep.subr.bf16.mxu0 %v2326_v9 }
 0x30e   : > { %v835_v56 = vadd.f32 %v1878_v7, %v822_v2  ;;  %v840_v19 = vadd.f32 %v1878_v7, %v827_v25  ;;  %1989 = vmatpush3.bf16.msra.mxu0 %v2327_v10  ;;  %2078 = vmatprep.subr.bf16.mxu1 %v3316_v14 }
 0x30f   : > { %v1881_v57 = vmul.f32 -1.442695, %v837_v1  ;;  %v1882_v20 = vmul.f32 -1.442695, %v838_v15  ;;  %v1883_v54 = vmul.f32 -1.442695, %v839_v55 }
 0x310   : > { %v1880_v21 = vmul.f32 -1.442695, %v836_v17  ;;  %v1879_v52 = vmul.f32 -1.442695, %v835_v56  ;;  %v1884_v39 = vmul.f32 -1.442695, %v840_v19 }
 0x311   : > { %2338 = vpow2.f32 %v1881_v57 }
 0x312   : > { %2340 = vpow2.f32 %v1882_v20 }
 0x313   : > { %2342 = vpow2.f32 %v1883_v54 }
 0x314   : > { %2344 = vpow2.f32 %v1880_v21 }
 0x315   : > { %2346 = vpow2.f32 %v1879_v52  ;;  %v3340_v52 = vld [vmem:[#allocation13] sm:$0xff]  }
 0x316   : > { %2348 = vpow2.f32 %v1884_v39  ;;  %2090 = vmatprep.subr.bf16.mxu0 %v3340_v52 }
 0x31b   : > { %v2339_v22 = vpop.eup %2338 }
 0x31c   : > { %v2341_v23 = vpop.eup %2340  ;;  %v861_v24 = vadd.f32 1.0, %v2339_v22 }
 0x31d   : > { %v2343_v27 = vpop.eup %2342  ;;  %v862_v28 = vadd.f32 1.0, %v2341_v23 }
 0x31e   : > { %v2345_v29 = vpop.eup %2344  ;;  %v863_v30 = vadd.f32 1.0, %v2343_v27  ;;  %2350 = vrcp.f32 %v861_v24 }
 0x31f   : > { %v2347_v32 = vpop.eup %2346  ;;  %2352 = vrcp.f32 %v862_v28  ;;  %v860_v33 = vadd.f32 1.0, %v2345_v29 }
 0x320   : > { %v2349_v6 = vpop.eup %2348  ;;  %2354 = vrcp.f32 %v863_v30  ;;  %v859_v34 = vadd.f32 1.0, %v2347_v32  ;;  %v2334_v32 = vld [vmem:[%s397_s9 + $0x4] sm:$0xff]  }
 0x321   : > { %2356 = vrcp.f32 %v860_v33  ;;  %v864_v8 = vadd.f32 1.0, %v2349_v6 }
 0x322   : > { %2358 = vrcp.f32 %v859_v34 }
 0x323   : > { %2360 = vrcp.f32 %v864_v8 }
 0x328   : > { %v2351_v35 = vpop.eup %2350 }
 0x329   : > { %v2353_v16 = vpop.eup %2352  ;;  %v879_v18 = vmul.f32 %v2351_v35, %v837_v1 }
 0x32a   : > { %v2355_v36 = vpop.eup %2354  ;;  %v880_v37 = vmul.f32 %v2353_v16, %v838_v15 }
 0x32b   : > { %v2357_v40 = vpop.eup %2356  ;;  %v881_v42 = vmul.f32 %v2355_v36, %v839_v55  ;;  %v3287_v26 = vmul.f32 %v3218_v49, %v879_v18 }
 0x32c   : > { %v2359_v38 = vpop.eup %2358  ;;  %v3290_v47 = vmul.f32 %v3221_v51, %v880_v37  ;;  %v878_v41 = vmul.f32 %v2357_v40, %v836_v17  ;;  %v1477_v37 = vshll.u32 %v2334_v32, 16 }
 0x32d   : > { %v2361_v58 = vpop.eup %2360  ;;  %v3293_v59 = vmul.f32 %v3248_v31, %v881_v42  ;;  %v897_v60 = vrot.slane %v3287_v26, 1  ;;  %v917_v61 = vrot.slane %v3287_v26, 2  ;;  %v877_v62 = vmul.f32 %v2359_v38, %v835_v56 }
 0x32e   : > { %v899_v63 = vrot.slane %v3290_v47, 1  ;;  %v3299_v4 = vmul.f32 %v3213_v48, %v878_v41  ;;  %v3302_v0 = vrot.slane %v3290_v47, 2  ;;  %v882_v3 = vmul.f32 %v2361_v58, %v840_v19  ;;  %v2329_v58 = vld [vmem:[#allocation8 + $0x108] sm:$0xff]  }
 0x32f   : > { %v3305_v5 = vrot.slane %v3293_v59, 1  ;;  %v3308_v7 = vmul.f32 %v3208_v46, %v877_v62  ;;  %v944_v17 = vrot.slane %v3293_v59, 2  ;;  %v2281_v28 = vpack.i.bf16 %v3293_v59, %v3290_v47 }
 0x330   : > { %v900_v11 = vsel %vm893_vm15, %v897_v60, %v899_v63  ;;  %v915_v12 = vrot.slane %v3299_v4, 2  ;;  %v3314_v13 = vsel %vm913_vm1, %v917_v61, %v3302_v0  ;;  %v895_v46 = vrot.slane %v3299_v4, 1 }
 0x331   : > { %v3320_v2 = vsel %vm893_vm15, %v899_v63, %v3305_v5  ;;  %v894_v25 = vrot.slane %v3308_v7, 1  ;;  %v3325_v1 = vmul.f32 %v3259_v50, %v882_v3  ;;  %v914_v56 = vrot.slane %v3308_v7, 2 }
 0x332   : > { %v2261_v15 = vpack.i.bf16 %v3320_v2, %v900_v11  ;;  %v918_v55 = vsel %vm913_vm1, %v915_v12, %v917_v61  ;;  %v898_v20 = vsel %vm893_vm15, %v895_v46, %v897_v60  ;;  %v2266_v39 = vpack.i.bf16 %v3287_v26, %v3299_v4  ;;  %v3378_v60 = vld [vmem:[%s397_s9 + $0xc] sm:$0xff]  }
 0x333   : > { %v2271_v19 = vpack.i.bf16 %v3314_v13, %v918_v55  ;;  %v959_v57 = vrot.slane %v3325_v1, 1  ;;  %v896_v50 = vsel %vm893_vm15, %v894_v25, %v895_v46  ;;  %v970_v54 = vrot.slane %v3325_v1, 2 }
 0x334   : > { %2262 = vrot.lane.b32.xlu0 %v2261_v15, %s2692_s24  ;;  %v916_v21 = vsel %vm913_vm1, %v914_v56, %v915_v12  ;;  %v2276_v23 = vpack.i.bf16 %v898_v20, %v896_v50  ;;  %v3358_v29 = vsel %vm913_vm1, %v3302_v0, %v944_v17  ;;  %v1475_v3 = vshrl.u32 %v2334_v32, 16 }
 0x335   : > { %2272 = vrot.lane.b32.xlu1 %v2271_v19, %s2692_s24  ;;  %v3347_v22 = vsel %vm913_vm1, %v944_v17, %v970_v54  ;;  %v960_v24 = vsel %vm893_vm15, %v3305_v5, %v959_v57  ;;  %v2291_v30 = vpack.i.bf16 %v944_v17, %v3358_v29  ;;  %v1479_v9 = vrot.slane %v1477_v37, 1  ;;  %v2331_v19 = vld [vmem:[#allocation8 + $0x110] sm:$0xff]   ;;  %vm3597_vm1 = vmmov %vm3589_vm0 }
 0x336   : > { %v2286_v27 = vpack.i.bf16 %v959_v57, %v960_v24  ;;  %v2333_v57 = vld [vmem:[#allocation13 + $0x8] sm:$0xff]  }
 0x338   : > { %2267 = vrot.lane.b32.xlu0 %v2266_v39, %s2692_s24 }
 0x339   : > { %2277 = vrot.lane.b32.xlu1 %v2276_v23, %s2692_s24 }
 0x33c   : > { %2287 = vrot.lane.b32.xlu0 %v2286_v27, %s2692_s24 }
 0x33d   : > { %2282 = vrot.lane.b32.xlu1 %v2281_v28, %s2692_s24 }
 0x340   : > { %2292 = vrot.lane.b32.xlu0 %v2291_v30, %s2692_s24 }
 0x341   : > { %907 = vrot.lane.b32.xlu1 %v899_v63, %s2692_s24 }
 0x3a6   : > { %v2263_v33 = vpop.permute.xlu0 %2262 }
 0x3a7   : > { %v2265_v6 = vunpack.i.h.bf16 %v2263_v33  ;;  %v2264_v34 = vunpack.i.l.bf16 %v2263_v33  ;;  %v2273_v8 = vpop.permute.xlu1 %2272 }
 0x3a8   : > { %v2275_v35 = vunpack.i.h.bf16 %v2273_v8  ;;  %v2274_v16 = vunpack.i.l.bf16 %v2273_v8  ;;  %v994_v8 = vpack.c.bf16 %v3358_v29, %v3314_v13 }
 0x3a9   : > { %v3369_v18 = vsel %vm3584_vm2, %v3287_v26, %v2264_v34  ;;  %v987_v36 = vsel %vm3585_vm4, %v3290_v47, %v2265_v6  ;;  %vm3598_vm2 = vmmov %vm3589_vm0  ;;  %vm1501_vm4 = vcmask 261120  }
 0x3aa   : > { %v984_v40 = vsel %vm3586_vm5, %v900_v11, %v2275_v35  ;;  %v983_v42 = vsel %vm3587_vm7, %v898_v20, %v2274_v16  ;;  %v2268_v43 = vpop.permute.xlu0 %2267  ;;  %v993_v44 = vpack.c.bf16 %v987_v36, %v3369_v18  ;;  %vm3599_vm5 = vmmov %vm3589_vm0  ;;  %v999_v16 = vpack.c.bf16 %v970_v54, %v3347_v22 }
 0x3ab   : > { %v992_v45 = vpack.c.bf16 %v984_v40, %v983_v42  ;;  %v2270_v38 = vunpack.i.h.bf16 %v2268_v43  ;;  %v2269_v41 = vunpack.i.l.bf16 %v2268_v43  ;;  %v2278_v53 = vpop.permute.xlu1 %2277  ;;  %vm3600_vm7 = vmmov %vm3589_vm0  ;;  %v2693_v54 = vmov 0  }
 0x3ac   : > { %v2280_v26 = vunpack.i.h.bf16 %v2278_v53  ;;  %v2279_v61 = vunpack.i.l.bf16 %v2278_v53  ;;  %1382 = vmatprep.mubr.bf16.mxu1 %v993_v44 }
 0x3ad   : > { %1383 = vmatmul.mubr.bf16.vlgmr.msra.gmra.mrb[4].mxu1 %v992_v45  ;;  %v979_v62 = vsel %vm3588_vm8, %v916_v21, %v2269_v41  ;;  %v980_v63 = vsel %vm3589_vm0, %v918_v55, %v2270_v38  ;;  %v1482_v55 = vshll.u32 %v3378_v60, 16  ;;  %vm1582_vm8 = vcmask 516096   ;;  %v1885_v45 = vld [vmem:[#allocation10] ss:$0 sm:$0xff] }
 0x3ae   : > { %v976_v10 = vsel %vm3590_vm3, %v3299_v4, %v2280_v26  ;;  %v975_v11 = vsel %vm3591_vm9, %v3308_v7, %v2279_v61  ;;  %v2288_v12 = vpop.permute.xlu0 %2287  ;;  %v991_v25 = vpack.c.bf16 %v980_v63, %v979_v62  ;;  %2079 = vmatpush3.bf16.msra.mxu1 %v3316_v14  ;;  %v1480_v14 = vor.u32 %v1479_v9, %v1475_v3 }
 0x3af   : > { %v990_v46 = vpack.c.bf16 %v976_v10, %v975_v11  ;;  %v2290_v15 = vunpack.i.h.bf16 %v2288_v12  ;;  %v2289_v17 = vunpack.i.l.bf16 %v2288_v12  ;;  %v2283_v56 = vpop.permute.xlu1 %2282  ;;  %2080 = vmatprep.subr.bf16.mxu1 %v2329_v58  ;;  %v1484_v33 = vrot.slane %v1482_v55, 1 }
 0x3b0   : > { %v2285_v50 = vunpack.i.h.bf16 %v2283_v56  ;;  %v2284_v20 = vunpack.i.l.bf16 %v2283_v56  ;;  %1333 = vmatprep.mubr.bf16.mxu0 %v991_v25  ;;  %vm1583_vm0 = vsmask.f32 256  ;;  %vm1588_vm9 = vcmask 519171  }
 0x3b1   : > { %1334 = vmatmul.mubr.bf16.vlgmr.msra.gmra.mrb[4].mxu0 %v990_v46  ;;  %v988_v4 = vsel %vm3592_vm10, %v3293_v59, %v2289_v17  ;;  %v989_v7 = vsel %vm3593_vm11, %v3325_v1, %v2290_v15  ;;  %v2332_v59 = vld [vmem:[#allocation8 + $0x118] sm:$0xff]   ;;  %vm1584_vm3 = vmand %vm1582_vm8, %vm1583_vm0  ;;  %vm1589_vm10 = vsmask.f32 7950  ;;  %vm1580_vm11 = vcmask 519168   ;;  %v1591_v1 = vld [vmem:[%s3414_s17 + $0x10] sm:$0x8] }
 0x3b2   : > { %v2293_v21 = vpop.permute.xlu0 %2292  ;;  %v981_v39 = vsel %vm3594_vm12, %v3314_v13, %v2284_v20  ;;  %v982_v23 = vsel %vm3595_vm6, %v3302_v0, %v2285_v50  ;;  %v998_v24 = vpack.c.bf16 %v989_v7, %v988_v4  ;;  %2081 = vmatpush3.bf16.msra.mxu1 %v2329_v58  ;;  %2091 = vmatpush3.bf16.msra.mxu0 %v3340_v52  ;;  %v1585_v13 = vld [vmem:[%s3414_s17 + $0x4] sm:$0x1]  ;;  %vm1590_vm12 = vmand %vm1588_vm9, %vm1589_vm10  ;;  %v1568_v7 = vrot.slane %v3221_v51, 1 }
 0x3b3   : > { %v2295_v27 = vunpack.i.h.bf16 %v2293_v21  ;;  %v2294_v28 = vunpack.i.l.bf16 %v2293_v21  ;;  %v908_v30 = vpop.permute.xlu1 %907  ;;  %v996_v32 = vpack.c.bf16 %v982_v23, %v981_v39  ;;  %2082 = vmatprep.subr.bf16.mxu1 %v2331_v19  ;;  %2092 = vmatprep.subr.bf16.mxu0 %v2333_v57  ;;  %v1586_v29 = vsel %vm1584_vm3, 0, %v1585_v13  ;;  %1581 = vst.msk [vmem:[%s3414_s17] sm:$0xf] %vm1580_vm11, %v2693_v54  ;;  %1594 = vst.msk [vmem:[%s3414_s17 + $0x14] sm:$0xf] %vm1580_vm11, %v2693_v54 }
 0x3b4   : > { %v978_v6 = vsel %vm3596_vm13, %v3290_v47, %v908_v30  ;;  %1390 = vmatprep.mubr.bf16.mxu1 %v998_v24  ;;  %v1485_v47 = vsel %vm1473_vm14, %v1480_v14, %v1484_v33  ;;  %1587 = vst [vmem:[%s3414_s17 + $0x4] sm:$0x1] %v1586_v29  ;;  %v1592_v22 = vsel %vm1590_vm12, 0, %v1591_v1  ;;  %v1570_v14 = vrot.slane %v3248_v31, 1 }
 0x3b5   : > { %1341 = vmatprep.mubr.bf16.mxu0 %v996_v32  ;;  %v985_v0 = vsel %vm3597_vm1, %v3320_v2, %v2294_v28  ;;  %v986_v52 = vsel %vm3598_vm2, %v3305_v5, %v2295_v27  ;;  %v995_v35 = vpack.c.bf16 %v978_v6, %v3369_v18  ;;  %v1486_v2 = vshrl.u32 %v3378_v60, 16  ;;  %1593 = vst [vmem:[%s3414_s17 + $0x10] sm:$0x8] %v1592_v22  ;;  %v1924_v32 = vld [vmem:[#allocation14] ss:$0 sm:$0xff] }
 0x3b6   : > { %v997_v34 = vpack.c.bf16 %v986_v52, %v985_v0  ;;  %2083 = vmatpush3.bf16.msra.mxu1 %v2331_v19  ;;  %2093 = vmatpush3.bf16.msra.mxu0 %v2333_v57  ;;  %v1565_v27 = vrot.slane %v3213_v48, 1  ;;  %v1566_v28 = vrot.slane %v3218_v49, 1  ;;  %v1571_v51 = vsel %vm893_vm15, %v1568_v7, %v1570_v14 }
 0x3b7   : > { %2084 = vmatprep.subr.bf16.mxu1 %v2332_v59  ;;  %v1488_v5 = vor.u32 %v1486_v2, %v1484_v33  ;;  %vm1648_vm6 = vsmask.f32 7938  ;;  %vm1607_vm13 = vsmask.f32 4368 }
 0x3b8   : > { %1391 = vmatmul.mubr.bf16.gmra.mrb[8].mxu1 %v997_v34  ;;  %v1567_v2 = vsel %vm893_vm15, %v1565_v27, %v1566_v28  ;;  %v1569_v29 = vsel %vm893_vm15, %v1566_v28, %v1568_v7  ;;  %vm1655_vm15 = vsmask.f32 3328  ;;  %vm3432_vm14 = vmand %vm1580_vm11, %vm1648_vm6 }
 0x3b9   : > { %1342 = vmatmul.mubr.bf16.gmra.mrb[8].mxu0 %v995_v35  ;;  %2086 = vmatprep.mubr.msk.bf16.mxu1 %vm3599_vm5, %v994_v8  ;;  %vm3439_vm1 = vmor %vm1583_vm0, %vm1607_vm13 }
 0x3ba   : > { %2085 = vmatpush3.bf16.msra.mxu1 %v2332_v59  ;;  %2094 = vmatprep.mubr.msk.bf16.mxu0 %vm1501_vm4, %v1485_v47  ;;  %vm1656_vm2 = vmand %vm1580_vm11, %vm1655_vm15 }
 0x3c0   : > { %2087 = vmatmul.mubr.msk.bf16.vlgmr.msra.gmra.mrb[12].mxu1 %vm3600_vm7, %v999_v16 }
 0x3c1   : > { %2095 = vmatmul.mubr.msk.bf16.vlgmr.msra.gmra.mrb[12].mxu0 %vm1501_vm4, %v1488_v5 }
 0x480   : > { %v2018_v18 = vpop.f32.mrb[4].mxu1 }
 0x481   : > { %v2019_v36 = vpop.f32.mrb[5].mxu1 }
 0x482   : > { %v2020_v37 = vadd.f32 %v2019_v36, %v2018_v18  ;;  %v2021_v40 = vpop.f32.mrb[6].mxu1 }
 0x483   : > { %v2022_v42 = vpop.f32.mrb[7].mxu1 }
 0x484   : > { %v2023_v43 = vadd.f32 %v2022_v42, %v2021_v40  ;;  %v1990_v44 = vpop.f32.mrb[4].mxu0 }
 0x485   : > { %v1991_v38 = vpop.f32.mrb[5].mxu0 }
 0x486   : > { %v1992_v41 = vadd.f32 %v1991_v38, %v1990_v44  ;;  %v1993_v53 = vpop.f32.mrb[6].mxu0 }
 0x487   : > { %v1994_v58 = vpop.f32.mrb[7].mxu0 }
 0x488   : > { %v1336_v60 = vadd.f32 %v1992_v41, %v1885_v45  ;;  %v1995_v26 = vadd.f32 %v1994_v58, %v1993_v53 }
 0x48a   : > { %v1339_v61 = vadd.f32 %v1995_v26, %v1885_v45  ;;  %v1385_v62 = vadd.f32 %v2020_v37, %v1336_v60 }
 0x48b   : > { %v2024_v63 = vpop.f32.mrb[8].mxu1 }
 0x48c   : > { %v1996_v3 = vpop.f32.mrb[8].mxu0  ;;  %v2025_v9 = vpop.f32.mrb[9].mxu1  ;;  %v1388_v10 = vadd.f32 %v2023_v43, %v1339_v61  ;;  %v1650_v61 = vld [vmem:[%s3414_s17 + $0x4] sm:$0xf] }
 0x48d   : > { %v2026_v11 = vadd.f32 %v2025_v9, %v2024_v63  ;;  %v1997_v12 = vpop.f32.mrb[9].mxu0  ;;  %v2027_v25 = vpop.f32.mrb[10].mxu1 }
 0x48e   : > { %v1998_v46 = vadd.f32 %v1997_v12, %v1996_v3  ;;  %v1999_v15 = vpop.f32.mrb[10].mxu0  ;;  %v2028_v17 = vpop.f32.mrb[11].mxu1 }
 0x48f   : > { %v2029_v56 = vadd.f32 %v2028_v17, %v2027_v25  ;;  %v2000_v19 = vpop.f32.mrb[11].mxu0 }
 0x490   : > { %v1344_v57 = vadd.f32 %v1998_v46, %v1885_v45  ;;  %v2001_v55 = vadd.f32 %v2000_v19, %v1999_v15  ;;  %v1657_v15 = vld [vmem:[%s3414_s17 + $0x10] sm:$0xf] }
 0x492   : > { %v1347_v50 = vadd.f32 %v2001_v55, %v1885_v45  ;;  %v1393_v20 = vadd.f32 %v2026_v11, %v1344_v57 }
 0x493   : > { %v2088_v4 = vpop.f32.mrb[12].mxu1 }
 0x494   : > { %v1442_v21 = vadd.f32 %v2088_v4, %v1393_v20  ;;  %v1433_v39 = vpop.f32.mrb[13].mxu1  ;;  %v2096_v23 = vpop.f32.mrb[12].mxu0  ;;  %v1396_v24 = vadd.f32 %v2029_v56, %v1347_v50 }
 0x495   : > { %v1434_v30 = vadd.f32 %v1433_v39, %v1385_v62  ;;  %v2089_v59 = vpop.f32.mrb[14].mxu1  ;;  %v1542_v33 = vpop.f32.mrb[13].mxu0 }
 0x496   : > { %v2123_v6 = vadd.f32 %v2096_v23, %v1442_v21  ;;  %v1445_v0 = vadd.f32 %v2089_v59, %v1396_v24  ;;  %v1436_v52 = vpop.f32.mrb[15].mxu1  ;;  %v2097_v34 = vpop.f32.mrb[14].mxu0 }
 0x497   : > { %v2126_v8 = vadd.f32 %v1542_v33, %v1434_v30  ;;  %v1437_v31 = vadd.f32 %v1436_v52, %v1388_v10  ;;  %v1545_v35 = vpop.f32.mrb[15].mxu0 }
 0x498   : > { %v2124_v47 = vadd.f32 %v2123_v6, %v1924_v32  ;;  %v2129_v5 = vadd.f32 %v1924_v32, %v1445_v0 }
 0x499   : > { %v2127_v48 = vadd.f32 %v2126_v8, %v1924_v32  ;;  %v2132_v16 = vadd.f32 %v1924_v32, %v1437_v31 }
 0x49a   : > { %v1578_v49 = vmul.f32 %v2124_v47, %v1571_v51  ;;  %v2130_v13 = vadd.f32 %v2129_v5, %v2097_v34 }
 0x49b   : > { %v1576_v1 = vmul.f32 %v2127_v48, %v1567_v2  ;;  %v2133_v54 = vadd.f32 %v2132_v16, %v1545_v35 }
 0x49c   : > { %v1940_v22 = vpack.c.bf16 %v1578_v49, %v1578_v49  ;;  %v1579_v18 = vmul.f32 %v2130_v13, %v1570_v14 }
 0x49d   : > { %v1938_v36 = vpack.c.bf16 %v1576_v1, %v1576_v1  ;;  %v1577_v37 = vmul.f32 %v2133_v54, %v1569_v29 }
 0x49e   : > { %v1627_v40 = vshrl.u32 %v1940_v22, 16  ;;  %v1941_v42 = vpack.c.bf16 %v1579_v18, %v1579_v18  ;;  %v1630_v60 = vshll.u32 %v1940_v22, 16 }
 0x49f   : > { %v1610_v43 = vshrl.u32 %v1938_v36, 16  ;;  %v1939_v44 = vpack.c.bf16 %v1577_v37, %v1577_v37  ;;  %v1613_v53 = vshll.u32 %v1938_v36, 16 }
 0x4a0   : > { %v1629_v45 = vrot.slane %v1627_v40, 7  ;;  %v1636_v38 = vshrl.u32 %v1941_v42, 16  ;;  %v1639_v63 = vshll.u32 %v1941_v42, 16 }
 0x4a1   : > { %v1612_v41 = vrot.slane %v1610_v43, 7  ;;  %v1618_v58 = vshrl.u32 %v1939_v44, 16  ;;  %v1621_v11 = vshll.u32 %v1939_v44, 16 }
 0x4a2   : > { %v1638_v62 = vrot.slane %v1636_v38, 7  ;;  %v1632_v12 = vor.u32 %v1630_v60, %v1629_v45  ;;  %v1634_v25 = vrot.slane %v1629_v45, 4 }
 0x4a3   : > { %v1615_v3 = vor.u32 %v1613_v53, %v1612_v41  ;;  %v1620_v10 = vrot.slane %v1618_v58, 7  ;;  %v1616_v17 = vrot.slane %v1612_v41, 4 }
 0x4a4   : > { %v1641_v46 = vor.u32 %v1639_v63, %v1638_v62 }
 0x4a5   : > { %v1651_v56 = vsel %vm3432_vm14, %v1615_v3, %v1650_v61  ;;  %v1623_v19 = vor.u32 %v1621_v11, %v1620_v10  ;;  %v1625_v57 = vrot.slane %v1620_v10, 4 }
 0x4a6   : > { %1652 = vst [vmem:[%s3414_s17 + $0x4] sm:$0xf] %v1651_v56  ;;  %v1642_v55 = vsel %vm3439_vm1, %v1634_v25, %v1641_v46 }
 0x4a7   : > { %v1658_v50 = vsel %vm1656_vm2, %v1642_v55, %v1657_v15  ;;  %v1624_v20 = vsel %vm3439_vm1, %v1616_v17, %v1623_v19  ;;  %v1633_v4 = vsel %vm3439_vm1, %v1625_v57, %v1632_v12 }
 0x4a8   : > { %1659 = vst [vmem:[%s3414_s17 + $0x10] sm:$0xf] %v1658_v50  ;;  %1653 = vst.msk [vmem:[%s3414_s17 + $0x8] sm:$0xf] %vm1580_vm11, %v1624_v20 }
 0x4a9   : > { %1654 = vst.msk [vmem:[%s3414_s17 + $0xc] sm:$0xf] %vm1580_vm11, %v1633_v4 }
 0x4aa   : > { %2603 = shalt.err (!%p2600_p0)
}
 0x4ab   : > { %s2604_s26 = scalar_lea.hbm %s3455_s18, 384  ;;  %s2608_s3 = scalar_lea.hbm %s3520_s8, 768 }
 0x4ac   : > { %p2605_p4 = scmp.ne.s32.totalorder %s3455_s18, %s2604_s26  ;;  %p2609_p3 = scmp.lt.u32.totalorder %s3455_s18, %s3520_s8 }
 0x4ad   : > { %p2610_p2 = scmp.lt.u32.totalorder %s2608_s3, %s2604_s26  ;;  %p2612_p5 = scmp.lt.u32.totalorder %s2604_s26, %s3455_s18 }
 0x4ae   : > { %p2606_p13 = pnand %p2605_p4, %p3605_p11 }
 0x4af   : > { %p2611_p10 = por %p2610_p2, %p2609_p3 }
 0x4b0   : > { %p2607_p1 = pneg %p2606_p13 }
 0x4b1   : > { %p2613_p6 = por %p2612_p5, %p2611_p10 }
 0x4b3   : > { %p2614_p7 = pnand %p2613_p6, %p2607_p1 }
 0x4b5   : > { %2617 = shalt.err (!%p2614_p7)
}
 0x4b6   : > { %s2695_s17 = smov 4  }
 0x4b7   : > { %2168 = dma.vmem_to_hbm [thread:$0]  (%p3605_p11), %s3457_s2, 384, %s3455_s18, %s1661_s16, %s2692_s24, %s2692_s24, %s2695_s17  }
 0x4b8 PF: > { %s1689_s1 = sand.u32 1, %s2664_s27   ;;  %p3606_p9 = scmp.ne.s32.totalorder %s3545_s14, 0 }
 0x4b9   : > { %p3607_p8 = scmp.ge.s32.totalorder %s2676_s30, 2  ;;  %s1690_s11 = scalar_lea.sflag [#allocation4], %s1689_s1 }
 0x4bb   : > { %p2197_p12 = pnand %p3607_p8, %p3606_p9 }
 0x4bd   : > { %2659 = dma.done.wait (!%p2197_p12), %s1690_s11, 384  }
 0x4be   : > { %2661 = vsyncadd (!%p2197_p12), %s1690_s11, 4294966912  ;;  %p27_p0 = scmp.ge.s32.totalorder %s2924_s15, 4   ;;  %s3608_s27 = smov %s2668_s28 }
 0x4bf   : > { %s3609_s28 = smov %s2672_s29  ;;  %s3610_s29 = smov %s2935_s22 }
 0x4c0   : > { %s3611_s30 = smov %s2924_s15  ;;  %29 = sbr.rel (!%p27_p0) target bundleno = 16 (0x10), region = 134 }
 0x4c7   :  { %1695 = vsyncpa [#allocation3], 1 }
 0x4c8   :  { %1697 = vsyncpa [#allocation3 + $0x1], 1 }
 0x4c9   :  { %1698 = vsyncpa [#allocation6], 1 }
 0x4ca   :  { %1699 = vsyncpa [#allocation9], 1 }
 0x4cb   :  { %1700 = vsyncpa [#allocation12], 1 }
 0x4cc   :  { %1702 = vsyncpa [#allocation12 + $0x1], 1 }
 0x4cd   :  { %1703 = vsyncpa [#allocation15], 1 }
 0x4ce   :  { %1704 = vsyncpa [#allocation4], 1 }
 0x4cf   :  { %1706 = vsyncpa [#allocation4 + $0x1], 1 }

// kernel: pose_encoder_forward.7
= control target key start
LH: loop header
LB: loop body
LE: loop exit
PB: predicated region body
PF: predicated region fallthrough
CT: control target
= control target key end

     0   :  { %s6250_s0 = inlined_call_operand.hbm [shape: bf16[2,160,32], index: 0, kind: input, shape index: {}]   ;;  %s6251_s1 = inlined_call_operand.hbm [shape: f32[1,32], index: 1, kind: input, shape index: {}]   ;;  %s6252_s2 = inlined_call_operand.hbm [shape: f32[1,32], index: 2, kind: input, shape index: {}]   ;;  %s6253_s3 = inlined_call_operand.hbm [shape: bf16[288,32], index: 3, kind: input, shape index: {}]   ;;  %s6254_s4 = inlined_call_operand.hbm [shape: f32[1,32], index: 4, kind: input, shape index: {}]   ;;  %s6255_s5 = inlined_call_operand.hbm [shape: bf16[2,160,32], index: 5, kind: input, shape index: {}]   ;;  %s6256_s6 = inlined_call_operand.hbm [shape: bf16[2,160,32], index: 6, kind: output, shape index: {}]  }
   0x1   :  { %6373 = sst [smem:[#allocation56_spill]] %s6250_s0 }
   0x2   :  { %6374 = sst [smem:[#allocation57_spill]] %s6251_s1 }
   0x3   :  { %6375 = sst [smem:[#allocation58_spill]] %s6252_s2 }
   0x4   :  { %11 = vsyncpa [#allocation3], 0 }
   0x5   :  { %13 = vsyncpa [#allocation3 + $0x1], 0 }
   0x6   :  { %14 = vsyncpa [#allocation6], 0 }
   0x7   :  { %15 = vsyncpa [#allocation9], 0 }
   0x8   :  { %16 = vsyncpa [#allocation12], 0 }
   0x9   :  { %18 = vsyncpa [#allocation12 + $0x1], 0 }
   0xa   :  { %19 = vsyncpa [#allocation4], 0 }
   0xb   :  { %21 = vsyncpa [#allocation4 + $0x1], 0  ;;  %s3896_s21 = smov 0   ;;  %s3898_s22 = smov 0  }
   0xc   :  { %s3900_s23 = smov 0   ;;  %s3902_s24 = smov 0  }
   0xd LB: > { %s3917_s25 = sadd.s32 4294967295, %s3841_s24   ;;  %s2767_s26 = sadd.s32 4294967294, %s3841_s24   ;;  %s3841_s24 = sphi %s3902_s24, %s6723_s24   ;;  %s3837_s23 = sphi %s3900_s23, %s6722_s23   ;;  %s3833_s22 = sphi %s3898_s22, %s6721_s22   ;;  %s3829_s21 = sphi %s3896_s21, %s6720_s21  }
   0xe   : > { %p47_p0 = scmp.ne.s32.totalorder %s3833_s22, %s3829_s21  ;;  %p6257_p1 = scmp.eq.s32.totalorder %s3917_s25, 0 }
   0xf   : > { %p187_p3 = scmp.eq.s32.totalorder %s2767_s26, 1  ;;  %p2768_p5 = scmp.ge.s32.totalorder %s3841_s24, 1 }
  0x10   : > { %p3926_p4 = por %p6257_p1, %p47_p0  ;;  %p194_p7 = scmp.lt.s32.totalorder %s3841_s24, 3 }
  0x11   : > { %p3931_p6 = por %p187_p3, %p47_p0  ;;  %s3843_s30 = smov [#allocation5]  }
  0x12   : > { %s6376_s27 = scalar_select %p3926_p4, 1, 0 }
  0x13   : > { %s6377_s28 = scalar_select %p3931_p6, 1, 0 }
  0x14   : > { %p3936_p8 = pnand %p2768_p5, %p194_p7  ;;  %s207_s7 = sshll.u32 %s3843_s30, 4  ;;  %s208_s7 = int_to_ptr.vmem [resolvable:$true] %s207_s7 }
  0x15   : > { %s3844_s8 = smov [#allocation8]   ;;  %s3845_s11 = smov [#allocation7]  }
  0x16   : > { %s6378_s29 = scalar_select %p3936_p8, 1, 0 }
  0x17   : > { %p3170_p10 = pneg %p3936_p8  ;;  %s228_s9 = sshll.u32 %s3844_s8, 4  ;;  %s3949_s9 = int_to_ptr.vmem [resolvable:$true] %s228_s9 }
  0x18   : > { %s3951_s12 = sshll.u32 %s3845_s11, 4  ;;  %s6380_s1 = sld [smem:[#allocation57_spill]]  ;;  %s219_s12 = int_to_ptr.vmem [resolvable:$true] %s3951_s12 }
  0x19   : > { %p3945_p11 = pnand %p3170_p10, %p6257_p1 }
  0x1b   : > { %p3961_p13 = pneg %p3945_p11 }
  0x1e   : > { %s3591_s15 = scalar_lea.hbm %s6380_s1, 16 }
  0x1f   : > { %p3592_p12 = scmp.ne.s32.totalorder %s6380_s1, %s3591_s15  ;;  %p3598_p5 = scmp.lt.u32.totalorder %s3591_s15, %s6380_s1 }
  0x21   : > { %p3594_p0 = pnand %p3961_p13, %p3592_p12 }
  0x23   : > { %p3595_p3 = pneg %p3594_p0 }
  0x25   : > { %p3600_p7 = pnand %p3598_p5, %p3595_p3 }
  0x27   : > { %3603 = shalt.err (!%p3600_p7)
}
  0x28   : > { %s3604_s26 = scalar_lea.vmem %s208_s7, 16  ;;  %s3611_s30 = scalar_lea.vmem %s208_s7, 32 }
  0x29   : > { %p3605_p10 = scmp.ne.s32.totalorder %s208_s7, %s3604_s26  ;;  %p3612_p2 = scmp.lt.s32.totalorder %s208_s7, %s208_s7 }
  0x2a   : > { %p3613_p6 = scmp.lt.s32.totalorder %s3611_s30, %s3604_s26 }
  0x2b   : > { %p3607_p9 = pnand %p3605_p10, %p3961_p13 }
  0x2c   : > { %p3614_p4 = por %p3613_p6, %p3612_p2 }
  0x2d   : > { %p3608_p1 = pneg %p3607_p9 }
  0x2f   : > { %p3615_p8 = pnand %p3614_p4, %p3608_p1 }
  0x31   : > { %3618 = shalt.err (!%p3615_p8)
}
  0x32   : > { %3173 = dma.hbm_to_vmem [thread:$0]  (!%p3945_p11), %s6380_s1, 16, %s208_s7, [#allocation6]  }
  0x33   : > { %s3619_s15 = scalar_lea.hbm %s6253_s3, 2304 }
  0x34   : > { %p3620_p9 = scmp.ne.s32.totalorder %s6253_s3, %s3619_s15  ;;  %p3626_p1 = scmp.lt.u32.totalorder %s3619_s15, %s6253_s3 }
  0x36   : > { %p3622_p12 = pnand %p3620_p9, %p3961_p13 }
  0x38   : > { %p3623_p2 = pneg %p3622_p12 }
  0x3a   : > { %p3628_p4 = pnand %p3626_p1, %p3623_p2 }
  0x3c   : > { %3631 = shalt.err (!%p3628_p4)
}
  0x3d   : > { %s3632_s7 = scalar_lea.vmem %s3949_s9, 2304  ;;  %p3640_p3 = scmp.lt.s32.totalorder %s3949_s9, %s3949_s9 }
  0x3e   : > { %p3633_p6 = scmp.ne.s32.totalorder %s3949_s9, %s3632_s7  ;;  %p3641_p5 = scmp.lt.s32.totalorder %s3632_s7, %s3632_s7 }
  0x40   : > { %p3635_p8 = pnand %p3633_p6, %p3961_p13  ;;  %p3642_p7 = por %p3641_p5, %p3640_p3 }
  0x42   : > { %p3636_p0 = pneg %p3635_p8 }
  0x44   : > { %p3643_p10 = pnand %p3642_p7, %p3636_p0 }
  0x46   : > { %3646 = shalt.err (!%p3643_p10)
}
  0x47   : > { %s6261_s26 = smov 64   ;;  %s6263_s30 = smov 4  }
  0x48   : > { %3179 = dma.hbm_to_vmem [thread:$0]  (!%p3945_p11), %s6253_s3, 2304, %s3949_s9, [#allocation9], %s6261_s26, %s6261_s26, %s6263_s30  }
  0x49   : > { %s6382_s2 = sld [smem:[#allocation58_spill]] }
  0x4f   : > { %s3647_s15 = scalar_lea.hbm %s6382_s2, 16 }
  0x50   : > { %p3648_p9 = scmp.ne.s32.totalorder %s6382_s2, %s3647_s15  ;;  %p3654_p1 = scmp.lt.u32.totalorder %s3647_s15, %s6382_s2 }
  0x52   : > { %p3650_p12 = pnand %p3648_p9, %p3961_p13 }
  0x54   : > { %p3651_p2 = pneg %p3650_p12 }
  0x56   : > { %p3656_p4 = pnand %p3654_p1, %p3651_p2 }
  0x58   : > { %3659 = shalt.err (!%p3656_p4)
}
  0x59   : > { %s3660_s7 = scalar_lea.vmem %s219_s12, 16  ;;  %s3667_s9 = scalar_lea.vmem %s219_s12, 32 }
  0x5a   : > { %p3661_p6 = scmp.ne.s32.totalorder %s219_s12, %s3660_s7  ;;  %p3668_p3 = scmp.lt.s32.totalorder %s219_s12, %s219_s12 }
  0x5b   : > { %p3669_p5 = scmp.lt.s32.totalorder %s3667_s9, %s3660_s7 }
  0x5c   : > { %p3663_p8 = pnand %p3661_p6, %p3961_p13 }
  0x5d   : > { %p3670_p7 = por %p3669_p5, %p3668_p3 }
  0x5e   : > { %p3664_p0 = pneg %p3663_p8 }
  0x60   : > { %p3671_p10 = pnand %p3670_p7, %p3664_p0 }
  0x62   : > { %3674 = shalt.err (!%p3671_p10)
}
  0x63   : > { %3176 = dma.hbm_to_vmem [thread:$0]  (!%p3945_p11), %s6382_s2, 16, %s219_s12, [#allocation6]  }
  0x64   : > { %s3848_s13 = smov [#allocation10]   ;;  %s3675_s17 = scalar_lea.hbm %s6254_s4, 16 }
  0x65   : > { %s242_s14 = sshll.u32 %s3848_s13, 4  ;;  %p3676_p9 = scmp.ne.s32.totalorder %s6254_s4, %s3675_s17  ;;  %s243_s14 = int_to_ptr.vmem [resolvable:$true] %s242_s14 }
  0x66   : > { %p3682_p1 = scmp.lt.u32.totalorder %s3675_s17, %s6254_s4 }
  0x67   : > { %p3678_p12 = pnand %p3676_p9, %p3961_p13 }
  0x69   : > { %p3679_p2 = pneg %p3678_p12 }
  0x6b   : > { %p3684_p4 = pnand %p3682_p1, %p3679_p2 }
  0x6d   : > { %3687 = shalt.err (!%p3684_p4)
}
  0x6e   : > { %s3688_s12 = scalar_lea.vmem %s243_s14, 16  ;;  %s3695_s8 = scalar_lea.vmem %s243_s14, 32 }
  0x6f   : > { %p3689_p6 = scmp.ne.s32.totalorder %s243_s14, %s3688_s12  ;;  %p3696_p3 = scmp.lt.s32.totalorder %s243_s14, %s243_s14 }
  0x70   : > { %p3697_p5 = scmp.lt.s32.totalorder %s3695_s8, %s3688_s12 }
  0x71   : > { %p3691_p8 = pnand %p3689_p6, %p3961_p13 }
  0x72   : > { %p3698_p7 = por %p3697_p5, %p3696_p3 }
  0x73   : > { %p3692_p0 = pneg %p3691_p8 }
  0x75   : > { %p3699_p10 = pnand %p3698_p7, %p3692_p0 }
  0x77   : > { %3702 = shalt.err (!%p3699_p10)
}
  0x78   : > { %3182 = dma.hbm_to_vmem [thread:$0]  (!%p3945_p11), %s6254_s4, 16, %s243_s14, [#allocation9]  }
  0x79   : > { %s4041_s18 = sadd.s32 1, %s3841_s24   ;;  %s34_s10 = sadd.s32 1, %s3837_s23 }
  0x7a   : > { %s31_s15 = ssub.s32 %s3841_s24, %s4041_s18  ;;  %p41_p13 = scmp.ne.s32.totalorder %s3837_s23, %s3833_s22 }
  0x7b   : > { %p32_p9 = scmp.eq.s32.totalorder %s31_s15, 0  ;;  %p42_p12 = scmp.eq.s32.totalorder %s3841_s24, 0 }
  0x7c   : > { %p6383_p2 = scmp.eq.s32.totalorder %s3917_s25, 1  ;;  %p3198_p4 = scmp.lt.s32.totalorder %s3841_s24, 2 }
  0x7d   : > { %s4057_s17 = scalar_select %p32_p9, %s3837_s23, %s34_s10  }
  0x7e   : > { %p4051_p1 = por %p6383_p2, %p41_p13  ;;  %p43_p6 = por %p42_p12, %p41_p13 }
  0x7f   : > { %s4060_s19 = sand.u32 1, %s3837_s23   ;;  %s6260_s20 = smul.u32 1280, %s3841_s24 }
  0x80   : > { %s3142_s14 = smul.u32 80, %s4060_s19  ;;  %p4064_p11 = pnand %p3198_p4, %p43_p6 }
  0x81   : > { %s6386_s0 = sld [smem:[#allocation56_spill]]  ;;  %s254_s10 = scalar_lea.sflag [#allocation3], %s4060_s19 }
  0x82   : > { %s257_s11 = scalar_lea.vmem [#allocation2], %s3142_s14  ;;  %p3705_p0 = pneg %p4064_p11 }
  0x83   : > { %s264_s13 = sshll.u32 %s257_s11, 4  ;;  %s4077_s13 = int_to_ptr.vmem [resolvable:$true] %s264_s13 }
  0x87   : > { %s4073_s8 = scalar_lea.hbm %s6386_s0, %s6260_s20  ;;  %s3708_s20 = scalar_lea.hbm %s6386_s0, 2560 }
  0x88   : > { %s3703_s15 = scalar_lea.hbm %s4073_s8, 1280  ;;  %p3709_p7 = scmp.lt.u32.totalorder %s4073_s8, %s6386_s0 }
  0x89   : > { %p3704_p8 = scmp.ne.s32.totalorder %s4073_s8, %s3703_s15  ;;  %p3710_p10 = scmp.lt.u32.totalorder %s3708_s20, %s3703_s15 }
  0x8a   : > { %p3712_p9 = scmp.lt.u32.totalorder %s3703_s15, %s4073_s8 }
  0x8b   : > { %p3706_p3 = pnand %p3705_p0, %p3704_p8  ;;  %p3711_p13 = por %p3710_p10, %p3709_p7 }
  0x8d   : > { %p3707_p5 = pneg %p3706_p3  ;;  %p3713_p12 = por %p3712_p9, %p3711_p13 }
  0x8f   : > { %p3714_p2 = pnand %p3713_p12, %p3707_p5 }
  0x91   : > { %3717 = shalt.err (!%p3714_p2)
}
  0x92   : > { %s3718_s11 = scalar_lea.vmem %s4077_s13, 1280  ;;  %s3849_s9 = smov [#allocation2]  }
  0x93   : > { %p3719_p4 = scmp.ne.s32.totalorder %s4077_s13, %s3718_s11  ;;  %s3723_s12 = sshll.u32 %s3849_s9, 4  ;;  %s3724_s12 = int_to_ptr.vmem [resolvable:$false] %s3723_s12 }
  0x94   : > { %s3725_s26 = scalar_lea.vmem %s3724_s12, 2560  ;;  %p3726_p3 = scmp.lt.s32.totalorder %s4077_s13, %s3724_s12 }
  0x95   : > { %p3721_p6 = pnand %p3719_p4, %p3705_p0  ;;  %p3727_p7 = scmp.lt.s32.totalorder %s3725_s26, %s3718_s11 }
  0x97   : > { %p3722_p8 = pneg %p3721_p6  ;;  %p3728_p10 = por %p3727_p7, %p3726_p3 }
  0x99   : > { %p3729_p13 = pnand %p3728_p10, %p3722_p8 }
  0x9b   : > { %3732 = shalt.err (!%p3729_p13)
}
  0x9c   : > { %s6387_s30 = smov 4   ;;  %s6388_s20 = smov 64  }
  0x9d   : > { %3186 = dma.hbm_to_vmem [thread:$0]  (!%p4064_p11), %s4073_s8, 1280, %s4077_s13, %s254_s10, %s6388_s20, %s6388_s20, %s6387_s30  }
  0x9e   : > { %s6389_s15 = smul.u32 1280, %s3841_s24  ;;  %s278_s26 = scalar_lea.vmem [#allocation11], %s3142_s14 }
  0x9f   : > { %s285_s0 = sshll.u32 %s278_s26, 4  ;;  %s275_s1 = scalar_lea.sflag [#allocation12], %s4060_s19  ;;  %s4119_s0 = int_to_ptr.vmem [resolvable:$true] %s285_s0 }
  0xa0   : > { %s4115_s12 = scalar_lea.hbm %s6255_s5, %s6389_s15  ;;  %s3738_s10 = scalar_lea.hbm %s6255_s5, 2560 }
  0xa1   : > { %s3733_s2 = scalar_lea.hbm %s4115_s12, 1280  ;;  %p3739_p2 = scmp.lt.u32.totalorder %s4115_s12, %s6255_s5 }
  0xa2   : > { %p3734_p5 = scmp.ne.s32.totalorder %s4115_s12, %s3733_s2  ;;  %p3740_p4 = scmp.lt.u32.totalorder %s3738_s10, %s3733_s2 }
  0xa3   : > { %p3742_p8 = scmp.lt.u32.totalorder %s3733_s2, %s4115_s12 }
  0xa4   : > { %p3736_p9 = pnand %p3734_p5, %p3705_p0  ;;  %p3741_p6 = por %p3740_p4, %p3739_p2 }
  0xa6   : > { %p3737_p12 = pneg %p3736_p9  ;;  %p3743_p3 = por %p3742_p8, %p3741_p6 }
  0xa8   : > { %p3744_p7 = pnand %p3743_p3, %p3737_p12 }
  0xaa   : > { %3747 = shalt.err (!%p3744_p7)
}
  0xab   : > { %s3748_s14 = scalar_lea.vmem %s4119_s0, 1280  ;;  %s3850_s11 = smov [#allocation11]  }
  0xac   : > { %p3749_p10 = scmp.ne.s32.totalorder %s4119_s0, %s3748_s14  ;;  %s3753_s26 = sshll.u32 %s3850_s11, 4  ;;  %s3754_s26 = int_to_ptr.vmem [resolvable:$false] %s3753_s26 }
  0xad   : > { %s3755_s8 = scalar_lea.vmem %s3754_s26, 2560  ;;  %p3756_p9 = scmp.lt.s32.totalorder %s4119_s0, %s3754_s26 }
  0xae   : > { %p3751_p13 = pnand %p3749_p10, %p3705_p0  ;;  %p3757_p2 = scmp.lt.s32.totalorder %s3755_s8, %s3748_s14 }
  0xb0   : > { %p3752_p5 = pneg %p3751_p13  ;;  %p3758_p4 = por %p3757_p2, %p3756_p9 }
  0xb2   : > { %p3759_p6 = pnand %p3758_p4, %p3752_p5 }
  0xb4   : > { %3762 = shalt.err (!%p3759_p6)
}
  0xb5   : > { %3189 = dma.hbm_to_vmem [thread:$0]  (!%p4064_p11), %s4115_s12, 1280, %s4119_s0, %s275_s1, %s6388_s20, %s6388_s20, %s6387_s30  }
  0xb6   : > { %p6390_p0 = scmp.ne.s32.totalorder %s6378_s29, 0 }
  0xb8   : > { %297 = sbr.rel (%p6390_p0) target bundleno = 1298 (0x512), region = 44 }
  0xbf   : > { %s4153_s2 = sand.u32 1, %s3833_s22   ;;  %p6391_p12 = scmp.ne.s32.totalorder %s6376_s27, 0 }
  0xc0   : > { %s4156_s13 = smul.u32 80, %s4153_s2  ;;  %s300_s7 = scalar_lea.sflag [#allocation3], %s4153_s2 }
  0xc2   : > { %s4160_s10 = scalar_lea.vmem [#allocation2], %s4156_s13 }
  0xc3   : > { %3808 = dma.done.wait (%p6391_p12), %s300_s7, 1280  }
  0xc4   : > { %3810 = vsyncadd (%p6391_p12), %s300_s7, 4294966016  ;;  %p6392_p11 = scmp.eq.s32.totalorder %s3917_s25, 0 }
  0xc6   : > { %3812 = dma.done.wait (%p6392_p11), [#allocation6], 32   ;;  %p6393_p8 = pmov %p6392_p11 }
  0xc8   : > { %3814 = vsyncadd (%p6393_p8), [#allocation6], 4294967264  ;;  %p6394_p3 = pmov %p6393_p8 }
  0xca   : > { %3816 = dma.done.wait (%p6394_p3), [#allocation9], 2320   ;;  %p6395_p7 = pmov %p6394_p3 }
  0xcb   : > { %s325_s0 = scalar_lea.sflag [#allocation12], %s4153_s2  ;;  %s4176_s1 = scalar_lea.vmem [#allocation11], %s4156_s13 }
  0xcc   : > { %3818 = vsyncadd (%p6395_p7), [#allocation9], 4294964976 }
  0xcd   : > { %3820 = dma.done.wait (%p6391_p12), %s325_s0, 1280  }
  0xce   : > { %3822 = vsyncadd (%p6391_p12), %s325_s0, 4294966016  ;;  %v403_v0 = vlaneseq  ;;  %v3851_v1 = vmov 0.0|0.0   ;;  %vm3852_vm0 = vmmov 0   ;;  %v6281_v4 = vmov 0.0   ;;  %v4201_v17 = vld [vmem:[%s4160_s10] sm:$0xff]   ;;  %v4204_v18 = vld [vmem:[%s4160_s10 + $0x8] sm:$0xff]  }
  0xcf   : > { %3114 = vmatprep.subr.bf16.mxu0 %v3851_v1  ;;  %3120 = vmatprep.subr.bf16.mxu1 %v3851_v1  ;;  %v3854_v14 = vmov 1.0|1.0   ;;  %v6287_v21 = vunpack.c.l.bf16 %v4201_v17  ;;  %v6286_v22 = vunpack.c.h.bf16 %v4201_v17  ;;  %v6285_v23 = vunpack.c.l.bf16 %v4204_v18  ;;  %v4212_v24 = vld [vmem:[%s4160_s10 + $0x10] sm:$0xff]   ;;  %v4216_v26 = vld [vmem:[%s4160_s10 + $0x18] sm:$0xff]   ;;  %v4237_v37 = vld [vmem:[%s4160_s10 + $0x20] sm:$0xff]   ;;  %s3855_s27 = smov 64  }
  0xd0   : > { %v4182_v2 = vshrl.u32 %v403_v0, 7  ;;  %v706_v3 = vand.u32 127, %v403_v0  ;;  %3080 = vmatprep.mubr.msk.f32.mxu0 %vm3852_vm0, %v6281_v4  ;;  %3091 = vmatprep.mubr.msk.f32.mxu1 %vm3852_vm0, %v6281_v4  ;;  %vm6265_vm4 = vcmask 261120   ;;  %v6284_v25 = vunpack.c.h.bf16 %v4204_v18  ;;  %6396 = vst [vmem:[#allocation19_spill] sm:$0xff] %v4216_v26  ;;  %6397 = vst [vmem:[#allocation20_spill] sm:$0xff] %v4237_v37  ;;  %v4248_v44 = vld [vmem:[%s4160_s10 + $0x28] sm:$0xff]  }
  0xd1   : > { %v6283_v27 = vunpack.c.l.bf16 %v4212_v24  ;;  %v726_v28 = vsel %vm6265_vm4, %v6287_v21, 0.0  ;;  %v727_v29 = vsel %vm6265_vm4, %v6286_v22, 0.0  ;;  %v729_v30 = vsel %vm6265_vm4, %v6285_v23, 0.0  ;;  %6398 = vst [vmem:[#allocation21_spill] sm:$0xff] %v4248_v44  ;;  %v4259_v51 = vld [vmem:[%s4160_s10 + $0x30] sm:$0xff]   ;;  %v4270_v58 = vld [vmem:[%s4160_s10 + $0x38] sm:$0xff]  }
  0xd2   : > { %v405_v5 = vadd.s32 8, %v4182_v2  ;;  %v4188_v6 = vcvt.s32.f32 %v4182_v2  ;;  %v707_v7 = vcvt.s32.f32 %v706_v3  ;;  %v406_v12 = vadd.s32 16, %v4182_v2  ;;  %6399 = vst [vmem:[#allocation22_spill] sm:$0xff] %v4259_v51  ;;  %6400 = vst [vmem:[#allocation23_spill] sm:$0xff] %v4270_v58  ;;  %s3856_s29 = smov 96   ;;  %s3857_s19 = smov 32  }
  0xd3   : > { %v407_v13 = vadd.s32 24, %v4182_v2  ;;  %v728_v31 = vadd.f32 %v727_v29, %v726_v28  ;;  %v6280_v32 = vunpack.c.h.bf16 %v4212_v24  ;;  %v6279_v33 = vunpack.c.l.bf16 %v4216_v26  ;;  %s5885_s30 = scalar_lea.vmem [#allocation13], %s4156_s13  ;;  %s3147_s20 = smul.u32 1280, %s3917_s25 }
  0xd4   : > { %v4190_v8 = vcvt.s32.f32 %v405_v5  ;;  %v708_v9 = vfloor.f32 %v4188_v6  ;;  %v712_v10 = vfloor.f32 %v707_v7  ;;  %v4196_v15 = vcvt.s32.f32 %v406_v12  ;;  %v4292_v12 = vld [vmem:[%s4160_s10 + $0x48] sm:$0xff]   ;;  %s2633_s12 = sshll.u32 %s5885_s30, 4  ;;  %s2620_s14 = scalar_lea.sflag [#allocation4], %s4153_s2  ;;  %s6196_s12 = int_to_ptr.vmem [resolvable:$true] %s2633_s12 }
  0xd5   : > { %v4198_v16 = vcvt.s32.f32 %v407_v13  ;;  %v731_v34 = vsel %vm6265_vm4, %v6284_v25, 0.0  ;;  %v730_v35 = vadd.f32 %v729_v30, %v728_v31  ;;  %v733_v36 = vsel %vm6265_vm4, %v6283_v27, 0.0  ;;  %6402 = vst [vmem:[#allocation25_spill] sm:$0xff] %v4292_v12  ;;  %s6194_s9 = scalar_lea.hbm %s6256_s6, %s3147_s20  ;;  %s3763_s11 = scalar_lea.vmem %s6196_s12, 1280 }
  0xd6   : > { %v709_v11 = vfloor.f32 %v4190_v8  ;;  %vm713_vm1 = vcmp.eq.f32.partialorder %v708_v9, %v712_v10  ;;  %v710_v19 = vfloor.f32 %v4196_v15  ;;  %v6278_v39 = vunpack.c.h.bf16 %v4216_v26  ;;  %p3764_p10 = scmp.ne.s32.totalorder %s6196_s12, %s3763_s11  ;;  %s3859_s26 = smov [#allocation13]  }
  0xd7   : > { %v711_v20 = vfloor.f32 %v4198_v16  ;;  %v732_v38 = vadd.f32 %v731_v34, %v730_v35  ;;  %v735_v40 = vsel %vm6265_vm4, %v6280_v32, 0.0  ;;  %v737_v41 = vsel %vm6265_vm4, %v6279_v33, 0.0  ;;  %s3767_s8 = sshll.u32 %s3859_s26, 4  ;;  %s3768_s8 = int_to_ptr.vmem [resolvable:$false] %s3767_s8 }
  0xd8   : > { %vm714_vm2 = vcmp.eq.f32.partialorder %v709_v11, %v712_v10  ;;  %vm715_vm5 = vcmp.eq.f32.partialorder %v710_v19, %v712_v10  ;;  %v6277_v43 = vunpack.c.l.bf16 %v4237_v37  ;;  %v6276_v46 = vunpack.c.h.bf16 %v4237_v37  ;;  %p3765_p13 = pnand %p3764_p10, %p4051_p1  ;;  %s3769_s13 = scalar_lea.vmem %s3768_s8, 2560 }
  0xd9   : > { %vm3115_vm3 = vmpackc.low %vm714_vm2, %vm713_vm1  ;;  %vm716_vm6 = vcmp.eq.f32.partialorder %v711_v20, %v712_v10  ;;  %v734_v42 = vadd.f32 %v733_v36, %v732_v38  ;;  %v739_v47 = vsel %vm6265_vm4, %v6278_v39, 0.0  ;;  %v6275_v49 = vunpack.c.l.bf16 %v4248_v44  ;;  %p3770_p9 = scmp.lt.s32.totalorder %s6196_s12, %s3768_s8  ;;  %p3771_p2 = scmp.lt.s32.totalorder %s3769_s13, %s3763_s11 }
  0xda   : > { %3116 = vmatpush3.bf16.msk.msra.mxu0 %vm3115_vm3, %v3854_v14  ;;  %3122 = vmatpush3.bf16.msk.msra.mxu1 %vm3115_vm3, %v3854_v14  ;;  %vm3118_vm7 = vmpackc.low %vm716_vm6, %vm715_vm5  ;;  %v741_v50 = vsel %vm6265_vm4, %v6277_v43, 0.0  ;;  %v6274_v53 = vunpack.c.h.bf16 %v4248_v44  ;;  %v743_v54 = vsel %vm6265_vm4, %v6276_v46, 0.0  ;;  %v6273_v56 = vunpack.c.l.bf16 %v4259_v51  ;;  %p3766_p5 = pneg %p3765_p13 }
  0xdb   : > { %3117 = vmatprep.subr.bf16.mxu0 %v3851_v1  ;;  %3123 = vmatprep.subr.bf16.mxu1 %v3851_v1  ;;  %v736_v45 = vadd.f32 %v735_v40, %v734_v42  ;;  %v745_v57 = vsel %vm6265_vm4, %v6275_v49, 0.0  ;;  %v6272_v60 = vunpack.c.h.bf16 %v4259_v51  ;;  %v6271_v63 = vunpack.c.l.bf16 %v4270_v58  ;;  %v4281_v1 = vld [vmem:[%s4160_s10 + $0x40] sm:$0xff]   ;;  %p3772_p4 = por %p3771_p2, %p3770_p9 }
  0xdc   : > { %v747_v61 = vsel %vm6265_vm4, %v6274_v53, 0.0  ;;  %v749_v0 = vsel %vm6265_vm4, %v6273_v56, 0.0  ;;  %6401 = vst [vmem:[#allocation24_spill] sm:$0xff] %v4281_v1  ;;  %v6270_v5 = vunpack.c.h.bf16 %v4270_v58  ;;  %v6269_v10 = vunpack.c.l.bf16 %v4281_v1 }
  0xdd   : > { %v738_v48 = vadd.f32 %v737_v41, %v736_v45  ;;  %v751_v7 = vsel %vm6265_vm4, %v6272_v60, 0.0  ;;  %v753_v11 = vsel %vm6265_vm4, %v6271_v63, 0.0  ;;  %v6267_v28 = vunpack.c.l.bf16 %v4292_v12  ;;  %p3773_p6 = pnand %p3772_p4, %p3766_p5 }
  0xde   : > { %3119 = vmatpush3.bf16.msk.msra.mxu0 %vm3118_vm7, %v3854_v14  ;;  %3125 = vmatpush3.bf16.msk.msra.mxu1 %vm3118_vm7, %v3854_v14  ;;  %v6268_v14 = vunpack.c.h.bf16 %v4281_v1  ;;  %v755_v19 = vsel %vm6265_vm4, %v6270_v5, 0.0  ;;  %v757_v29 = vsel %vm6265_vm4, %v6269_v10, 0.0  ;;  %v6266_v31 = vunpack.c.h.bf16 %v4292_v12 }
  0xdf   : > { %v740_v52 = vadd.f32 %v739_v47, %v738_v48  ;;  %v761_v36 = vsel %vm6265_vm4, %v6267_v28, 0.0 }
  0xe0   : > { %v759_v34 = vsel %vm6265_vm4, %v6268_v14, 0.0  ;;  %v763_v40 = vsel %vm6265_vm4, %v6266_v31, 0.0 }
  0xe1   : > { %v742_v55 = vadd.f32 %v741_v50, %v740_v52 }
  0xe3   : > { %v744_v59 = vadd.f32 %v743_v54, %v742_v55  ;;  %v445_v55 = vmul.f32 0.0625, %v4188_v6 }
  0xe5   : > { %v746_v62 = vadd.f32 %v745_v57, %v744_v59  ;;  %v465_v57 = vfloor.f32 %v445_v55  ;;  %v446_v59 = vmul.f32 0.0625, %v4190_v8  ;;  %v4370_v55 = vadd.s32 128, %v4182_v2 }
  0xe7   : > { %v748_v3 = vadd.f32 %v747_v61, %v746_v62  ;;  %v447_v61 = vmul.f32 0.0625, %v4196_v15  ;;  %v485_v62 = vmul.f32 16.0, %v465_v57  ;;  %vm525_vm8 = vcmp.ge.f32.partialorder %v465_v57, 1.0 }
  0xe8   : > { %vm545_vm9 = vcmp.le.f32.partialorder %v465_v57, 8.0  ;;  %v4373_v57 = vadd.s32 136, %v4182_v2  ;;  %v6294_v31 = vcvt.s32.f32 %v4370_v55 }
  0xe9   : > { %v750_v9 = vadd.f32 %v749_v0, %v748_v3  ;;  %v448_v0 = vmul.f32 0.0625, %v4198_v16  ;;  %v466_v3 = vfloor.f32 %v446_v59  ;;  %vm565_vm10 = vmand %vm525_vm8, %vm545_vm9  ;;  %v4376_v59 = vadd.s32 144, %v4182_v2 }
  0xea   : > { %v6296_v28 = vcvt.s32.f32 %v4373_v57  ;;  %v461_v25 = vmul.f32 0.0625, %v6294_v31 }
  0xeb   : > { %v752_v13 = vadd.f32 %v751_v7, %v750_v9  ;;  %v467_v7 = vfloor.f32 %v447_v61  ;;  %v505_v9 = vsub.f32 %v4188_v6, %v485_v62  ;;  %vm526_vm12 = vcmp.ge.f32.partialorder %v466_v3, 1.0 }
  0xec   : > { %vm546_vm13 = vcmp.le.f32.partialorder %v466_v3, 8.0  ;;  %v4379_v61 = vadd.s32 152, %v4182_v2  ;;  %v6297_v14 = vcvt.s32.f32 %v4376_v59  ;;  %v462_v23 = vmul.f32 0.0625, %v6296_v28 }
  0xed   : > { %v754_v20 = vadd.f32 %v753_v11, %v752_v13  ;;  %v468_v11 = vfloor.f32 %v448_v0  ;;  %v486_v13 = vmul.f32 16.0, %v466_v3  ;;  %vm585_vm11 = vcmp.ge.f32.partialorder %v505_v9, 1.0  ;;  %vm566_vm2 = vmand %vm526_vm12, %vm546_vm13 }
  0xee   : > { %vm605_vm14 = vmand %vm565_vm10, %vm585_vm11  ;;  %vm625_vm15 = vcmp.le.f32.partialorder %v505_v9, 8.0  ;;  %vm527_vm0 = vcmp.ge.f32.partialorder %v467_v7, 1.0  ;;  %vm547_vm1 = vcmp.le.f32.partialorder %v467_v7, 8.0  ;;  %v6299_v10 = vcvt.s32.f32 %v4379_v61 }
  0xef   : > { %v756_v30 = vadd.f32 %v755_v19, %v754_v20  ;;  %v487_v19 = vmul.f32 16.0, %v467_v7  ;;  %v488_v20 = vmul.f32 16.0, %v468_v11  ;;  %vm528_vm3 = vcmp.ge.f32.partialorder %v468_v11, 1.0  ;;  %vm645_vm7 = vmand %vm605_vm14, %vm625_vm15 }
  0xf0   : > { %vm548_vm5 = vcmp.le.f32.partialorder %v468_v11, 8.0  ;;  %vm567_vm8 = vmand %vm527_vm0, %vm547_vm1  ;;  %v4322_v6 = vsel %vm645_vm7, 1.0, %v6281_v4  ;;  %v463_v22 = vmul.f32 0.0625, %v6297_v14  ;;  %v464_v21 = vmul.f32 0.0625, %v6299_v10 }
  0xf1   : > { %v758_v35 = vadd.f32 %v757_v29, %v756_v30  ;;  %v506_v29 = vsub.f32 %v4190_v8, %v486_v13  ;;  %v507_v30 = vsub.f32 %v4196_v15, %v487_v19 }
  0xf3   : > { %v760_v38 = vadd.f32 %v759_v34, %v758_v35  ;;  %v508_v34 = vsub.f32 %v4198_v16, %v488_v20  ;;  %vm586_vm6 = vcmp.ge.f32.partialorder %v506_v29, 1.0  ;;  %vm587_vm9 = vcmp.ge.f32.partialorder %v507_v30, 1.0 }
  0xf4   : > { %vm606_vm11 = vmand %vm566_vm2, %vm586_vm6  ;;  %vm626_vm12 = vcmp.le.f32.partialorder %v506_v29, 8.0  ;;  %vm627_vm14 = vcmp.le.f32.partialorder %v507_v30, 8.0  ;;  %v4334_v35 = vadd.s32 32, %v4182_v2 }
  0xf5   : > { %v762_v41 = vadd.f32 %v761_v36, %v760_v38  ;;  %vm588_vm10 = vcmp.ge.f32.partialorder %v508_v34, 1.0  ;;  %vm607_vm13 = vmand %vm567_vm8, %vm587_vm9  ;;  %vm628_vm0 = vcmp.le.f32.partialorder %v508_v34, 8.0  ;;  %v4337_v36 = vadd.s32 40, %v4182_v2 }
  0xf6   : > { %vm646_vm1 = vmand %vm606_vm11, %vm626_vm12  ;;  %v4340_v38 = vadd.s32 48, %v4182_v2  ;;  %v6303_v62 = vcvt.s32.f32 %v4334_v35  ;;  %v6407_v12 = vcvt.s32.f32 %v4334_v35 }
  0xf7   : > { %v764_v42 = vadd.f32 %v763_v40, %v762_v41  ;;  %v4325_v8 = vsel %vm646_vm1, 1.0, %v6281_v4  ;;  %v4343_v40 = vadd.s32 56, %v4182_v2  ;;  %v4346_v41 = vadd.s32 64, %v4182_v2 }
  0xf8   : > { %v6302_v0 = vcvt.s32.f32 %v4337_v36  ;;  %v6301_v3 = vcvt.s32.f32 %v4340_v38  ;;  %v449_v5 = vmul.f32 0.0625, %v6303_v62  ;;  %v6408_v58 = vcvt.s32.f32 %v4337_v36 }
  0xf9   : > { %v765_v45 = vrot.slane %v764_v42, 4  ;;  %v6300_v7 = vcvt.s32.f32 %v4343_v40  ;;  %v6298_v9 = vcvt.s32.f32 %v4346_v41  ;;  %v6409_v26 = vcvt.s32.f32 %v4340_v38 }
  0xfa   : > { %v450_v63 = vmul.f32 0.0625, %v6302_v0  ;;  %v451_v60 = vmul.f32 0.0625, %v6301_v3 }
  0xfb   : > { %v766_v47 = vadd.f32 %v765_v45, %v764_v42  ;;  %v4349_v42 = vadd.s32 72, %v4182_v2  ;;  %v4352_v45 = vadd.s32 80, %v4182_v2  ;;  %v452_v56 = vmul.f32 0.0625, %v6300_v7 }
  0xfc   : > { %v453_v53 = vmul.f32 0.0625, %v6298_v9 }
  0xfd   : > { %v767_v48 = vrot.slane %v766_v47, 2  ;;  %v6295_v11 = vcvt.s32.f32 %v4349_v42  ;;  %v6292_v13 = vcvt.s32.f32 %v4352_v45  ;;  %v472_v49 = vfloor.f32 %v452_v56 }
  0xff   : > { %v768_v50 = vadd.f32 %v767_v48, %v766_v47  ;;  %v4355_v47 = vadd.s32 88, %v4182_v2  ;;  %v4358_v48 = vadd.s32 96, %v4182_v2  ;;  %v454_v46 = vmul.f32 0.0625, %v6295_v11 }
 0x100   : > { %v455_v43 = vmul.f32 0.0625, %v6292_v13  ;;  %vm552_vm11 = vcmp.le.f32.partialorder %v472_v49, 8.0 }
 0x101   : > { %v769_v52 = vrot.slane %v768_v50, 1  ;;  %v6290_v19 = vcvt.s32.f32 %v4355_v47  ;;  %v6288_v20 = vcvt.s32.f32 %v4358_v48  ;;  %v4432_v13 = vfloor.f32 %v454_v46 }
 0x102   : > { %v4452_v46 = vfloor.f32 %v464_v21 }
 0x103   : > { %v770_v54 = vadd.f32 %v769_v52, %v768_v50  ;;  %v4361_v50 = vadd.s32 104, %v4182_v2  ;;  %v4364_v52 = vadd.s32 112, %v4182_v2  ;;  %v456_v39 = vmul.f32 0.0625, %v6290_v19 }
 0x104   : > { %v457_v33 = vmul.f32 0.0625, %v6288_v20  ;;  %v469_v20 = vfloor.f32 %v449_v5  ;;  %v471_v19 = vfloor.f32 %v451_v60  ;;  %v4446_v5 = vfloor.f32 %v461_v25  ;;  %6406 = vst [vmem:[#allocation29_spill] sm:$0xff] %v4452_v46 }
 0x105   : > { %3081 = vmatmul.mubr.msk.f32.vlgmr.msra.gmra.mrb[0].mxu0 %vm6265_vm4, %v770_v54  ;;  %vm568_vm4 = vmand %vm528_vm3, %vm548_vm5  ;;  %v4367_v54 = vadd.s32 120, %v4182_v2  ;;  %v6289_v29 = vcvt.s32.f32 %v4361_v50  ;;  %v6291_v30 = vcvt.s32.f32 %v4364_v52  ;;  %v4436_v31 = vfloor.f32 %v456_v39 }
 0x106   : > { %vm608_vm15 = vmand %vm568_vm4, %vm588_vm10  ;;  %v4438_v11 = vfloor.f32 %v457_v33  ;;  %v4448_v60 = vfloor.f32 %v462_v23  ;;  %v491_v39 = vmul.f32 16.0, %v471_v19  ;;  %v501_v10 = vmul.f32 16.0, %v4446_v5 }
 0x107   : > { %vm647_vm3 = vmand %vm607_vm13, %vm627_vm14  ;;  %v6293_v34 = vcvt.s32.f32 %v4367_v54  ;;  %v458_v32 = vmul.f32 0.0625, %v6289_v29  ;;  %v470_v29 = vfloor.f32 %v450_v63  ;;  %v492_v63 = vmul.f32 16.0, %v472_v49 }
 0x108   : > { %vm648_vm5 = vmand %vm608_vm15, %vm628_vm0  ;;  %v4328_v15 = vsel %vm647_vm3, 1.0, %v6281_v4  ;;  %v497_v25 = vmul.f32 16.0, %v4438_v11  ;;  %v502_v7 = vmul.f32 16.0, %v4448_v60  ;;  %v504_v0 = vmul.f32 16.0, %v4452_v46 }
 0x109   : > { %6403 = vst [vmem:[#allocation26_spill] sm:$0xff] %v4328_v15  ;;  %v4331_v16 = vsel %vm648_vm5, 1.0, %v6281_v4  ;;  %v459_v4 = vmul.f32 0.0625, %v6291_v30  ;;  %v460_v27 = vmul.f32 0.0625, %v6293_v34  ;;  %v4430_v30 = vfloor.f32 %v453_v53 }
 0x10a   : > { %6404 = vst [vmem:[#allocation27_spill] sm:$0xff] %v4331_v16  ;;  %v4434_v34 = vfloor.f32 %v455_v43  ;;  %v4440_v28 = vfloor.f32 %v458_v32  ;;  %v4450_v53 = vfloor.f32 %v463_v22  ;;  %v489_v43 = vmul.f32 16.0, %v469_v20 }
 0x10b   : > { %v4442_v14 = vfloor.f32 %v459_v4  ;;  %v4444_v9 = vfloor.f32 %v460_v27  ;;  %v490_v56 = vmul.f32 16.0, %v470_v29  ;;  %v493_v33 = vmul.f32 16.0, %v4430_v30 }
 0x10c   : > { %6405 = vst [vmem:[#allocation28_spill] sm:$0xff] %v4450_v53  ;;  %v494_v32 = vmul.f32 16.0, %v4432_v13  ;;  %v495_v4 = vmul.f32 16.0, %v4434_v34  ;;  %v496_v27 = vmul.f32 16.0, %v4436_v31  ;;  %v498_v23 = vmul.f32 16.0, %v4440_v28 }
 0x10d   : > { %v499_v22 = vmul.f32 16.0, %v4442_v14  ;;  %v500_v21 = vmul.f32 16.0, %v4444_v9  ;;  %v503_v3 = vmul.f32 16.0, %v4450_v53  ;;  %v509_v1 = vsub.f32 %v6407_v12, %v489_v43 }
 0x10e   : > { %v4470_v51 = vsub.f32 %v6408_v58, %v490_v56  ;;  %vm529_vm4 = vcmp.ge.f32.partialorder %v469_v20, 1.0  ;;  %vm549_vm2 = vcmp.le.f32.partialorder %v469_v20, 8.0  ;;  %v4474_v16 = vsub.f32 %v6409_v26, %v491_v39 }
 0x10f   : > { %vm530_vm6 = vcmp.ge.f32.partialorder %v470_v29, 1.0  ;;  %vm550_vm7 = vcmp.le.f32.partialorder %v470_v29, 8.0  ;;  %v6410_v46 = vcvt.s32.f32 %v4343_v40  ;;  %v6411_v12 = vcvt.s32.f32 %v4346_v41  ;;  %vm4493_vm12 = vmand %vm529_vm4, %vm549_vm2 }
 0x110   : > { %vm531_vm8 = vcmp.ge.f32.partialorder %v471_v19, 1.0  ;;  %vm551_vm9 = vcmp.le.f32.partialorder %v471_v19, 8.0  ;;  %v6412_v58 = vcvt.s32.f32 %v4349_v42  ;;  %vm532_vm10 = vcmp.ge.f32.partialorder %v472_v49, 1.0  ;;  %vm4508_vm15 = vmand %vm530_vm6, %vm550_vm7 }
 0x111   : > { %v4478_v53 = vsub.f32 %v6410_v46, %v492_v63  ;;  %v4482_v35 = vsub.f32 %v6411_v12, %v493_v33  ;;  %v6416_v40 = vsub.s32 0, %v4182_v2  ;;  %vm533_vm13 = vcmp.ge.f32.partialorder %v4430_v30, 1.0  ;;  %vm4524_vm3 = vmand %vm531_vm8, %vm551_vm9 }
 0x112   : > { %v4486_v36 = vsub.f32 %v6412_v58, %v494_v32  ;;  %vm553_vm14 = vcmp.le.f32.partialorder %v4430_v30, 8.0  ;;  %v6420_v20 = vcvt.s32.f32 %v4358_v48  ;;  %vm534_vm0 = vcmp.ge.f32.partialorder %v4432_v13, 1.0  ;;  %vm4542_vm5 = vmand %vm532_vm10, %vm552_vm11 }
 0x113   : > { %vm554_vm1 = vcmp.le.f32.partialorder %v4432_v13, 8.0  ;;  %v6424_v29 = vcvt.s32.f32 %v4364_v52  ;;  %v6425_v48 = vcvt.s32.f32 %v4367_v54  ;;  %vm589_vm4 = vcmp.ge.f32.partialorder %v509_v1, 1.0  ;;  %vm4560_vm7 = vmand %vm533_vm13, %vm553_vm14  ;;  %v6460_v12 = vld [vmem:[#allocation28_spill] sm:$0xff]  ;;  %v6484_v13 = vld [vmem:[#allocation19_spill] sm:$0xff] }
 0x114   : > { %v4514_v46 = vsub.f32 %v6420_v20, %v497_v25  ;;  %v6429_v19 = vcvt.s32.f32 %v4373_v57  ;;  %v6430_v33 = vcvt.s32.f32 %v4376_v59  ;;  %vm535_vm2 = vcmp.ge.f32.partialorder %v4434_v34, 1.0  ;;  %vm4568_vm8 = vmand %vm534_vm0, %vm554_vm1  ;;  %v6473_v20 = vld [vmem:[#allocation27_spill] sm:$0xff] }
 0x115   : > { %v4530_v56 = vsub.f32 %v6424_v29, %v499_v22  ;;  %v4534_v39 = vsub.f32 %v6425_v48, %v500_v21  ;;  %vm555_vm6 = vcmp.le.f32.partialorder %v4434_v34, 8.0  ;;  %v6434_v57 = vmov 0  ;;  %vm609_vm14 = vmand %vm4493_vm12, %vm589_vm4  ;;  %v6474_v29 = vld [vmem:[#allocation29_spill] sm:$0xff] }
 0x116   : > { %v4548_v52 = vsub.f32 %v6429_v19, %v502_v7  ;;  %v4552_v54 = vsub.f32 %v6430_v33, %v503_v3  ;;  %v6435_v57 = vsel %vm4568_vm8, 4294967295, %v6434_v57  ;;  %v6436_v59 = vunpack.c.l.bf16 %v4201_v17  ;;  %vm4592_vm8 = vmand %vm535_vm2, %vm555_vm6 }
 0x117   : > { %v6437_v7 = vunpack.c.h.bf16 %v4201_v17  ;;  %vm556_vm13 = vcmp.le.f32.partialorder %v4436_v31, 8.0  ;;  %vm629_vm0 = vcmp.le.f32.partialorder %v509_v1, 8.0  ;;  %vm557_vm1 = vcmp.le.f32.partialorder %v4438_v11, 8.0 }
 0x118   : > { %vm6441_vm9 = vcmp.ge.f32.partialorder %v4470_v51, 1.0  ;;  %vm6444_vm11 = vcmp.ge.f32.partialorder %v4436_v31, 1.0  ;;  %vm4621_vm12 = vmand %vm609_vm14, %vm629_vm0  ;;  %vm6450_vm14 = vcmp.ge.f32.partialorder %v4474_v16, 1.0  ;;  %vm631_vm4 = vcmp.le.f32.partialorder %v4474_v16, 8.0 }
 0x119   : > { %vm4609_vm2 = vmand %vm4508_vm15, %vm6441_vm9  ;;  %vm6453_vm15 = vcmp.ge.f32.partialorder %v4438_v11, 1.0  ;;  %v6459_v16 = vunpack.c.l.bf16 %v4212_v24  ;;  %vm6461_vm6 = vcmp.ge.f32.partialorder %v4478_v53, 1.0  ;;  %v6464_v58 = vmov 0.0  }
 0x11a   : > { %vm4616_vm10 = vmand %vm6444_vm11, %vm556_vm13  ;;  %vm593_vm13 = vcmp.ge.f32.partialorder %v4482_v35, 1.0  ;;  %vm6456_vm11 = vcmp.le.f32.partialorder %v4470_v51, 8.0  ;;  %v6485_v19 = vunpack.c.l.bf16 %v6484_v13 }
 0x11b   : > { %vm4642_vm0 = vmand %vm4524_vm3, %vm6450_vm14 }
 0x11c   : > { %vm4652_vm9 = vmand %vm6453_vm15, %vm557_vm1  ;;  %vm6466_vm1 = vcmp.le.f32.partialorder %v4440_v28, 8.0  ;;  %vm6467_vm15 = vcmp.ge.f32.partialorder %v4440_v28, 1.0 }
 0x11d   : > { %vm4661_vm3 = vmand %vm4609_vm2, %vm6456_vm11  ;;  %vm632_vm11 = vcmp.le.f32.partialorder %v4478_v53, 8.0 }
 0x11e   : > { %vm4679_vm2 = vmand %vm4542_vm5, %vm6461_vm6  ;;  %v4727_v48 = vsel %vm4661_vm3, 1.0, %v6464_v58  ;;  %vm6492_vm6 = vcmp.le.f32.partialorder %v4444_v9, 8.0  ;;  %vm6493_vm3 = vcmp.ge.f32.partialorder %v4444_v9, 1.0 }
 0x11f   : > { %vm4693_vm14 = vmand %vm6467_vm15, %vm6466_vm1  ;;  %vm633_vm1 = vcmp.le.f32.partialorder %v4482_v35, 8.0  ;;  %6477 = vst [vmem:[#allocation29_spill] sm:$0xff] %v4727_v48  ;;  %vm6478_vm15 = vcmp.le.f32.partialorder %v4442_v14, 8.0 }
 0x120   : > { %vm4699_vm5 = vmand %vm4642_vm0, %vm631_vm4 }
 0x121   : > { %vm4719_vm0 = vmand %vm4560_vm7, %vm593_vm13 }
 0x122   : > { %vm4742_vm13 = vmand %vm4679_vm2, %vm632_vm11 }
 0x1d8   : > { %v840_v62 = vpop.f32.mrb[0].mxu0 }
 0x1d9   : > { %v844_v44 = vmul.f32 0.015625, %v840_v62  ;;  %v3082_v37 = vpop.f32.mrb[1].mxu0  ;;  %v6417_v62 = vcvt.s32.f32 %v4355_v47 }
 0x1da   : > { %v6413_v37 = vcvt.s32.f32 %v4352_v45 }
 0x1db   : > { %v4499_v41 = vrot.slane %v844_v44, %v6416_v40  ;;  %v4503_v42 = vsub.f32 %v6417_v62, %v496_v27  ;;  %v6421_v44 = vcvt.s32.f32 %v4361_v50  ;;  %v6426_v50 = vcvt.s32.f32 %v4370_v55 }
 0x1dc   : > { %v4490_v26 = vsub.f32 %v6413_v37, %v495_v4  ;;  %v6449_v4 = vunpack.c.h.bf16 %v4204_v18  ;;  %v4687_v37 = vsel %vm4621_vm12, 1.0, %v6464_v58  ;;  %v6472_v62 = vunpack.c.h.bf16 %v4212_v24 }
 0x1dd   : > { %v4518_v43 = vsub.f32 %v6421_v44, %v498_v23  ;;  %v4538_v63 = vsub.f32 %v6426_v50, %v501_v10  ;;  %v6433_v10 = vcvt.s32.f32 %v4379_v61  ;;  %v4576_v3 = vsub.f32 %v6436_v59, %v4499_v41  ;;  %6465 = vst [vmem:[#allocation28_spill] sm:$0xff] %v4687_v37 }
 0x1de   : > { %v4581_v30 = vsub.f32 %v6437_v7, %v4499_v41  ;;  %v6440_v61 = vunpack.c.l.bf16 %v4204_v18  ;;  %v4628_v27 = vsub.f32 %v6449_v4, %v4499_v41  ;;  %v4668_v21 = vsub.f32 %v6459_v16, %v4499_v41  ;;  %v6510_v16 = vld [vmem:[#allocation20_spill] sm:$0xff] }
 0x1df   : > { %v4566_v55 = vsub.f32 %v6433_v10, %v504_v0  ;;  %v869_v25 = vmul.f32 %v4322_v6, %v4576_v3  ;;  %v4706_v45 = vsub.f32 %v6472_v62, %v4499_v41  ;;  %vm6479_vm12 = vcmp.ge.f32.partialorder %v4442_v14, 1.0 }
 0x1e0   : > { %v4600_v0 = vsub.f32 %v6440_v61, %v4499_v41  ;;  %v870_v31 = vmul.f32 %v4325_v8, %v4581_v30  ;;  %v872_v44 = vmul.f32 %v6473_v20, %v4628_v27  ;;  %vm4733_vm4 = vmand %vm6479_vm12, %vm6478_vm15  ;;  %vm595_vm7 = vcmp.ge.f32.partialorder %v4490_v26, 1.0 }
 0x1e1   : > { %v889_v28 = vmul.f32 %v869_v25, %v4576_v3  ;;  %v4749_v33 = vsub.f32 %v6485_v19, %v4499_v41  ;;  %v873_v14 = vmul.f32 %v4687_v37, %v4668_v21  ;;  %vm6486_vm12 = vcmp.ge.f32.partialorder %v4486_v36, 1.0 }
 0x1e2   : > { %v871_v11 = vmul.f32 %v4328_v15, %v4600_v0  ;;  %v890_v47 = vmul.f32 %v870_v31, %v4581_v30  ;;  %vm6487_vm15 = vnez %v6435_v57  ;;  %v4767_v10 = vsel %vm4699_vm5, 1.0, %v6464_v58 }
 0x1e3   : > { %vm4759_vm2 = vmand %vm6487_vm15, %vm6486_vm12  ;;  %6490 = vst [vmem:[#allocation19_spill] sm:$0xff] %v4767_v10  ;;  %v6491_v59 = vunpack.c.h.bf16 %v6484_v13  ;;  %v874_v1 = vmul.f32 %v4727_v48, %v4706_v45  ;;  %v892_v32 = vmul.f32 %v872_v44, %v4628_v27  ;;  %vm6498_vm5 = vcmask 261120  }
 0x1e4   : > { %v891_v49 = vmul.f32 %v871_v11, %v4600_v0  ;;  %vm4778_vm12 = vmand %vm6493_vm3, %vm6492_vm6  ;;  %v909_v4 = vsel %vm6498_vm5, %v889_v28, 0.0  ;;  %v4806_v31 = vsel %vm4742_vm13, 1.0, %v6464_v58  ;;  %v6511_v11 = vunpack.c.l.bf16 %v6510_v16 }
 0x1e5   : > { %v4772_v7 = vsub.f32 %v6491_v59, %v4499_v41  ;;  %vm4784_vm15 = vmand %vm4719_vm0, %vm633_vm1  ;;  %vm635_vm0 = vcmp.le.f32.partialorder %v4490_v26, 8.0  ;;  %6502 = vst [vmem:[#allocation30_spill] sm:$0xff] %v4806_v31  ;;  %vm6503_vm1 = vcmp.le.f32.partialorder %v4446_v5, 8.0  ;;  %v893_v40 = vmul.f32 %v873_v14, %v4668_v21  ;;  %v6535_v59 = vld [vmem:[#allocation21_spill] sm:$0xff] }
 0x1e6   : > { %vm6499_vm11 = vmmov %vm6498_vm5  ;;  %v4827_v51 = vsub.f32 %v6511_v11, %v4499_v41  ;;  %vm6512_vm13 = vcmask 261120   ;;  %v4846_v44 = vsel %vm4784_vm15, 1.0, %v6464_v58  ;;  %v6523_v24 = vunpack.c.h.bf16 %v6510_v16 }
 0x1e7   : > { %v910_v25 = vsel %vm6499_vm11, %v890_v47, 0.0  ;;  %vm4798_vm3 = vmand %vm4592_vm8, %vm595_vm7  ;;  %vm6504_vm11 = vcmp.ge.f32.partialorder %v4446_v5, 1.0  ;;  %vm6507_vm8 = vcmp.le.f32.partialorder %v4486_v36, 8.0  ;;  %v875_v5 = vmul.f32 %v4767_v10, %v4749_v33  ;;  %6516 = vst [vmem:[#allocation20_spill] sm:$0xff] %v4846_v44 }
 0x1e8   : > { %v911_v18 = vadd.f32 %v910_v25, %v909_v4  ;;  %vm4812_vm5 = vmand %vm6504_vm11, %vm6503_vm1  ;;  %v912_v62 = vsel %vm6512_vm13, %v891_v49, 0.0  ;;  %vm6513_vm11 = vcmp.ge.f32.partialorder %v4503_v42, 1.0  ;;  %vm6517_vm13 = vcmp.le.f32.partialorder %v4448_v60, 8.0 }
 0x1e9   : > { %vm4820_vm7 = vmand %vm4759_vm2, %vm6507_vm8  ;;  %vm636_vm8 = vcmp.le.f32.partialorder %v4503_v42, 8.0  ;;  %vm6518_vm1 = vcmp.ge.f32.partialorder %v4448_v60, 1.0  ;;  %v4867_v35 = vsub.f32 %v6523_v24, %v4499_v41  ;;  %v876_v60 = vmul.f32 %v4806_v31, %v4772_v7 }
 0x1ea   : > { %vm4838_vm2 = vmand %vm4616_vm10, %vm6513_vm11  ;;  %v913_v28 = vadd.f32 %v912_v62, %v911_v18  ;;  %v894_v13 = vmul.f32 %v874_v1, %v4706_v45  ;;  %vm6524_vm15 = vcmask 261120   ;;  %vm6525_vm11 = vcmp.ge.f32.partialorder %v4514_v46, 1.0  ;;  %v6554_v62 = vld [vmem:[#allocation22_spill] sm:$0xff] }
 0x1eb   : > { %vm4852_vm6 = vmand %vm6518_vm1, %vm6517_vm13  ;;  %v914_v19 = vsel %vm6524_vm15, %v892_v32, 0.0  ;;  %v4886_v14 = vsel %vm4820_vm7, 1.0, %v6464_v58  ;;  %vm6529_vm13 = vcmp.le.f32.partialorder %v6460_v12, 8.0  ;;  %vm6530_vm15 = vcmp.ge.f32.partialorder %v6460_v12, 1.0 }
 0x1ec   : > { %vm4860_vm10 = vmand %vm4798_vm3, %vm635_vm0  ;;  %vm637_vm0 = vcmp.le.f32.partialorder %v4514_v46, 8.0  ;;  %6528 = vst [vmem:[#allocation31_spill] sm:$0xff] %v4886_v14  ;;  %v915_v49 = vadd.f32 %v914_v19, %v913_v28  ;;  %v6536_v61 = vunpack.c.l.bf16 %v6535_v59  ;;  %v877_v12 = vmul.f32 %v4846_v44, %v4827_v51 }
 0x1ed   : > { %vm4878_vm3 = vmand %vm4652_vm9, %vm6525_vm11  ;;  %v895_v32 = vmul.f32 %v875_v5, %v4749_v33  ;;  %vm6537_vm7 = vcmask 261120   ;;  %v4926_v25 = vsel %vm4860_vm10, 1.0, %v6464_v58  ;;  %v6548_v38 = vunpack.c.h.bf16 %v6535_v59 }
 0x1ee   : > { %vm4892_vm1 = vmand %vm6530_vm15, %vm6529_vm13  ;;  %v4907_v1 = vsub.f32 %v6536_v61, %v4499_v41  ;;  %v916_v4 = vsel %vm6537_vm7, %v893_v40, 0.0  ;;  %vm6538_vm13 = vcmp.ge.f32.partialorder %v4518_v43, 1.0  ;;  %6541 = vst [vmem:[#allocation21_spill] sm:$0xff] %v4926_v25  ;;  %vm6542_vm15 = vcmp.le.f32.partialorder %v6474_v29, 8.0 }
 0x1ef   : > { %vm4900_vm9 = vmand %vm4838_vm2, %vm636_vm8  ;;  %vm638_vm8 = vcmp.le.f32.partialorder %v4518_v43, 8.0  ;;  %v917_v9 = vadd.f32 %v916_v4, %v915_v49  ;;  %vm6543_vm7 = vcmp.ge.f32.partialorder %v6474_v29, 1.0  ;;  %v4947_v17 = vsub.f32 %v6548_v38, %v4499_v41 }
 0x1f0   : > { %vm4918_vm2 = vmand %vm4693_vm14, %vm6538_vm13  ;;  %v878_v29 = vmul.f32 %v4886_v14, %v4867_v35  ;;  %v896_v16 = vmul.f32 %v876_v60, %v4772_v7  ;;  %vm6549_vm10 = vcmask 261120   ;;  %vm601_vm13 = vcmp.ge.f32.partialorder %v4538_v63, 1.0 }
 0x1f1   : > { %vm4932_vm11 = vmand %vm6543_vm7, %vm6542_vm15  ;;  %v918_v11 = vsel %vm6549_vm10, %v894_v13, 0.0  ;;  %vm6550_vm15 = vcmp.ge.f32.partialorder %v4530_v56, 1.0  ;;  %v4962_v46 = vsel %vm4900_vm9, 1.0, %v6464_v58  ;;  %v6555_v36 = vunpack.c.l.bf16 %v6554_v62 }
 0x1f2   : > { %vm4940_vm14 = vmand %vm4878_vm3, %vm637_vm0  ;;  %vm639_vm0 = vcmp.le.f32.partialorder %v4530_v56, 8.0  ;;  %6551 = vst [vmem:[#allocation32_spill] sm:$0xff] %v4962_v46  ;;  %v919_v5 = vadd.f32 %v918_v11, %v917_v9  ;;  %v879_v56 = vmul.f32 %v4926_v25, %v4907_v1  ;;  %v897_v50 = vmul.f32 %v877_v12, %v4827_v51  ;;  %v6566_v12 = vld [vmem:[#allocation23_spill] sm:$0xff] }
 0x1f3   : > { %vm619_vm3 = vmand %vm4733_vm4, %vm6550_vm15  ;;  %v4973_v28 = vsub.f32 %v6555_v36, %v4499_v41  ;;  %vm602_vm9 = vcmp.ge.f32.partialorder %v4548_v52, 1.0  ;;  %v4988_v24 = vsel %vm4940_vm14, 1.0, %v6464_v58  ;;  %v6561_v19 = vunpack.c.h.bf16 %v6554_v62  ;;  %v6575_v62 = vld [vmem:[#allocation24_spill] sm:$0xff] }
 0x1f4   : > { %vm4966_vm7 = vmand %vm4918_vm2, %vm638_vm8  ;;  %vm640_vm8 = vcmp.le.f32.partialorder %v4534_v39, 8.0  ;;  %6558 = vst [vmem:[#allocation22_spill] sm:$0xff] %v4988_v24  ;;  %v880_v57 = vmul.f32 %v4962_v46, %v4947_v17  ;;  %vm603_vm14 = vcmp.ge.f32.partialorder %v4552_v54, 1.0  ;;  %v6576_v36 = vunpack.c.l.bf16 %v6575_v62 }
 0x1f5   : > { %vm6556_vm4 = vmmov %vm6549_vm10  ;;  %vm6557_vm10 = vcmp.ge.f32.partialorder %v4534_v39, 1.0  ;;  %v4997_v26 = vsub.f32 %v6561_v19, %v4499_v41  ;;  %v898_v39 = vmul.f32 %v878_v29, %v4867_v35  ;;  %v5012_v23 = vsel %vm4966_vm7, 1.0, %v6464_v58 }
 0x1f6   : > { %v920_v34 = vsel %vm6556_vm4, %v895_v32, 0.0  ;;  %vm620_vm2 = vmand %vm4778_vm12, %vm6557_vm10  ;;  %6563 = vst [vmem:[#allocation33_spill] sm:$0xff] %v5012_v23  ;;  %v6567_v32 = vunpack.c.l.bf16 %v6566_v12  ;;  %v881_v22 = vmul.f32 %v4988_v24, %v4973_v28  ;;  %vm642_vm10 = vcmp.le.f32.partialorder %v4548_v52, 8.0 }
 0x1f7   : > { %v921_v60 = vadd.f32 %v920_v34, %v919_v5  ;;  %vm4990_vm15 = vmand %vm619_vm3, %vm639_vm0  ;;  %vm641_vm0 = vcmp.le.f32.partialorder %v4538_v63, 8.0  ;;  %v899_v63 = vmul.f32 %v879_v56, %v4907_v1  ;;  %v6572_v29 = vunpack.c.h.bf16 %v6566_v12 }
 0x1f8   : > { %vm6562_vm12 = vmmov %vm6556_vm4  ;;  %v5021_v4 = vsub.f32 %v6567_v32, %v4499_v41  ;;  %v5036_v9 = vsel %vm4990_vm15, 1.0, %v6464_v58  ;;  %v882_v47 = vmul.f32 %v5012_v23, %v4997_v26  ;;  %v900_v52 = vmul.f32 %v880_v57, %v4947_v17 }
 0x1f9   : > { %v922_v49 = vsel %vm6562_vm12, %v896_v16, 0.0  ;;  %vm621_vm3 = vmand %vm4812_vm5, %vm601_vm13  ;;  %vm604_vm13 = vcmp.ge.f32.partialorder %v4566_v55, 1.0  ;;  %6569 = vst [vmem:[#allocation23_spill] sm:$0xff] %v5036_v9  ;;  %v5045_v16 = vsub.f32 %v6572_v29, %v4499_v41  ;;  %v865_v56 = vsub.f32 %v6576_v36, %v4499_v41 }
 0x1fa   : > { %v923_v59 = vadd.f32 %v922_v49, %v921_v60  ;;  %vm5014_vm4 = vmand %vm620_vm2, %vm640_vm8  ;;  %vm643_vm8 = vcmp.le.f32.partialorder %v4552_v54, 8.0  ;;  %v901_v34 = vmul.f32 %v881_v22, %v4973_v28  ;;  %v6579_v13 = vunpack.c.h.bf16 %v6575_v62 }
 0x1fb   : > { %vm6568_vm5 = vmmov %vm6562_vm12  ;;  %v5059_v5 = vsel %vm5014_vm4, 1.0, %v6464_v58 }
 0x1fc   : > { %v924_v42 = vsel %vm6568_vm5, %v897_v50, 0.0  ;;  %vm622_vm7 = vmand %vm4852_vm6, %vm602_vm9  ;;  %6574 = vst [vmem:[#allocation34_spill] sm:$0xff] %v5059_v5  ;;  %v883_v50 = vmul.f32 %v5036_v9, %v5021_v4  ;;  %v866_v19 = vsub.f32 %v6579_v13, %v4499_v41  ;;  %v884_v57 = vmul.f32 %v5059_v5, %v5045_v16 }
 0x1fd   : > { %v925_v43 = vadd.f32 %v924_v42, %v923_v59  ;;  %vm5038_vm2 = vmand %vm621_vm3, %vm641_vm0  ;;  %v6582_v59 = vld [vmem:[#allocation25_spill] sm:$0xff] }
 0x1fe   : > { %vm6573_vm6 = vmmov %vm6568_vm5  ;;  %v5076_v54 = vsel %vm5038_vm2, 1.0, %v6464_v58  ;;  %v6583_v61 = vunpack.c.l.bf16 %v6582_v59  ;;  %v903_v22 = vmul.f32 %v883_v50, %v5021_v4  ;;  %v6585_v38 = vunpack.c.h.bf16 %v6582_v59 }
 0x1ff   : > { %v926_v11 = vsel %vm6573_vm6, %v898_v39, 0.0  ;;  %vm623_vm9 = vmand %vm4892_vm1, %vm603_vm14  ;;  %vm644_vm14 = vcmp.le.f32.partialorder %v4566_v55, 8.0  ;;  %6578 = vst [vmem:[#allocation24_spill] sm:$0xff] %v5076_v54  ;;  %v902_v39 = vmul.f32 %v882_v47, %v4997_v26  ;;  %v885_v32 = vmul.f32 %v5076_v54, %v865_v56 }
 0x200   : > { %v927_v40 = vadd.f32 %v926_v11, %v925_v43  ;;  %vm662_vm15 = vmand %vm622_vm7, %vm642_vm10  ;;  %v5091_v12 = vsub.f32 %v6583_v61, %v4499_v41  ;;  %v5102_v29 = vsub.f32 %v6585_v38, %v4499_v41 }
 0x201   : > { %vm6577_vm12 = vmmov %vm6568_vm5  ;;  %v5086_v55 = vsel %vm662_vm15, 1.0, %v6464_v58  ;;  %v905_v50 = vmul.f32 %v885_v32, %v865_v56  ;;  %vm1364_vm15 = vcmask 1045504  }
 0x202   : > { %v928_v53 = vsel %vm6577_vm12, %v899_v63, 0.0  ;;  %vm624_vm1 = vmand %vm4932_vm11, %vm604_vm13  ;;  %6581 = vst [vmem:[#allocation35_spill] sm:$0xff] %v5086_v55  ;;  %v886_v47 = vmul.f32 %v5086_v55, %v866_v19  ;;  %vm1284_vm12 = vcmask 1046528  }
 0x203   : > { %v929_v60 = vadd.f32 %v928_v53, %v927_v40  ;;  %vm663_vm3 = vmand %vm623_vm9, %vm643_vm8 }
 0x204   : > { %vm6580_vm0 = vmmov %vm6568_vm5  ;;  %v5097_v42 = vsel %vm663_vm3, 1.0, %v6464_v58 }
 0x205   : > { %v930_v18 = vsel %vm6580_vm0, %v900_v52, 0.0  ;;  %vm664_vm11 = vmand %vm624_vm1, %vm644_vm14  ;;  %v904_v52 = vmul.f32 %v884_v57, %v5045_v16  ;;  %v887_v36 = vmul.f32 %v5097_v42, %v5091_v12  ;;  %vm1704_vm1 = vcmask 523264  }
 0x206   : > { %v931_v49 = vadd.f32 %v930_v18, %v929_v60  ;;  %vm6584_vm4 = vmmov %vm6580_vm0  ;;  %v5108_v40 = vsel %vm664_vm11, 1.0, %v6464_v58  ;;  %v906_v60 = vmul.f32 %v886_v47, %v866_v19  ;;  %vm1721_vm14 = vcmask 785408  }
 0x207   : > { %v932_v63 = vsel %vm6584_vm4, %v901_v34, 0.0  ;;  %vm6586_vm5 = vmmov %vm6580_vm0  ;;  %v888_v41 = vmul.f32 %v5108_v40, %v5102_v29 }
 0x208   : > { %v933_v43 = vadd.f32 %v932_v63, %v931_v49  ;;  %v934_v11 = vsel %vm6586_vm5, %v902_v39, 0.0  ;;  %vm6587_vm13 = vmmov %vm6580_vm0  ;;  %v907_v39 = vmul.f32 %v887_v36, %v5091_v12 }
 0x209   : > { %v936_v34 = vsel %vm6587_vm13, %v903_v22, 0.0  ;;  %vm6588_vm7 = vmmov %vm6580_vm0  ;;  %v908_v49 = vmul.f32 %v888_v41, %v5102_v29 }
 0x20a   : > { %v935_v62 = vadd.f32 %v934_v11, %v933_v43  ;;  %v938_v13 = vsel %vm6588_vm7, %v904_v52, 0.0  ;;  %vm6589_vm10 = vmmov %vm6580_vm0 }
 0x20b   : > { %v940_v58 = vsel %vm6589_vm10, %v905_v50, 0.0  ;;  %vm6590_vm2 = vmmov %vm6580_vm0 }
 0x20c   : > { %v937_v53 = vadd.f32 %v936_v34, %v935_v62  ;;  %v942_v59 = vsel %vm6590_vm2, %v906_v60, 0.0  ;;  %vm6591_vm6 = vmmov %vm6580_vm0 }
 0x20d   : > { %v944_v32 = vsel %vm6591_vm6, %v907_v39, 0.0  ;;  %vm6592_vm9 = vmmov %vm6580_vm0  ;;  %v5127_v39 = vld [vmem:[#allocation5] ss:$0 sm:$0xff] }
 0x20e   : > { %v939_v57 = vadd.f32 %v938_v13, %v937_v53  ;;  %v946_v63 = vsel %vm6592_vm9, %v908_v49, 0.0  ;;  %vm6593_vm8 = vmmov %vm6580_vm0  ;;  %v6594_v13 = vsub.s32 0, %v4182_v2 }
 0x20f   : > { %vm6629_vm3 = vmmov %vm6580_vm0 }
 0x210   : > { %v941_v18 = vadd.f32 %v940_v58, %v939_v57  ;;  %vm6630_vm11 = vmmov %vm6580_vm0 }
 0x211   : > { %vm6631_vm4 = vmmov %vm6580_vm0 }
 0x212   : > { %v943_v61 = vadd.f32 %v942_v59, %v941_v18  ;;  %vm6632_vm5 = vmmov %vm6580_vm0 }
 0x213   : > { %vm6633_vm13 = vmmov %vm6580_vm0 }
 0x214   : > { %v945_v22 = vadd.f32 %v944_v32, %v943_v61  ;;  %v5135_v61 = vld [vmem:[#allocation7] ss:$0 sm:$0xff]  ;;  %vm6634_vm7 = vmmov %vm6580_vm0 }
 0x215   : > { %vm6635_vm10 = vmmov %vm6580_vm0 }
 0x216   : > { %v947_v43 = vadd.f32 %v946_v63, %v945_v22  ;;  %vm6636_vm2 = vmmov %vm6580_vm0 }
 0x217   : > { %vm6637_vm6 = vmmov %vm6580_vm0 }
 0x218   : > { %v948_v38 = vrot.slane %v947_v43, 4  ;;  %vm6638_vm9 = vmmov %vm6580_vm0 }
 0x21a   : > { %v949_v47 = vadd.f32 %v948_v38, %v947_v43 }
 0x21c   : > { %v950_v52 = vrot.slane %v949_v47, 2 }
 0x21e   : > { %v951_v11 = vadd.f32 %v950_v52, %v949_v47 }
 0x220   : > { %v952_v62 = vrot.slane %v951_v11, 1 }
 0x222   : > { %v953_v36 = vadd.f32 %v952_v62, %v951_v11 }
 0x224   : > { %3092 = vmatmul.mubr.msk.f32.vlgmr.msra.gmra.mrb[0].mxu1 %vm6593_vm8, %v953_v36  ;;  %vm6639_vm8 = vmmov %vm6580_vm0 }
 0x2f7   : > { %v1023_v50 = vpop.f32.mrb[0].mxu1 }
 0x2f8   : > { %v1027_v34 = vmul.f32 0.015625, %v1023_v50  ;;  %v3093_v53 = vpop.f32.mrb[1].mxu1 }
 0x2fa   : > { %v1028_v41 = vadd.f32 1e-06, %v1027_v34 }
 0x2fc   : > { %3509 = vrsqrt.f32 %v1028_v41 }
 0x306   : > { %v3510_v60 = vpop.eup %3509 }
 0x307   : > { %v5125_v57 = vrot.slane %v3510_v60, %v6594_v13 }
 0x309   : > { %v1050_v58 = vmul.f32 %v5125_v57, %v865_v56  ;;  %v1051_v18 = vmul.f32 %v5125_v57, %v866_v19  ;;  %v1038_v49 = vmul.f32 %v5125_v57, %v4668_v21  ;;  %v1039_v59 = vmul.f32 %v5125_v57, %v4706_v45 }
 0x30a   : > { %v1040_v32 = vmul.f32 %v5125_v57, %v4749_v33  ;;  %v1041_v2 = vmul.f32 %v5125_v57, %v4772_v7  ;;  %v1036_v22 = vmul.f32 %v5125_v57, %v4600_v0  ;;  %v1037_v56 = vmul.f32 %v5125_v57, %v4628_v27 }
 0x30b   : > { %v1077_v19 = vmul.f32 %v5127_v39, %v1050_v58  ;;  %v1078_v21 = vmul.f32 %v5127_v39, %v1051_v18  ;;  %v1065_v45 = vmul.f32 %v5127_v39, %v1038_v49  ;;  %v1066_v63 = vmul.f32 %v5127_v39, %v1039_v59 }
 0x30c   : > { %v1067_v43 = vmul.f32 %v5127_v39, %v1040_v32  ;;  %v1068_v33 = vmul.f32 %v5127_v39, %v1041_v2  ;;  %v1063_v7 = vmul.f32 %v5127_v39, %v1036_v22  ;;  %v1064_v38 = vmul.f32 %v5127_v39, %v1037_v56 }
 0x30d   : > { %v5154_v0 = vadd.f32 %v5135_v61, %v1077_v19  ;;  %v5157_v27 = vadd.f32 %v5135_v61, %v1078_v21  ;;  %v5160_v47 = vadd.f32 %v5135_v61, %v1065_v45  ;;  %v5163_v52 = vadd.f32 %v5135_v61, %v1066_v63 }
 0x30e   : > { %v5166_v11 = vadd.f32 %v5135_v61, %v1067_v43  ;;  %v5169_v62 = vadd.f32 %v5135_v61, %v1068_v33  ;;  %v5172_v36 = vadd.f32 %v5135_v61, %v1063_v7  ;;  %v5175_v50 = vadd.f32 %v5135_v61, %v1064_v38 }
 0x30f   : > { %v2833_v34 = vmul.f32 -1.442695, %v5154_v0  ;;  %v2834_v53 = vmul.f32 -1.442695, %v5157_v27  ;;  %v2821_v41 = vmul.f32 -1.442695, %v5160_v47  ;;  %v1052_v60 = vmul.f32 %v5125_v57, %v5091_v12 }
 0x310   : > { %v2822_v13 = vmul.f32 -1.442695, %v5163_v52  ;;  %v2823_v58 = vmul.f32 -1.442695, %v5166_v11  ;;  %v1053_v18 = vmul.f32 %v5125_v57, %v5102_v29  ;;  %v2824_v49 = vmul.f32 -1.442695, %v5169_v62 }
 0x311   : > { %3511 = vpow2.f32 %v2833_v34  ;;  %v2819_v59 = vmul.f32 -1.442695, %v5172_v36  ;;  %v1079_v32 = vmul.f32 %v5127_v39, %v1052_v60  ;;  %v1048_v12 = vmul.f32 %v5125_v57, %v5021_v4 }
 0x312   : > { %3513 = vpow2.f32 %v2834_v53  ;;  %v1080_v2 = vmul.f32 %v5127_v39, %v1053_v18  ;;  %v1049_v22 = vmul.f32 %v5125_v57, %v5045_v16  ;;  %v2820_v56 = vmul.f32 -1.442695, %v5175_v50 }
 0x313   : > { %3515 = vpow2.f32 %v2821_v41  ;;  %v5196_v29 = vadd.f32 %v5135_v61, %v1079_v32  ;;  %v1042_v19 = vmul.f32 %v5125_v57, %v4827_v51  ;;  %v1075_v45 = vmul.f32 %v5127_v39, %v1048_v12 }
 0x314   : > { %3517 = vpow2.f32 %v2822_v13  ;;  %v5201_v21 = vadd.f32 %v5135_v61, %v1080_v2  ;;  %v1076_v4 = vmul.f32 %v5127_v39, %v1049_v22  ;;  %v1043_v41 = vmul.f32 %v5125_v57, %v4867_v35 }
 0x315   : > { %3519 = vpow2.f32 %v2823_v58  ;;  %v2835_v16 = vmul.f32 -1.442695, %v5196_v29  ;;  %v1069_v63 = vmul.f32 %v5127_v39, %v1042_v19  ;;  %v5209_v33 = vadd.f32 %v5135_v61, %v1075_v45 }
 0x316   : > { %3521 = vpow2.f32 %v2824_v49  ;;  %v2836_v43 = vmul.f32 -1.442695, %v5201_v21  ;;  %v5212_v51 = vadd.f32 %v5135_v61, %v1076_v4  ;;  %v1044_v18 = vmul.f32 %v5125_v57, %v4907_v1 }
 0x317   : > { %3523 = vpow2.f32 %v2819_v59  ;;  %v5215_v7 = vadd.f32 %v5135_v61, %v1069_v63  ;;  %v2831_v38 = vmul.f32 -1.442695, %v5209_v33  ;;  %v1045_v32 = vmul.f32 %v5125_v57, %v4947_v17 }
 0x318   : > { %3525 = vpow2.f32 %v2820_v56  ;;  %v2832_v34 = vmul.f32 -1.442695, %v5212_v51  ;;  %v1070_v22 = vmul.f32 %v5127_v39, %v1043_v41  ;;  %v1046_v35 = vmul.f32 %v5125_v57, %v4973_v28 }
 0x319   : > { %3527 = vpow2.f32 %v2835_v16  ;;  %v2825_v53 = vmul.f32 -1.442695, %v5215_v7  ;;  %v1047_v1 = vmul.f32 %v5125_v57, %v4997_v26  ;;  %v1071_v16 = vmul.f32 %v5127_v39, %v1044_v18 }
 0x31a   : > { %3529 = vpow2.f32 %v2836_v43  ;;  %v1072_v43 = vmul.f32 %v5127_v39, %v1045_v32  ;;  %v5234_v28 = vadd.f32 %v5135_v61, %v1070_v22 }
 0x31b   : > { %v3512_v60 = vpop.eup %3511  ;;  %3531 = vpow2.f32 %v2831_v38 }
 0x31c   : > { %v3514_v13 = vpop.eup %3513  ;;  %v1184_v58 = vadd.f32 1.0, %v3512_v60  ;;  %3533 = vpow2.f32 %v2832_v34  ;;  %v1074_v60 = vmul.f32 %v5127_v39, %v1047_v1 }
 0x31d   : > { %v3516_v49 = vpop.eup %3515  ;;  %v1185_v59 = vadd.f32 1.0, %v3514_v13  ;;  %3535 = vpow2.f32 %v2825_v53  ;;  %v1073_v53 = vmul.f32 %v5127_v39, %v1046_v35  ;;  %v1034_v13 = vmul.f32 %v5125_v57, %v4576_v3 }
 0x31e   : > { %v3518_v2 = vpop.eup %3517  ;;  %3537 = vrcp.f32 %v1184_v58  ;;  %v1172_v12 = vadd.f32 1.0, %v3516_v49  ;;  %v5241_v49 = vadd.f32 %v5135_v61, %v1071_v16  ;;  %v2826_v3 = vmul.f32 -1.442695, %v5234_v28 }
 0x31f   : > { %v3520_v56 = vpop.eup %3519  ;;  %3539 = vrcp.f32 %v1185_v59  ;;  %v1173_v19 = vadd.f32 1.0, %v3518_v2  ;;  %v5244_v2 = vadd.f32 %v5135_v61, %v1072_v43 }
 0x320   : > { %v3522_v45 = vpop.eup %3521  ;;  %3541 = vrcp.f32 %v1172_v12  ;;  %v1174_v4 = vadd.f32 1.0, %v3520_v56  ;;  %v1035_v12 = vmul.f32 %v5125_v57, %v4581_v30  ;;  %v5250_v56 = vadd.f32 %v5135_v61, %v1073_v53 }
 0x321   : > { %v3524_v17 = vpop.eup %3523  ;;  %3543 = vrcp.f32 %v1173_v19  ;;  %v1175_v63 = vadd.f32 1.0, %v3522_v45  ;;  %v5253_v45 = vadd.f32 %v5135_v61, %v1074_v60  ;;  %v2827_v30 = vmul.f32 -1.442695, %v5241_v49 }
 0x322   : > { %v3526_v38 = vpop.eup %3525  ;;  %3545 = vrcp.f32 %v1174_v4  ;;  %v1170_v34 = vadd.f32 1.0, %v3524_v17  ;;  %v1061_v4 = vmul.f32 %v5127_v39, %v1034_v13  ;;  %v1062_v43 = vmul.f32 %v5127_v39, %v1035_v12 }
 0x323   : > { %v3528_v41 = vpop.eup %3527  ;;  %3547 = vrcp.f32 %v1175_v63  ;;  %v1171_v26 = vadd.f32 1.0, %v3526_v38  ;;  %v2828_v63 = vmul.f32 -1.442695, %v5244_v2  ;;  %v2829_v53 = vmul.f32 -1.442695, %v5250_v56 }
 0x324   : > { %v3530_v58 = vpop.eup %3529  ;;  %3549 = vrcp.f32 %v1170_v34  ;;  %v1186_v18 = vadd.f32 1.0, %v3528_v41  ;;  %v2830_v13 = vmul.f32 -1.442695, %v5253_v45 }
 0x325   : > { %v3532_v59 = vpop.eup %3531  ;;  %3551 = vrcp.f32 %v1171_v26  ;;  %v1187_v32 = vadd.f32 1.0, %v3530_v58 }
 0x326   : > { %v3534_v22 = vpop.eup %3533  ;;  %3553 = vrcp.f32 %v1186_v18  ;;  %v1182_v35 = vadd.f32 1.0, %v3532_v59 }
 0x327   : > { %v3536_v19 = vpop.eup %3535  ;;  %3555 = vrcp.f32 %v1187_v32  ;;  %v1183_v1 = vadd.f32 1.0, %v3534_v22  ;;  %v3491_v22 = vld [vmem:[#allocation8 + $0x40] sm:$0xff]  }
 0x328   : > { %v3538_v16 = vpop.eup %3537  ;;  %3557 = vrcp.f32 %v1182_v35  ;;  %v1176_v18 = vadd.f32 1.0, %v3536_v19  ;;  %v3492_v35 = vld [vmem:[#allocation8] sm:$0xff]   ;;  %2998 = vmatprep.subr.bf16.mxu0 %v3491_v22  ;;  %3126 = vmatprep.subr.bf16.mxu1 %v3491_v22 }
 0x329   : > { %v3540_v57 = vpop.eup %3539  ;;  %v1244_v17 = vmul.f32 %v3538_v16, %v5154_v0  ;;  %3559 = vrcp.f32 %v1183_v1  ;;  %v5268_v0 = vadd.f32 %v5135_v61, %v1061_v4  ;;  %2999 = vmatpush3.bf16.msra.mxu0 %v3492_v35  ;;  %3134 = vmatpush3.bf16.msra.mxu1 %v3492_v35 }
 0x32a   : > { %v3542_v38 = vpop.eup %3541  ;;  %v1245_v34 = vmul.f32 %v3540_v57, %v5157_v27  ;;  %3561 = vpow2.f32 %v2826_v3 }
 0x32b   : > { %v3544_v41 = vpop.eup %3543  ;;  %v5263_v26 = vmul.f32 %v5076_v54, %v1244_v17  ;;  %v1232_v60 = vmul.f32 %v3542_v38, %v5160_v47  ;;  %3563 = vpow2.f32 %v2827_v30  ;;  %v5279_v47 = vadd.f32 %v5135_v61, %v1062_v43 }
 0x32c   : > { %v3546_v58 = vpop.eup %3545  ;;  %v5271_v39 = vmul.f32 %v5086_v55, %v1245_v34  ;;  %v1233_v27 = vmul.f32 %v3544_v41, %v5163_v52  ;;  %3565 = vpow2.f32 %v2828_v63  ;;  %v2817_v61 = vmul.f32 -1.442695, %v5268_v0 }
 0x32d   : > { %v3548_v59 = vpop.eup %3547  ;;  %v5275_v32 = vmul.f32 %v4687_v37, %v1232_v60  ;;  %v1234_v12 = vmul.f32 %v3546_v58, %v5166_v11  ;;  %3567 = vpow2.f32 %v2829_v53  ;;  %v2818_v38 = vmul.f32 -1.442695, %v5279_v47 }
 0x32e   : > { %v3550_v3 = vpop.eup %3549  ;;  %v5283_v1 = vpack.i.bf16 %v5271_v39, %v5263_v26  ;;  %v5286_v52 = vmul.f32 %v4727_v48, %v1233_v27  ;;  %v1235_v19 = vmul.f32 %v3548_v59, %v5169_v62  ;;  %3569 = vrcp.f32 %v1176_v18 }
 0x32f   : > { %v3552_v4 = vpop.eup %3551  ;;  %v5290_v16 = vmul.f32 %v4767_v10, %v1234_v12  ;;  %v1230_v11 = vmul.f32 %v3550_v3, %v5172_v36  ;;  %3571 = vpow2.f32 %v2830_v13  ;;  %v1292_v55 = vrot.slane %v5275_v32, 1 }
 0x330   : > { %v3554_v30 = vpop.eup %3553  ;;  %3262 = vrot.lane.b32.xlu0 %v5283_v1, %s3855_s27  ;;  %v3251_v57 = vpack.i.bf16 %v5286_v52, %v5275_v32  ;;  %v5299_v62 = vmul.f32 %v4806_v31, %v1235_v19  ;;  %v1231_v17 = vmul.f32 %v3552_v4, %v5175_v50  ;;  %3573 = vpow2.f32 %v2817_v61 }
 0x331   : > { %v3556_v36 = vpop.eup %3555  ;;  %v5303_v63 = vmul.f32 %v4328_v15, %v1230_v11  ;;  %v1246_v43 = vmul.f32 %v3554_v30, %v5196_v29  ;;  %3575 = vpow2.f32 %v2818_v38  ;;  %v1514_v4 = vrot.slane %v5263_v26, 2  ;;  %v3494_v38 = vld [vmem:[#allocation8 + $0x8] sm:$0xff]  }
 0x332   : > { %v3558_v34 = vpop.eup %3557  ;;  %3252 = vrot.lane.b32.xlu1 %v3251_v57, %s3855_s27  ;;  %v5310_v53 = vpack.i.bf16 %v5299_v62, %v5290_v16  ;;  %v5313_v50 = vmul.f32 %v6473_v20, %v1231_v17  ;;  %v1247_v41 = vmul.f32 %v3556_v36, %v5201_v21 }
 0x333   : > { %v3560_v60 = vpop.eup %3559  ;;  %v5317_v29 = vmul.f32 %v5097_v42, %v1246_v43  ;;  %v1242_v13 = vmul.f32 %v3558_v34, %v5209_v33  ;;  %v3493_v43 = vld [vmem:[#allocation8 + $0x48] sm:$0xff]  }
 0x334   : > { %v3562_v58 = vpop.eup %3561  ;;  %3272 = vrot.lane.b32.xlu0 %v5310_v53, %s3855_s27  ;;  %v3256_v27 = vpack.i.bf16 %v5313_v50, %v5303_v63  ;;  %v5325_v18 = vmul.f32 %v5108_v40, %v1247_v41  ;;  %v1243_v59 = vmul.f32 %v3560_v60, %v5212_v51  ;;  %3000 = vmatprep.subr.bf16.mxu0 %v3493_v43 }
 0x335   : > { %v5329_v21 = vmul.f32 %v5036_v9, %v1242_v13  ;;  %v1177_v42 = vadd.f32 1.0, %v3562_v58  ;;  %v3564_v12 = vpop.eup %3563  ;;  %3127 = vmatprep.subr.bf16.mxu1 %v3493_v43  ;;  %3001 = vmatpush3.bf16.msra.mxu0 %v3494_v38  ;;  %v3505_v9 = vld [vmem:[#allocation8 + $0x78] sm:$0xff]  }
 0x336   : > { %3257 = vrot.lane.b32.xlu1 %v3256_v27, %s3856_s29  ;;  %v3281_v33 = vpack.i.bf16 %v5325_v18, %v5317_v29  ;;  %v5335_v22 = vmul.f32 %v5059_v5, %v1243_v59  ;;  %v3566_v35 = vpop.eup %3565  ;;  %v1178_v40 = vadd.f32 1.0, %v3564_v12  ;;  %v3495_v12 = vld [vmem:[#allocation8 + $0x50] sm:$0xff]   ;;  %3135 = vmatpush3.bf16.msra.mxu1 %v3494_v38  ;;  %v5375_v38 = vrot.slane %v5271_v39, 2 }
 0x337   : > { %3577 = vrcp.f32 %v1177_v42  ;;  %v1179_v3 = vadd.f32 1.0, %v3566_v35  ;;  %v3568_v19 = vpop.eup %3567  ;;  %v6324_v30 = vrot.slane %v5329_v21, 2  ;;  %3002 = vmatprep.subr.bf16.mxu0 %v3495_v12  ;;  %3128 = vmatprep.subr.bf16.mxu1 %v3495_v12  ;;  %v3500_v12 = vld [vmem:[#allocation8 + $0x20] sm:$0xff]  }
 0x338   : > { %3282 = vrot.lane.b32.xlu0 %v3281_v33, %s3855_s27  ;;  %v5340_v51 = vpack.i.bf16 %v5335_v22, %v5329_v21  ;;  %3579 = vrcp.f32 %v1178_v40  ;;  %v3570_v11 = vpop.eup %3569  ;;  %v1180_v61 = vadd.f32 1.0, %v3568_v19  ;;  %v5347_v17 = vrot.slane %v5335_v22, 2  ;;  %v3496_v33 = vld [vmem:[#allocation8 + $0x10] sm:$0xff]   ;;  %v3497_v19 = vld [vmem:[#allocation8 + $0x58] sm:$0xff]  }
 0x339   : > { %3581 = vrcp.f32 %v1179_v3  ;;  %v3572_v36 = vpop.eup %3571  ;;  %v1236_v58 = vmul.f32 %v3570_v11, %v5215_v7  ;;  %3003 = vmatpush3.bf16.msra.mxu0 %v3496_v33  ;;  %v3498_v11 = vld [vmem:[#allocation8 + $0x18] sm:$0xff]  }
 0x33a   : > { %3267 = vrot.lane.b32.xlu1 %v5340_v51, %s3856_s29  ;;  %v1181_v34 = vadd.f32 1.0, %v3572_v36  ;;  %3583 = vrcp.f32 %v1180_v61  ;;  %v5353_v41 = vsel %vm1364_vm15, %v6324_v30, %v5347_v17  ;;  %v3574_v60 = vpop.eup %3573  ;;  %v5357_v13 = vsel %vm1364_vm15, %v5347_v17, %v1514_v4  ;;  %3136 = vmatpush3.bf16.msra.mxu1 %v3496_v33 }
 0x33b   : > { %6595 = vst [vmem:[#allocation25_spill] sm:$0xff] %v5353_v41  ;;  %6596 = vst [vmem:[#allocation36_spill] sm:$0xff] %v5357_v13  ;;  %v1168_v27 = vadd.f32 1.0, %v3574_v60  ;;  %v3576_v42 = vpop.eup %3575  ;;  %v5365_v7 = vmul.f32 %v4846_v44, %v1236_v58  ;;  %3004 = vmatprep.subr.bf16.mxu0 %v3497_v19  ;;  %3129 = vmatprep.subr.bf16.mxu1 %v3497_v19  ;;  %v6323_v58 = vrot.slane %v5317_v29, 2 }
 0x33c   : > { %3585 = vrcp.f32 %v1181_v34  ;;  %v1169_v35 = vadd.f32 1.0, %v3576_v42  ;;  %v3499_v42 = vld [vmem:[#allocation8 + $0x60] sm:$0xff]  }
 0x33d   : > { %3587 = vrcp.f32 %v1168_v27  ;;  %6597 = vst [vmem:[#allocation37_spill] sm:$0xff] %v5365_v7  ;;  %3005 = vmatpush3.bf16.msra.mxu0 %v3498_v11  ;;  %v5391_v27 = vsel %vm1364_vm15, %v1514_v4, %v5375_v38  ;;  %v1300_v31 = vrot.slane %v5365_v7, 1 }
 0x33e   : > { %3277 = vrot.lane.b32.xlu1 %v3251_v57, %s3856_s29  ;;  %3589 = vrcp.f32 %v1169_v35  ;;  %6601 = vst [vmem:[#allocation41_spill] sm:$0xff] %v5391_v27  ;;  %3137 = vmatpush3.bf16.msra.mxu1 %v3498_v11  ;;  %v5399_v35 = vsel %vm1364_vm15, %v5375_v38, %v6323_v58  ;;  %v1378_v11 = vrot.slane %v5299_v62, 2  ;;  %v6622_v10 = vpack.i.bf16 %v5375_v38, %v5391_v27 }
 0x33f   : > { %6602 = vst [vmem:[#allocation42_spill] sm:$0xff] %v5399_v35  ;;  %3006 = vmatprep.subr.bf16.mxu0 %v3499_v42  ;;  %3130 = vmatprep.subr.bf16.mxu1 %v3499_v42  ;;  %v3501_v42 = vld [vmem:[#allocation8 + $0x68] sm:$0xff]  }
 0x341   : > { %v3578_v40 = vpop.eup %3577  ;;  %3007 = vmatpush3.bf16.msra.mxu0 %v3500_v12 }
 0x342   : > { %v1237_v3 = vmul.f32 %v3578_v40, %v5234_v28  ;;  %3287 = vrot.lane.b32.xlu1 %v5283_v1, %s3856_s29  ;;  %v3580_v57 = vpop.eup %3579  ;;  %3138 = vmatpush3.bf16.msra.mxu1 %v3500_v12 }
 0x343   : > { %v3582_v61 = vpop.eup %3581  ;;  %v1238_v43 = vmul.f32 %v3580_v57, %v5241_v49  ;;  %3008 = vmatprep.subr.bf16.mxu0 %v3501_v42  ;;  %3131 = vmatprep.subr.bf16.mxu1 %v3501_v42 }
 0x344   : > { %v5370_v36 = vmul.f32 %v4886_v14, %v1237_v3  ;;  %v1239_v28 = vmul.f32 %v3582_v61, %v5244_v2  ;;  %v3584_v1 = vpop.eup %3583  ;;  %v6325_v61 = vrot.slane %v5365_v7, 2 }
 0x345   : > { %v5380_v60 = vmul.f32 %v4926_v25, %v1238_v43  ;;  %v1240_v2 = vmul.f32 %v3584_v1, %v5250_v56  ;;  %v1374_v56 = vrot.slane %v5286_v52, 2 }
 0x346   : > { %6598 = vst [vmem:[#allocation38_spill] sm:$0xff] %v5370_v36  ;;  %v3291_v34 = vpack.i.bf16 %v5370_v36, %v5365_v7  ;;  %3297 = vrot.lane.b32.xlu1 %v5310_v53, %s3856_s29  ;;  %v5386_v49 = vmul.f32 %v4962_v46, %v1239_v28  ;;  %v3586_v33 = vpop.eup %3585  ;;  %v6326_v53 = vrot.slane %v5290_v16, 2  ;;  %v1372_v28 = vrot.slane %v5275_v32, 2 }
 0x347   : > { %6599 = vst [vmem:[#allocation39_spill] sm:$0xff] %v5380_v60  ;;  %v1241_v40 = vmul.f32 %v3586_v33, %v5253_v45  ;;  %v3588_v3 = vpop.eup %3587  ;;  %v5407_v57 = vmul.f32 %v4988_v24, %v1240_v2  ;;  %v1368_v45 = vrot.slane %v5303_v63, 2  ;;  %v1384_v5 = vrot.slane %v5380_v60, 2 }
 0x348   : > { %6600 = vst [vmem:[#allocation40_spill] sm:$0xff] %v5386_v49  ;;  %3292 = vrot.lane.b32.xlu0 %v3291_v34, %s3855_s27  ;;  %v3301_v4 = vpack.i.bf16 %v5386_v49, %v5380_v60  ;;  %v1228_v1 = vmul.f32 %v3588_v3, %v5268_v0  ;;  %v3590_v2 = vpop.eup %3589  ;;  %v5425_v33 = vsel %vm1364_vm15, %v6326_v53, %v1378_v11  ;;  %v3502_v3 = vld [vmem:[#allocation8 + $0x28] sm:$0xff]   ;;  %v1302_v20 = vrot.slane %v5370_v36, 1 }
 0x349   : > { %v5415_v43 = vmul.f32 %v5012_v23, %v1241_v40  ;;  %v5430_v40 = vsel %vm1364_vm15, %v1378_v11, %v6325_v61  ;;  %v1229_v19 = vmul.f32 %v3590_v2, %v5279_v47  ;;  %3009 = vmatpush3.bf16.msra.mxu0 %v3502_v3  ;;  %3139 = vmatpush3.bf16.msra.mxu1 %v3502_v3  ;;  %v1388_v30 = vrot.slane %v5407_v57, 2  ;;  %v3503_v61 = vld [vmem:[#allocation8 + $0x70] sm:$0xff]  }
 0x34a   : > { %3307 = vrot.lane.b32.xlu1 %v3291_v34, %s3856_s29  ;;  %v1370_v34 = vrot.slane %v5313_v50, 2  ;;  %v5434_v0 = vmul.f32 %v4322_v6, %v1228_v1  ;;  %v3504_v6 = vld [vmem:[#allocation8 + $0x30] sm:$0xff]   ;;  %v6603_v54 = vrot.slane %v5407_v57, 1  ;;  %3010 = vmatprep.subr.bf16.mxu0 %v3503_v61 }
 0x34b   : > { %v5438_v59 = vpack.i.bf16 %v5415_v43, %v5407_v57  ;;  %v5444_v11 = vmul.f32 %v4325_v8, %v1229_v19  ;;  %v1310_v19 = vrot.slane %v5415_v43, 1  ;;  %v1382_v8 = vrot.slane %v5370_v36, 2  ;;  %3132 = vmatprep.subr.bf16.mxu1 %v3503_v61 }
 0x34c   : > { %3302 = vrot.lane.b32.xlu0 %v3301_v4, %s3855_s27  ;;  %v1365_v47 = vrot.slane %v5434_v0, 2  ;;  %v1371_v12 = vsel %vm1364_vm15, %v1368_v45, %v1370_v34  ;;  %v1285_v42 = vrot.slane %v5434_v0, 1  ;;  %v6609_v61 = vrot.slane %v5303_v63, 1 }
 0x34d   : > { %v1366_v2 = vrot.slane %v5444_v11, 2  ;;  %v1286_v58 = vrot.slane %v5444_v11, 1  ;;  %v5471_v24 = vsel %vm1284_vm12, %v6603_v54, %v1310_v19  ;;  %v6608_v54 = vrot.slane %v5290_v16, 2  ;;  %3011 = vmatpush3.bf16.msra.mxu0 %v3504_v6  ;;  %3140 = vmatpush3.bf16.msra.mxu1 %v3504_v6 }
 0x34e   : > { %3317 = vrot.lane.b32.xlu1 %v3301_v4, %s3856_s29  ;;  %v1373_v4 = vsel %vm1364_vm15, %v1370_v34, %v1372_v28  ;;  %v1390_v34 = vrot.slane %v5415_v43, 2  ;;  %6604 = vst [vmem:[#allocation43_spill] sm:$0xff] %v5471_v24  ;;  %v5503_v46 = vsel %vm1364_vm15, %v1382_v8, %v1384_v5  ;;  %3012 = vmatprep.subr.bf16.mxu0 %v3505_v9 }
 0x34f   : > { %v1367_v53 = vsel %vm1364_vm15, %v1365_v47, %v1366_v2  ;;  %v1369_v1 = vsel %vm1364_vm15, %v1366_v2, %v1368_v45  ;;  %v3326_v3 = vpack.i.bf16 %v1373_v4, %v1371_v12  ;;  %v6605_v47 = vrot.slane %v5329_v21, 1  ;;  %3133 = vmatprep.subr.bf16.mxu1 %v3505_v9 }
 0x350   : > { %3312 = vrot.lane.b32.xlu0 %v5438_v59, %s3855_s27  ;;  %v3336_v23 = vpack.i.bf16 %v1369_v1, %v1367_v53  ;;  %v1294_v2 = vrot.slane %v5286_v52, 1  ;;  %v5485_v53 = vsel %vm1364_vm15, %v1372_v28, %v1374_v56  ;;  %v5490_v12 = vsel %vm1364_vm15, %v1374_v56, %v6608_v54  ;;  %v3506_v1 = vld [vmem:[#allocation8 + $0x38] sm:$0xff]  }
 0x351   : > { %v5476_v45 = vsel %vm1284_vm12, %v1310_v19, %v6605_v47  ;;  %v1386_v4 = vrot.slane %v5386_v49, 2  ;;  %v1287_v19 = vsel %vm1284_vm12, %v1285_v42, %v1286_v58  ;;  %v6610_v47 = vrot.slane %v5365_v7, 2  ;;  %3013 = vmatpush3.bf16.msra.mxu0 %v3506_v1  ;;  %3141 = vmatpush3.bf16.msra.mxu1 %v3506_v1 }
 0x352   : > { %6606 = vst [vmem:[#allocation44_spill] sm:$0xff] %v5476_v45  ;;  %3337 = vrot.lane.b32.xlu1 %v3336_v23, %s3855_s27  ;;  %v1289_v23 = vsel %vm1284_vm12, %v1286_v58, %v6609_v61  ;;  %v5508_v56 = vpack.i.bf16 %v5476_v45, %v5471_v24  ;;  %v6612_v42 = vrot.slane %v5329_v21, 2 }
 0x353   : > { %v5500_v28 = vsel %vm1364_vm15, %v6610_v47, %v1382_v8  ;;  %v5516_v54 = vsel %vm1364_vm15, %v1384_v5, %v1386_v4  ;;  %v5519_v61 = vsel %vm1364_vm15, %v1386_v4, %v1388_v30  ;;  %v5522_v8 = vsel %vm1284_vm12, %v1292_v55, %v1294_v2 }
 0x354   : > { %3322 = vrot.lane.b32.xlu0 %v5340_v51, %s3855_s27  ;;  %v5482_v51 = vsel %vm1364_vm15, %v1388_v30, %v1390_v34  ;;  %6611 = vst [vmem:[#allocation46_spill] sm:$0xff] %v5500_v28  ;;  %v5513_v58 = vsel %vm1364_vm15, %v1390_v34, %v6612_v42  ;;  %6614 = vst [vmem:[#allocation48_spill] sm:$0xff] %v5516_v54  ;;  %v1290_v47 = vrot.slane %v5313_v50, 1  ;;  %v6616_v30 = vrot.slane %v5290_v16, 1 }
 0x355   : > { %6607 = vst [vmem:[#allocation45_spill] sm:$0xff] %v5482_v51  ;;  %6613 = vst [vmem:[#allocation47_spill] sm:$0xff] %v5513_v58  ;;  %v3331_v25 = vpack.i.bf16 %v1289_v23, %v1287_v19  ;;  %v1670_v23 = vrot.slane %v5325_v18, 2  ;;  %v5544_v42 = vpack.i.bf16 %v5513_v58, %v5482_v51  ;;  %v6617_v5 = vrot.slane %v5303_v63, 1 }
 0x356   : > { %6615 = vst [vmem:[#allocation49_spill] sm:$0xff] %v5519_v61  ;;  %3352 = vrot.lane.b32.xlu1 %v5508_v56, %s3857_s19  ;;  %v5534_v4 = vsel %vm1284_vm12, %v1294_v2, %v6616_v30  ;;  %v5552_v9 = vsel %vm1284_vm12, %v1290_v47, %v1292_v55  ;;  %v6618_v30 = vrot.slane %v5317_v29, 2  ;;  %v1494_v34 = vrot.slane %v5263_v26, 1 }
 0x357   : > { %v5549_v2 = vsel %vm1284_vm12, %v6617_v5, %v1290_v47  ;;  %v5565_v5 = vrot.slane %v5271_v39, 1  ;;  %v1616_v55 = vrot.slane %v5317_v29, 1  ;;  %v1314_v47 = vrot.slane %v5335_v22, 1 }
 0x358   : > { %3327 = vrot.lane.b32.xlu0 %v3326_v3, %s3857_s19  ;;  %v1671_v19 = vsel %vm1364_vm15, %v6618_v30, %v1670_v23  ;;  %v3371_v1 = vpack.i.bf16 %v5552_v9, %v5549_v2  ;;  %v3346_v30 = vpack.i.bf16 %v5357_v13, %v5353_v41  ;;  %v6620_v29 = vrot.slane %v5329_v21, 1  ;;  %vm6640_vm15 = vmmov %vm6580_vm0 }
 0x359   : > { %v5561_v6 = vpack.c.bf16 %v1670_v23, %v1671_v19  ;;  %v5577_v26 = vsel %vm1284_vm12, %v1494_v34, %v5565_v5  ;;  %v1617_v39 = vsel %vm1284_vm12, %v5565_v5, %v1616_v55 }
 0x35a   : > { %3357 = vrot.lane.b32.xlu1 %v5544_v42, %s3855_s27  ;;  %v5585_v19 = vsel %vm1284_vm12, %v6620_v29, %v1314_v47  ;;  %v3361_v23 = vpack.i.bf16 %v1617_v39, %v5577_v26  ;;  %v6621_v29 = vrot.slane %v5290_v16, 1  ;;  %v5604_v39 = vld [vmem:[#allocation8 + $0x80] sm:$0xff]  }
 0x35b   : > { %6619 = vst [vmem:[#allocation50_spill] sm:$0xff] %v5561_v6  ;;  %v3391_v44 = vpack.i.bf16 %v1314_v47, %v5585_v19  ;;  %3094 = vmatprep.subr.bf16.mxu1 %v5604_v39 }
 0x35c   : > { %3332 = vrot.lane.b32.xlu0 %v3331_v25, %s3857_s19  ;;  %v3341_v25 = vpack.i.bf16 %v5534_v4, %v5522_v8 }
 0x35e   : > { %3372 = vrot.lane.b32.xlu1 %v3371_v1, %s3857_s19  ;;  %v1298_v1 = vrot.slane %v5299_v62, 1 }
 0x360   : > { %3342 = vrot.lane.b32.xlu0 %v3341_v25, %s3856_s29  ;;  %v5599_v14 = vsel %vm1284_vm12, %v6621_v29, %v1298_v1  ;;  %v1618_v29 = vrot.slane %v5325_v18, 1  ;;  %v3406_v18 = vpack.i.bf16 %v5430_v40, %v5425_v33 }
 0x362   : > { %3377 = vrot.lane.b32.xlu1 %v3326_v3, %s3855_s27  ;;  %v5602_v3 = vsel %vm1284_vm12, %v1298_v1, %v1300_v31  ;;  %v1619_v1 = vsel %vm1284_vm12, %v1616_v55, %v1618_v29  ;;  %v1306_v55 = vrot.slane %v5386_v49, 1 }
 0x364   : > { %3347 = vrot.lane.b32.xlu0 %v3346_v30, %s3857_s19  ;;  %v3366_v30 = vpack.i.bf16 %v5490_v12, %v5485_v53 }
 0x366   : > { %3392 = vrot.lane.b32.xlu1 %v3391_v44, %s3857_s19  ;;  %v3381_v44 = vpack.i.bf16 %v5602_v3, %v5599_v14 }
 0x368   : > { %3362 = vrot.lane.b32.xlu0 %v3361_v23, %s3856_s29  ;;  %v3396_v23 = vpack.i.bf16 %v5347_v17, %v5353_v41  ;;  %v3401_v17 = vpack.i.bf16 %v1618_v29, %v1619_v1  ;;  %v3446_v1 = vpack.i.bf16 %v5519_v61, %v5516_v54 }
 0x36a   : > { %3397 = vrot.lane.b32.xlu1 %v3396_v23, %s3855_s27  ;;  %v1304_v23 = vrot.slane %v5380_v60, 1 }
 0x36c   : > { %3367 = vrot.lane.b32.xlu0 %v3366_v30, %s3857_s19  ;;  %v5632_v38 = vsel %vm1284_vm12, %v1302_v20, %v1304_v23 }
 0x36e   : > { %3412 = vrot.lane.b32.xlu1 %v3341_v25, %s3857_s19  ;;  %v5629_v25 = vsel %vm1284_vm12, %v1300_v31, %v1302_v20  ;;  %v5644_v31 = vsel %vm1284_vm12, %v1304_v23, %v1306_v55  ;;  %v6624_v20 = vrot.slane %v5407_v57, 1 }
 0x36f   : > { %6623 = vst [vmem:[#allocation51_spill] sm:$0xff] %v5644_v31 }
 0x370   : > { %3382 = vrot.lane.b32.xlu0 %v3381_v44, %s3856_s29 }
 0x372   : > { %3417 = vrot.lane.b32.xlu1 %v3366_v30, %s3855_s27  ;;  %v3426_v30 = vpack.i.bf16 %v5503_v46, %v5500_v28 }
 0x374   : > { %3387 = vrot.lane.b32.xlu0 %v6622_v10, %s3857_s19  ;;  %v3421_v10 = vpack.i.bf16 %v5632_v38, %v5629_v25 }
 0x376   : > { %3432 = vrot.lane.b32.xlu1 %v3381_v44, %s3857_s19  ;;  %v5649_v44 = vsel %vm1284_vm12, %v1306_v55, %v6624_v20 }
 0x377   : > { %6625 = vst [vmem:[#allocation52_spill] sm:$0xff] %v5649_v44  ;;  %v3441_v29 = vpack.i.bf16 %v5649_v44, %v5644_v31 }
 0x378   : > { %3402 = vrot.lane.b32.xlu0 %v3401_v17, %s3856_s29  ;;  %v5666_v17 = vsel %vm1284_vm12, %v1314_v47, %v1494_v34 }
 0x379   : > { %v3481_v23 = vpack.i.bf16 %v5666_v17, %v5585_v19 }
 0x37a   : > { %3437 = vrot.lane.b32.xlu1 %v3406_v18, %s3855_s27 }
 0x37c   : > { %3407 = vrot.lane.b32.xlu0 %v3406_v18, %s3857_s19 }
 0x37e   : > { %3452 = vrot.lane.b32.xlu1 %v3421_v10, %s3857_s19 }
 0x380   : > { %3422 = vrot.lane.b32.xlu0 %v3421_v10, %s3856_s29 }
 0x382   : > { %3457 = vrot.lane.b32.xlu1 %v3426_v30, %s3855_s27 }
 0x384   : > { %3427 = vrot.lane.b32.xlu0 %v3426_v30, %s3857_s19 }
 0x386   : > { %3472 = vrot.lane.b32.xlu1 %v3441_v29, %s3857_s19 }
 0x388   : > { %3442 = vrot.lane.b32.xlu0 %v3441_v29, %s3856_s29 }
 0x38a   : > { %3477 = vrot.lane.b32.xlu1 %v3446_v1, %s3855_s27 }
 0x38c   : > { %3447 = vrot.lane.b32.xlu0 %v3446_v1, %s3857_s19 }
 0x38e   : > { %3487 = vrot.lane.b32.xlu1 %v5438_v59, %s3856_s29 }
 0x390   : > { %3462 = vrot.lane.b32.xlu0 %v5508_v56, %s3856_s29 }
 0x394   : > { %3467 = vrot.lane.b32.xlu0 %v5544_v42, %s3857_s19 }
 0x398   : > { %3482 = vrot.lane.b32.xlu0 %v3481_v23, %s3856_s29 }
 0x3a2   : > { %v5673_v10 = vpop.permute.xlu0 %3262 }
 0x3a4   : > { %v3253_v18 = vpop.permute.xlu1 %3252 }
 0x3a5   : > { %v3255_v49 = vunpack.i.h.bf16 %v3253_v18  ;;  %v3254_v58 = vunpack.i.l.bf16 %v3253_v18 }
 0x3a6   : > { %v5677_v56 = vpop.permute.xlu0 %3272 }
 0x3a8   : > { %v3258_v55 = vpop.permute.xlu1 %3257 }
 0x3a9   : > { %v3260_v54 = vunpack.i.h.bf16 %v3258_v55 }
 0x3aa   : > { %v5681_v34 = vpop.permute.xlu0 %3282 }
 0x3ac   : > { %v5675_v30 = vpop.permute.xlu1 %3267 }
 0x3b0   : > { %v5679_v59 = vpop.permute.xlu1 %3277 }
 0x3b4   : > { %v5683_v47 = vpop.permute.xlu1 %3287 }
 0x3b8   : > { %v5685_v42 = vpop.permute.xlu1 %3297 }
 0x3ba   : > { %v5687_v20 = vpop.permute.xlu0 %3292 }
 0x3bc   : > { %v5689_v29 = vpop.permute.xlu1 %3307 }
 0x3be   : > { %v5691_v1 = vpop.permute.xlu0 %3302 }
 0x3c0   : > { %v5695_v15 = vpop.permute.xlu1 %3317 }
 0x3c1   : > { %6627 = vst [vmem:[#allocation54_spill] sm:$0xff] %v5695_v15 }
 0x3c2   : > { %v5693_v23 = vpop.permute.xlu0 %3312 }
 0x3c3   : > { %6626 = vst [vmem:[#allocation53_spill] sm:$0xff] %v5693_v23  ;;  %v3259_v23 = vunpack.i.l.bf16 %v3258_v55 }
 0x3c4   : > { %v3338_v37 = vpop.permute.xlu1 %3337 }
 0x3c5   : > { %v3340_v13 = vunpack.i.h.bf16 %v3338_v37  ;;  %v3339_v24 = vunpack.i.l.bf16 %v3338_v37 }
 0x3c6   : > { %v5697_v48 = vpop.permute.xlu0 %3322 }
 0x3c7   : > { %6628 = vst [vmem:[#allocation55_spill] sm:$0xff] %v5697_v48 }
 0x3c8   : > { %v3353_v35 = vpop.permute.xlu1 %3352 }
 0x3c9   : > { %v3354_v44 = vunpack.i.l.bf16 %v3353_v35  ;;  %v3355_v15 = vunpack.i.h.bf16 %v3353_v35 }
 0x3ca   : > { %v3328_v6 = vpop.permute.xlu0 %3327 }
 0x3cb   : > { %v3330_v27 = vunpack.i.h.bf16 %v3328_v6  ;;  %v3329_v41 = vunpack.i.l.bf16 %v3328_v6 }
 0x3cc   : > { %v3358_v48 = vpop.permute.xlu1 %3357 }
 0x3cd   : > { %v1739_v61 = vsel %vm6629_vm3, %v5552_v9, %v3330_v27  ;;  %v1738_v31 = vsel %vm6580_vm0, %v5549_v2, %v3329_v41  ;;  %v3359_v36 = vunpack.i.l.bf16 %v3358_v48  ;;  %v3360_v9 = vunpack.i.h.bf16 %v3358_v48  ;;  %vm6641_vm3 = vmmov %vm6580_vm0 }
 0x3ce   : > { %v3333_v45 = vpop.permute.xlu0 %3332  ;;  %v1754_v28 = vsel %vm1704_vm1, %v1738_v31, %v3254_v58  ;;  %v1755_v41 = vsel %vm1704_vm1, %v1739_v61, %v3255_v49 }
 0x3cf   : > { %v3335_v60 = vunpack.i.h.bf16 %v3333_v45  ;;  %v3334_v51 = vunpack.i.l.bf16 %v3333_v45 }
 0x3d1   : > { %v1689_v6 = vsel %vm6630_vm11, %v5444_v11, %v3335_v60  ;;  %v1688_v37 = vsel %vm6631_vm4, %v5434_v0, %v3334_v51  ;;  %v3373_v0 = vpop.permute.xlu1 %3372  ;;  %v1701_v51 = vsel %vm6633_vm13, %v5415_v43, %v3355_v15  ;;  %vm6642_vm11 = vmmov %vm6580_vm0 }
 0x3d2   : > { %v1706_v45 = vsel %vm1704_vm1, %v1689_v6, %v3340_v13  ;;  %v1705_v18 = vsel %vm1704_vm1, %v1688_v37, %v3339_v24  ;;  %v3343_v55 = vpop.permute.xlu0 %3342  ;;  %v1700_v13 = vsel %vm6632_vm5, %v5407_v57, %v3354_v44  ;;  %v1718_v49 = vsel %vm1704_vm1, %v1701_v51, %v3360_v9  ;;  %vm6643_vm4 = vmmov %vm6580_vm0 }
 0x3d3   : > { %v3345_v7 = vunpack.i.h.bf16 %v3343_v55  ;;  %v3344_v27 = vunpack.i.l.bf16 %v3343_v55  ;;  %v1722_v60 = vsel %vm1721_vm14, %v1705_v18, %v3259_v23  ;;  %v1723_v11 = vsel %vm1721_vm14, %v1706_v45, %v3260_v54  ;;  %vm6644_vm5 = vmmov %vm6580_vm0 }
 0x3d4   : > { %v1717_v48 = vsel %vm1704_vm1, %v1700_v13, %v3359_v36  ;;  %v1786_v54 = vpack.c.bf16 %v1723_v11, %v1722_v60  ;;  %v3270_v23 = vunpack.i.h.bf16 %v5675_v30  ;;  %v3269_v57 = vunpack.i.l.bf16 %v5675_v30  ;;  %vm6645_vm13 = vmmov %vm6580_vm0 }
 0x3d5   : > { %v1770_v24 = vsel %vm1721_vm14, %v1754_v28, %v3344_v27  ;;  %v1771_v35 = vsel %vm1721_vm14, %v1755_v41, %v3345_v7  ;;  %v3378_v28 = vpop.permute.xlu1 %3377  ;;  %v3265_v7 = vunpack.i.h.bf16 %v5673_v10  ;;  %v3264_v44 = vunpack.i.l.bf16 %v5673_v10 }
 0x3d6   : > { %v3348_v58 = vpop.permute.xlu0 %3347  ;;  %v1787_v2 = vpack.c.bf16 %v1771_v35, %v1770_v24  ;;  %v3375_v43 = vunpack.i.h.bf16 %v3373_v0  ;;  %v3374_v6 = vunpack.i.l.bf16 %v3373_v0  ;;  %v1734_v45 = vsel %vm1721_vm14, %v1717_v48, %v3269_v57 }
 0x3d7   : > { %v3350_v61 = vunpack.i.h.bf16 %v3348_v58  ;;  %v3349_v31 = vunpack.i.l.bf16 %v3348_v58  ;;  %v1735_v30 = vsel %vm1721_vm14, %v1718_v49, %v3270_v23  ;;  %v3380_v27 = vunpack.i.h.bf16 %v3378_v28  ;;  %v3508_v49 = vld [vmem:[#allocation8 + $0x88] sm:$0xff]  }
 0x3d8   : > { %2017 = vmatprep.mubr.bf16.mxu0 %v1787_v2  ;;  %v3379_v9 = vunpack.i.l.bf16 %v3378_v28  ;;  %v1691_v11 = vsel %vm6636_vm2, %v5313_v50, %v3375_v43  ;;  %v1690_v0 = vsel %vm6637_vm6, %v5303_v63, %v3374_v6  ;;  %v1804_v35 = vpack.c.bf16 %v1735_v30, %v1734_v45  ;;  %vm6649_vm2 = vmmov %vm6580_vm0 }
 0x3d9   : > { %v1751_v15 = vsel %vm6634_vm7, %v5666_v17, %v3350_v61  ;;  %v1750_v36 = vsel %vm6635_vm10, %v5585_v19, %v3349_v31  ;;  %2018 = vmatmul.mubr.bf16.vlgmr.msra.gmra.mrb[4].mxu0 %v1786_v54  ;;  %v3393_v17 = vpop.permute.xlu1 %3392  ;;  %v1708_v48 = vsel %vm1704_vm1, %v1691_v11, %v3380_v27  ;;  %v3280_v61 = vunpack.i.h.bf16 %v5679_v59  ;;  %vm6646_vm7 = vmmov %vm6580_vm0 }
 0x3da   : > { %v3363_v37 = vpop.permute.xlu0 %3362  ;;  %v1766_v10 = vsel %vm1704_vm1, %v1750_v36, %v3264_v44  ;;  %v1767_v41 = vsel %vm1704_vm1, %v1751_v15, %v3265_v7  ;;  %v1707_v51 = vsel %vm1704_vm1, %v1690_v0, %v3379_v9  ;;  %v3279_v31 = vunpack.i.l.bf16 %v5679_v59  ;;  %vm6648_vm10 = vmmov %vm6580_vm0 }
 0x3db   : > { %v3365_v18 = vunpack.i.h.bf16 %v3363_v37  ;;  %v3364_v55 = vunpack.i.l.bf16 %v3363_v37  ;;  %v3275_v50 = vunpack.i.h.bf16 %v5677_v56  ;;  %v3274_v63 = vunpack.i.l.bf16 %v5677_v56  ;;  %vm6650_vm6 = vmmov %vm6580_vm0 }
 0x3dc   : > { %v3395_v28 = vunpack.i.h.bf16 %v3393_v17  ;;  %v3394_v7 = vunpack.i.l.bf16 %v3393_v17  ;;  %v1724_v15 = vsel %vm1721_vm14, %v1707_v51, %v3279_v31  ;;  %v1725_v59 = vsel %vm1721_vm14, %v1708_v48, %v3280_v61 }
 0x3dd   : > { %v1782_v60 = vsel %vm1721_vm14, %v1766_v10, %v3364_v55  ;;  %v1783_v19 = vsel %vm1721_vm14, %v1767_v41, %v3365_v18  ;;  %v3398_v54 = vpop.permute.xlu1 %3397  ;;  %v1789_v9 = vpack.c.bf16 %v1725_v59, %v1724_v15  ;;  %v3289_v11 = vunpack.i.l.bf16 %v5683_v47 }
 0x3de   : > { %v3368_v13 = vpop.permute.xlu0 %3367  ;;  %v1805_v24 = vpack.c.bf16 %v1783_v19, %v1782_v60  ;;  %v3400_v6 = vunpack.i.h.bf16 %v3398_v54  ;;  %v3399_v56 = vunpack.i.l.bf16 %v3398_v54  ;;  %v1703_v18 = vsel %vm6640_vm15, %v5335_v22, %v3395_v28  ;;  %vm6654_vm15 = vmmov %vm6580_vm0 }
 0x3df   : > { %v3370_v58 = vunpack.i.h.bf16 %v3368_v13  ;;  %v3369_v2 = vunpack.i.l.bf16 %v3368_v13  ;;  %v3290_v19 = vunpack.i.h.bf16 %v5683_v47  ;;  %v3285_v22 = vunpack.i.h.bf16 %v5681_v34 }
 0x3e0   : > { %2065 = vmatprep.mubr.bf16.mxu1 %v1805_v24  ;;  %v1720_v41 = vsel %vm1704_vm1, %v1703_v18, %v3400_v6  ;;  %v3299_v6 = vunpack.i.l.bf16 %v5685_v42  ;;  %v6647_v18 = vpack.c.bf16 %v5490_v12, %v5485_v53 }
 0x3e1   : > { %v1741_v23 = vsel %vm6638_vm9, %v5534_v4, %v3370_v58  ;;  %v1740_v57 = vsel %vm6639_vm8, %v5522_v8, %v3369_v2  ;;  %2066 = vmatmul.mubr.bf16.vlgmr.msra.gmra.mrb[4].mxu1 %v1804_v35  ;;  %v3413_v8 = vpop.permute.xlu1 %3412  ;;  %v1737_v47 = vsel %vm1721_vm14, %v1720_v41, %v3290_v19  ;;  %vm6651_vm9 = vmmov %vm6580_vm0 }
 0x3e2   : > { %v3383_v44 = vpop.permute.xlu0 %3382  ;;  %3095 = vmatpush3.bf16.msra.mxu1 %v5604_v39  ;;  %v1756_v4 = vsel %vm1704_vm1, %v1740_v57, %v3274_v63  ;;  %v1757_v37 = vsel %vm1704_vm1, %v1741_v23, %v3275_v50  ;;  %v1702_v39 = vsel %vm6641_vm3, %v5329_v21, %v3394_v7  ;;  %v3284_v21 = vunpack.i.l.bf16 %v5681_v34  ;;  %vm6652_vm8 = vmmov %vm6580_vm0 }
 0x3e3   : > { %v3385_v36 = vunpack.i.h.bf16 %v3383_v44  ;;  %v3384_v43 = vunpack.i.l.bf16 %v3383_v44  ;;  %3096 = vmatprep.subr.bf16.mxu1 %v3508_v49  ;;  %v1719_v10 = vsel %vm1704_vm1, %v1702_v39, %v3399_v56  ;;  %v3415_v35 = vunpack.i.h.bf16 %v3413_v8  ;;  %vm6657_vm3 = vmmov %vm6580_vm0 }
 0x3e4   : > { %v3414_v51 = vunpack.i.l.bf16 %v3413_v8  ;;  %v1736_v58 = vsel %vm1721_vm14, %v1719_v10, %v3289_v11 }
 0x3e5   : > { %v1772_v45 = vsel %vm1721_vm14, %v1756_v4, %v3384_v43  ;;  %v1773_v30 = vsel %vm1721_vm14, %v1757_v37, %v3385_v36  ;;  %v3418_v0 = vpop.permute.xlu1 %3417  ;;  %v1693_v63 = vsel %vm6643_vm4, %v5286_v52, %v3415_v35  ;;  %v1807_v7 = vpack.c.bf16 %v1737_v47, %v1736_v58  ;;  %vm6663_vm4 = vmmov %vm6580_vm0 }
 0x3e6   : > { %v3388_v55 = vpop.permute.xlu0 %3387  ;;  %v1790_v27 = vpack.c.bf16 %v1773_v30, %v1772_v45  ;;  %3097 = vmatpush3.bf16.msra.mxu1 %v3508_v49  ;;  %v3420_v61 = vunpack.i.h.bf16 %v3418_v0  ;;  %v3419_v31 = vunpack.i.l.bf16 %v3418_v0  ;;  %v1692_v23 = vsel %vm6644_vm5, %v5275_v32, %v3414_v51  ;;  %vm6665_vm5 = vmmov %vm6580_vm0 }
 0x3e7   : > { %v3390_v17 = vunpack.i.h.bf16 %v3388_v55  ;;  %v3389_v60 = vunpack.i.l.bf16 %v3388_v55  ;;  %v3300_v43 = vunpack.i.h.bf16 %v5685_v42  ;;  %v3295_v52 = vunpack.i.h.bf16 %v5687_v20 }
 0x3e8   : > { %2025 = vmatprep.mubr.bf16.mxu0 %v1790_v27  ;;  %v1709_v44 = vsel %vm1704_vm1, %v1692_v23, %v3419_v31  ;;  %v1710_v15 = vsel %vm1704_vm1, %v1693_v63, %v3420_v61  ;;  %v3294_v4 = vunpack.i.l.bf16 %v5687_v20  ;;  %v3309_v35 = vunpack.i.l.bf16 %v5689_v29  ;;  %v6658_v63 = vld [vmem:[#allocation37_spill] sm:$0xff] }
 0x3e9   : > { %v1753_v13 = vsel %vm6580_vm0, %v5565_v5, %v3390_v17  ;;  %v1752_v24 = vsel %vm6642_vm11, %v5577_v26, %v3389_v60  ;;  %2026 = vmatmul.mubr.bf16.gmra.mrb[8].mxu0 %v1789_v9  ;;  %v3433_v5 = vpop.permute.xlu1 %3432  ;;  %v1726_v42 = vsel %vm1721_vm14, %v1709_v44, %v3299_v6  ;;  %v1727_v39 = vsel %vm1721_vm14, %v1710_v15, %v3300_v43  ;;  %v6659_v44 = vld [vmem:[#allocation38_spill] sm:$0xff]  ;;  %vm6660_vm11 = vmmov %vm6580_vm0 }
 0x3ea   : > { %v3403_v48 = vpop.permute.xlu0 %3402  ;;  %v1768_v34 = vsel %vm1704_vm1, %v1752_v24, %v3284_v21  ;;  %v1769_v54 = vsel %vm1704_vm1, %v1753_v13, %v3285_v22  ;;  %v3435_v8 = vunpack.i.h.bf16 %v3433_v5  ;;  %v3434_v45 = vunpack.i.l.bf16 %v3433_v5  ;;  %v6661_v6 = vld [vmem:[#allocation54_spill] sm:$0xff] }
 0x3eb   : > { %v3405_v2 = vunpack.i.h.bf16 %v3403_v48  ;;  %v3404_v49 = vunpack.i.l.bf16 %v3403_v48  ;;  %v1792_v11 = vpack.c.bf16 %v1727_v39, %v1726_v42  ;;  %v3310_v24 = vunpack.i.h.bf16 %v5689_v29  ;;  %v6667_v42 = vld [vmem:[#allocation48_spill] sm:$0xff] }
 0x3ec   : > { %v1695_v53 = vsel %vm6649_vm2, %v5299_v62, %v3435_v8  ;;  %v1694_v12 = vsel %vm6650_vm6, %v5290_v16, %v3434_v45  ;;  %v3305_v62 = vunpack.i.h.bf16 %v5691_v1  ;;  %v6653_v58 = vpack.c.bf16 %v5430_v40, %v5425_v33  ;;  %v6664_v45 = vld [vmem:[#allocation51_spill] sm:$0xff]  ;;  %vm6678_vm2 = vmmov %vm6580_vm0 }
 0x3ed   : > { %v1784_v50 = vsel %vm1721_vm14, %v1768_v34, %v3404_v49  ;;  %v1785_v26 = vsel %vm1721_vm14, %v1769_v54, %v3405_v2  ;;  %v3438_v56 = vpop.permute.xlu1 %3437  ;;  %v3304_v47 = vunpack.i.l.bf16 %v5691_v1  ;;  %v6655_v49 = vld [vmem:[#allocation46_spill] sm:$0xff]  ;;  %vm6680_vm6 = vmmov %vm6580_vm0 }
 0x3ee   : > { %v3408_v57 = vpop.permute.xlu0 %3407  ;;  %v1808_v28 = vpack.c.bf16 %v1785_v26, %v1784_v50  ;;  %v3440_v27 = vunpack.i.h.bf16 %v3438_v56  ;;  %v6656_v61 = vpack.c.bf16 %v5503_v46, %v6655_v49 }
 0x3ef   : > { %v3410_v59 = vunpack.i.h.bf16 %v3408_v57  ;;  %v3409_v36 = vunpack.i.l.bf16 %v3408_v57 }
 0x3f0   : > { %2073 = vmatprep.mubr.bf16.mxu1 %v1808_v28  ;;  %v1712_v22 = vsel %vm1704_vm1, %v1695_v53, %v3440_v27 }
 0x3f1   : > { %v1743_v32 = vsel %vm6645_vm13, %v5602_v3, %v3410_v59  ;;  %v1742_v37 = vsel %vm6646_vm7, %v5599_v14, %v3409_v36  ;;  %2074 = vmatmul.mubr.bf16.gmra.mrb[8].mxu1 %v1807_v7  ;;  %v3439_v3 = vunpack.i.l.bf16 %v3438_v56  ;;  %v3453_v10 = vpop.permute.xlu1 %3452  ;;  %v1729_v31 = vsel %vm1721_vm14, %v1712_v22, %v3310_v24  ;;  %vm6669_vm13 = vmmov %vm6580_vm0 }
 0x3f2   : > { %v3423_v30 = vpop.permute.xlu0 %3422  ;;  %3098 = vmatprep.mubr.msk.bf16.mxu1 %vm6648_vm10, %v6647_v18  ;;  %v1758_v9 = vsel %vm1704_vm1, %v1742_v37, %v3294_v4  ;;  %v1759_v14 = vsel %vm1704_vm1, %v1743_v32, %v3295_v52  ;;  %v3454_v2 = vunpack.i.l.bf16 %v3453_v10  ;;  %v3319_v56 = vunpack.i.l.bf16 %v6661_v6  ;;  %v6662_v37 = vld [vmem:[#allocation52_spill] sm:$0xff]  ;;  %v6666_v18 = vld [vmem:[#allocation49_spill] sm:$0xff]  ;;  %vm6674_vm7 = vmmov %vm6580_vm0 }
 0x3f3   : > { %v3425_v20 = vunpack.i.h.bf16 %v3423_v30  ;;  %v3424_v55 = vunpack.i.l.bf16 %v3423_v30  ;;  %v1711_v0 = vsel %vm1704_vm1, %v1694_v12, %v3439_v3  ;;  %v3320_v32 = vunpack.i.h.bf16 %v6661_v6  ;;  %vm6676_vm10 = vmmov %vm6580_vm0 }
 0x3f4   : > { %v1696_v23 = vsel %vm6580_vm0, %v6658_v63, %v3454_v2  ;;  %v6668_v39 = vpack.c.bf16 %v6666_v18, %v6667_v42  ;;  %v3858_v42 = vmov 0  }
 0x3f5   : > { %v1774_v41 = vsel %vm1721_vm14, %v1758_v9, %v3424_v55  ;;  %v1775_v17 = vsel %vm1721_vm14, %v1759_v14, %v3425_v20  ;;  %v3458_v51 = vpop.permute.xlu1 %3457  ;;  %v6670_v20 = vld [vmem:[#allocation53_spill] sm:$0xff]  ;;  %v6671_v9 = vld [vmem:[#allocation47_spill] sm:$0xff] }
 0x3f6   : > { %v3428_v60 = vpop.permute.xlu0 %3427  ;;  %v1793_v19 = vpack.c.bf16 %v1775_v17, %v1774_v41  ;;  %v3459_v5 = vunpack.i.l.bf16 %v3458_v51  ;;  %v3460_v33 = vunpack.i.h.bf16 %v3458_v51  ;;  %v3315_v55 = vunpack.i.h.bf16 %v6670_v20  ;;  %v6672_v14 = vld [vmem:[#allocation45_spill] sm:$0xff] }
 0x3f7   : > { %v3430_v21 = vunpack.i.h.bf16 %v3428_v60  ;;  %v3429_v13 = vunpack.i.l.bf16 %v3428_v60  ;;  %v3314_v27 = vunpack.i.l.bf16 %v6670_v20 }
 0x3f8   : > { %2033 = vmatprep.mubr.bf16.mxu0 %v1793_v19  ;;  %v1713_v59 = vsel %vm1704_vm1, %v1696_v23, %v3459_v5  ;;  %v6681_v5 = vld [vmem:[#allocation43_spill] sm:$0xff] }
 0x3f9   : > { %v1745_v16 = vsel %vm6651_vm9, %v5632_v38, %v3430_v21  ;;  %v1744_v48 = vsel %vm6652_vm8, %v5629_v25, %v3429_v13  ;;  %2034 = vmatmul.mubr.bf16.gmra.mrb[12].mxu0 %v1792_v11  ;;  %3099 = vmatmul.mubr.msk.bf16.vlgmr.msra.gmra.mrb[12].mxu1 %vm6654_vm15, %v6653_v58  ;;  %v1728_v38 = vsel %vm1721_vm14, %v1711_v0, %v3309_v35  ;;  %v3455_v25 = vunpack.i.h.bf16 %v3453_v10  ;;  %v3473_v50 = vpop.permute.xlu1 %3472  ;;  %v6675_v58 = vld [vmem:[#allocation39_spill] sm:$0xff]  ;;  %vm6682_vm9 = vmmov %vm6580_vm0 }
 0x3fa   : > { %v3443_v29 = vpop.permute.xlu0 %3442  ;;  %3102 = vmatprep.mubr.msk.bf16.mxu1 %vm6657_vm3, %v6656_v61  ;;  %v1760_v40 = vsel %vm1704_vm1, %v1744_v48, %v3304_v47  ;;  %v1761_v1 = vsel %vm1704_vm1, %v1745_v16, %v3305_v62  ;;  %v1795_v7 = vpack.c.bf16 %v1729_v31, %v1728_v38  ;;  %v6673_v10 = vpack.c.bf16 %v6671_v9, %v6672_v14  ;;  %v6677_v61 = vld [vmem:[#allocation40_spill] sm:$0xff]  ;;  %vm6686_vm8 = vmmov %vm6580_vm0 }
 0x3fb   : > { %v3445_v34 = vunpack.i.h.bf16 %v3443_v29  ;;  %v3444_v54 = vunpack.i.l.bf16 %v3443_v29  ;;  %v1697_v15 = vsel %vm6660_vm11, %v6659_v44, %v3455_v25  ;;  %v1730_v41 = vsel %vm1721_vm14, %v1713_v59, %v3319_v56  ;;  %vm6691_vm15 = vmmov %vm6580_vm0 }
 0x3fc   : > { %v1714_v52 = vsel %vm1704_vm1, %v1697_v15, %v3460_v33  ;;  %v3474_v17 = vunpack.i.l.bf16 %v3473_v50  ;;  %v3475_v19 = vunpack.i.h.bf16 %v3473_v50  ;;  %vm6693_vm3 = vmmov %vm6580_vm0  ;;  %vm2372_vm0 = vcmask 253952  }
 0x3fd   : > { %v1776_v26 = vsel %vm1721_vm14, %v1760_v40, %v3444_v54  ;;  %v1777_v46 = vsel %vm1721_vm14, %v1761_v1, %v3445_v34  ;;  %v3478_v4 = vpop.permute.xlu1 %3477  ;;  %v1731_v60 = vsel %vm1721_vm14, %v1714_v52, %v3320_v32  ;;  %v6679_v34 = vld [vmem:[#allocation44_spill] sm:$0xff]  ;;  %v6684_v1 = vld [vmem:[#allocation25_spill] sm:$0xff]  ;;  %vm2373_vm11 = vsmask.f32 256 }
 0x3fe   : > { %v3448_v57 = vpop.permute.xlu0 %3447  ;;  %v1796_v28 = vpack.c.bf16 %v1777_v46, %v1776_v26  ;;  %v3479_v11 = vunpack.i.l.bf16 %v3478_v4  ;;  %v3480_v13 = vunpack.i.h.bf16 %v3478_v4  ;;  %v1698_v47 = vsel %vm6676_vm10, %v6675_v58, %v3474_v17  ;;  %v6683_v40 = vld [vmem:[#allocation36_spill] sm:$0xff]  ;;  %v6687_v26 = vld [vmem:[#allocation55_spill] sm:$0xff] }
 0x3ff   : > { %v3450_v36 = vunpack.i.h.bf16 %v3448_v57  ;;  %v3449_v43 = vunpack.i.l.bf16 %v3448_v57  ;;  %v1798_v49 = vpack.c.bf16 %v1731_v60, %v1730_v41  ;;  %v1699_v38 = vsel %vm6678_vm2, %v6677_v61, %v3475_v19  ;;  %v6688_v57 = vld [vmem:[#allocation42_spill] sm:$0xff] }
 0x400   : > { %2041 = vmatprep.mubr.bf16.mxu0 %v1796_v28  ;;  %v1715_v31 = vsel %vm1704_vm1, %v1698_v47, %v3479_v11  ;;  %v1716_v25 = vsel %vm1704_vm1, %v1699_v38, %v3480_v13  ;;  %v6685_v50 = vpack.c.bf16 %v6683_v40, %v6684_v1  ;;  %v3325_v46 = vunpack.i.h.bf16 %v6687_v26  ;;  %v6689_v28 = vld [vmem:[#allocation41_spill] sm:$0xff]  ;;  %v2980_v60 = vld [vmem:[%s4176_s1 + $0x8] sm:$0xff]   ;;  %v2982_v13 = vld [vmem:[%s4176_s1 + $0x18] sm:$0xff]  }
 0x401   : > { %v1747_v8 = vsel %vm6663_vm4, %v6662_v37, %v3450_v36  ;;  %v1746_v30 = vsel %vm6665_vm5, %v6664_v45, %v3449_v43  ;;  %2042 = vmatmul.mubr.bf16.gmra.mrb[16].mxu0 %v1795_v7  ;;  %3103 = vmatmul.mubr.msk.bf16.gmra.mrb[16].mxu1 %vm6669_vm13, %v6668_v39  ;;  %v3488_v21 = vpop.permute.xlu1 %3487  ;;  %v3324_v63 = vunpack.i.l.bf16 %v6687_v26  ;;  %v6690_v7 = vpack.c.bf16 %v6688_v57, %v6689_v28  ;;  %v6692_v37 = vld [vmem:[#allocation50_spill] sm:$0xff]  ;;  %v6698_v57 = vld [vmem:[#allocation19_spill] sm:$0xff] }
 0x402   : > { %v3463_v3 = vpop.permute.xlu0 %3462  ;;  %3106 = vmatprep.mubr.msk.bf16.mxu1 %vm6674_vm7, %v6673_v10  ;;  %v1762_v0 = vsel %vm1704_vm1, %v1746_v30, %v3314_v27  ;;  %v1763_v22 = vsel %vm1704_vm1, %v1747_v8, %v3315_v55  ;;  %v3490_v16 = vunpack.i.h.bf16 %v3488_v21  ;;  %v3489_v48 = vunpack.i.l.bf16 %v3488_v21  ;;  %v2375_v8 = vld [vmem:[%s5885_s30 + $0x8] sm:$0x1]  ;;  %v2381_v30 = vld [vmem:[%s5885_s30 + $0x44] sm:$0x8] }
 0x403   : > { %v3465_v53 = vunpack.i.h.bf16 %v3463_v3  ;;  %v3464_v12 = vunpack.i.l.bf16 %v3463_v3  ;;  %vm2379_vm4 = vsmask.f32 7950  ;;  %vm2369_vm13 = vcmask 257024   ;;  %v2984_v61 = vld [vmem:[%s4176_s1 + $0x28] sm:$0xff]  }
 0x404   : > { %v1732_v44 = vsel %vm1721_vm14, %v1715_v31, %v3489_v48  ;;  %v1733_v15 = vsel %vm1721_vm14, %v1716_v25, %v3490_v16  ;;  %2370 = vst.msk [vmem:[%s5885_s30] sm:$0xf] %vm2369_vm13, %v3858_v42  ;;  %2371 = vst.msk [vmem:[%s5885_s30 + $0x4] sm:$0xf] %vm2369_vm13, %v3858_v42  ;;  %v2942_v21 = vunpack.c.h.bf16 %v2980_v60  ;;  %v2313_v28 = vrot.slane %v6698_v57, 1  ;;  %v6706_v57 = vld [vmem:[#allocation35_spill] sm:$0xff] }
 0x405   : > { %v1778_v24 = vsel %vm1721_vm14, %v1762_v0, %v3464_v12  ;;  %v1779_v35 = vsel %vm1721_vm14, %v1763_v22, %v3465_v53  ;;  %v1801_v4 = vpack.c.bf16 %v1733_v15, %v1732_v44  ;;  %2384 = vst.msk [vmem:[%s5885_s30 + $0x48] sm:$0xf] %vm2369_vm13, %v3858_v42  ;;  %2385 = vst.msk [vmem:[%s5885_s30 + $0x4c] sm:$0xf] %vm2369_vm13, %v3858_v42  ;;  %v2981_v53 = vld [vmem:[%s4176_s1 + $0x10] sm:$0xff]   ;;  %v2941_v22 = vunpack.c.l.bf16 %v2980_v60 }
 0x406   : > { %v3468_v51 = vpop.permute.xlu0 %3467  ;;  %v1799_v62 = vpack.c.bf16 %v1779_v35, %v1778_v24  ;;  %v2945_v11 = vunpack.c.l.bf16 %v2981_v53  ;;  %v2946_v0 = vunpack.c.h.bf16 %v2981_v53  ;;  %v6694_v35 = vld [vmem:[#allocation28_spill] sm:$0xff]  ;;  %v6699_v44 = vld [vmem:[#allocation31_spill] sm:$0xff]  ;;  %vm2595_vm7 = vsmask.f32 7938 }
 0x407   : > { %v3470_v2 = vunpack.i.h.bf16 %v3468_v51  ;;  %v3469_v29 = vunpack.i.l.bf16 %v3468_v51  ;;  %v2309_v51 = vrot.slane %v6694_v35, 1  ;;  %v2227_v25 = vrot.slane %v2941_v22, 1  ;;  %vm6064_vm2 = vmand %vm2369_vm13, %vm2595_vm7 }
 0x408   : > { %2049 = vmatprep.mubr.bf16.mxu0 %v1799_v62  ;;  %v6695_v62 = vld [vmem:[#allocation29_spill] sm:$0xff]  ;;  %v2230_v58 = vrot.slane %v2945_v11, 1  ;;  %v2232_v47 = vrot.slane %v2946_v0, 1  ;;  %v2319_v15 = vrot.slane %v6699_v44, 1  ;;  %v6703_v0 = vld [vmem:[#allocation32_spill] sm:$0xff] }
 0x409   : > { %v1749_v54 = vsel %vm6680_vm6, %v6679_v34, %v3470_v2  ;;  %v1748_v33 = vsel %vm6682_vm9, %v6681_v5, %v3469_v29  ;;  %2050 = vmatmul.mubr.bf16.gmra.mrb[20].mxu0 %v1798_v49  ;;  %3107 = vmatmul.mubr.msk.bf16.gmra.mrb[20].mxu1 %vm6686_vm8, %v6685_v50  ;;  %v2311_v16 = vrot.slane %v6695_v62, 1  ;;  %v6696_v2 = vld [vmem:[#allocation26_spill] sm:$0xff]  ;;  %v2949_v49 = vunpack.c.l.bf16 %v2982_v13 }
 0x40a   : > { %v3483_v23 = vpop.permute.xlu0 %3482  ;;  %3110 = vmatprep.mubr.msk.bf16.mxu1 %vm6691_vm15, %v6690_v7  ;;  %v1764_v43 = vsel %vm1704_vm1, %v1748_v33, %v3324_v63  ;;  %v1765_v6 = vsel %vm1704_vm1, %v1749_v54, %v3325_v46  ;;  %vm2374_vm1 = vmand %vm2372_vm0, %vm2373_vm11  ;;  %v2306_v29 = vrot.slane %v6696_v2, 1  ;;  %v2228_v34 = vrot.slane %v2942_v21, 1  ;;  %v6697_v54 = vld [vmem:[#allocation27_spill] sm:$0xff]  ;;  %v6704_v21 = vld [vmem:[#allocation22_spill] sm:$0xff] }
 0x40b   : > { %v3485_v59 = vunpack.i.h.bf16 %v3483_v23  ;;  %v3484_v36 = vunpack.i.l.bf16 %v3483_v23  ;;  %v2376_v45 = vsel %vm2374_vm1, 0, %v2375_v8  ;;  %v2307_v5 = vrot.slane %v6697_v54, 1  ;;  %v2983_v33 = vld [vmem:[%s4176_s1 + $0x20] sm:$0xff]  }
 0x40c   : > { %2377 = vst [vmem:[%s5885_s30 + $0x8] sm:$0x1] %v2376_v45  ;;  %v2954_v1 = vunpack.c.h.bf16 %v2983_v33  ;;  %v5920_v26 = vsel %vm1284_vm12, %v2309_v51, %v2311_v16  ;;  %v2950_v46 = vunpack.c.h.bf16 %v2982_v13  ;;  %v2957_v63 = vunpack.c.l.bf16 %v2984_v61  ;;  %v6702_v8 = vld [vmem:[#allocation21_spill] sm:$0xff] }
 0x40d   : > { %v1780_v56 = vsel %vm1721_vm14, %v1764_v43, %v3484_v36  ;;  %v1781_v52 = vsel %vm1721_vm14, %v1765_v6, %v3485_v59  ;;  %vm2378_vm14 = vcmask 257027   ;;  %v2234_v23 = vrot.slane %v2949_v49, 1  ;;  %v2986_v49 = vld [vmem:[%s4176_s1 + $0x38] sm:$0xff]  }
 0x40e   : > { %v1802_v32 = vpack.c.bf16 %v1781_v52, %v1780_v56  ;;  %vm2380_vm5 = vmand %vm2378_vm14, %vm2379_vm4  ;;  %v2953_v7 = vunpack.c.l.bf16 %v2983_v33  ;;  %v5925_v59 = vsel %vm1284_vm12, %v2230_v58, %v2232_v47  ;;  %v5928_v36 = vsel %vm1284_vm12, %v2227_v25, %v2228_v34  ;;  %v6700_v52 = vld [vmem:[#allocation20_spill] sm:$0xff] }
 0x40f   : > { %v2382_v18 = vsel %vm2380_vm5, 0, %v2381_v30  ;;  %v5931_v43 = vsel %vm1284_vm12, %v2306_v29, %v2307_v5  ;;  %v2958_v6 = vunpack.c.h.bf16 %v2984_v61  ;;  %v2240_v56 = vrot.slane %v2954_v1, 1  ;;  %v5975_v61 = vld [vmem:[#allocation10] ss:$0 sm:$0xff]  ;;  %v6705_v1 = vld [vmem:[#allocation24_spill] sm:$0xff] }
 0x410   : > { %2057 = vmatprep.mubr.bf16.mxu0 %v1802_v32  ;;  %2383 = vst [vmem:[%s5885_s30 + $0x44] sm:$0x8] %v2382_v18  ;;  %v6701_v32 = vld [vmem:[#allocation30_spill] sm:$0xff]  ;;  %v2321_v45 = vrot.slane %v6702_v8, 1  ;;  %v5937_v18 = vsel %vm1284_vm12, %v2228_v34, %v2230_v58  ;;  %v5940_v42 = vsel %vm1284_vm12, %v2307_v5, %v2309_v51  ;;  %v2323_v22 = vrot.slane %v6703_v0, 1 }
 0x411   : > { %2058 = vmatmul.mubr.bf16.gmra.mrb[24].mxu0 %v1801_v4  ;;  %3111 = vmatmul.mubr.msk.bf16.gmra.mrb[24].mxu1 %vm6693_vm3, %v6692_v37  ;;  %v2317_v4 = vrot.slane %v6700_v52, 1  ;;  %v2315_v37 = vrot.slane %v6701_v32, 1  ;;  %v2244_v11 = vrot.slane %v2958_v6, 1  ;;  %v2325_v13 = vrot.slane %v6704_v21, 1  ;;  %v6707_v52 = vld [vmem:[#allocation33_spill] sm:$0xff] }
 0x412   : > { %v5987_v33 = vsel %vm1284_vm12, %v2321_v45, %v2323_v22  ;;  %v2966_v32 = vunpack.c.h.bf16 %v2986_v49  ;;  %vm2434_vm10 = vsmask.f32 4368  ;;  %vm2614_vm9 = vsmask.f32 3328 }
 0x413   : > { %v5950_v53 = vsel %vm1284_vm12, %v2317_v4, %v2319_v15  ;;  %v5961_v62 = vsel %vm1284_vm12, %v2313_v28, %v2315_v37  ;;  %v5981_v25 = vsel %vm1284_vm12, %v2315_v37, %v2317_v4  ;;  %v6369_v4 = vrot.slane %v6707_v52, 1  ;;  %vm6074_vm6 = vmor %vm2373_vm11, %vm2434_vm10 }
 0x4ac   : > { %v3014_v39 = vpop.f32.mrb[4].mxu0 }
 0x4ad   : > { %v3015_v20 = vpop.f32.mrb[5].mxu0 }
 0x4ae   : > { %v5900_v55 = vadd.f32 %v3015_v20, %v3014_v39  ;;  %v3017_v27 = vpop.f32.mrb[6].mxu0  ;;  %v2236_v39 = vrot.slane %v2950_v46, 1  ;;  %v2242_v20 = vrot.slane %v2957_v63, 1  ;;  %v6372_v46 = vrot.slane %v6705_v1, 1 }
 0x4af   : > { %v3018_v3 = vpop.f32.mrb[7].mxu0 }
 0x4b0   : > { %v5902_v9 = vadd.f32 %v3018_v3, %v3017_v27  ;;  %v2985_v27 = vld [vmem:[%s4176_s1 + $0x30] sm:$0xff]   ;;  %v5972_v2 = vsel %vm1284_vm12, %v2240_v56, %v2242_v20  ;;  %v5984_v5 = vsel %vm1284_vm12, %v2242_v20, %v2244_v11  ;;  %v2020_v6 = vadd.f32 %v5900_v55, %v5975_v61 }
 0x4b1   : > { %v2962_v29 = vunpack.c.h.bf16 %v2985_v27 }
 0x4b2   : > { %v2023_v55 = vadd.f32 %v5902_v9, %v5975_v61 }
 0x4b4   : > { %v3050_v14 = vpop.f32.mrb[4].mxu1 }
 0x4b5   : > { %v3051_v10 = vpop.f32.mrb[5].mxu1 }
 0x4b6   : > { %v5904_v41 = vadd.f32 %v3051_v10, %v3050_v14  ;;  %v3053_v17 = vpop.f32.mrb[6].mxu1  ;;  %v5944_v14 = vsel %vm1284_vm12, %v2232_v47, %v2234_v23  ;;  %v5947_v10 = vsel %vm1284_vm12, %v2311_v16, %v2313_v28  ;;  %v5964_v16 = vsel %vm1284_vm12, %v2319_v15, %v2321_v45 }
 0x4b7   : > { %v3054_v12 = vpop.f32.mrb[7].mxu1  ;;  %v5969_v47 = vsel %vm1284_vm12, %v2234_v23, %v2236_v39  ;;  %v2335_v28 = vrot.slane %v6706_v57, 1 }
 0x4b8   : > { %v5908_v19 = vadd.f32 %v3054_v12, %v3053_v17  ;;  %v2238_v17 = vrot.slane %v2953_v7, 1  ;;  %v2965_v7 = vunpack.c.l.bf16 %v2986_v49 }
 0x4ba   : > { %v5958_v51 = vsel %vm1284_vm12, %v2238_v17, %v2240_v56  ;;  %v5999_v56 = vrot.slane %v2962_v29, 1  ;;  %v6709_v29 = vld [vmem:[#allocation34_spill] sm:$0xff] }
 0x4bb   : > { %v6371_v49 = vrot.slane %v6709_v29, 1 }
 0x4bc   : > { %v3020_v24 = vpop.f32.mrb[8].mxu0 }
 0x4bd   : > { %v3021_v48 = vpop.f32.mrb[9].mxu0 }
 0x4be   : > { %v3022_v38 = vadd.f32 %v3021_v48, %v3020_v24  ;;  %v3023_v31 = vpop.f32.mrb[10].mxu0  ;;  %v2987_v24 = vld [vmem:[%s4176_s1 + $0x40] sm:$0xff]   ;;  %v2961_v48 = vunpack.c.l.bf16 %v2985_v27 }
 0x4bf   : > { %v3024_v40 = vpop.f32.mrb[11].mxu0  ;;  %v2969_v34 = vunpack.c.l.bf16 %v2987_v24  ;;  %v2970_v54 = vunpack.c.h.bf16 %v2987_v24 }
 0x4c0   : > { %v5917_v50 = vadd.f32 %v3024_v40, %v3023_v31  ;;  %v5978_v31 = vsel %vm1284_vm12, %v2236_v39, %v2238_v17  ;;  %v5992_v40 = vsel %vm1284_vm12, %v2323_v22, %v2325_v13  ;;  %v2028_v63 = vadd.f32 %v3022_v38, %v5975_v61 }
 0x4c1   : > { %v2246_v23 = vrot.slane %v2961_v48, 1  ;;  %v6004_v39 = vrot.slane %v2970_v54, 1 }
 0x4c2   : > { %v2031_v38 = vadd.f32 %v5917_v50, %v5975_v61  ;;  %v6010_v50 = vrot.slane %v2965_v7, 1 }
 0x4c4   : > { %v3056_v30 = vpop.f32.mrb[8].mxu1 }
 0x4c5   : > { %v3057_v3 = vpop.f32.mrb[9].mxu1 }
 0x4c6   : > { %v5952_v12 = vadd.f32 %v3057_v3, %v3056_v30  ;;  %v3059_v60 = vpop.f32.mrb[10].mxu1  ;;  %v2254_v30 = vrot.slane %v2969_v34, 1 }
 0x4c7   : > { %v3060_v35 = vpop.f32.mrb[11].mxu1 }
 0x4c8   : > { %v5966_v58 = vadd.f32 %v3060_v35, %v3059_v60  ;;  %v6708_v60 = vld [vmem:[#allocation23_spill] sm:$0xff] }
 0x4c9   : > { %v6370_v0 = vrot.slane %v6708_v60, 1 }
 0x4cc   : > { %v3026_v44 = vpop.f32.mrb[12].mxu0  ;;  %v3100_v15 = vpop.f32.mrb[12].mxu1 }
 0x4cd   : > { %v2125_v37 = vadd.f32 %v3100_v15, %v2028_v63  ;;  %v3027_v8 = vpop.f32.mrb[13].mxu0  ;;  %v2116_v45 = vpop.f32.mrb[13].mxu1 }
 0x4ce   : > { %v3028_v20 = vadd.f32 %v3027_v8, %v3026_v44  ;;  %v2117_v27 = vadd.f32 %v2116_v45, %v2020_v6  ;;  %v3029_v3 = vpop.f32.mrb[14].mxu0  ;;  %v3101_v17 = vpop.f32.mrb[14].mxu1  ;;  %v2252_v44 = vrot.slane %v2966_v32, 1  ;;  %v6017_v6 = vsel %vm1284_vm12, %v2244_v11, %v2246_v23 }
 0x4cf   : > { %v2276_v22 = vadd.f32 %v5925_v59, %v2125_v37  ;;  %v2128_v24 = vadd.f32 %v3101_v17, %v2031_v38  ;;  %v3030_v35 = vpop.f32.mrb[15].mxu0  ;;  %v2119_v48 = vpop.f32.mrb[15].mxu1  ;;  %v6024_v59 = vsel %vm1284_vm12, %v6372_v46, %v2335_v28  ;;  %v6030_v32 = vsel %vm1284_vm12, %v2246_v23, %v5999_v56 }
 0x4d0   : > { %v2274_v34 = vadd.f32 %v5928_v36, %v2117_v27  ;;  %v3031_v54 = vadd.f32 %v3030_v35, %v3029_v3  ;;  %v2120_v63 = vadd.f32 %v2119_v48, %v2023_v55  ;;  %v6042_v37 = vsel %vm1284_vm12, %v2254_v30, %v6004_v39 }
 0x4d1   : > { %v2355_v15 = vmul.f32 %v5920_v26, %v2276_v22  ;;  %v2277_v9 = vadd.f32 %v5944_v14, %v2128_v24  ;;  %v6037_v26 = vsel %vm1284_vm12, %v2325_v13, %v6369_v4  ;;  %v6054_v8 = vsel %vm1284_vm12, %v6010_v50, %v2252_v44 }
 0x4d2   : > { %v2353_v7 = vmul.f32 %v5931_v43, %v2274_v34  ;;  %v2275_v36 = vadd.f32 %v5937_v18, %v2120_v63  ;;  %v6049_v43 = vsel %vm1284_vm12, %v6370_v0, %v6371_v49  ;;  %v2036_v3 = vadd.f32 %v3028_v20, %v5975_v61 }
 0x4d3   : > { %v2885_v14 = vpack.c.bf16 %v2355_v15, %v2355_v15  ;;  %v2356_v11 = vmul.f32 %v5947_v10, %v2277_v9  ;;  %v6057_v10 = vsel %vm1284_vm12, %v2252_v44, %v2254_v30  ;;  %v2039_v55 = vadd.f32 %v3031_v54, %v5975_v61 }
 0x4d4   : > { %v2883_v18 = vpack.c.bf16 %v2353_v7, %v2353_v7  ;;  %v2354_v21 = vmul.f32 %v5940_v42, %v2275_v36  ;;  %v3032_v23 = vpop.f32.mrb[16].mxu0  ;;  %v3104_v13 = vpop.f32.mrb[16].mxu1 }
 0x4d5   : > { %v2454_v45 = vshrl.u32 %v2885_v14, 16  ;;  %v2886_v38 = vpack.c.bf16 %v2356_v11, %v2356_v11  ;;  %v3033_v27 = vpop.f32.mrb[17].mxu0  ;;  %v2132_v17 = vpop.f32.mrb[17].mxu1  ;;  %v2457_v22 = vshll.u32 %v2885_v14, 16  ;;  %v2597_v14 = vld [vmem:[%s5885_s30 + $0x8] sm:$0xf] }
 0x4d6   : > { %v2437_v24 = vshrl.u32 %v2883_v18, 16  ;;  %v2884_v42 = vpack.c.bf16 %v2354_v21, %v2354_v21  ;;  %v3034_v35 = vadd.f32 %v3033_v27, %v3032_v23  ;;  %v3035_v48 = vpop.f32.mrb[18].mxu0  ;;  %v3105_v34 = vpop.f32.mrb[18].mxu1  ;;  %v2440_v15 = vshll.u32 %v2883_v18, 16 }
 0x4d7   : > { %v2456_v63 = vrot.slane %v2454_v45, 7  ;;  %v2463_v9 = vshrl.u32 %v2886_v38, 16  ;;  %v2133_v30 = vadd.f32 %v2132_v17, %v2036_v3  ;;  %v3036_v44 = vpop.f32.mrb[19].mxu0  ;;  %v2135_v7 = vpop.f32.mrb[19].mxu1  ;;  %v2466_v11 = vshll.u32 %v2886_v38, 16 }
 0x4d8   : > { %v2439_v36 = vrot.slane %v2437_v24, 7  ;;  %v2445_v4 = vshrl.u32 %v2884_v42, 16  ;;  %v2044_v20 = vadd.f32 %v3034_v35, %v5975_v61  ;;  %v2448_v18 = vshll.u32 %v2884_v42, 16 }
 0x4d9   : > { %v2459_v0 = vor.u32 %v2457_v22, %v2456_v63  ;;  %v6069_v21 = vrot.slane %v2463_v9, 7  ;;  %v2278_v23 = vadd.f32 %v5969_v47, %v2133_v30  ;;  %v2461_v45 = vrot.slane %v2456_v63, 4 }
 0x4da   : > { %v2442_v27 = vor.u32 %v2440_v15, %v2439_v36  ;;  %v2447_v3 = vrot.slane %v2445_v4, 7  ;;  %v2141_v17 = vadd.f32 %v3104_v13, %v2044_v20  ;;  %v2443_v22 = vrot.slane %v2439_v36, 4 }
 0x4db   : > { %v2468_v24 = vor.u32 %v2466_v11, %v6069_v21  ;;  %v2357_v35 = vmul.f32 %v5961_v62, %v2278_v23  ;;  %v3037_v42 = vadd.f32 %v3036_v44, %v3035_v48  ;;  %v2136_v48 = vadd.f32 %v2135_v7, %v2039_v55 }
 0x4dc   : > { %v2598_v47 = vsel %vm6064_vm2, %v2442_v27, %v2597_v14  ;;  %v2450_v63 = vor.u32 %v2448_v18, %v2447_v3  ;;  %v2452_v9 = vrot.slane %v2447_v3, 4  ;;  %v2280_v30 = vadd.f32 %v5958_v51, %v2141_v17  ;;  %v3038_v49 = vpop.f32.mrb[20].mxu0  ;;  %v6083_v46 = vpop.f32.mrb[20].mxu1 }
 0x4dd   : > { %2599 = vst [vmem:[%s5885_s30 + $0x8] sm:$0xf] %v2598_v47  ;;  %v2469_v4 = vsel %vm6074_vm6, %v2461_v45, %v2468_v24  ;;  %v2887_v13 = vpack.c.bf16 %v2357_v35, %v2357_v35  ;;  %v2047_v62 = vadd.f32 %v3037_v42, %v5975_v61  ;;  %v3039_v15 = vpop.f32.mrb[21].mxu0  ;;  %v2148_v44 = vpop.f32.mrb[21].mxu1  ;;  %v2279_v18 = vadd.f32 %v5978_v31, %v2136_v48 }
 0x4de   : > { %2602 = vst.msk [vmem:[%s5885_s30 + $0x14] sm:$0xf] %vm2369_vm13, %v2469_v4  ;;  %v2451_v51 = vsel %vm6074_vm6, %v2443_v22, %v2450_v63  ;;  %v2460_v36 = vsel %vm6074_vm6, %v2452_v9, %v2459_v0  ;;  %v2359_v11 = vmul.f32 %v5950_v53, %v2280_v30  ;;  %v3040_v20 = vadd.f32 %v3039_v15, %v3038_v49  ;;  %v3041_v54 = vpop.f32.mrb[22].mxu0  ;;  %v6096_v14 = vpop.f32.mrb[22].mxu1 }
 0x4df   : > { %2600 = vst.msk [vmem:[%s5885_s30 + $0xc] sm:$0xf] %vm2369_vm13, %v2451_v51  ;;  %2601 = vst.msk [vmem:[%s5885_s30 + $0x10] sm:$0xf] %vm2369_vm13, %v2460_v36  ;;  %v2472_v55 = vshrl.u32 %v2887_v13, 16  ;;  %v2144_v7 = vadd.f32 %v3105_v34, %v2047_v62  ;;  %v3042_v23 = vpop.f32.mrb[23].mxu0  ;;  %v2068_v27 = vadd.f32 %v5904_v41, %v5975_v61  ;;  %v2076_v3 = vadd.f32 %v5952_v12, %v5975_v61 }
 0x4e0   : > { %v2151_v45 = vpop.f32.mrb[23].mxu1  ;;  %v2889_v0 = vpack.c.bf16 %v2359_v11, %v2359_v11  ;;  %v2052_v53 = vadd.f32 %v3040_v20, %v5975_v61  ;;  %v3043_v49 = vadd.f32 %v3042_v23, %v3041_v54  ;;  %v2475_v22 = vshll.u32 %v2887_v13, 16 }
 0x4e1   : > { %v2474_v17 = vrot.slane %v2472_v55, 7  ;;  %v2281_v24 = vadd.f32 %v5972_v2, %v2144_v7  ;;  %v2358_v34 = vmul.f32 %v5981_v25, %v2279_v18  ;;  %v2079_v41 = vadd.f32 %v5966_v58, %v5975_v61 }
 0x4e2   : > { %v2490_v35 = vshrl.u32 %v2889_v0, 16  ;;  %v2149_v31 = vadd.f32 %v2148_v44, %v2052_v53  ;;  %v2055_v42 = vadd.f32 %v3043_v49, %v5975_v61  ;;  %v2470_v47 = vrot.slane %v6069_v21, 4 }
 0x4e3   : > { %v2477_v63 = vor.u32 %v2475_v22, %v2474_v17  ;;  %v2360_v9 = vmul.f32 %v5964_v16, %v2281_v24  ;;  %v2888_v12 = vpack.c.bf16 %v2358_v34, %v2358_v34  ;;  %v2493_v4 = vshll.u32 %v2889_v0, 16 }
 0x4e4   : > { %v2492_v30 = vrot.slane %v2490_v35, 7  ;;  %v2282_v2 = vadd.f32 %v5984_v5, %v2149_v31  ;;  %v2152_v13 = vadd.f32 %v2151_v45, %v2055_v42  ;;  %v3044_v25 = vpop.f32.mrb[24].mxu0  ;;  %v3112_v62 = vpop.f32.mrb[24].mxu1  ;;  %v2479_v15 = vrot.slane %v2474_v17, 4 }
 0x4e5   : > { %v2478_v48 = vsel %vm6074_vm6, %v2470_v47, %v2477_v63  ;;  %v2890_v44 = vpack.c.bf16 %v2360_v9, %v2360_v9  ;;  %v2481_v58 = vshrl.u32 %v2888_v12, 16  ;;  %v3045_v51 = vpop.f32.mrb[25].mxu0  ;;  %v2164_v21 = vpop.f32.mrb[25].mxu1  ;;  %v2484_v16 = vshll.u32 %v2888_v12, 16 }
 0x4e6   : > { %v2495_v36 = vor.u32 %v2493_v4, %v2492_v30  ;;  %2603 = vst.msk [vmem:[%s5885_s30 + $0x18] sm:$0xf] %vm2369_vm13, %v2478_v48  ;;  %v2361_v11 = vmul.f32 %v5987_v33, %v2282_v2  ;;  %v2283_v20 = vadd.f32 %v6017_v6, %v2152_v13  ;;  %v3047_v5 = vpop.f32.mrb[26].mxu0  ;;  %v3113_v54 = vpop.f32.mrb[26].mxu1  ;;  %v2173_v23 = vadd.f32 %v3112_v62, %v2076_v3 }
 0x4e7   : > { %v2499_v55 = vshrl.u32 %v2890_v44, 16  ;;  %v2502_v7 = vshll.u32 %v2890_v44, 16  ;;  %v2483_v18 = vrot.slane %v2481_v58, 7  ;;  %v3048_v45 = vpop.f32.mrb[27].mxu0  ;;  %v2167_v0 = vpop.f32.mrb[27].mxu1  ;;  %v3046_v17 = vadd.f32 %v3045_v51, %v3044_v25 }
 0x4e8   : > { %v2891_v53 = vpack.c.bf16 %v2361_v11, %v2361_v11  ;;  %v2362_v49 = vmul.f32 %v5992_v40, %v2283_v20  ;;  %v2165_v22 = vadd.f32 %v2164_v21, %v2068_v27  ;;  %v2288_v6 = vadd.f32 %v6042_v37, %v2173_v23 }
 0x4e9   : > { %v2501_v24 = vrot.slane %v2499_v55, 7  ;;  %v2486_v34 = vor.u32 %v2484_v16, %v2483_v18  ;;  %v2488_v33 = vrot.slane %v2483_v18, 4  ;;  %v2497_v35 = vrot.slane %v2492_v30, 4 }
 0x4ea   : > { %v2508_v31 = vshrl.u32 %v2891_v53, 16  ;;  %v2892_v42 = vpack.c.bf16 %v2362_v49, %v2362_v49  ;;  %v2060_v3 = vadd.f32 %v3046_v17, %v5975_v61  ;;  %v2511_v9 = vshll.u32 %v2891_v53, 16 }
 0x4eb   : > { %v2504_v47 = vor.u32 %v2502_v7, %v2501_v24  ;;  %v2487_v63 = vsel %vm6074_vm6, %v2479_v15, %v2486_v34  ;;  %v2496_v40 = vsel %vm6074_vm6, %v2488_v33, %v2495_v36  ;;  %v2506_v27 = vrot.slane %v2501_v24, 4 }
 0x4ec   : > { %2604 = vst.msk [vmem:[%s5885_s30 + $0x1c] sm:$0xf] %vm2369_vm13, %v2487_v63  ;;  %2605 = vst.msk [vmem:[%s5885_s30 + $0x20] sm:$0xf] %vm2369_vm13, %v2496_v40  ;;  %v2510_v37 = vrot.slane %v2508_v31, 7  ;;  %v2517_v12 = vshrl.u32 %v2892_v42, 16  ;;  %v2367_v30 = vmul.f32 %v6024_v59, %v2288_v6  ;;  %v2157_v2 = vadd.f32 %v6083_v46, %v2060_v3 }
 0x4ed   : > { %v2505_v4 = vsel %vm6074_vm6, %v2497_v35, %v2504_v47  ;;  %v2286_v13 = vadd.f32 %v6054_v8, %v2165_v22  ;;  %v2176_v25 = vadd.f32 %v3113_v54, %v2079_v41  ;;  %v2520_v15 = vshll.u32 %v2892_v42, 16  ;;  %v2616_v35 = vld [vmem:[%s5885_s30 + $0x44] sm:$0xf] }
 0x4ee   : > { %2606 = vst.msk [vmem:[%s5885_s30 + $0x24] sm:$0xf] %vm2369_vm13, %v2505_v4  ;;  %v2513_v62 = vor.u32 %v2511_v9, %v2510_v37  ;;  %v2519_v48 = vrot.slane %v2517_v12, 7  ;;  %v2897_v44 = vpack.c.bf16 %v2367_v30, %v2367_v30  ;;  %v2284_v58 = vadd.f32 %v6030_v32, %v2157_v2 }
 0x4ef   : > { %v2365_v59 = vmul.f32 %v6049_v43, %v2286_v13  ;;  %v2289_v51 = vadd.f32 %v6004_v39, %v2176_v25  ;;  %v3049_v21 = vadd.f32 %v3048_v45, %v3047_v5  ;;  %v2515_v36 = vrot.slane %v2510_v37, 4 }
 0x4f0   : > { %v2514_v46 = vsel %vm6074_vm6, %v2506_v27, %v2513_v62  ;;  %v2522_v8 = vor.u32 %v2520_v15, %v2519_v48  ;;  %v2071_v41 = vadd.f32 %v5908_v19, %v5975_v61  ;;  %v2562_v16 = vshrl.u32 %v2897_v44, 16 }
 0x4f1   : > { %2607 = vst.msk [vmem:[%s5885_s30 + $0x28] sm:$0xf] %vm2369_vm13, %v2514_v46  ;;  %v2363_v11 = vmul.f32 %v6037_v26, %v2284_v58  ;;  %v2895_v32 = vpack.c.bf16 %v2365_v59, %v2365_v59  ;;  %v2368_v43 = vmul.f32 %v2335_v28, %v2289_v51  ;;  %v2063_v20 = vadd.f32 %v3049_v21, %v5975_v61 }
 0x4f2   : > { %v2523_v39 = vsel %vm6074_vm6, %v2515_v36, %v2522_v8  ;;  %v2168_v5 = vadd.f32 %v2167_v0, %v2071_v41  ;;  %v2251_v19 = vsel %vm1284_vm12, %v5999_v56, %v6010_v50  ;;  %v6714_v26 = vrot.slane %v6705_v1, 1 }
 0x4f3   : > { %2608 = vst.msk [vmem:[%s5885_s30 + $0x2c] sm:$0xf] %vm2369_vm13, %v2523_v39  ;;  %v2893_v54 = vpack.c.bf16 %v2363_v11, %v2363_v11  ;;  %v2898_v55 = vpack.c.bf16 %v2368_v43, %v2368_v43  ;;  %v6715_v7 = vrot.slane %v6709_v29, 1  ;;  %v2160_v28 = vadd.f32 %v6096_v14, %v2063_v20 }
 0x4f4   : > { %v6716_v18 = vrot.slane %v6708_v60, 1  ;;  %v6717_v61 = vrot.slane %v6707_v52, 1  ;;  %v2287_v45 = vadd.f32 %v6057_v10, %v2168_v5  ;;  %v2564_v0 = vrot.slane %v2562_v16, 7 }
 0x4f5   : > { %v2334_v57 = vsel %vm1284_vm12, %v6715_v7, %v6714_v26  ;;  %v2526_v53 = vshrl.u32 %v2893_v54, 16  ;;  %v2544_v49 = vshrl.u32 %v2895_v32, 16  ;;  %v2571_v56 = vshrl.u32 %v2898_v55, 16 }
 0x4f6   : > { %v2330_v23 = vsel %vm1284_vm12, %v6717_v61, %v6716_v18  ;;  %v2285_v1 = vadd.f32 %v2251_v19, %v2160_v28  ;;  %v2366_v50 = vmul.f32 %v2334_v57, %v2287_v45  ;;  %v2529_v17 = vshll.u32 %v2893_v54, 16  ;;  %vm2615_vm12 = vmand %vm2369_vm13, %vm2614_vm9 }
 0x4f7   : > { %v2528_v29 = vrot.slane %v2526_v53, 7  ;;  %v2573_v22 = vrot.slane %v2571_v56, 7  ;;  %v2574_v14 = vshll.u32 %v2898_v55, 16  ;;  %v2524_v60 = vrot.slane %v2519_v48, 4 }
 0x4f8   : > { %v2364_v24 = vmul.f32 %v2330_v23, %v2285_v1  ;;  %v2896_v52 = vpack.c.bf16 %v2366_v50, %v2366_v50  ;;  %v2569_v34 = vrot.slane %v2564_v0, 4  ;;  %v2546_v6 = vrot.slane %v2544_v49, 7 }
 0x4f9   : > { %v2531_v33 = vor.u32 %v2529_v17, %v2528_v29  ;;  %v2576_v10 = vor.u32 %v2574_v14, %v2573_v22  ;;  %v2565_v3 = vshll.u32 %v2897_v44, 16  ;;  %v2547_v30 = vshll.u32 %v2895_v32, 16 }
 0x4fa   : > { %v2894_v31 = vpack.c.bf16 %v2364_v24, %v2364_v24  ;;  %v2553_v42 = vshrl.u32 %v2896_v52, 16  ;;  %v2556_v37 = vshll.u32 %v2896_v52, 16  ;;  %v2551_v4 = vrot.slane %v2546_v6, 4 }
 0x4fb   : > { %v2532_v47 = vsel %vm6074_vm6, %v2524_v60, %v2531_v33  ;;  %v2577_v63 = vsel %vm6074_vm6, %v2569_v34, %v2576_v10  ;;  %v2567_v12 = vor.u32 %v2565_v3, %v2564_v0  ;;  %v2533_v48 = vrot.slane %v2528_v29, 4 }
 0x4fc   : > { %2609 = vst.msk [vmem:[%s5885_s30 + $0x30] sm:$0xf] %vm2369_vm13, %v2532_v47  ;;  %v2617_v40 = vsel %vm2615_vm12, %v2577_v63, %v2616_v35  ;;  %v2535_v9 = vshrl.u32 %v2894_v31, 16  ;;  %v2555_v27 = vrot.slane %v2553_v42, 7  ;;  %v2538_v13 = vshll.u32 %v2894_v31, 16 }
 0x4fd   : > { %2618 = vst [vmem:[%s5885_s30 + $0x44] sm:$0xf] %v2617_v40  ;;  %v2549_v15 = vor.u32 %v2547_v30, %v2546_v6 }
 0x4fe   : > { %v2537_v2 = vrot.slane %v2535_v9, 7  ;;  %v2558_v25 = vor.u32 %v2556_v37, %v2555_v27  ;;  %v2560_v62 = vrot.slane %v2555_v27, 4 }
 0x500   : > { %v2540_v44 = vor.u32 %v2538_v13, %v2537_v2  ;;  %v2542_v58 = vrot.slane %v2537_v2, 4  ;;  %v2559_v59 = vsel %vm6074_vm6, %v2551_v4, %v2558_v25  ;;  %v2568_v51 = vsel %vm6074_vm6, %v2560_v62, %v2567_v12 }
 0x501   : > { %2612 = vst.msk [vmem:[%s5885_s30 + $0x3c] sm:$0xf] %vm2369_vm13, %v2559_v59  ;;  %2613 = vst.msk [vmem:[%s5885_s30 + $0x40] sm:$0xf] %vm2369_vm13, %v2568_v51 }
 0x502   : > { %v2541_v21 = vsel %vm6074_vm6, %v2533_v48, %v2540_v44  ;;  %v2550_v46 = vsel %vm6074_vm6, %v2542_v58, %v2549_v15 }
 0x503   : > { %2610 = vst.msk [vmem:[%s5885_s30 + $0x34] sm:$0xf] %vm2369_vm13, %v2541_v21  ;;  %2611 = vst.msk [vmem:[%s5885_s30 + $0x38] sm:$0xf] %vm2369_vm13, %v2550_v46 }
 0x504   : > { %3776 = shalt.err (!%p3773_p6)
}
 0x505   : > { %s3777_s7 = scalar_lea.hbm %s6194_s9, 1280  ;;  %s3781_s1 = scalar_lea.hbm %s6256_s6, 2560 }
 0x506   : > { %p3778_p0 = scmp.ne.s32.totalorder %s6194_s9, %s3777_s7  ;;  %p3782_p8 = scmp.lt.u32.totalorder %s6194_s9, %s6256_s6 }
 0x507   : > { %p3783_p3 = scmp.lt.u32.totalorder %s3781_s1, %s3777_s7  ;;  %p3785_p10 = scmp.lt.u32.totalorder %s3777_s7, %s6194_s9 }
 0x508   : > { %p3779_p12 = pnand %p3778_p0, %p4051_p1 }
 0x509   : > { %p3784_p7 = por %p3783_p3, %p3782_p8 }
 0x50a   : > { %p3780_p11 = pneg %p3779_p12 }
 0x50b   : > { %p3786_p13 = por %p3785_p10, %p3784_p7 }
 0x50d   : > { %p3787_p5 = pnand %p3786_p13, %p3780_p11 }
 0x50f   : > { %3790 = shalt.err (!%p3787_p5)
}
 0x510   : > { %s3860_s30 = smov 4  }
 0x511   : > { %3168 = dma.vmem_to_hbm [thread:$0]  (%p4051_p1), %s6196_s12, 1280, %s6194_s9, %s2620_s14, %s3855_s27, %s3855_s27, %s3860_s30  }
 0x512 PF: > { %s2648_s20 = sand.u32 1, %s3829_s21   ;;  %p6718_p9 = scmp.ne.s32.totalorder %s6377_s28, 0 }
 0x513   : > { %p6719_p2 = scmp.ge.s32.totalorder %s3841_s24, 2  ;;  %s2649_s25 = scalar_lea.sflag [#allocation4], %s2648_s20 }
 0x515   : > { %p3191_p4 = pnand %p6719_p2, %p6718_p9 }
 0x517   : > { %3824 = dma.done.wait (!%p3191_p4), %s2649_s25, 1280  }
 0x518   : > { %3826 = vsyncadd (!%p3191_p4), %s2649_s25, 4294966016  ;;  %p24_p6 = scmp.ge.s32.totalorder %s4041_s18, 4   ;;  %s6720_s21 = smov %s3833_s22 }
 0x519   : > { %s6721_s22 = smov %s3837_s23  ;;  %s6722_s23 = smov %s4057_s17 }
 0x51a   : > { %s6723_s24 = smov %s4041_s18  ;;  %26 = sbr.rel (!%p24_p6) target bundleno = 13 (0xd), region = 118 }
 0x521   :  { %2654 = vsyncpa [#allocation3], 1 }
 0x522   :  { %2656 = vsyncpa [#allocation3 + $0x1], 1 }
 0x523   :  { %2657 = vsyncpa [#allocation6], 1 }
 0x524   :  { %2658 = vsyncpa [#allocation9], 1 }
 0x525   :  { %2659 = vsyncpa [#allocation12], 1 }
 0x526   :  { %2661 = vsyncpa [#allocation12 + $0x1], 1 }
 0x527   :  { %2662 = vsyncpa [#allocation4], 1 }
 0x528   :  { %2664 = vsyncpa [#allocation4 + $0x1], 1 }

</bundles_post_ra>
